<compile_context>
chip_gen: v7x
topology: tpu7x:2x2x1
jax: 0.10.0
libtpu: 0.0.40
codegen_flags: <defaults>
</compile_context>

<pallas_src>
import functools

import jax
import jax.numpy as jnp
from jax import lax
from jax.experimental import pallas as pl
from jax.experimental.pallas import tpu as pltpu

_COORD_PAD = 8      # xyz (3) zero-padded to 8: sublane-aligned contraction dim
_NEG = -1e30        # Python float (NOT np/jnp scalar) -> stays a jaxpr literal
_BIG = 1e30
_NT = (((1,), (1,)), ((), ()))   # dot_general dims: contract last dims (A @ B^T)


def _vmem_limit_bytes(n_mats, n, m, dp):
    # n_mats live (n, m) f32 matrices + double-buffered inputs + slack.
    # Intentionally fails at compile time (instead of spilling inside the
    # auction loop) if the working set exceeds the part's VMEM.
    est = n_mats * n * m * 4 + 4 * (n + m) * dp * 4 + (1 << 20)
    return int(min(max(est, 16 * 1024 * 1024), 100 * 1024 * 1024))


# ----------------------------------------------------------------------------
# Kernel 1: fused EMD term.
#   - cost matrix pred<->gt on the MXU
#   - Jacobi auction match, benefit folded into cost/price (VMEM resident)
#   - per-batch sum of matched squared distances
#   pred (1, N, 8), gt_t (1, 8, M)  ->  (1, 1, 1)
# ----------------------------------------------------------------------------
def _emd_auction_kernel(p_ref, gt_ref, o_ref, *, n_iters, chunk):
    p = p_ref[0]       # (N, 8) — last 5 coords are zero padding
    g_t = gt_ref[0]    # (8, M)
    N = p.shape[0]
    M = g_t.shape[1]

    # Squared-distance cost matrix on the MXU; no in-kernel transposes.
    pn = jnp.sum(p * p, axis=1, keepdims=True)          # (N, 1)
    gn = jnp.sum(g_t * g_t, axis=0, keepdims=True)      # (1, M)
    cost = jnp.maximum(
        pn + gn - 2.0 * jnp.dot(p, g_t, preferred_element_type=jnp.float32),
        0.0)                                            # (N, M) — only persistent NxM

    row_n1 = lax.broadcasted_iota(jnp.int32, (N, 1), 0)  # (N,1); no (N,M) iotas kept
    eps_bid = (jnp.max(cost) - jnp.min(cost) + 1e-9) / float(8 * N)

    # TODO(synk): the reference auction_match is an exact CUDA auction solver;
    # this is an approximate Jacobi auction (capped rounds, NN fallback for
    # rows still unassigned at the cap).
    def one_round(carry):
        nprice, owner = carry                            # (1,M) f32 (= -price), (1,M) i32
        owned_any = jnp.max(jnp.where(owner == row_n1, 1, 0), axis=1, keepdims=True)
        unassigned = owned_any == 0                      # (N, 1)
        value = nprice - cost                            # (N, M): benefit - price, fused
        v1 = jnp.max(value, axis=1, keepdims=True)       # (N, 1)
        is_best = value >= v1                            # ties allowed: no argmax pass
        v2 = jnp.max(jnp.where(is_best, _NEG, value), axis=1, keepdims=True)
        # bid on the best column(s): -cost - v2 + eps == (eps - v2) - cost
        bids = jnp.where(jnp.logical_and(is_best, unassigned),
                         (eps_bid - v2) - cost, _NEG)    # (N, M)
        win_bid = jnp.max(bids, axis=0, keepdims=True)   # (1, M)
        winner = jnp.min(jnp.where(bids >= win_bid, row_n1, N),
                         axis=0, keepdims=True)          # (1, M)
        has_bid = win_bid > -1e29
        nprice = jnp.where(has_bid, -win_bid, nprice)
        owner = jnp.where(has_bid, winner, owner)
        return nprice, owner

    def cond(state):
        it, min_owner, _, _ = state
        return jnp.logical_and(it < n_iters, min_owner < 0)

    def body(state):
        it, _, nprice, owner = state
        carry = (nprice, owner)
        for _ in range(chunk):   # static unroll; convergence checked once per chunk
            carry = one_round(carry)
        nprice, owner = carry
        return it + chunk, jnp.min(owner), nprice, owner

    # Every carry is built from staged ops (no concrete consts captured).
    state0 = (jnp.zeros((), jnp.int32),
              jnp.zeros((), jnp.int32) - 1,
              jnp.zeros((1, M), jnp.float32),            # nprice = -price, starts at 0
              jnp.zeros((1, M), jnp.int32) - 1)          # owner = -1 (unowned)
    _, _, _, owner = lax.while_loop(cond, body, state0)

    owned = owner == row_n1                              # (N, M)
    owned_any = jnp.max(jnp.where(owned, 1, 0), axis=1, keepdims=True)
    matched = jnp.sum(jnp.where(owned, cost, 0.0), axis=1, keepdims=True)
    fallback = jnp.min(cost, axis=1, keepdims=True)      # NN fallback if not converged
    per_row = jnp.where(owned_any > 0, matched, fallback)
    o_ref[0] = jnp.sum(per_row, axis=0, keepdims=True)   # (1, 1)


def emd_auction_sums(pred_pad, gt_t, *, n_iters=5000, chunk=8):
    B, N, Dp = pred_pad.shape
    M = gt_t.shape[2]
    kernel = functools.partial(_emd_auction_kernel, n_iters=n_iters, chunk=chunk)
    return pl.pallas_call(
        kernel,
        out_shape=jax.ShapeDtypeStruct((B, 1, 1), jnp.float32),
        grid=(B,),
        in_specs=[
            pl.BlockSpec((1, N, Dp), lambda b: (b, 0, 0)),
            pl.BlockSpec((1, Dp, M), lambda b: (b, 0, 0)),
        ],
        out_specs=pl.BlockSpec((1, 1, 1), lambda b: (b, 0, 0)),
        compiler_params=pltpu.CompilerParams(
            dimension_semantics=("parallel",),
            vmem_limit_bytes=_vmem_limit_bytes(8, N, M, Dp),
        ),
    )(pred_pad, gt_t)


# ----------------------------------------------------------------------------
# Kernel 2: repulsion loss — MXU pred<->pred distances (pred shipped ONCE),
# exact diagonal self-mask, kNN(k=nn_size) via value-masked min extraction,
# per-batch sum of (radius - dist) * exp(-d2 / h^2) over the k-1 neighbours.
#   pred (1, N, 8)  ->  (1, 1, 1)
# ----------------------------------------------------------------------------
def _repulsion_kernel(p_ref, o_ref, *, nn_size, radius, h, eps):
    p = p_ref[0]                                         # (N, 8)
    N, Dp = p.shape

    psq = p * p
    pn = jnp.sum(psq, axis=1, keepdims=True)             # (N, 1)
    # Row-vector of squared norms via a tiny MXU matmul (avoids an XLU transpose).
    ones8 = jnp.ones((8, Dp), jnp.float32)
    pn_row = lax.dot_general(ones8, psq, _NT,
                             preferred_element_type=jnp.float32)[0:1, :]  # (1, N)
    gram = lax.dot_general(p, p, _NT, preferred_element_type=jnp.float32)  # (N, N)
    d2 = pn + pn_row - 2.0 * gram

    row_n1 = lax.broadcasted_iota(jnp.int32, (N, 1), 0)
    col_1n = lax.broadcasted_iota(jnp.int32, (1, N), 1)
    cur = jnp.where(row_n1 == col_1n, _BIG, d2)          # mask self exactly (diagonal)

    inv_h2 = 1.0 / (h * h)
    contrib = jnp.zeros((N, 1), jnp.float32)
    for t in range(nn_size - 1):                         # k-1 neighbours (self dropped)
        mn = jnp.min(cur, axis=1, keepdims=True)         # (N, 1)
        d2c = jnp.maximum(mn, eps)
        dist = jnp.sqrt(d2c)
        w = jnp.exp(-d2c * inv_h2)
        contrib = contrib + (radius - dist) * w
        if t < nn_size - 2:                              # last step needs no re-mask
            cur = jnp.where(cur <= mn, _BIG, cur)        # value mask, no argmin pass

    o_ref[0] = jnp.sum(contrib, axis=0, keepdims=True)   # (1, 1)


def repulsion_sums(pred_pad, *, nn_size, radius, h, eps):
    B, N, Dp = pred_pad.shape
    kernel = functools.partial(_repulsion_kernel, nn_size=nn_size,
                               radius=radius, h=h, eps=eps)
    return pl.pallas_call(
        kernel,
        out_shape=jax.ShapeDtypeStruct((B, 1, 1), jnp.float32),
        grid=(B,),
        in_specs=[pl.BlockSpec((1, N, Dp), lambda b: (b, 0, 0))],
        out_specs=pl.BlockSpec((1, 1, 1), lambda b: (b, 0, 0)),
        compiler_params=pltpu.CompilerParams(
            dimension_semantics=("parallel",),
            vmem_limit_bytes=_vmem_limit_bytes(6, N, N, Dp),
        ),
    )(pred_pad)


# ----------------------------------------------------------------------------
# Full forward: mirrors UpsampleLoss.forward -> (emd_loss * 100, alpha * rep_loss)
# ----------------------------------------------------------------------------
def upsample_loss_forward(
    pred, gt, pcd_radius, *, alpha=1.0, nn_size=5, radius=0.07, h=0.03, eps=1e-12
):
    B, N, _ = pred.shape

    # wrapper-side layout plumbing: pad xyz 3 -> 8; gt transposed once so the
    # EMD kernel does a pure NN-form MXU matmul (pred is shipped untransposed).
    pad = ((0, 0), (0, 0), (0, _COORD_PAD - 3))
    pred_pad = jnp.pad(pred.astype(jnp.float32), pad)          # (B, N, 8)
    gt_pad = jnp.pad(gt.astype(jnp.float32), pad)              # (B, M, 8)
    gt_t = jnp.transpose(gt_pad, (0, 2, 1))                    # (B, 8, M)

    # ---- EMD term (fused cost matrix + auction match + matched-cost sum) ----
    emd_sums = emd_auction_sums(pred_pad, gt_t)                # (B, 1, 1)  [Pallas]
    per_b = emd_sums.reshape(B, 1) / float(N * 3)              # mean over N*3 elems
    dist2 = per_b / pcd_radius                                 # tiny -> plain JAX
    emd_loss = jnp.mean(dist2) * 100.0

    # ---- repulsion term ----
    rep_sums = repulsion_sums(
        pred_pad, nn_size=nn_size, radius=radius, h=h, eps=eps
    )                                                          # (B, 1, 1)  [Pallas]
    rep_loss = jnp.sum(rep_sums) / float(B * N * (nn_size - 1))

    return emd_loss, alpha * rep_loss


if __name__ == "__main__":
    key = jax.random.PRNGKey(0)
    k1, k2, k3 = jax.random.split(key, 3)

    B, N = 2, 64  # small point clouds; EMD requires pred/gt with equal N
    pred = jax.random.normal(k1, (B, N, 3), dtype=jnp.float32) * 0.5
    gt = jax.random.normal(k2, (B, N, 3), dtype=jnp.float32) * 0.5
    pcd_radius = jax.random.uniform(
        k3, (B, 1), dtype=jnp.float32, minval=0.5, maxval=1.5
    )

    loss_fn = jax.jit(upsample_loss_forward)
    emd_loss, rep_loss = loss_fn(pred, gt, pcd_radius)
    jax.block_until_ready((emd_loss, rep_loss))
    print("KERNEL_OK")
</pallas_src>

<mosaic_0001>
module attributes {stable_mosaic.version = 11 : i64} {
  func.func @_repulsion_kernel(%arg0: i32, %arg1: memref<1x64x8xf32, #tpu.memory_space<vmem>>, %arg2: memref<1x1x1xf32, #tpu.memory_space<vmem>>) attributes {dimension_semantics = [#tpu.dimension_semantics<parallel>], iteration_bounds = array<i64: 2>, scalar_prefetch = 0 : i64, scratch_operands = 0 : i64, tpu.core_type = #tpu.core_type<tc>, window_params = [{transform_indices = @transform_0, window_bounds = array<i64: 1, 64, 8>}, {transform_indices = @transform_1, window_bounds = array<i64: 1, 1, 1>}]} {
    %c0 = arith.constant 0 : index
    %c0_0 = arith.constant 0 : index
    %c0_1 = arith.constant 0 : index
    %0 = vector.load %arg1[%c0, %c0_0, %c0_1] : memref<1x64x8xf32, #tpu.memory_space<vmem>>, vector<1x64x8xf32>
    %1 = vector.shape_cast %0 : vector<1x64x8xf32> to vector<64x8xf32>
    %2 = arith.mulf %1, %1 : vector<64x8xf32>
    %cst = arith.constant dense<0.000000e+00> : vector<64xf32>
    %3 = vector.multi_reduction <add>, %2, %cst [1] : vector<64x8xf32> to vector<64xf32>
    %4 = vector.shape_cast %3 : vector<64xf32> to vector<64x1xf32>
    %cst_2 = arith.constant 1.000000e+00 : f32
    %5 = vector.broadcast %cst_2 : f32 to vector<8x8xf32>
    %cst_3 = arith.constant dense<0.000000e+00> : vector<8x64xf32>
    %6 = tpu.matmul %5, %2, %cst_3 {dimension_numbers = #tpu.dot_dimension_numbers<[1], [1], [0], [0], [0, 0, 1, 0], [], []>} : vector<8x8xf32>, vector<64x8xf32>, vector<8x64xf32> -> vector<8x64xf32>
    %7 = vector.extract_strided_slice %6 {offsets = [0, 0], sizes = [1, 64], strides = [1, 1]} : vector<8x64xf32> to vector<1x64xf32>
    %cst_4 = arith.constant dense<0.000000e+00> : vector<64x64xf32>
    %8 = tpu.matmul %1, %1, %cst_4 {dimension_numbers = #tpu.dot_dimension_numbers<[1], [1], [0], [0], [0, 0, 1, 0], [], []>} : vector<64x8xf32>, vector<64x8xf32>, vector<64x64xf32> -> vector<64x64xf32>
    %9 = vector.broadcast %4 : vector<64x1xf32> to vector<64x64xf32>
    %10 = vector.broadcast %7 : vector<1x64xf32> to vector<64x64xf32>
    %11 = arith.addf %9, %10 : vector<64x64xf32>
    %cst_5 = arith.constant 2.000000e+00 : f32
    %12 = vector.broadcast %cst_5 : f32 to vector<64x64xf32>
    %13 = arith.mulf %12, %8 : vector<64x64xf32>
    %14 = arith.subf %11, %13 : vector<64x64xf32>
    %15 = tpu.iota {dimensions = array<i32: 0>} : vector<64x1xi32>
    %16 = tpu.iota {dimensions = array<i32: 1>} : vector<1x64xi32>
    %17 = vector.broadcast %15 : vector<64x1xi32> to vector<64x64xi32>
    %18 = vector.broadcast %16 : vector<1x64xi32> to vector<64x64xi32>
    %19 = arith.cmpi eq, %17, %18 : vector<64x64xi32>
    %cst_6 = arith.constant 1.000000e+30 : f32
    %20 = vector.broadcast %cst_6 : f32 to vector<64x64xf32>
    %21 = arith.select %19, %20, %14 : vector<64x64xi1>, vector<64x64xf32>
    %cst_7 = arith.constant 0.000000e+00 : f32
    %22 = vector.broadcast %cst_7 : f32 to vector<64x1xf32>
    %cst_8 = arith.constant dense<0x7F800000> : vector<64xf32>
    %23 = vector.multi_reduction <minimumf>, %21, %cst_8 [1] : vector<64x64xf32> to vector<64xf32>
    %24 = vector.shape_cast %23 : vector<64xf32> to vector<64x1xf32>
    %cst_9 = arith.constant 9.99999996E-13 : f32
    %25 = vector.broadcast %cst_9 : f32 to vector<64x1xf32>
    %26 = arith.maximumf %24, %25 : vector<64x1xf32>
    %27 = math.sqrt %26 : vector<64x1xf32>
    %cst_10 = arith.constant 0.000000e+00 : f32
    %28 = vector.broadcast %cst_10 : f32 to vector<64x1xf32>
    %29 = arith.subf %28, %26 : vector<64x1xf32>
    %cst_11 = arith.constant 1111.11108 : f32
    %30 = vector.broadcast %cst_11 : f32 to vector<64x1xf32>
    %31 = arith.mulf %29, %30 : vector<64x1xf32>
    %32 = math.exp %31 : vector<64x1xf32>
    %cst_12 = arith.constant 7.000000e-02 : f32
    %33 = vector.broadcast %cst_12 : f32 to vector<64x1xf32>
    %34 = arith.subf %33, %27 : vector<64x1xf32>
    %35 = arith.mulf %34, %32 : vector<64x1xf32>
    %36 = arith.addf %22, %35 : vector<64x1xf32>
    %37 = vector.broadcast %24 : vector<64x1xf32> to vector<64x64xf32>
    %38 = arith.cmpf ole, %21, %37 : vector<64x64xf32>
    %cst_13 = arith.constant 1.000000e+30 : f32
    %39 = vector.broadcast %cst_13 : f32 to vector<64x64xf32>
    %40 = arith.select %38, %39, %21 : vector<64x64xi1>, vector<64x64xf32>
    %cst_14 = arith.constant dense<0x7F800000> : vector<64xf32>
    %41 = vector.multi_reduction <minimumf>, %40, %cst_14 [1] : vector<64x64xf32> to vector<64xf32>
    %42 = vector.shape_cast %41 : vector<64xf32> to vector<64x1xf32>
    %cst_15 = arith.constant 9.99999996E-13 : f32
    %43 = vector.broadcast %cst_15 : f32 to vector<64x1xf32>
    %44 = arith.maximumf %42, %43 : vector<64x1xf32>
    %45 = math.sqrt %44 : vector<64x1xf32>
    %cst_16 = arith.constant 0.000000e+00 : f32
    %46 = vector.broadcast %cst_16 : f32 to vector<64x1xf32>
    %47 = arith.subf %46, %44 : vector<64x1xf32>
    %cst_17 = arith.constant 1111.11108 : f32
    %48 = vector.broadcast %cst_17 : f32 to vector<64x1xf32>
    %49 = arith.mulf %47, %48 : vector<64x1xf32>
    %50 = math.exp %49 : vector<64x1xf32>
    %cst_18 = arith.constant 7.000000e-02 : f32
    %51 = vector.broadcast %cst_18 : f32 to vector<64x1xf32>
    %52 = arith.subf %51, %45 : vector<64x1xf32>
    %53 = arith.mulf %52, %50 : vector<64x1xf32>
    %54 = arith.addf %36, %53 : vector<64x1xf32>
    %55 = vector.broadcast %42 : vector<64x1xf32> to vector<64x64xf32>
    %56 = arith.cmpf ole, %40, %55 : vector<64x64xf32>
    %cst_19 = arith.constant 1.000000e+30 : f32
    %57 = vector.broadcast %cst_19 : f32 to vector<64x64xf32>
    %58 = arith.select %56, %57, %40 : vector<64x64xi1>, vector<64x64xf32>
    %cst_20 = arith.constant dense<0x7F800000> : vector<64xf32>
    %59 = vector.multi_reduction <minimumf>, %58, %cst_20 [1] : vector<64x64xf32> to vector<64xf32>
    %60 = vector.shape_cast %59 : vector<64xf32> to vector<64x1xf32>
    %cst_21 = arith.constant 9.99999996E-13 : f32
    %61 = vector.broadcast %cst_21 : f32 to vector<64x1xf32>
    %62 = arith.maximumf %60, %61 : vector<64x1xf32>
    %63 = math.sqrt %62 : vector<64x1xf32>
    %cst_22 = arith.constant 0.000000e+00 : f32
    %64 = vector.broadcast %cst_22 : f32 to vector<64x1xf32>
    %65 = arith.subf %64, %62 : vector<64x1xf32>
    %cst_23 = arith.constant 1111.11108 : f32
    %66 = vector.broadcast %cst_23 : f32 to vector<64x1xf32>
    %67 = arith.mulf %65, %66 : vector<64x1xf32>
    %68 = math.exp %67 : vector<64x1xf32>
    %cst_24 = arith.constant 7.000000e-02 : f32
    %69 = vector.broadcast %cst_24 : f32 to vector<64x1xf32>
    %70 = arith.subf %69, %63 : vector<64x1xf32>
    %71 = arith.mulf %70, %68 : vector<64x1xf32>
    %72 = arith.addf %54, %71 : vector<64x1xf32>
    %73 = vector.broadcast %60 : vector<64x1xf32> to vector<64x64xf32>
    %74 = arith.cmpf ole, %58, %73 : vector<64x64xf32>
    %cst_25 = arith.constant 1.000000e+30 : f32
    %75 = vector.broadcast %cst_25 : f32 to vector<64x64xf32>
    %76 = arith.select %74, %75, %58 : vector<64x64xi1>, vector<64x64xf32>
    %cst_26 = arith.constant dense<0x7F800000> : vector<64xf32>
    %77 = vector.multi_reduction <minimumf>, %76, %cst_26 [1] : vector<64x64xf32> to vector<64xf32>
    %78 = vector.shape_cast %77 : vector<64xf32> to vector<64x1xf32>
    %cst_27 = arith.constant 9.99999996E-13 : f32
    %79 = vector.broadcast %cst_27 : f32 to vector<64x1xf32>
    %80 = arith.maximumf %78, %79 : vector<64x1xf32>
    %81 = math.sqrt %80 : vector<64x1xf32>
    %cst_28 = arith.constant 0.000000e+00 : f32
    %82 = vector.broadcast %cst_28 : f32 to vector<64x1xf32>
    %83 = arith.subf %82, %80 : vector<64x1xf32>
    %cst_29 = arith.constant 1111.11108 : f32
    %84 = vector.broadcast %cst_29 : f32 to vector<64x1xf32>
    %85 = arith.mulf %83, %84 : vector<64x1xf32>
    %86 = math.exp %85 : vector<64x1xf32>
    %cst_30 = arith.constant 7.000000e-02 : f32
    %87 = vector.broadcast %cst_30 : f32 to vector<64x1xf32>
    %88 = arith.subf %87, %81 : vector<64x1xf32>
    %89 = arith.mulf %88, %86 : vector<64x1xf32>
    %90 = arith.addf %72, %89 : vector<64x1xf32>
    %cst_31 = arith.constant dense<0.000000e+00> : vector<1xf32>
    %91 = vector.multi_reduction <add>, %90, %cst_31 [0] : vector<64x1xf32> to vector<1xf32>
    %92 = vector.shape_cast %91 : vector<1xf32> to vector<1x1xf32>
    %c0_32 = arith.constant 0 : index
    %c0_33 = arith.constant 0 : index
    %c0_34 = arith.constant 0 : index
    %93 = vector.load %arg2[%c0_32, %c0_33, %c0_34] : memref<1x1x1xf32, #tpu.memory_space<vmem>>, vector<1x1x1xf32>
    %94 = vector.shape_cast %93 : vector<1x1x1xf32> to vector<1x1xf32>
    %95 = vector.shape_cast %92 : vector<1x1xf32> to vector<1x1x1xf32>
    tpu.vector_store %arg2[%c0_32, %c0_33, %c0_34], %95 {strides = array<i32>} : memref<1x1x1xf32, #tpu.memory_space<vmem>>, vector<1x1x1xf32>,
    return
  }
  func.func @transform_0(%arg0: i32) -> (i32, i32, i32) {
    %c0_i32 = arith.constant 0 : i32
    %c0_i32_0 = arith.constant 0 : i32
    %c0_i32_1 = arith.constant 0 : i32
    return %arg0, %c0_i32, %c0_i32_0 : i32, i32, i32
  }
  func.func @transform_1(%arg0: i32) -> (i32, i32, i32) {
    %c0_i32 = arith.constant 0 : i32
    %c0_i32_0 = arith.constant 0 : i32
    %c0_i32_1 = arith.constant 0 : i32
    return %arg0, %c0_i32, %c0_i32_0 : i32, i32, i32
  }
}

module attributes {stable_mosaic.version = 11 : i64} {
  func.func @_emd_auction_kernel(%arg0: i32, %arg1: memref<1x64x8xf32, #tpu.memory_space<vmem>>, %arg2: memref<1x8x64xf32, #tpu.memory_space<vmem>>, %arg3: memref<1x1x1xf32, #tpu.memory_space<vmem>>) attributes {dimension_semantics = [#tpu.dimension_semantics<parallel>], iteration_bounds = array<i64: 2>, scalar_prefetch = 0 : i64, scratch_operands = 0 : i64, tpu.core_type = #tpu.core_type<tc>, window_params = [{transform_indices = @transform_0, window_bounds = array<i64: 1, 64, 8>}, {transform_indices = @transform_1, window_bounds = array<i64: 1, 8, 64>}, {transform_indices = @transform_2, window_bounds = array<i64: 1, 1, 1>}]} {
    %c0 = arith.constant 0 : index
    %c0_0 = arith.constant 0 : index
    %c0_1 = arith.constant 0 : index
    %0 = vector.load %arg1[%c0, %c0_0, %c0_1] : memref<1x64x8xf32, #tpu.memory_space<vmem>>, vector<1x64x8xf32>
    %1 = vector.shape_cast %0 : vector<1x64x8xf32> to vector<64x8xf32>
    %c0_2 = arith.constant 0 : index
    %c0_3 = arith.constant 0 : index
    %c0_4 = arith.constant 0 : index
    %2 = vector.load %arg2[%c0_2, %c0_3, %c0_4] : memref<1x8x64xf32, #tpu.memory_space<vmem>>, vector<1x8x64xf32>
    %3 = vector.shape_cast %2 : vector<1x8x64xf32> to vector<8x64xf32>
    %4 = arith.mulf %1, %1 : vector<64x8xf32>
    %cst = arith.constant dense<0.000000e+00> : vector<64xf32>
    %5 = vector.multi_reduction <add>, %4, %cst [1] : vector<64x8xf32> to vector<64xf32>
    %6 = vector.shape_cast %5 : vector<64xf32> to vector<64x1xf32>
    %7 = arith.mulf %3, %3 : vector<8x64xf32>
    %cst_5 = arith.constant dense<0.000000e+00> : vector<64xf32>
    %8 = vector.multi_reduction <add>, %7, %cst_5 [0] : vector<8x64xf32> to vector<64xf32>
    %9 = vector.shape_cast %8 : vector<64xf32> to vector<1x64xf32>
    %10 = vector.broadcast %6 : vector<64x1xf32> to vector<64x64xf32>
    %11 = vector.broadcast %9 : vector<1x64xf32> to vector<64x64xf32>
    %12 = arith.addf %10, %11 : vector<64x64xf32>
    %cst_6 = arith.constant dense<0.000000e+00> : vector<64x64xf32>
    %13 = tpu.matmul %1, %3, %cst_6 {dimension_numbers = #tpu.dot_dimension_numbers<[1], [0], [0], [1], [0, 0, 1, 1], [], []>} : vector<64x8xf32>, vector<8x64xf32>, vector<64x64xf32> -> vector<64x64xf32>
    %cst_7 = arith.constant 2.000000e+00 : f32
    %14 = vector.broadcast %cst_7 : f32 to vector<64x64xf32>
    %15 = arith.mulf %14, %13 : vector<64x64xf32>
    %16 = arith.subf %12, %15 : vector<64x64xf32>
    %cst_8 = arith.constant 0.000000e+00 : f32
    %17 = vector.broadcast %cst_8 : f32 to vector<64x64xf32>
    %18 = arith.maximumf %16, %17 : vector<64x64xf32>
    %19 = tpu.iota {dimensions = array<i32: 0>} : vector<64x1xi32>
    %20 = vector.shape_cast %18 : vector<64x64xf32> to vector<1x64x64xf32>
    %cst_9 = arith.constant dense<0xFF800000> : vector<1xf32>
    %21 = vector.multi_reduction <maximumf>, %20, %cst_9 [1, 2] : vector<1x64x64xf32> to vector<1xf32>
    %22 = vector.shape_cast %21 : vector<1xf32> to vector<1x1x1xf32>
    %23 = vector.extract %22[0, 0, 0] : f32 from vector<1x1x1xf32>
    %24 = vector.shape_cast %18 : vector<64x64xf32> to vector<1x64x64xf32>
    %cst_10 = arith.constant dense<0x7F800000> : vector<1xf32>
    %25 = vector.multi_reduction <minimumf>, %24, %cst_10 [1, 2] : vector<1x64x64xf32> to vector<1xf32>
    %26 = vector.shape_cast %25 : vector<1xf32> to vector<1x1x1xf32>
    %27 = vector.extract %26[0, 0, 0] : f32 from vector<1x1x1xf32>
    %28 = arith.subf %23, %27 : f32
    %cst_11 = arith.constant 9.99999971E-10 : f32
    %29 = arith.addf %28, %cst_11 : f32
    %cst_12 = arith.constant 5.120000e+02 : f32
    %30 = arith.divf %29, %cst_12 : f32
    %c0_i32 = arith.constant 0 : i32
    %c1_i32 = arith.constant 1 : i32
    %31 = arith.subi %c0_i32, %c1_i32 : i32
    %cst_13 = arith.constant 0.000000e+00 : f32
    %32 = vector.broadcast %cst_13 : f32 to vector<1x64xf32>
    %c0_i32_14 = arith.constant 0 : i32
    %33 = vector.broadcast %c0_i32_14 : i32 to vector<1x64xi32>
    %c1_i32_15 = arith.constant 1 : i32
    %34 = vector.broadcast %c1_i32_15 : i32 to vector<1x64xi32>
    %35 = arith.subi %33, %34 : vector<1x64xi32>
    %c0_i32_16 = arith.constant 0 : i32
    %36:4 = scf.while (%arg4 = %c0_i32_16, %arg5 = %31, %arg6 = %32, %arg7 = %35) : (i32, i32, vector<1x64xf32>, vector<1x64xi32>) -> (i32, i32, vector<1x64xf32>, vector<1x64xi32>) {
      %c5000_i32 = arith.constant 5000 : i32
      %59 = arith.cmpi slt, %arg4, %c5000_i32 : i32
      %c0_i32_28 = arith.constant 0 : i32
      %60 = arith.cmpi slt, %arg5, %c0_i32_28 : i32
      %61 = arith.andi %59, %60 : i1
      scf.condition(%61) %arg4, %arg5, %arg6, %arg7 : i32, i32, vector<1x64xf32>, vector<1x64xi32>
    } do {
    ^bb0(%arg4: i32, %arg5: i32, %arg6: vector<1x64xf32>, %arg7: vector<1x64xi32>):
      %59 = vector.broadcast %arg7 : vector<1x64xi32> to vector<64x64xi32>
      %60 = vector.broadcast %19 : vector<64x1xi32> to vector<64x64xi32>
      %61 = arith.cmpi eq, %59, %60 : vector<64x64xi32>
      %c1_i32_28 = arith.constant 1 : i32
      %c0_i32_29 = arith.constant 0 : i32
      %62 = vector.broadcast %c1_i32_28 : i32 to vector<64x64xi32>
      %63 = vector.broadcast %c0_i32_29 : i32 to vector<64x64xi32>
      %64 = arith.select %61, %62, %63 : vector<64x64xi1>, vector<64x64xi32>
      %cst_30 = arith.constant dense<-2147483648> : vector<64xi32>
      %65 = vector.multi_reduction <maxsi>, %64, %cst_30 [1] : vector<64x64xi32> to vector<64xi32>
      %66 = vector.shape_cast %65 : vector<64xi32> to vector<64x1xi32>
      %c0_i32_31 = arith.constant 0 : i32
      %67 = vector.broadcast %c0_i32_31 : i32 to vector<64x1xi32>
      %68 = arith.cmpi eq, %66, %67 : vector<64x1xi32>
      %69 = vector.broadcast %arg6 : vector<1x64xf32> to vector<64x64xf32>
      %70 = arith.subf %69, %18 : vector<64x64xf32>
      %cst_32 = arith.constant dense<0xFF800000> : vector<64xf32>
      %71 = vector.multi_reduction <maximumf>, %70, %cst_32 [1] : vector<64x64xf32> to vector<64xf32>
      %72 = vector.shape_cast %71 : vector<64xf32> to vector<64x1xf32>
      %73 = vector.broadcast %72 : vector<64x1xf32> to vector<64x64xf32>
      %74 = arith.cmpf oge, %70, %73 : vector<64x64xf32>
      %cst_33 = arith.constant -1.000000e+30 : f32
      %75 = vector.broadcast %cst_33 : f32 to vector<64x64xf32>
      %76 = arith.select %74, %75, %70 : vector<64x64xi1>, vector<64x64xf32>
      %cst_34 = arith.constant dense<0xFF800000> : vector<64xf32>
      %77 = vector.multi_reduction <maximumf>, %76, %cst_34 [1] : vector<64x64xf32> to vector<64xf32>
      %78 = vector.shape_cast %77 : vector<64xf32> to vector<64x1xf32>
      %79 = vector.broadcast %68 : vector<64x1xi1> to vector<64x64xi1>
      %80 = arith.andi %74, %79 : vector<64x64xi1>
      %81 = vector.broadcast %30 : f32 to vector<64x1xf32>
      %82 = arith.subf %81, %78 : vector<64x1xf32>
      %83 = vector.broadcast %82 : vector<64x1xf32> to vector<64x64xf32>
      %84 = arith.subf %83, %18 : vector<64x64xf32>
      %cst_35 = arith.constant -1.000000e+30 : f32
      %85 = vector.broadcast %cst_35 : f32 to vector<64x64xf32>
      %86 = arith.select %80, %84, %85 : vector<64x64xi1>, vector<64x64xf32>
      %cst_36 = arith.constant dense<0xFF800000> : vector<64xf32>
      %87 = vector.multi_reduction <maximumf>, %86, %cst_36 [0] : vector<64x64xf32> to vector<64xf32>
      %88 = vector.shape_cast %87 : vector<64xf32> to vector<1x64xf32>
      %89 = vector.broadcast %88 : vector<1x64xf32> to vector<64x64xf32>
      %90 = arith.cmpf oge, %86, %89 : vector<64x64xf32>
      %c64_i32 = arith.constant 64 : i32
      %91 = vector.shape_cast %19 : vector<64x1xi32> to vector<64x1xi32>
      %92 = vector.broadcast %91 : vector<64x1xi32> to vector<64x64xi32>
      %93 = vector.broadcast %c64_i32 : i32 to vector<64x64xi32>
      %94 = arith.select %90, %92, %93 : vector<64x64xi1>, vector<64x64xi32>
      %cst_37 = arith.constant dense<2147483647> : vector<64xi32>
      %95 = vector.multi_reduction <minsi>, %94, %cst_37 [0] : vector<64x64xi32> to vector<64xi32>
      %96 = vector.shape_cast %95 : vector<64xi32> to vector<1x64xi32>
      %cst_38 = arith.constant -1.000000e+29 : f32
      %97 = vector.broadcast %cst_38 : f32 to vector<1x64xf32>
      %98 = arith.cmpf ogt, %88, %97 : vector<1x64xf32>
      %cst_39 = arith.constant 0.000000e+00 : f32
      %99 = vector.broadcast %cst_39 : f32 to vector<1x64xf32>
      %100 = arith.subf %99, %88 : vector<1x64xf32>
      %101 = arith.select %98, %100, %arg6 : vector<1x64xi1>, vector<1x64xf32>
      %102 = arith.select %98, %96, %arg7 : vector<1x64xi1>, vector<1x64xi32>
      %103 = vector.broadcast %102 : vector<1x64xi32> to vector<64x64xi32>
      %104 = vector.broadcast %19 : vector<64x1xi32> to vector<64x64xi32>
      %105 = arith.cmpi eq, %103, %104 : vector<64x64xi32>
      %c1_i32_40 = arith.constant 1 : i32
      %c0_i32_41 = arith.constant 0 : i32
      %106 = vector.broadcast %c1_i32_40 : i32 to vector<64x64xi32>
      %107 = vector.broadcast %c0_i32_41 : i32 to vector<64x64xi32>
      %108 = arith.select %105, %106, %107 : vector<64x64xi1>, vector<64x64xi32>
      %cst_42 = arith.constant dense<-2147483648> : vector<64xi32>
      %109 = vector.multi_reduction <maxsi>, %108, %cst_42 [1] : vector<64x64xi32> to vector<64xi32>
      %110 = vector.shape_cast %109 : vector<64xi32> to vector<64x1xi32>
      %c0_i32_43 = arith.constant 0 : i32
      %111 = vector.broadcast %c0_i32_43 : i32 to vector<64x1xi32>
      %112 = arith.cmpi eq, %110, %111 : vector<64x1xi32>
      %113 = vector.broadcast %101 : vector<1x64xf32> to vector<64x64xf32>
      %114 = arith.subf %113, %18 : vector<64x64xf32>
      %cst_44 = arith.constant dense<0xFF800000> : vector<64xf32>
      %115 = vector.multi_reduction <maximumf>, %114, %cst_44 [1] : vector<64x64xf32> to vector<64xf32>
      %116 = vector.shape_cast %115 : vector<64xf32> to vector<64x1xf32>
      %117 = vector.broadcast %116 : vector<64x1xf32> to vector<64x64xf32>
      %118 = arith.cmpf oge, %114, %117 : vector<64x64xf32>
      %cst_45 = arith.constant -1.000000e+30 : f32
      %119 = vector.broadcast %cst_45 : f32 to vector<64x64xf32>
      %120 = arith.select %118, %119, %114 : vector<64x64xi1>, vector<64x64xf32>
      %cst_46 = arith.constant dense<0xFF800000> : vector<64xf32>
      %121 = vector.multi_reduction <maximumf>, %120, %cst_46 [1] : vector<64x64xf32> to vector<64xf32>
      %122 = vector.shape_cast %121 : vector<64xf32> to vector<64x1xf32>
      %123 = vector.broadcast %112 : vector<64x1xi1> to vector<64x64xi1>
      %124 = arith.andi %118, %123 : vector<64x64xi1>
      %125 = vector.broadcast %30 : f32 to vector<64x1xf32>
      %126 = arith.subf %125, %122 : vector<64x1xf32>
      %127 = vector.broadcast %126 : vector<64x1xf32> to vector<64x64xf32>
      %128 = arith.subf %127, %18 : vector<64x64xf32>
      %cst_47 = arith.constant -1.000000e+30 : f32
      %129 = vector.broadcast %cst_47 : f32 to vector<64x64xf32>
      %130 = arith.select %124, %128, %129 : vector<64x64xi1>, vector<64x64xf32>
      %cst_48 = arith.constant dense<0xFF800000> : vector<64xf32>
      %131 = vector.multi_reduction <maximumf>, %130, %cst_48 [0] : vector<64x64xf32> to vector<64xf32>
      %132 = vector.shape_cast %131 : vector<64xf32> to vector<1x64xf32>
      %133 = vector.broadcast %132 : vector<1x64xf32> to vector<64x64xf32>
      %134 = arith.cmpf oge, %130, %133 : vector<64x64xf32>
      %c64_i32_49 = arith.constant 64 : i32
      %135 = vector.shape_cast %19 : vector<64x1xi32> to vector<64x1xi32>
      %136 = vector.broadcast %135 : vector<64x1xi32> to vector<64x64xi32>
      %137 = vector.broadcast %c64_i32_49 : i32 to vector<64x64xi32>
      %138 = arith.select %134, %136, %137 : vector<64x64xi1>, vector<64x64xi32>
      %cst_50 = arith.constant dense<2147483647> : vector<64xi32>
      %139 = vector.multi_reduction <minsi>, %138, %cst_50 [0] : vector<64x64xi32> to vector<64xi32>
      %140 = vector.shape_cast %139 : vector<64xi32> to vector<1x64xi32>
      %cst_51 = arith.constant -1.000000e+29 : f32
      %141 = vector.broadcast %cst_51 : f32 to vector<1x64xf32>
      %142 = arith.cmpf ogt, %132, %141 : vector<1x64xf32>
      %cst_52 = arith.constant 0.000000e+00 : f32
      %143 = vector.broadcast %cst_52 : f32 to vector<1x64xf32>
      %144 = arith.subf %143, %132 : vector<1x64xf32>
      %145 = arith.select %142, %144, %101 : vector<1x64xi1>, vector<1x64xf32>
      %146 = arith.select %142, %140, %102 : vector<1x64xi1>, vector<1x64xi32>
      %147 = vector.broadcast %146 : vector<1x64xi32> to vector<64x64xi32>
      %148 = vector.broadcast %19 : vector<64x1xi32> to vector<64x64xi32>
      %149 = arith.cmpi eq, %147, %148 : vector<64x64xi32>
      %c1_i32_53 = arith.constant 1 : i32
      %c0_i32_54 = arith.constant 0 : i32
      %150 = vector.broadcast %c1_i32_53 : i32 to vector<64x64xi32>
      %151 = vector.broadcast %c0_i32_54 : i32 to vector<64x64xi32>
      %152 = arith.select %149, %150, %151 : vector<64x64xi1>, vector<64x64xi32>
      %cst_55 = arith.constant dense<-2147483648> : vector<64xi32>
      %153 = vector.multi_reduction <maxsi>, %152, %cst_55 [1] : vector<64x64xi32> to vector<64xi32>
      %154 = vector.shape_cast %153 : vector<64xi32> to vector<64x1xi32>
      %c0_i32_56 = arith.constant 0 : i32
      %155 = vector.broadcast %c0_i32_56 : i32 to vector<64x1xi32>
      %156 = arith.cmpi eq, %154, %155 : vector<64x1xi32>
      %157 = vector.broadcast %145 : vector<1x64xf32> to vector<64x64xf32>
      %158 = arith.subf %157, %18 : vector<64x64xf32>
      %cst_57 = arith.constant dense<0xFF800000> : vector<64xf32>
      %159 = vector.multi_reduction <maximumf>, %158, %cst_57 [1] : vector<64x64xf32> to vector<64xf32>
      %160 = vector.shape_cast %159 : vector<64xf32> to vector<64x1xf32>
      %161 = vector.broadcast %160 : vector<64x1xf32> to vector<64x64xf32>
      %162 = arith.cmpf oge, %158, %161 : vector<64x64xf32>
      %cst_58 = arith.constant -1.000000e+30 : f32
      %163 = vector.broadcast %cst_58 : f32 to vector<64x64xf32>
      %164 = arith.select %162, %163, %158 : vector<64x64xi1>, vector<64x64xf32>
      %cst_59 = arith.constant dense<0xFF800000> : vector<64xf32>
      %165 = vector.multi_reduction <maximumf>, %164, %cst_59 [1] : vector<64x64xf32> to vector<64xf32>
      %166 = vector.shape_cast %165 : vector<64xf32> to vector<64x1xf32>
      %167 = vector.broadcast %156 : vector<64x1xi1> to vector<64x64xi1>
      %168 = arith.andi %162, %167 : vector<64x64xi1>
      %169 = vector.broadcast %30 : f32 to vector<64x1xf32>
      %170 = arith.subf %169, %166 : vector<64x1xf32>
      %171 = vector.broadcast %170 : vector<64x1xf32> to vector<64x64xf32>
      %172 = arith.subf %171, %18 : vector<64x64xf32>
      %cst_60 = arith.constant -1.000000e+30 : f32
      %173 = vector.broadcast %cst_60 : f32 to vector<64x64xf32>
      %174 = arith.select %168, %172, %173 : vector<64x64xi1>, vector<64x64xf32>
      %cst_61 = arith.constant dense<0xFF800000> : vector<64xf32>
      %175 = vector.multi_reduction <maximumf>, %174, %cst_61 [0] : vector<64x64xf32> to vector<64xf32>
      %176 = vector.shape_cast %175 : vector<64xf32> to vector<1x64xf32>
      %177 = vector.broadcast %176 : vector<1x64xf32> to vector<64x64xf32>
      %178 = arith.cmpf oge, %174, %177 : vector<64x64xf32>
      %c64_i32_62 = arith.constant 64 : i32
      %179 = vector.shape_cast %19 : vector<64x1xi32> to vector<64x1xi32>
      %180 = vector.broadcast %179 : vector<64x1xi32> to vector<64x64xi32>
      %181 = vector.broadcast %c64_i32_62 : i32 to vector<64x64xi32>
      %182 = arith.select %178, %180, %181 : vector<64x64xi1>, vector<64x64xi32>
      %cst_63 = arith.constant dense<2147483647> : vector<64xi32>
      %183 = vector.multi_reduction <minsi>, %182, %cst_63 [0] : vector<64x64xi32> to vector<64xi32>
      %184 = vector.shape_cast %183 : vector<64xi32> to vector<1x64xi32>
      %cst_64 = arith.constant -1.000000e+29 : f32
      %185 = vector.broadcast %cst_64 : f32 to vector<1x64xf32>
      %186 = arith.cmpf ogt, %176, %185 : vector<1x64xf32>
      %cst_65 = arith.constant 0.000000e+00 : f32
      %187 = vector.broadcast %cst_65 : f32 to vector<1x64xf32>
      %188 = arith.subf %187, %176 : vector<1x64xf32>
      %189 = arith.select %186, %188, %145 : vector<1x64xi1>, vector<1x64xf32>
      %190 = arith.select %186, %184, %146 : vector<1x64xi1>, vector<1x64xi32>
      %191 = vector.broadcast %190 : vector<1x64xi32> to vector<64x64xi32>
      %192 = vector.broadcast %19 : vector<64x1xi32> to vector<64x64xi32>
      %193 = arith.cmpi eq, %191, %192 : vector<64x64xi32>
      %c1_i32_66 = arith.constant 1 : i32
      %c0_i32_67 = arith.constant 0 : i32
      %194 = vector.broadcast %c1_i32_66 : i32 to vector<64x64xi32>
      %195 = vector.broadcast %c0_i32_67 : i32 to vector<64x64xi32>
      %196 = arith.select %193, %194, %195 : vector<64x64xi1>, vector<64x64xi32>
      %cst_68 = arith.constant dense<-2147483648> : vector<64xi32>
      %197 = vector.multi_reduction <maxsi>, %196, %cst_68 [1] : vector<64x64xi32> to vector<64xi32>
      %198 = vector.shape_cast %197 : vector<64xi32> to vector<64x1xi32>
      %c0_i32_69 = arith.constant 0 : i32
      %199 = vector.broadcast %c0_i32_69 : i32 to vector<64x1xi32>
      %200 = arith.cmpi eq, %198, %199 : vector<64x1xi32>
      %201 = vector.broadcast %189 : vector<1x64xf32> to vector<64x64xf32>
      %202 = arith.subf %201, %18 : vector<64x64xf32>
      %cst_70 = arith.constant dense<0xFF800000> : vector<64xf32>
      %203 = vector.multi_reduction <maximumf>, %202, %cst_70 [1] : vector<64x64xf32> to vector<64xf32>
      %204 = vector.shape_cast %203 : vector<64xf32> to vector<64x1xf32>
      %205 = vector.broadcast %204 : vector<64x1xf32> to vector<64x64xf32>
      %206 = arith.cmpf oge, %202, %205 : vector<64x64xf32>
      %cst_71 = arith.constant -1.000000e+30 : f32
      %207 = vector.broadcast %cst_71 : f32 to vector<64x64xf32>
      %208 = arith.select %206, %207, %202 : vector<64x64xi1>, vector<64x64xf32>
      %cst_72 = arith.constant dense<0xFF800000> : vector<64xf32>
      %209 = vector.multi_reduction <maximumf>, %208, %cst_72 [1] : vector<64x64xf32> to vector<64xf32>
      %210 = vector.shape_cast %209 : vector<64xf32> to vector<64x1xf32>
      %211 = vector.broadcast %200 : vector<64x1xi1> to vector<64x64xi1>
      %212 = arith.andi %206, %211 : vector<64x64xi1>
      %213 = vector.broadcast %30 : f32 to vector<64x1xf32>
      %214 = arith.subf %213, %210 : vector<64x1xf32>
      %215 = vector.broadcast %214 : vector<64x1xf32> to vector<64x64xf32>
      %216 = arith.subf %215, %18 : vector<64x64xf32>
      %cst_73 = arith.constant -1.000000e+30 : f32
      %217 = vector.broadcast %cst_73 : f32 to vector<64x64xf32>
      %218 = arith.select %212, %216, %217 : vector<64x64xi1>, vector<64x64xf32>
      %cst_74 = arith.constant dense<0xFF800000> : vector<64xf32>
      %219 = vector.multi_reduction <maximumf>, %218, %cst_74 [0] : vector<64x64xf32> to vector<64xf32>
      %220 = vector.shape_cast %219 : vector<64xf32> to vector<1x64xf32>
      %221 = vector.broadcast %220 : vector<1x64xf32> to vector<64x64xf32>
      %222 = arith.cmpf oge, %218, %221 : vector<64x64xf32>
      %c64_i32_75 = arith.constant 64 : i32
      %223 = vector.shape_cast %19 : vector<64x1xi32> to vector<64x1xi32>
      %224 = vector.broadcast %223 : vector<64x1xi32> to vector<64x64xi32>
      %225 = vector.broadcast %c64_i32_75 : i32 to vector<64x64xi32>
      %226 = arith.select %222, %224, %225 : vector<64x64xi1>, vector<64x64xi32>
      %cst_76 = arith.constant dense<2147483647> : vector<64xi32>
      %227 = vector.multi_reduction <minsi>, %226, %cst_76 [0] : vector<64x64xi32> to vector<64xi32>
      %228 = vector.shape_cast %227 : vector<64xi32> to vector<1x64xi32>
      %cst_77 = arith.constant -1.000000e+29 : f32
      %229 = vector.broadcast %cst_77 : f32 to vector<1x64xf32>
      %230 = arith.cmpf ogt, %220, %229 : vector<1x64xf32>
      %cst_78 = arith.constant 0.000000e+00 : f32
      %231 = vector.broadcast %cst_78 : f32 to vector<1x64xf32>
      %232 = arith.subf %231, %220 : vector<1x64xf32>
      %233 = arith.select %230, %232, %189 : vector<1x64xi1>, vector<1x64xf32>
      %234 = arith.select %230, %228, %190 : vector<1x64xi1>, vector<1x64xi32>
      %235 = vector.broadcast %234 : vector<1x64xi32> to vector<64x64xi32>
      %236 = vector.broadcast %19 : vector<64x1xi32> to vector<64x64xi32>
      %237 = arith.cmpi eq, %235, %236 : vector<64x64xi32>
      %c1_i32_79 = arith.constant 1 : i32
      %c0_i32_80 = arith.constant 0 : i32
      %238 = vector.broadcast %c1_i32_79 : i32 to vector<64x64xi32>
      %239 = vector.broadcast %c0_i32_80 : i32 to vector<64x64xi32>
      %240 = arith.select %237, %238, %239 : vector<64x64xi1>, vector<64x64xi32>
      %cst_81 = arith.constant dense<-2147483648> : vector<64xi32>
      %241 = vector.multi_reduction <maxsi>, %240, %cst_81 [1] : vector<64x64xi32> to vector<64xi32>
      %242 = vector.shape_cast %241 : vector<64xi32> to vector<64x1xi32>
      %c0_i32_82 = arith.constant 0 : i32
      %243 = vector.broadcast %c0_i32_82 : i32 to vector<64x1xi32>
      %244 = arith.cmpi eq, %242, %243 : vector<64x1xi32>
      %245 = vector.broadcast %233 : vector<1x64xf32> to vector<64x64xf32>
      %246 = arith.subf %245, %18 : vector<64x64xf32>
      %cst_83 = arith.constant dense<0xFF800000> : vector<64xf32>
      %247 = vector.multi_reduction <maximumf>, %246, %cst_83 [1] : vector<64x64xf32> to vector<64xf32>
      %248 = vector.shape_cast %247 : vector<64xf32> to vector<64x1xf32>
      %249 = vector.broadcast %248 : vector<64x1xf32> to vector<64x64xf32>
      %250 = arith.cmpf oge, %246, %249 : vector<64x64xf32>
      %cst_84 = arith.constant -1.000000e+30 : f32
      %251 = vector.broadcast %cst_84 : f32 to vector<64x64xf32>
      %252 = arith.select %250, %251, %246 : vector<64x64xi1>, vector<64x64xf32>
      %cst_85 = arith.constant dense<0xFF800000> : vector<64xf32>
      %253 = vector.multi_reduction <maximumf>, %252, %cst_85 [1] : vector<64x64xf32> to vector<64xf32>
      %254 = vector.shape_cast %253 : vector<64xf32> to vector<64x1xf32>
      %255 = vector.broadcast %244 : vector<64x1xi1> to vector<64x64xi1>
      %256 = arith.andi %250, %255 : vector<64x64xi1>
      %257 = vector.broadcast %30 : f32 to vector<64x1xf32>
      %258 = arith.subf %257, %254 : vector<64x1xf32>
      %259 = vector.broadcast %258 : vector<64x1xf32> to vector<64x64xf32>
      %260 = arith.subf %259, %18 : vector<64x64xf32>
      %cst_86 = arith.constant -1.000000e+30 : f32
      %261 = vector.broadcast %cst_86 : f32 to vector<64x64xf32>
      %262 = arith.select %256, %260, %261 : vector<64x64xi1>, vector<64x64xf32>
      %cst_87 = arith.constant dense<0xFF800000> : vector<64xf32>
      %263 = vector.multi_reduction <maximumf>, %262, %cst_87 [0] : vector<64x64xf32> to vector<64xf32>
      %264 = vector.shape_cast %263 : vector<64xf32> to vector<1x64xf32>
      %265 = vector.broadcast %264 : vector<1x64xf32> to vector<64x64xf32>
      %266 = arith.cmpf oge, %262, %265 : vector<64x64xf32>
      %c64_i32_88 = arith.constant 64 : i32
      %267 = vector.shape_cast %19 : vector<64x1xi32> to vector<64x1xi32>
      %268 = vector.broadcast %267 : vector<64x1xi32> to vector<64x64xi32>
      %269 = vector.broadcast %c64_i32_88 : i32 to vector<64x64xi32>
      %270 = arith.select %266, %268, %269 : vector<64x64xi1>, vector<64x64xi32>
      %cst_89 = arith.constant dense<2147483647> : vector<64xi32>
      %271 = vector.multi_reduction <minsi>, %270, %cst_89 [0] : vector<64x64xi32> to vector<64xi32>
      %272 = vector.shape_cast %271 : vector<64xi32> to vector<1x64xi32>
      %cst_90 = arith.constant -1.000000e+29 : f32
      %273 = vector.broadcast %cst_90 : f32 to vector<1x64xf32>
      %274 = arith.cmpf ogt, %264, %273 : vector<1x64xf32>
      %cst_91 = arith.constant 0.000000e+00 : f32
      %275 = vector.broadcast %cst_91 : f32 to vector<1x64xf32>
      %276 = arith.subf %275, %264 : vector<1x64xf32>
      %277 = arith.select %274, %276, %233 : vector<1x64xi1>, vector<1x64xf32>
      %278 = arith.select %274, %272, %234 : vector<1x64xi1>, vector<1x64xi32>
      %279 = vector.broadcast %278 : vector<1x64xi32> to vector<64x64xi32>
      %280 = vector.broadcast %19 : vector<64x1xi32> to vector<64x64xi32>
      %281 = arith.cmpi eq, %279, %280 : vector<64x64xi32>
      %c1_i32_92 = arith.constant 1 : i32
      %c0_i32_93 = arith.constant 0 : i32
      %282 = vector.broadcast %c1_i32_92 : i32 to vector<64x64xi32>
      %283 = vector.broadcast %c0_i32_93 : i32 to vector<64x64xi32>
      %284 = arith.select %281, %282, %283 : vector<64x64xi1>, vector<64x64xi32>
      %cst_94 = arith.constant dense<-2147483648> : vector<64xi32>
      %285 = vector.multi_reduction <maxsi>, %284, %cst_94 [1] : vector<64x64xi32> to vector<64xi32>
      %286 = vector.shape_cast %285 : vector<64xi32> to vector<64x1xi32>
      %c0_i32_95 = arith.constant 0 : i32
      %287 = vector.broadcast %c0_i32_95 : i32 to vector<64x1xi32>
      %288 = arith.cmpi eq, %286, %287 : vector<64x1xi32>
      %289 = vector.broadcast %277 : vector<1x64xf32> to vector<64x64xf32>
      %290 = arith.subf %289, %18 : vector<64x64xf32>
      %cst_96 = arith.constant dense<0xFF800000> : vector<64xf32>
      %291 = vector.multi_reduction <maximumf>, %290, %cst_96 [1] : vector<64x64xf32> to vector<64xf32>
      %292 = vector.shape_cast %291 : vector<64xf32> to vector<64x1xf32>
      %293 = vector.broadcast %292 : vector<64x1xf32> to vector<64x64xf32>
      %294 = arith.cmpf oge, %290, %293 : vector<64x64xf32>
      %cst_97 = arith.constant -1.000000e+30 : f32
      %295 = vector.broadcast %cst_97 : f32 to vector<64x64xf32>
      %296 = arith.select %294, %295, %290 : vector<64x64xi1>, vector<64x64xf32>
      %cst_98 = arith.constant dense<0xFF800000> : vector<64xf32>
      %297 = vector.multi_reduction <maximumf>, %296, %cst_98 [1] : vector<64x64xf32> to vector<64xf32>
      %298 = vector.shape_cast %297 : vector<64xf32> to vector<64x1xf32>
      %299 = vector.broadcast %288 : vector<64x1xi1> to vector<64x64xi1>
      %300 = arith.andi %294, %299 : vector<64x64xi1>
      %301 = vector.broadcast %30 : f32 to vector<64x1xf32>
      %302 = arith.subf %301, %298 : vector<64x1xf32>
      %303 = vector.broadcast %302 : vector<64x1xf32> to vector<64x64xf32>
      %304 = arith.subf %303, %18 : vector<64x64xf32>
      %cst_99 = arith.constant -1.000000e+30 : f32
      %305 = vector.broadcast %cst_99 : f32 to vector<64x64xf32>
      %306 = arith.select %300, %304, %305 : vector<64x64xi1>, vector<64x64xf32>
      %cst_100 = arith.constant dense<0xFF800000> : vector<64xf32>
      %307 = vector.multi_reduction <maximumf>, %306, %cst_100 [0] : vector<64x64xf32> to vector<64xf32>
      %308 = vector.shape_cast %307 : vector<64xf32> to vector<1x64xf32>
      %309 = vector.broadcast %308 : vector<1x64xf32> to vector<64x64xf32>
      %310 = arith.cmpf oge, %306, %309 : vector<64x64xf32>
      %c64_i32_101 = arith.constant 64 : i32
      %311 = vector.shape_cast %19 : vector<64x1xi32> to vector<64x1xi32>
      %312 = vector.broadcast %311 : vector<64x1xi32> to vector<64x64xi32>
      %313 = vector.broadcast %c64_i32_101 : i32 to vector<64x64xi32>
      %314 = arith.select %310, %312, %313 : vector<64x64xi1>, vector<64x64xi32>
      %cst_102 = arith.constant dense<2147483647> : vector<64xi32>
      %315 = vector.multi_reduction <minsi>, %314, %cst_102 [0] : vector<64x64xi32> to vector<64xi32>
      %316 = vector.shape_cast %315 : vector<64xi32> to vector<1x64xi32>
      %cst_103 = arith.constant -1.000000e+29 : f32
      %317 = vector.broadcast %cst_103 : f32 to vector<1x64xf32>
      %318 = arith.cmpf ogt, %308, %317 : vector<1x64xf32>
      %cst_104 = arith.constant 0.000000e+00 : f32
      %319 = vector.broadcast %cst_104 : f32 to vector<1x64xf32>
      %320 = arith.subf %319, %308 : vector<1x64xf32>
      %321 = arith.select %318, %320, %277 : vector<1x64xi1>, vector<1x64xf32>
      %322 = arith.select %318, %316, %278 : vector<1x64xi1>, vector<1x64xi32>
      %323 = vector.broadcast %322 : vector<1x64xi32> to vector<64x64xi32>
      %324 = vector.broadcast %19 : vector<64x1xi32> to vector<64x64xi32>
      %325 = arith.cmpi eq, %323, %324 : vector<64x64xi32>
      %c1_i32_105 = arith.constant 1 : i32
      %c0_i32_106 = arith.constant 0 : i32
      %326 = vector.broadcast %c1_i32_105 : i32 to vector<64x64xi32>
      %327 = vector.broadcast %c0_i32_106 : i32 to vector<64x64xi32>
      %328 = arith.select %325, %326, %327 : vector<64x64xi1>, vector<64x64xi32>
      %cst_107 = arith.constant dense<-2147483648> : vector<64xi32>
      %329 = vector.multi_reduction <maxsi>, %328, %cst_107 [1] : vector<64x64xi32> to vector<64xi32>
      %330 = vector.shape_cast %329 : vector<64xi32> to vector<64x1xi32>
      %c0_i32_108 = arith.constant 0 : i32
      %331 = vector.broadcast %c0_i32_108 : i32 to vector<64x1xi32>
      %332 = arith.cmpi eq, %330, %331 : vector<64x1xi32>
      %333 = vector.broadcast %321 : vector<1x64xf32> to vector<64x64xf32>
      %334 = arith.subf %333, %18 : vector<64x64xf32>
      %cst_109 = arith.constant dense<0xFF800000> : vector<64xf32>
      %335 = vector.multi_reduction <maximumf>, %334, %cst_109 [1] : vector<64x64xf32> to vector<64xf32>
      %336 = vector.shape_cast %335 : vector<64xf32> to vector<64x1xf32>
      %337 = vector.broadcast %336 : vector<64x1xf32> to vector<64x64xf32>
      %338 = arith.cmpf oge, %334, %337 : vector<64x64xf32>
      %cst_110 = arith.constant -1.000000e+30 : f32
      %339 = vector.broadcast %cst_110 : f32 to vector<64x64xf32>
      %340 = arith.select %338, %339, %334 : vector<64x64xi1>, vector<64x64xf32>
      %cst_111 = arith.constant dense<0xFF800000> : vector<64xf32>
      %341 = vector.multi_reduction <maximumf>, %340, %cst_111 [1] : vector<64x64xf32> to vector<64xf32>
      %342 = vector.shape_cast %341 : vector<64xf32> to vector<64x1xf32>
      %343 = vector.broadcast %332 : vector<64x1xi1> to vector<64x64xi1>
      %344 = arith.andi %338, %343 : vector<64x64xi1>
      %345 = vector.broadcast %30 : f32 to vector<64x1xf32>
      %346 = arith.subf %345, %342 : vector<64x1xf32>
      %347 = vector.broadcast %346 : vector<64x1xf32> to vector<64x64xf32>
      %348 = arith.subf %347, %18 : vector<64x64xf32>
      %cst_112 = arith.constant -1.000000e+30 : f32
      %349 = vector.broadcast %cst_112 : f32 to vector<64x64xf32>
      %350 = arith.select %344, %348, %349 : vector<64x64xi1>, vector<64x64xf32>
      %cst_113 = arith.constant dense<0xFF800000> : vector<64xf32>
      %351 = vector.multi_reduction <maximumf>, %350, %cst_113 [0] : vector<64x64xf32> to vector<64xf32>
      %352 = vector.shape_cast %351 : vector<64xf32> to vector<1x64xf32>
      %353 = vector.broadcast %352 : vector<1x64xf32> to vector<64x64xf32>
      %354 = arith.cmpf oge, %350, %353 : vector<64x64xf32>
      %c64_i32_114 = arith.constant 64 : i32
      %355 = vector.shape_cast %19 : vector<64x1xi32> to vector<64x1xi32>
      %356 = vector.broadcast %355 : vector<64x1xi32> to vector<64x64xi32>
      %357 = vector.broadcast %c64_i32_114 : i32 to vector<64x64xi32>
      %358 = arith.select %354, %356, %357 : vector<64x64xi1>, vector<64x64xi32>
      %cst_115 = arith.constant dense<2147483647> : vector<64xi32>
      %359 = vector.multi_reduction <minsi>, %358, %cst_115 [0] : vector<64x64xi32> to vector<64xi32>
      %360 = vector.shape_cast %359 : vector<64xi32> to vector<1x64xi32>
      %cst_116 = arith.constant -1.000000e+29 : f32
      %361 = vector.broadcast %cst_116 : f32 to vector<1x64xf32>
      %362 = arith.cmpf ogt, %352, %361 : vector<1x64xf32>
      %cst_117 = arith.constant 0.000000e+00 : f32
      %363 = vector.broadcast %cst_117 : f32 to vector<1x64xf32>
      %364 = arith.subf %363, %352 : vector<1x64xf32>
      %365 = arith.select %362, %364, %321 : vector<1x64xi1>, vector<1x64xf32>
      %366 = arith.select %362, %360, %322 : vector<1x64xi1>, vector<1x64xi32>
      %367 = vector.broadcast %366 : vector<1x64xi32> to vector<64x64xi32>
      %368 = vector.broadcast %19 : vector<64x1xi32> to vector<64x64xi32>
      %369 = arith.cmpi eq, %367, %368 : vector<64x64xi32>
      %c1_i32_118 = arith.constant 1 : i32
      %c0_i32_119 = arith.constant 0 : i32
      %370 = vector.broadcast %c1_i32_118 : i32 to vector<64x64xi32>
      %371 = vector.broadcast %c0_i32_119 : i32 to vector<64x64xi32>
      %372 = arith.select %369, %370, %371 : vector<64x64xi1>, vector<64x64xi32>
      %cst_120 = arith.constant dense<-2147483648> : vector<64xi32>
      %373 = vector.multi_reduction <maxsi>, %372, %cst_120 [1] : vector<64x64xi32> to vector<64xi32>
      %374 = vector.shape_cast %373 : vector<64xi32> to vector<64x1xi32>
      %c0_i32_121 = arith.constant 0 : i32
      %375 = vector.broadcast %c0_i32_121 : i32 to vector<64x1xi32>
      %376 = arith.cmpi eq, %374, %375 : vector<64x1xi32>
      %377 = vector.broadcast %365 : vector<1x64xf32> to vector<64x64xf32>
      %378 = arith.subf %377, %18 : vector<64x64xf32>
      %cst_122 = arith.constant dense<0xFF800000> : vector<64xf32>
      %379 = vector.multi_reduction <maximumf>, %378, %cst_122 [1] : vector<64x64xf32> to vector<64xf32>
      %380 = vector.shape_cast %379 : vector<64xf32> to vector<64x1xf32>
      %381 = vector.broadcast %380 : vector<64x1xf32> to vector<64x64xf32>
      %382 = arith.cmpf oge, %378, %381 : vector<64x64xf32>
      %cst_123 = arith.constant -1.000000e+30 : f32
      %383 = vector.broadcast %cst_123 : f32 to vector<64x64xf32>
      %384 = arith.select %382, %383, %378 : vector<64x64xi1>, vector<64x64xf32>
      %cst_124 = arith.constant dense<0xFF800000> : vector<64xf32>
      %385 = vector.multi_reduction <maximumf>, %384, %cst_124 [1] : vector<64x64xf32> to vector<64xf32>
      %386 = vector.shape_cast %385 : vector<64xf32> to vector<64x1xf32>
      %387 = vector.broadcast %376 : vector<64x1xi1> to vector<64x64xi1>
      %388 = arith.andi %382, %387 : vector<64x64xi1>
      %389 = vector.broadcast %30 : f32 to vector<64x1xf32>
      %390 = arith.subf %389, %386 : vector<64x1xf32>
      %391 = vector.broadcast %390 : vector<64x1xf32> to vector<64x64xf32>
      %392 = arith.subf %391, %18 : vector<64x64xf32>
      %cst_125 = arith.constant -1.000000e+30 : f32
      %393 = vector.broadcast %cst_125 : f32 to vector<64x64xf32>
      %394 = arith.select %388, %392, %393 : vector<64x64xi1>, vector<64x64xf32>
      %cst_126 = arith.constant dense<0xFF800000> : vector<64xf32>
      %395 = vector.multi_reduction <maximumf>, %394, %cst_126 [0] : vector<64x64xf32> to vector<64xf32>
      %396 = vector.shape_cast %395 : vector<64xf32> to vector<1x64xf32>
      %397 = vector.broadcast %396 : vector<1x64xf32> to vector<64x64xf32>
      %398 = arith.cmpf oge, %394, %397 : vector<64x64xf32>
      %c64_i32_127 = arith.constant 64 : i32
      %399 = vector.shape_cast %19 : vector<64x1xi32> to vector<64x1xi32>
      %400 = vector.broadcast %399 : vector<64x1xi32> to vector<64x64xi32>
      %401 = vector.broadcast %c64_i32_127 : i32 to vector<64x64xi32>
      %402 = arith.select %398, %400, %401 : vector<64x64xi1>, vector<64x64xi32>
      %cst_128 = arith.constant dense<2147483647> : vector<64xi32>
      %403 = vector.multi_reduction <minsi>, %402, %cst_128 [0] : vector<64x64xi32> to vector<64xi32>
      %404 = vector.shape_cast %403 : vector<64xi32> to vector<1x64xi32>
      %cst_129 = arith.constant -1.000000e+29 : f32
      %405 = vector.broadcast %cst_129 : f32 to vector<1x64xf32>
      %406 = arith.cmpf ogt, %396, %405 : vector<1x64xf32>
      %cst_130 = arith.constant 0.000000e+00 : f32
      %407 = vector.broadcast %cst_130 : f32 to vector<1x64xf32>
      %408 = arith.subf %407, %396 : vector<1x64xf32>
      %409 = arith.select %406, %408, %365 : vector<1x64xi1>, vector<1x64xf32>
      %410 = arith.select %406, %404, %366 : vector<1x64xi1>, vector<1x64xi32>
      %c8_i32 = arith.constant 8 : i32
      %411 = arith.addi %arg4, %c8_i32 : i32
      %412 = vector.shape_cast %410 : vector<1x64xi32> to vector<1x1x64xi32>
      %cst_131 = arith.constant dense<2147483647> : vector<1xi32>
      %413 = vector.multi_reduction <minsi>, %412, %cst_131 [1, 2] : vector<1x1x64xi32> to vector<1xi32>
      %414 = vector.shape_cast %413 : vector<1xi32> to vector<1x1x1xi32>
      %415 = vector.extract %414[0, 0, 0] : i32 from vector<1x1x1xi32>
      scf.yield %411, %415, %409, %410 : i32, i32, vector<1x64xf32>, vector<1x64xi32>
    }
    %37 = vector.broadcast %36#3 : vector<1x64xi32> to vector<64x64xi32>
    %38 = vector.broadcast %19 : vector<64x1xi32> to vector<64x64xi32>
    %39 = arith.cmpi eq, %37, %38 : vector<64x64xi32>
    %c1_i32_17 = arith.constant 1 : i32
    %c0_i32_18 = arith.constant 0 : i32
    %40 = vector.broadcast %c1_i32_17 : i32 to vector<64x64xi32>
    %41 = vector.broadcast %c0_i32_18 : i32 to vector<64x64xi32>
    %42 = arith.select %39, %40, %41 : vector<64x64xi1>, vector<64x64xi32>
    %cst_19 = arith.constant dense<-2147483648> : vector<64xi32>
    %43 = vector.multi_reduction <maxsi>, %42, %cst_19 [1] : vector<64x64xi32> to vector<64xi32>
    %44 = vector.shape_cast %43 : vector<64xi32> to vector<64x1xi32>
    %cst_20 = arith.constant 0.000000e+00 : f32
    %45 = vector.broadcast %cst_20 : f32 to vector<64x64xf32>
    %46 = arith.select %39, %18, %45 : vector<64x64xi1>, vector<64x64xf32>
    %cst_21 = arith.constant dense<0.000000e+00> : vector<64xf32>
    %47 = vector.multi_reduction <add>, %46, %cst_21 [1] : vector<64x64xf32> to vector<64xf32>
    %48 = vector.shape_cast %47 : vector<64xf32> to vector<64x1xf32>
    %cst_22 = arith.constant dense<0x7F800000> : vector<64xf32>
    %49 = vector.multi_reduction <minimumf>, %18, %cst_22 [1] : vector<64x64xf32> to vector<64xf32>
    %50 = vector.shape_cast %49 : vector<64xf32> to vector<64x1xf32>
    %c0_i32_23 = arith.constant 0 : i32
    %51 = vector.broadcast %c0_i32_23 : i32 to vector<64x1xi32>
    %52 = arith.cmpi sgt, %44, %51 : vector<64x1xi32>
    %53 = arith.select %52, %48, %50 : vector<64x1xi1>, vector<64x1xf32>
    %cst_24 = arith.constant dense<0.000000e+00> : vector<1xf32>
    %54 = vector.multi_reduction <add>, %53, %cst_24 [0] : vector<64x1xf32> to vector<1xf32>
    %55 = vector.shape_cast %54 : vector<1xf32> to vector<1x1xf32>
    %c0_25 = arith.constant 0 : index
    %c0_26 = arith.constant 0 : index
    %c0_27 = arith.constant 0 : index
    %56 = vector.load %arg3[%c0_25, %c0_26, %c0_27] : memref<1x1x1xf32, #tpu.memory_space<vmem>>, vector<1x1x1xf32>
    %57 = vector.shape_cast %56 : vector<1x1x1xf32> to vector<1x1xf32>
    %58 = vector.shape_cast %55 : vector<1x1xf32> to vector<1x1x1xf32>
    tpu.vector_store %arg3[%c0_25, %c0_26, %c0_27], %58 {strides = array<i32>} : memref<1x1x1xf32, #tpu.memory_space<vmem>>, vector<1x1x1xf32>,
    return
  }
  func.func @transform_0(%arg0: i32) -> (i32, i32, i32) {
    %c0_i32 = arith.constant 0 : i32
    %c0_i32_0 = arith.constant 0 : i32
    %c0_i32_1 = arith.constant 0 : i32
    return %arg0, %c0_i32, %c0_i32_0 : i32, i32, i32
  }
  func.func @transform_1(%arg0: i32) -> (i32, i32, i32) {
    %c0_i32 = arith.constant 0 : i32
    %c0_i32_0 = arith.constant 0 : i32
    %c0_i32_1 = arith.constant 0 : i32
    return %arg0, %c0_i32, %c0_i32_0 : i32, i32, i32
  }
  func.func @transform_2(%arg0: i32) -> (i32, i32, i32) {
    %c0_i32 = arith.constant 0 : i32
    %c0_i32_0 = arith.constant 0 : i32
    %c0_i32_1 = arith.constant 0 : i32
    return %arg0, %c0_i32, %c0_i32_0 : i32, i32, i32
  }
}

</mosaic_0001>

<bundles_post_ra>
// kernel: upsample_loss_forward.3
= control target key start
LH: loop header
LB: loop body
LE: loop exit
PB: predicated region body
PF: predicated region fallthrough
CT: control target
= control target key end

     0   :  { %s1431_s6 = smov 0   ;;  %s2032_s0 = inlined_call_operand.vmem [shape: f32[2,64,8], index: 0, kind: input, shape index: {}]   ;;  %s2033_s1 = inlined_call_operand.vmem [shape: f32[2,1,1], index: 1, kind: output, shape index: {}]  }
   0x1 LB: > { %s1122_s7 = sadd.s32 4294967295, %s1415_s6   ;;  %p1126_p0 = scmp.ge.s32.totalorder %s1415_s6, 1  ;;  %s1415_s6 = sphi %s1431_s6, %s11_s6  }
   0x2   : > { %p87_p1 = scmp.lt.s32.totalorder %s1415_s6, 3 }
   0x4   : > { %p88_p2 = pnand %p1126_p0, %p87_p1 }
   0x5   : > { %p105_p3 = scmp.lt.s32.totalorder (!%p88_p2), %s1122_s7, 1  ;;  %v1417_v0 = vmov (!%p88_p2), 0.0|0.0   ;;  %vm1418_vm0 = vmmov (!%p88_p2), 0   ;;  %v1419_v1 = vmov (!%p88_p2), 0.0   ;;  %vm129_vm1 = vcmask (!%p88_p2), 64512  }
   0x6   : > { %91 = sbr.rel (%p88_p2) target bundleno = 921 (0x399), region = 24  ;;  %1229 = vmatprep.subr.bf16.mxu0 (!%p88_p2), %v1417_v0  ;;  %1198 = vmatprep.mubr.msk.f32.mxu0 (!%p88_p2), %vm1418_vm0, %v1419_v1  ;;  %vm1449_vm2 = vmpackc.low (!%p88_p2), %vm129_vm1, %vm129_vm1  ;;  %v1420_v35 = vmov (!%p88_p2), 1.0   ;;  %v380_v36 = vlaneseq (!%p88_p2)  ;;  %vm435_vm4 = vcmask (!%p88_p2), 523264  }
   0x8   : > { %v381_v39 = vshrl.u32 (!%p88_p2), %v380_v36, 7  ;;  %v1502_v44 = vand.u32 (!%p88_p2), 127, %v380_v36 }
   0xa   : > { %v382_v41 = vsub.s32 (!%p88_p2), 0, %v381_v39  ;;  %v410_v47 = vadd.s32 (!%p88_p2), 8, %v381_v39  ;;  %v411_v52 = vadd.s32 (!%p88_p2), 16, %v381_v39  ;;  %v412_v53 = vadd.s32 (!%p88_p2), 24, %v381_v39 }
   0xb   : > { %vm419_vm3 = vcmp.eq.s32.totalorder (!%p88_p2), %v381_v39, %v1502_v44  ;;  %v414_v58 = vadd.s32 (!%p88_p2), 40, %v381_v39 }
   0xc   : > { %vm420_vm5 = vcmp.eq.s32.totalorder (!%p88_p2), %v410_v47, %v1502_v44  ;;  %vm421_vm6 = vcmp.eq.s32.totalorder (!%p88_p2), %v411_v52, %v1502_v44  ;;  %vm422_vm7 = vcmp.eq.s32.totalorder (!%p88_p2), %v412_v53, %v1502_v44 }
   0xd   : > { %s2037_s7 = smov (!%p105_p3, %s1122_s7), 1  ;;  %vm424_vm8 = vcmp.eq.s32.totalorder %v414_v58, %v1502_v44 }
   0xe   : > { %s1156_s8 = sshll.u32 %s2037_s7, 6  ;;  %s112_s14 = scalar_lea.vmem %s2033_s1, %s2037_s7 }
   0xf   : > { %s1445_s11 = scalar_lea.vmem %s2032_s0, %s1156_s8 }
  0x10   : > { %v113_v3 = vld [vmem:[%s1445_s11] sm:$0xff]  ;;  %v114_v4 = vld [vmem:[%s1445_s11 + $0x8] sm:$0xff]  ;;  %v115_v5 = vld [vmem:[%s1445_s11 + $0x10] sm:$0xff] }
  0x11   : > { %v1245_v6 = vpack.c.bf16 %v114_v4, %v113_v3  ;;  %v121_v7 = vmul.f32 %v113_v3, %v113_v3  ;;  %v122_v8 = vmul.f32 %v114_v4, %v114_v4  ;;  %v116_v9 = vld [vmem:[%s1445_s11 + $0x18] sm:$0xff]  ;;  %1217 = vmatprep.mubr.msk.f32.mxu1 %vm129_vm1, %v113_v3  ;;  %v123_v11 = vmul.f32 %v115_v5, %v115_v5  ;;  %v117_v16 = vld [vmem:[%s1445_s11 + $0x20] sm:$0xff]  ;;  %v118_v17 = vld [vmem:[%s1445_s11 + $0x28] sm:$0xff] }
  0x12   : > { %v1251_v10 = vpack.c.bf16 %v116_v9, %v115_v5  ;;  %v124_v15 = vmul.f32 %v116_v9, %v116_v9  ;;  %v1257_v21 = vpack.c.bf16 %v118_v17, %v117_v16  ;;  %v126_v22 = vmul.f32 %v118_v17, %v118_v17  ;;  %v120_v24 = vld [vmem:[%s1445_s11 + $0x38] sm:$0xff]  ;;  %v119_v25 = vld [vmem:[%s1445_s11 + $0x30] sm:$0xff] }
  0x13   : > { %1247 = vmatprep.subr.msk.bf16.mxu1 %vm1449_vm2, %v1245_v6  ;;  %v1230_v12 = vpack.c.bf16 %v122_v8, %v121_v7  ;;  %v136_v13 = vsel %vm129_vm1, %v123_v11, 0.0  ;;  %v130_v14 = vsel %vm129_vm1, %v121_v7, 0.0  ;;  %v133_v19 = vsel %vm129_vm1, %v122_v8, 0.0 }
  0x14   : > { %1250 = vmatpush3.bf16.xpose.msk.msra.mxu1 %vm1449_vm2, %v1245_v6  ;;  %137 = vadd.xlane.f32.xlu1 %v136_v13  ;;  %v139_v18 = vsel %vm129_vm1, %v124_v15, 0.0  ;;  %v1234_v20 = vpack.c.bf16 %v124_v15, %v123_v11  ;;  %v125_v23 = vmul.f32 %v117_v16, %v117_v16  ;;  %v145_v26 = vsel %vm129_vm1, %v126_v22, 0.0 }
  0x15   : > { %1232 = vmatpush3.bf16.xpose.msk.msra.mxu0 %vm1449_vm2, %v1230_v12  ;;  %1253 = vmatprep.subr.msk.bf16.mxu1 %vm1449_vm2, %v1251_v10  ;;  %v128_v28 = vmul.f32 %v120_v24, %v120_v24  ;;  %v127_v29 = vmul.f32 %v119_v25, %v119_v25  ;;  %v1263_v33 = vpack.c.bf16 %v120_v24, %v119_v25 }
  0x16   : > { %1233 = vmatprep.subr.bf16.mxu0 %v1417_v0  ;;  %131 = vadd.xlane.f32.xlu0 %v130_v14  ;;  %v142_v27 = vsel %vm129_vm1, %v125_v23, 0.0  ;;  %v1238_v32 = vpack.c.bf16 %v126_v22, %v125_v23  ;;  %v415_v22 = vadd.s32 48, %v381_v39 }
  0x17   : > { %v151_v30 = vsel %vm129_vm1, %v128_v28, 0.0  ;;  %v148_v31 = vsel %vm129_vm1, %v127_v29, 0.0  ;;  %v1242_v34 = vpack.c.bf16 %v128_v28, %v127_v29 }
  0x18   : > { %140 = vadd.xlane.f32.xlu1 %v139_v18  ;;  %vm425_vm11 = vcmp.eq.s32.totalorder %v415_v22, %v1502_v44 }
  0x1a   : > { %134 = vadd.xlane.f32.xlu0 %v133_v19 }
  0x1c   : > { %1256 = vmatpush3.bf16.xpose.msk.msra.mxu1 %vm1449_vm2, %v1251_v10  ;;  %146 = vadd.xlane.f32.xlu1 %v145_v26 }
  0x1d   : > { %1236 = vmatpush3.bf16.xpose.msk.msra.mxu0 %vm1449_vm2, %v1234_v20  ;;  %1259 = vmatprep.subr.msk.bf16.mxu1 %vm1449_vm2, %v1257_v21 }
  0x1e   : > { %1237 = vmatprep.subr.bf16.mxu0 %v1417_v0  ;;  %143 = vadd.xlane.f32.xlu0 %v142_v27 }
  0x20   : > { %152 = vadd.xlane.f32.xlu1 %v151_v30 }
  0x22   : > { %149 = vadd.xlane.f32.xlu0 %v148_v31 }
  0x24   : > { %1262 = vmatpush3.bf16.xpose.msk.msra.mxu1 %vm1449_vm2, %v1257_v21  ;;  %v416_v21 = vadd.s32 56, %v381_v39 }
  0x25   : > { %1240 = vmatpush3.bf16.xpose.msk.msra.mxu0 %vm1449_vm2, %v1238_v32  ;;  %1265 = vmatprep.subr.msk.bf16.mxu1 %vm1449_vm2, %v1263_v33 }
  0x26   : > { %1241 = vmatprep.subr.bf16.mxu0 %v1417_v0  ;;  %vm426_vm10 = vcmp.eq.s32.totalorder %v416_v21, %v1502_v44 }
  0x2c   : > { %1268 = vmatpush3.bf16.xpose.msk.msra.mxu1 %vm1449_vm2, %v1263_v33 }
  0x2d   : > { %1244 = vmatpush3.bf16.xpose.msk.msra.mxu0 %vm1449_vm2, %v1242_v34 }
  0x33   : > { %1218 = vmatmul.mubr.msk.f32.vlgmr.msra.gmra.mrb[0].mxu1 %vm129_vm1, %v114_v4  ;;  %v413_v4 = vadd.s32 32, %v381_v39 }
  0x34   : > { %1199 = vmatmul.mubr.msk.f32.vlgmr.msra.gmra.mrb[0].mxu0 %vm129_vm1, %v1420_v35  ;;  %1220 = vmatprep.mubr.msk.f32.mxu1 %vm129_vm1, %v115_v5 }
  0x35   : > { %vm423_vm9 = vcmp.eq.s32.totalorder %v413_v4, %v1502_v44 }
  0x37   : > { %1221 = vmatmul.mubr.msk.f32.gmra.mrb[2].mxu1 %vm129_vm1, %v116_v9 }
  0x38   : > { %1223 = vmatprep.mubr.msk.f32.mxu1 %vm129_vm1, %v117_v16 }
  0x3b   : > { %1224 = vmatmul.mubr.msk.f32.gmra.mrb[4].mxu1 %vm129_vm1, %v118_v17 }
  0x3c   : > { %1226 = vmatprep.mubr.msk.f32.mxu1 %vm129_vm1, %v119_v25 }
  0x3f   : > { %1227 = vmatmul.mubr.msk.f32.gmra.mrb[6].mxu1 %vm129_vm1, %v120_v24 }
  0xa1   : > { %v138_v37 = vpop.xlane.xlu1 %137 }
  0xa3   : > { %v132_v38 = vpop.xlane.xlu0 %131 }
  0xa5   : > { %v141_v40 = vpop.xlane.xlu1 %140 }
  0xa7   : > { %v135_v42 = vpop.xlane.xlu0 %134 }
  0xa9   : > { %v147_v54 = vpop.xlane.xlu1 %146 }
  0xab   : > { %v144_v59 = vpop.xlane.xlu0 %143 }
  0xad   : > { %v153_v14 = vpop.xlane.xlu1 %152 }
  0xaf   : > { %v150_v19 = vpop.xlane.xlu0 %149 }
 0x106   : > { %v1219_v43 = vpop.f32.mrb[0].mxu1 }
 0x107   : > { %v247_v45 = vpop.f32.mrb[0].mxu0  ;;  %v341_v46 = vpop.f32.mrb[1].mxu1  ;;  %v393_v49 = vmul.f32 2.0, %v1219_v43 }
 0x108   : > { %v383_v48 = vrot.slane %v247_v45, %v382_v41  ;;  %v1200_v50 = vpop.f32.mrb[1].mxu0  ;;  %v392_v51 = vmul.f32 2.0, %v341_v46 }
 0x10a   : > { %v385_v55 = vadd.f32 %v383_v48, %v135_v42  ;;  %v384_v56 = vadd.f32 %v383_v48, %v132_v38  ;;  %v1222_v57 = vpop.f32.mrb[2].mxu1  ;;  %v387_v60 = vadd.f32 %v383_v48, %v141_v40  ;;  %v386_v1 = vadd.f32 %v383_v48, %v138_v37 }
 0x10b   : > { %v395_v61 = vmul.f32 2.0, %v1222_v57  ;;  %v351_v62 = vpop.f32.mrb[3].mxu1  ;;  %v389_v9 = vadd.f32 %v383_v48, %v147_v54  ;;  %v388_v15 = vadd.f32 %v383_v48, %v144_v59  ;;  %v391_v25 = vadd.f32 %v383_v48, %v153_v14 }
 0x10c   : > { %v401_v63 = vsub.f32 %v385_v55, %v393_v49  ;;  %v400_v0 = vsub.f32 %v384_v56, %v392_v51  ;;  %v394_v2 = vmul.f32 2.0, %v351_v62  ;;  %v390_v30 = vadd.f32 %v383_v48, %v150_v19 }
 0x10d   : > { %v403_v3 = vsub.f32 %v387_v60, %v395_v61 }
 0x10e   : > { %v402_v5 = vsub.f32 %v386_v1, %v394_v2  ;;  %v1225_v6 = vpop.f32.mrb[4].mxu1  ;;  %v427_v7 = vsel %vm419_vm3, 1e+30, %v400_v0  ;;  %v428_v8 = vsel %vm420_vm5, 1e+30, %v401_v63 }
 0x10f   : > { %v397_v10 = vmul.f32 2.0, %v1225_v6  ;;  %v361_v11 = vpop.f32.mrb[5].mxu1  ;;  %v436_v12 = vsel %vm435_vm4, %v427_v7, inf  ;;  %v439_v13 = vsel %vm435_vm4, %v428_v8, inf  ;;  %v430_v18 = vsel %vm422_vm7, 1e+30, %v403_v3 }
 0x110   : > { %v396_v16 = vmul.f32 2.0, %v361_v11  ;;  %437 = vmin.xlane.f32.xlu0 %v436_v12  ;;  %440 = vmin.xlane.f32.xlu1 %v439_v13  ;;  %v429_v17 = vsel %vm421_vm6, 1e+30, %v402_v5  ;;  %v445_v29 = vsel %vm435_vm4, %v430_v18, inf }
 0x111   : > { %v405_v20 = vsub.f32 %v389_v9, %v397_v10  ;;  %v442_v28 = vsel %vm435_vm4, %v429_v17, inf }
 0x112   : > { %v404_v23 = vsub.f32 %v388_v15, %v396_v16  ;;  %v1228_v24 = vpop.f32.mrb[6].mxu1 }
 0x113   : > { %v399_v26 = vmul.f32 2.0, %v1228_v24  ;;  %v371_v27 = vpop.f32.mrb[7].mxu1  ;;  %v432_v32 = vsel %vm424_vm8, 1e+30, %v405_v20 }
 0x114   : > { %v398_v31 = vmul.f32 2.0, %v371_v27  ;;  %443 = vmin.xlane.f32.xlu0 %v442_v28  ;;  %446 = vmin.xlane.f32.xlu1 %v445_v29  ;;  %v431_v33 = vsel %vm423_vm9, 1e+30, %v404_v23  ;;  %v451_v36 = vsel %vm435_vm4, %v432_v32, inf }
 0x115   : > { %v407_v34 = vsub.f32 %v391_v25, %v399_v26  ;;  %v448_v37 = vsel %vm435_vm4, %v431_v33, inf }
 0x116   : > { %v406_v35 = vsub.f32 %v390_v30, %v398_v31 }
 0x117   : > { %v434_v38 = vsel %vm426_vm10, 1e+30, %v407_v34 }
 0x118   : > { %452 = vmin.xlane.f32.xlu1 %v451_v36  ;;  %449 = vmin.xlane.f32.xlu0 %v448_v37  ;;  %v433_v39 = vsel %vm425_vm11, 1e+30, %v406_v35  ;;  %v457_v40 = vsel %vm435_vm4, %v434_v38, inf }
 0x119   : > { %v454_v41 = vsel %vm435_vm4, %v433_v39, inf }
 0x11c   : > { %458 = vmin.xlane.f32.xlu1 %v457_v40  ;;  %455 = vmin.xlane.f32.xlu0 %v454_v41 }
 0x19d   : > { %v441_v42 = vpop.xlane.xlu1 %440  ;;  %v438_v43 = vpop.xlane.xlu0 %437 }
 0x19e   : > { %vm581_vm12 = vcmp.le.f32.partialorder %v428_v8, %v441_v42  ;;  %vm580_vm13 = vcmp.le.f32.partialorder %v427_v7, %v438_v43  ;;  %v1566_v2 = vmax.f32 %v441_v42, 1e-12  ;;  %v1568_v3 = vmax.f32 %v438_v43, 1e-12 }
 0x19f   : > { %v1528_v44 = vsel %vm581_vm12, 1e+30, %v428_v8  ;;  %v1530_v45 = vsel %vm580_vm13, 1e+30, %v427_v7 }
 0x1a0   : > { %v599_v46 = vsel %vm435_vm4, %v1528_v44, inf  ;;  %v596_v48 = vsel %vm435_vm4, %v1530_v45, inf  ;;  %1281 = vrsqrt.f32 %v1566_v2  ;;  %v525_v5 = vsub.f32 0.0, %v1566_v2 }
 0x1a1   : > { %v447_v47 = vpop.xlane.xlu1 %446  ;;  %600 = vmin.xlane.f32.xlu1 %v599_v46  ;;  %597 = vmin.xlane.f32.xlu0 %v596_v48  ;;  %v444_v49 = vpop.xlane.xlu0 %443  ;;  %1283 = vrsqrt.f32 %v1568_v3  ;;  %v524_v7 = vsub.f32 0.0, %v1568_v3  ;;  %vm477_vm5 = vcmp.eq.f32.partialorder %v1566_v2, inf  ;;  %vm479_vm6 = vcmp.eq.f32.partialorder %v1566_v2, 0.0 }
 0x1a2   : > { %vm583_vm14 = vcmp.le.f32.partialorder %v430_v18, %v447_v47  ;;  %vm582_vm15 = vcmp.le.f32.partialorder %v429_v17, %v444_v49  ;;  %v1570_v4 = vmax.f32 %v447_v47, 1e-12  ;;  %v1575_v6 = vmax.f32 %v444_v49, 1e-12 }
 0x1a3   : > { %v1536_v50 = vsel %vm583_vm14, 1e+30, %v430_v18  ;;  %v1540_v53 = vsel %vm582_vm15, 1e+30, %v429_v17  ;;  %v533_v9 = vmul.f32 1111.1111, %v525_v5 }
 0x1a4   : > { %v605_v52 = vsel %vm435_vm4, %v1536_v50, inf  ;;  %v602_v54 = vsel %vm435_vm4, %v1540_v53, inf  ;;  %1285 = vrsqrt.f32 %v1570_v4  ;;  %v527_v8 = vsub.f32 0.0, %v1570_v4 }
 0x1a5   : > { %v453_v51 = vpop.xlane.xlu1 %452  ;;  %606 = vmin.xlane.f32.xlu1 %v605_v52  ;;  %603 = vmin.xlane.f32.xlu0 %v602_v54  ;;  %v450_v56 = vpop.xlane.xlu0 %449  ;;  %1287 = vrsqrt.f32 %v1575_v6  ;;  %v526_v10 = vsub.f32 0.0, %v1575_v6  ;;  %v532_v11 = vmul.f32 1111.1111, %v524_v7  ;;  %v542_v15 = vmul.f32 1.442695, %v533_v9 }
 0x1a6   : > { %vm585_vm0 = vcmp.le.f32.partialorder %v432_v32, %v453_v51  ;;  %vm584_vm1 = vcmp.le.f32.partialorder %v431_v33, %v450_v56  ;;  %v535_v12 = vmul.f32 1111.1111, %v527_v8  ;;  %v1582_v13 = vmax.f32 %v453_v51, 1e-12 }
 0x1a7   : > { %v1544_v55 = vsel %vm585_vm0, 1e+30, %v432_v32  ;;  %v1550_v59 = vsel %vm584_vm1, 1e+30, %v431_v33  ;;  %v534_v16 = vmul.f32 1111.1111, %v526_v10 }
 0x1a8   : > { %v611_v57 = vsel %vm435_vm4, %v1544_v55, inf  ;;  %v608_v60 = vsel %vm435_vm4, %v1550_v59, inf  ;;  %v540_v17 = vmul.f32 1.442695, %v532_v11  ;;  %v480_v19 = vand.u32 2147483648, %v1566_v2 }
 0x1a9   : > { %612 = vmin.xlane.f32.xlu1 %v611_v57  ;;  %v1548_v58 = vpop.xlane.xlu1 %458  ;;  %v1555_v61 = vpop.xlane.xlu0 %455  ;;  %609 = vmin.xlane.f32.xlu0 %v608_v60  ;;  %vm470_vm7 = vcmp.eq.f32.partialorder %v1568_v3, inf  ;;  %v473_v20 = vand.u32 2147483648, %v1568_v3  ;;  %v546_v21 = vmul.f32 1.442695, %v535_v12  ;;  %vm472_vm8 = vcmp.eq.f32.partialorder %v1568_v3, 0.0 }
 0x1aa   : > { %vm587_vm2 = vcmp.le.f32.partialorder %v434_v38, %v1548_v58  ;;  %vm586_vm3 = vcmp.le.f32.partialorder %v433_v39, %v1555_v61  ;;  %v1282_v14 = vpop.eup %1281  ;;  %vm491_vm9 = vcmp.eq.f32.partialorder %v1570_v4, inf  ;;  %1289 = vrsqrt.f32 %v1582_v13 }
 0x1ab   : > { %v1558_v62 = vsel %vm587_vm2, 1e+30, %v434_v38  ;;  %v1562_v0 = vsel %vm586_vm3, 1e+30, %v433_v39  ;;  %v1284_v18 = vpop.eup %1283  ;;  %v476_v23 = vmul.f32 %v1282_v14, %v1566_v2  ;;  %v529_v24 = vsub.f32 0.0, %v1582_v13 }
 0x1ac   : > { %v617_v63 = vsel %vm435_vm4, %v1558_v62, inf  ;;  %v614_v1 = vsel %vm435_vm4, %v1562_v0, inf  ;;  %1291 = vpow2.f32 %v542_v15  ;;  %vm493_vm10 = vcmp.eq.f32.partialorder %v1570_v4, 0.0 }
 0x1ad   : > { %618 = vmin.xlane.f32.xlu1 %v617_v63  ;;  %615 = vmin.xlane.f32.xlu0 %v614_v1  ;;  %v494_v25 = vand.u32 2147483648, %v1570_v4  ;;  %v544_v26 = vmul.f32 1.442695, %v534_v16  ;;  %v469_v27 = vmul.f32 %v1284_v18, %v1568_v3  ;;  %1293 = vpow2.f32 %v540_v17 }
 0x1ae   : > { %v1286_v22 = vpop.eup %1285  ;;  %vm484_vm11 = vcmp.eq.f32.partialorder %v1575_v6, inf  ;;  %v1598_v28 = vmax.f32 %v450_v56, 1e-12  ;;  %1295 = vpow2.f32 %v546_v21  ;;  %v487_v31 = vand.u32 2147483648, %v1575_v6 }
 0x1af   : > { %v1288_v29 = vpop.eup %1287  ;;  %v490_v30 = vmul.f32 %v1286_v22, %v1570_v4  ;;  %v508_v32 = vand.u32 2147483648, %v1582_v13  ;;  %v478_v34 = vsel %vm477_vm5, %v1566_v2, %v476_v23  ;;  %vm486_vm12 = vcmp.eq.f32.partialorder %v1575_v6, 0.0 }
 0x1b0   : > { %v537_v35 = vmul.f32 1111.1111, %v529_v24  ;;  %1297 = vpow2.f32 %v544_v26  ;;  %v471_v40 = vsel %vm470_vm7, %v1568_v3, %v469_v27  ;;  %v483_v41 = vmul.f32 %v1288_v29, %v1575_v6 }
 0x1b1   : > { %v528_v42 = vsub.f32 0.0, %v1598_v28  ;;  %v1624_v43 = vsel %vm479_vm6, %v480_v19, %v478_v34  ;;  %v492_v46 = vsel %vm491_vm9, %v1570_v4, %v490_v30  ;;  %v1639_v52 = vsel %vm472_vm8, %v473_v20, %v471_v40 }
 0x1b2   : > { %v550_v47 = vmul.f32 1.442695, %v537_v35  ;;  %v1646_v60 = vsel %vm493_vm10, %v494_v25, %v492_v46  ;;  %v557_v5 = vsub.f32 0.07, %v1624_v43  ;;  %v556_v4 = vsub.f32 0.07, %v1639_v52 }
 0x1b3   : > { %v536_v63 = vmul.f32 1111.1111, %v528_v42  ;;  %v559_v14 = vsub.f32 0.07, %v1646_v60  ;;  %vm505_vm0 = vcmp.eq.f32.partialorder %v1582_v13, inf  ;;  %vm507_vm8 = vcmp.eq.f32.partialorder %v1582_v13, 0.0 }
 0x1b4   : > { %v1290_v57 = vpop.eup %1289 }
 0x1b5   : > { %v504_v16 = vmul.f32 %v1290_v57, %v1582_v13  ;;  %v548_v17 = vmul.f32 1.442695, %v536_v63 }
 0x1b6   : > { %v1292_v3 = vpop.eup %1291 }
 0x1b7   : > { %v1294_v9 = vpop.eup %1293  ;;  %v565_v43 = vmul.f32 %v1292_v3, %v557_v5 }
 0x1b8   : > { %v1296_v12 = vpop.eup %1295 }
 0x22e   : > { %v601_v33 = vpop.xlane.xlu1 %600  ;;  %v598_v37 = vpop.xlane.xlu0 %597 }
 0x22f   : > { %v1607_v36 = vmax.f32 %v601_v33, 1e-12  ;;  %vm741_vm13 = vcmp.le.f32.partialorder %v1528_v44, %v601_v33  ;;  %v1610_v38 = vmax.f32 %v598_v37, 1e-12  ;;  %vm740_vm14 = vcmp.le.f32.partialorder %v1530_v45, %v598_v37 }
 0x230   : > { %v1614_v39 = vsel %vm741_vm13, 1e+30, %v1528_v44  ;;  %v1635_v51 = vsel %vm740_vm14, 1e+30, %v1530_v45  ;;  %v485_v45 = vsel %vm484_vm11, %v1575_v6, %v483_v41  ;;  %vm498_vm11 = vcmp.eq.f32.partialorder %v1598_v28, inf }
 0x231   : > { %1299 = vrsqrt.f32 %v1607_v36  ;;  %v685_v44 = vsub.f32 0.0, %v1607_v36  ;;  %v684_v48 = vsub.f32 0.0, %v1610_v38  ;;  %v759_v49 = vsel %vm435_vm4, %v1614_v39, inf }
 0x232   : > { %1301 = vrsqrt.f32 %v1610_v38  ;;  %760 = vmin.xlane.f32.xlu1 %v759_v49  ;;  %v756_v56 = vsel %vm435_vm4, %v1635_v51, inf  ;;  %v607_v2 = vpop.xlane.xlu1 %606  ;;  %v1662_v15 = vsel %vm486_vm12, %v487_v31, %v485_v45  ;;  %v604_v19 = vpop.xlane.xlu0 %603  ;;  %vm637_vm1 = vcmp.eq.f32.partialorder %v1607_v36, inf }
 0x233   : > { %1303 = vrsqrt.f32 %v1598_v28  ;;  %v693_v54 = vmul.f32 1111.1111, %v685_v44  ;;  %v692_v1 = vmul.f32 1111.1111, %v684_v48  ;;  %757 = vmin.xlane.f32.xlu0 %v756_v56  ;;  %v1652_v8 = vmax.f32 %v607_v2, 1e-12 }
 0x234   : > { %vm743_vm15 = vcmp.le.f32.partialorder %v1536_v50, %v607_v2  ;;  %1305 = vpow2.f32 %v550_v47  ;;  %v1673_v6 = vmax.f32 %v604_v19, 1e-12  ;;  %vm742_vm2 = vcmp.le.f32.partialorder %v1540_v53, %v604_v19 }
 0x235   : > { %v702_v7 = vmul.f32 1.442695, %v693_v54  ;;  %v700_v10 = vmul.f32 1.442695, %v692_v1  ;;  %v1657_v11 = vsel %vm743_vm15, 1e+30, %v1536_v50  ;;  %v1668_v50 = vpop.eup %1297  ;;  %v564_v48 = vmul.f32 %v1294_v9, %v556_v4 }
 0x236   : > { %v687_v18 = vsub.f32 0.0, %v1652_v8  ;;  %v765_v20 = vsel %vm435_vm4, %v1657_v11, inf  ;;  %vm639_vm3 = vcmp.eq.f32.partialorder %v1607_v36, 0.0  ;;  %v640_v22 = vand.u32 2147483648, %v1607_v36  ;;  %v613_v33 = vpop.xlane.xlu1 %612  ;;  %v610_v1 = vpop.xlane.xlu0 %609 }
 0x237   : > { %1307 = vpow2.f32 %v702_v7  ;;  %766 = vmin.xlane.f32.xlu1 %v765_v20  ;;  %v1679_v24 = vsel %vm742_vm2, 1e+30, %v1540_v53  ;;  %vm630_vm5 = vcmp.eq.f32.partialorder %v1610_v38, inf  ;;  %vm632_vm6 = vcmp.eq.f32.partialorder %v1610_v38, 0.0 }
 0x238   : > { %1309 = vpow2.f32 %v700_v10  ;;  %v695_v23 = vmul.f32 1111.1111, %v687_v18  ;;  %v633_v29 = vand.u32 2147483648, %v1610_v38  ;;  %v686_v31 = vsub.f32 0.0, %v1673_v6 }
 0x239   : > { %1311 = vrsqrt.f32 %v1652_v8  ;;  %v1693_v35 = vmax.f32 %v613_v33, 1e-12  ;;  %vm745_vm7 = vcmp.le.f32.partialorder %v1544_v55, %v613_v33  ;;  %v762_v37 = vsel %vm435_vm4, %v1679_v24, inf }
 0x23a   : > { %1313 = vrsqrt.f32 %v1673_v6  ;;  %v706_v30 = vmul.f32 1.442695, %v695_v23  ;;  %v694_v42 = vmul.f32 1111.1111, %v686_v31  ;;  %763 = vmin.xlane.f32.xlu0 %v762_v37  ;;  %v558_v49 = vsub.f32 0.07, %v1662_v15  ;;  %v1749_v33 = vpop.xlane.xlu0 %615 }
 0x23b   : > { %v1300_v21 = vpop.eup %1299  ;;  %v567_v56 = vmul.f32 %v1296_v12, %v559_v14  ;;  %v689_v57 = vsub.f32 0.0, %v1693_v35  ;;  %v1711_v60 = vsel %vm745_vm7, 1e+30, %v1544_v55  ;;  %v506_v45 = vsel %vm505_vm0, %v1582_v13, %v504_v16 }
 0x23c   : > { %v1302_v25 = vpop.eup %1301  ;;  %v636_v26 = vmul.f32 %v1300_v21, %v1607_v36  ;;  %1315 = vpow2.f32 %v706_v30  ;;  %v771_v2 = vsel %vm435_vm4, %v1711_v60, inf  ;;  %v1719_v9 = vmax.f32 %v610_v1, 1e-12 }
 0x23d   : > { %v629_v27 = vmul.f32 %v1302_v25, %v1610_v38  ;;  %v1688_v34 = vpop.eup %1303  ;;  %1317 = vrsqrt.f32 %v1693_v35  ;;  %v697_v7 = vmul.f32 1111.1111, %v689_v57  ;;  %vm744_vm9 = vcmp.le.f32.partialorder %v1550_v59, %v610_v1  ;;  %772 = vmin.xlane.f32.xlu1 %v771_v2 }
 0x23e   : > { %v638_v53 = vsel %vm637_vm1, %v1607_v36, %v636_v26  ;;  %v1704_v47 = vpop.eup %1305  ;;  %v704_v36 = vmul.f32 1.442695, %v694_v42  ;;  %1319 = vpow2.f32 %v548_v17  ;;  %vm651_vm10 = vcmp.eq.f32.partialorder %v1652_v8, inf }
 0x23f   : > { %v641_v40 = vsel %vm639_vm3, %v640_v22, %v638_v53  ;;  %v631_v41 = vsel %vm630_vm5, %v1610_v38, %v629_v27  ;;  %v654_v10 = vand.u32 2147483648, %v1652_v8  ;;  %v710_v15 = vmul.f32 1.442695, %v697_v7  ;;  %v1740_v22 = vpop.xlane.xlu1 %618 }
 0x240   : > { %v717_v46 = vsub.f32 0.07, %v641_v40  ;;  %v634_v44 = vsel %vm632_vm6, %v633_v29, %v631_v41  ;;  %1321 = vpow2.f32 %v704_v36  ;;  %v1732_v16 = vsel %vm744_vm9, 1e+30, %v1550_v59 }
 0x241   : > { %v716_v52 = vsub.f32 0.07, %v634_v44  ;;  %v1308_v54 = vpop.eup %1307  ;;  %1323 = vrsqrt.f32 %v1719_v9  ;;  %vm653_vm12 = vcmp.eq.f32.partialorder %v1652_v8, 0.0  ;;  %vm644_vm13 = vcmp.eq.f32.partialorder %v1673_v6, inf }
 0x242   : > { %v1310_v38 = vpop.eup %1309  ;;  %v725_v63 = vmul.f32 %v1308_v54, %v717_v46  ;;  %v647_v20 = vand.u32 2147483648, %v1673_v6  ;;  %1325 = vpow2.f32 %v710_v15  ;;  %v688_v21 = vsub.f32 0.0, %v1719_v9 }
 0x243   : > { %v1312_v3 = vpop.eup %1311  ;;  %v724_v5 = vmul.f32 %v1310_v38, %v716_v52  ;;  %vm646_vm14 = vcmp.eq.f32.partialorder %v1673_v6, 0.0  ;;  %v566_v27 = vmul.f32 %v1668_v50, %v558_v49  ;;  %v497_v29 = vmul.f32 %v1688_v34, %v1598_v28 }
 0x244   : > { %v1722_v55 = vadd.f32 %v725_v63, %v565_v43  ;;  %v650_v4 = vmul.f32 %v1312_v3, %v1652_v8  ;;  %v1314_v12 = vpop.eup %1313  ;;  %v696_v31 = vmul.f32 1111.1111, %v688_v21  ;;  %vm747_vm15 = vcmp.le.f32.partialorder %v1558_v62, %v1740_v22 }
 0x245   : > { %v1728_v14 = vadd.f32 %v724_v5, %v564_v48  ;;  %v643_v18 = vmul.f32 %v1314_v12, %v1673_v6  ;;  %v509_v50 = vsel %vm507_vm8, %v508_v32, %v506_v45  ;;  %vm665_vm0 = vcmp.eq.f32.partialorder %v1693_v35, inf }
 0x246   : > { %v652_v17 = vsel %vm651_vm10, %v1652_v8, %v650_v4  ;;  %v1316_v23 = vpop.eup %1315  ;;  %v768_v8 = vsel %vm435_vm4, %v1732_v16, inf  ;;  %v668_v34 = vand.u32 2147483648, %v1693_v35  ;;  %v708_v41 = vmul.f32 1.442695, %v696_v31 }
 0x247   : > { %v655_v19 = vsel %vm653_vm12, %v654_v10, %v652_v17  ;;  %v645_v59 = vsel %vm644_vm13, %v1673_v6, %v643_v18  ;;  %v1318_v26 = vpop.eup %1317  ;;  %769 = vmin.xlane.f32.xlu0 %v768_v8  ;;  %vm667_vm1 = vcmp.eq.f32.partialorder %v1693_v35, 0.0  ;;  %vm746_vm2 = vcmp.le.f32.partialorder %v1562_v0, %v1749_v33 }
 0x248   : > { %v719_v25 = vsub.f32 0.07, %v655_v19  ;;  %v648_v30 = vsel %vm646_vm14, %v647_v20, %v645_v59  ;;  %v664_v40 = vmul.f32 %v1318_v26, %v1693_v35  ;;  %v1320_v6 = vpop.eup %1319  ;;  %1327 = vpow2.f32 %v708_v41 }
 0x249   : > { %v718_v37 = vsub.f32 0.07, %v648_v30  ;;  %v1767_v13 = vsel %vm747_vm15, 1e+30, %v1558_v62  ;;  %v561_v32 = vsub.f32 0.07, %v509_v50  ;;  %v499_v49 = vsel %vm498_vm11, %v1598_v28, %v497_v29 }
 0x24a   : > { %v727_v53 = vmul.f32 %v1316_v23, %v719_v25  ;;  %v1322_v42 = vpop.eup %1321  ;;  %v666_v46 = vsel %vm665_vm0, %v1693_v35, %v664_v40  ;;  %v501_v54 = vand.u32 2147483648, %v1598_v28  ;;  %vm500_vm3 = vcmp.eq.f32.partialorder %v1598_v28, 0.0 }
 0x24b   : > { %v726_v44 = vmul.f32 %v1322_v42, %v718_v37  ;;  %v669_v48 = vsel %vm667_vm1, %v668_v34, %v666_v46  ;;  %v1324_v36 = vpop.eup %1323  ;;  %v777_v57 = vsel %vm435_vm4, %v1767_v13, inf  ;;  %v1780_v62 = vsel %vm746_vm2, 1e+30, %v1562_v0 }
 0x24c   : > { %v1760_v43 = vadd.f32 %v727_v53, %v567_v56  ;;  %v721_v52 = vsub.f32 0.07, %v669_v48  ;;  %v657_v35 = vmul.f32 %v1324_v36, %v1719_v9  ;;  %v1326_v38 = vpop.eup %1325  ;;  %v502_v45 = vsel %vm500_vm3, %v501_v54, %v499_v49  ;;  %778 = vmin.xlane.f32.xlu1 %v777_v57 }
 0x24d   : > { %v1773_v56 = vadd.f32 %v726_v44, %v566_v27  ;;  %vm658_vm5 = vcmp.eq.f32.partialorder %v1719_v9, inf  ;;  %v661_v63 = vand.u32 2147483648, %v1719_v9  ;;  %v774_v1 = vsel %vm435_vm4, %v1780_v62, inf }
 0x24e   : > { %v569_v28 = vmul.f32 %v1704_v47, %v561_v32  ;;  %v729_v2 = vmul.f32 %v1326_v38, %v721_v52  ;;  %v659_v3 = vsel %vm658_vm5, %v1719_v9, %v657_v35  ;;  %vm660_vm6 = vcmp.eq.f32.partialorder %v1719_v9, 0.0  ;;  %775 = vmin.xlane.f32.xlu0 %v774_v1 }
 0x24f   : > { %v662_v0 = vsel %vm660_vm6, %v661_v63, %v659_v3  ;;  %v560_v5 = vsub.f32 0.07, %v502_v45 }
 0x250   : > { %v1789_v7 = vadd.f32 %v729_v2, %v569_v28  ;;  %v720_v4 = vsub.f32 0.07, %v662_v0 }
 0x251   : > { %v568_v12 = vmul.f32 %v1320_v6, %v560_v5 }
 0x252   : > { %v1328_v10 = vpop.eup %1327 }
 0x253   : > { %v728_v15 = vmul.f32 %v1328_v10, %v720_v4 }
 0x255   : > { %v1791_v17 = vadd.f32 %v728_v15, %v568_v12 }
 0x2bf   : > { %v761_v18 = vpop.xlane.xlu1 %760 }
 0x2c0   : > { %v781_v19 = vmax.f32 %v761_v18, 1e-12  ;;  %vm901_vm7 = vcmp.le.f32.partialorder %v1614_v39, %v761_v18  ;;  %v758_v47 = vpop.xlane.xlu0 %757 }
 0x2c1   : > { %v780_v20 = vmax.f32 %v758_v47, 1e-12  ;;  %vm900_vm8 = vcmp.le.f32.partialorder %v1635_v51, %v758_v47  ;;  %v909_v9 = vsel %vm901_vm7, 1e+30, %v1614_v39 }
 0x2c2   : > { %1329 = vrsqrt.f32 %v781_v19  ;;  %v845_v21 = vsub.f32 0.0, %v781_v19  ;;  %v919_v25 = vsel %vm435_vm4, %v909_v9, inf  ;;  %v908_v59 = vsel %vm900_vm8, 1e+30, %v1635_v51 }
 0x2c3   : > { %1331 = vrsqrt.f32 %v780_v20  ;;  %v844_v23 = vsub.f32 0.0, %v780_v20  ;;  %920 = vmin.xlane.f32.xlu1 %v919_v25  ;;  %v916_v27 = vsel %vm435_vm4, %v908_v59, inf  ;;  %vm797_vm11 = vcmp.eq.f32.partialorder %v781_v19, inf }
 0x2c4   : > { %v853_v8 = vmul.f32 1111.1111, %v845_v21  ;;  %v767_v26 = vpop.xlane.xlu1 %766  ;;  %917 = vmin.xlane.f32.xlu0 %v916_v27  ;;  %vm799_vm12 = vcmp.eq.f32.partialorder %v781_v19, 0.0  ;;  %v800_v46 = vand.u32 2147483648, %v781_v19  ;;  %vm790_vm13 = vcmp.eq.f32.partialorder %v780_v20, inf }
 0x2c5   : > { %v852_v29 = vmul.f32 1111.1111, %v844_v23  ;;  %v1799_v30 = vmax.f32 %v767_v26, 1e-12  ;;  %vm903_vm9 = vcmp.le.f32.partialorder %v1657_v11, %v767_v26  ;;  %vm792_vm14 = vcmp.eq.f32.partialorder %v780_v20, 0.0 }
 0x2c6   : > { %v862_v39 = vmul.f32 1.442695, %v853_v8  ;;  %v911_v31 = vsel %vm903_vm9, 1e+30, %v1657_v11  ;;  %v793_v52 = vand.u32 2147483648, %v780_v20 }
 0x2c7   : > { %v860_v53 = vmul.f32 1.442695, %v852_v29  ;;  %1333 = vrsqrt.f32 %v1799_v30  ;;  %v847_v51 = vsub.f32 0.0, %v1799_v30  ;;  %v925_v37 = vsel %vm435_vm4, %v911_v31, inf  ;;  %v764_v40 = vpop.xlane.xlu0 %763 }
 0x2c8   : > { %1335 = vpow2.f32 %v862_v39  ;;  %926 = vmin.xlane.f32.xlu1 %v925_v37  ;;  %v1806_v50 = vmax.f32 %v764_v40, 1e-12  ;;  %vm902_vm10 = vcmp.le.f32.partialorder %v1679_v24, %v764_v40  ;;  %vm811_vm0 = vcmp.eq.f32.partialorder %v1799_v30, inf }
 0x2c9   : > { %1337 = vpow2.f32 %v860_v53  ;;  %v855_v6 = vmul.f32 1111.1111, %v847_v51  ;;  %v910_v11 = vsel %vm902_vm10, 1e+30, %v1679_v24  ;;  %vm813_vm1 = vcmp.eq.f32.partialorder %v1799_v30, 0.0 }
 0x2ca   : > { %1339 = vrsqrt.f32 %v1806_v50  ;;  %v846_v32 = vsub.f32 0.0, %v1806_v50  ;;  %v773_v36 = vpop.xlane.xlu1 %772  ;;  %v922_v54 = vsel %vm435_vm4, %v910_v11, inf  ;;  %v814_v12 = vand.u32 2147483648, %v1799_v30 }
 0x2cb   : > { %v866_v44 = vmul.f32 1.442695, %v855_v6  ;;  %v1814_v38 = vmax.f32 %v773_v36, 1e-12  ;;  %923 = vmin.xlane.f32.xlu0 %v922_v54  ;;  %vm905_vm15 = vcmp.le.f32.partialorder %v1711_v60, %v773_v36  ;;  %vm804_vm3 = vcmp.eq.f32.partialorder %v1806_v50, inf }
 0x2cc   : > { %v1330_v34 = vpop.eup %1329  ;;  %v854_v57 = vmul.f32 1111.1111, %v846_v32  ;;  %v913_v15 = vsel %vm905_vm15, 1e+30, %v1711_v60  ;;  %vm806_vm5 = vcmp.eq.f32.partialorder %v1806_v50, 0.0 }
 0x2cd   : > { %v1332_v41 = vpop.eup %1331  ;;  %v796_v42 = vmul.f32 %v1330_v34, %v781_v19  ;;  %1341 = vpow2.f32 %v866_v44  ;;  %v849_v5 = vsub.f32 0.0, %v1814_v38  ;;  %v931_v9 = vsel %vm435_vm4, %v913_v15, inf }
 0x2ce   : > { %v789_v48 = vmul.f32 %v1332_v41, %v780_v20  ;;  %v864_v2 = vmul.f32 1.442695, %v854_v57  ;;  %1343 = vrsqrt.f32 %v1814_v38  ;;  %932 = vmin.xlane.f32.xlu1 %v931_v9  ;;  %vm825_vm6 = vcmp.eq.f32.partialorder %v1814_v38, inf }
 0x2cf   : > { %v798_v49 = vsel %vm797_vm11, %v781_v19, %v796_v42  ;;  %v857_v47 = vmul.f32 1111.1111, %v849_v5  ;;  %v828_v42 = vand.u32 2147483648, %v1814_v38  ;;  %vm827_vm7 = vcmp.eq.f32.partialorder %v1814_v38, 0.0 }
 0x2d0   : > { %v801_v35 = vsel %vm799_vm12, %v800_v46, %v798_v49  ;;  %v791_v24 = vsel %vm790_vm13, %v780_v20, %v789_v48  ;;  %1345 = vpow2.f32 %v864_v2  ;;  %v1883_v9 = vmax.f32 %v1740_v22, 1e-12 }
 0x2d1   : > { %v877_v45 = vsub.f32 0.07, %v801_v35  ;;  %v794_v63 = vsel %vm792_vm14, %v793_v52, %v791_v24  ;;  %v1334_v1 = vpop.eup %1333  ;;  %v870_v26 = vmul.f32 1.442695, %v857_v47 }
 0x2d2   : > { %v876_v28 = vsub.f32 0.07, %v794_v63  ;;  %v1336_v3 = vpop.eup %1335  ;;  %v810_v0 = vmul.f32 %v1334_v1, %v1799_v30  ;;  %v691_v22 = vsub.f32 0.0, %v1883_v9 }
 0x2d3   : > { %v1338_v4 = vpop.eup %1337  ;;  %v885_v10 = vmul.f32 %v1336_v3, %v877_v45 }
 0x2d4   : > { %v884_v18 = vmul.f32 %v1338_v4, %v876_v28  ;;  %v812_v19 = vsel %vm811_vm0, %v1799_v30, %v810_v0  ;;  %v770_v20 = vpop.xlane.xlu0 %769  ;;  %v1340_v59 = vpop.eup %1339  ;;  %v807_v30 = vand.u32 2147483648, %v1806_v50 }
 0x2d5   : > { %v1827_v21 = vadd.f32 %v885_v10, %v1722_v55  ;;  %v815_v23 = vsel %vm813_vm1, %v814_v12, %v812_v19  ;;  %v784_v25 = vmax.f32 %v770_v20, 1e-12  ;;  %vm904_vm2 = vcmp.le.f32.partialorder %v1732_v16, %v770_v20 }
 0x2d6   : > { %v1831_v8 = vadd.f32 %v884_v18, %v1728_v14  ;;  %v879_v60 = vsub.f32 0.07, %v815_v23  ;;  %v912_v27 = vsel %vm904_vm2, 1e+30, %v1732_v16  ;;  %v803_v29 = vmul.f32 %v1340_v59, %v1806_v50 }
 0x2d7   : > { %1347 = vrsqrt.f32 %v784_v25  ;;  %v1342_v55 = vpop.eup %1341  ;;  %v848_v39 = vsub.f32 0.0, %v784_v25  ;;  %v928_v31 = vsel %vm435_vm4, %v912_v27, inf  ;;  %vm818_vm9 = vcmp.eq.f32.partialorder %v784_v25, inf }
 0x2d8   : > { %1349 = vpow2.f32 %v870_v26  ;;  %v887_v53 = vmul.f32 %v1342_v55, %v879_v60  ;;  %v805_v14 = vsel %vm804_vm3, %v1806_v50, %v803_v29  ;;  %929 = vmin.xlane.f32.xlu0 %v928_v31  ;;  %v1344_v37 = vpop.eup %1343  ;;  %v821_v24 = vand.u32 2147483648, %v784_v25 }
 0x2d9   : > { %v808_v51 = vsel %vm806_vm5, %v807_v30, %v805_v14  ;;  %v856_v16 = vmul.f32 1111.1111, %v848_v39  ;;  %v824_v34 = vmul.f32 %v1344_v37, %v1814_v38  ;;  %v1846_v46 = vpop.xlane.xlu1 %778  ;;  %vm820_vm11 = vcmp.eq.f32.partialorder %v784_v25, 0.0 }
 0x2da   : > { %v1841_v40 = vadd.f32 %v887_v53, %v1760_v43  ;;  %v878_v6 = vsub.f32 0.07, %v808_v51  ;;  %v1346_v41 = vpop.eup %1345  ;;  %vm907_vm8 = vcmp.le.f32.partialorder %v1767_v13, %v1846_v46  ;;  %v1886_v23 = vmax.f32 %v1749_v33, 1e-12 }
 0x2db   : > { %v868_v11 = vmul.f32 1.442695, %v856_v16  ;;  %v826_v50 = vsel %vm825_vm6, %v1814_v38, %v824_v34  ;;  %v1850_v43 = vpop.xlane.xlu0 %775  ;;  %v915_v57 = vsel %vm907_vm8, 1e+30, %v1767_v13  ;;  %v1870_v13 = vmax.f32 %v1548_v58, 1e-12 }
 0x2dc   : > { %v886_v44 = vmul.f32 %v1346_v41, %v878_v6  ;;  %v829_v48 = vsel %vm827_vm7, %v828_v42, %v826_v50  ;;  %vm906_vm10 = vcmp.le.f32.partialorder %v1780_v62, %v1850_v43  ;;  %v690_v33 = vsub.f32 0.0, %v1886_v23 }
 0x2dd   : > { %1351 = vpow2.f32 %v868_v11  ;;  %v881_v49 = vsub.f32 0.07, %v829_v48  ;;  %v914_v38 = vsel %vm906_vm10, 1e+30, %v1780_v62  ;;  %v1873_v62 = vmax.f32 %v1555_v61, 1e-12 }
 0x2de   : > { %v1853_v32 = vadd.f32 %v886_v44, %v1773_v56  ;;  %v937_v56 = vsel %vm435_vm4, %v915_v57, inf  ;;  %v934_v28 = vsel %vm435_vm4, %v914_v38, inf  ;;  %vm519_vm4 = vcmp.eq.f32.partialorder %v1870_v13, inf }
 0x2df   : > { %938 = vmin.xlane.f32.xlu1 %v937_v56  ;;  %935 = vmin.xlane.f32.xlu0 %v934_v28  ;;  %1353 = vrsqrt.f32 %v1873_v62  ;;  %v530_v4 = vsub.f32 0.0, %v1873_v62  ;;  %vm512_vm12 = vcmp.eq.f32.partialorder %v1873_v62, inf  ;;  %vm514_vm13 = vcmp.eq.f32.partialorder %v1873_v62, 0.0 }
 0x2e0   : > { %1355 = vrsqrt.f32 %v1870_v13  ;;  %v515_v16 = vand.u32 2147483648, %v1873_v62  ;;  %v699_v11 = vmul.f32 1111.1111, %v691_v22  ;;  %v698_v41 = vmul.f32 1111.1111, %v690_v33 }
 0x2e1   : > { %v1348_v52 = vpop.eup %1347  ;;  %v538_v12 = vmul.f32 1111.1111, %v530_v4  ;;  %v1907_v44 = vmax.f32 %v1850_v43, 1e-12  ;;  %vm679_vm7 = vcmp.eq.f32.partialorder %v1883_v9, inf  ;;  %vm681_vm8 = vcmp.eq.f32.partialorder %v1883_v9, 0.0 }
 0x2e2   : > { %v1350_v36 = vpop.eup %1349  ;;  %v817_v54 = vmul.f32 %v1348_v52, %v784_v25 }
 0x2e3   : > { %v889_v35 = vmul.f32 %v1350_v36, %v881_v49  ;;  %v552_v58 = vmul.f32 1.442695, %v538_v12  ;;  %v850_v33 = vsub.f32 0.0, %v1907_v44 }
 0x2e4   : > { %v819_v45 = vsel %vm818_vm9, %v784_v25, %v817_v54  ;;  %vm672_vm9 = vcmp.eq.f32.partialorder %v1886_v23, inf }
 0x2e5   : > { %v1863_v63 = vadd.f32 %v889_v35, %v1789_v7  ;;  %v822_v1 = vsel %vm820_vm11, %v821_v24, %v819_v45  ;;  %v531_v7 = vsub.f32 0.0, %v1870_v13  ;;  %vm674_vm11 = vcmp.eq.f32.partialorder %v1886_v23, 0.0 }
 0x2e6   : > { %v880_v2 = vsub.f32 0.07, %v822_v1 }
 0x2e7   : > { %v1352_v3 = vpop.eup %1351  ;;  %v539_v10 = vmul.f32 1111.1111, %v531_v7 }
 0x2e8   : > { %v888_v0 = vmul.f32 %v1352_v3, %v880_v2 }
 0x2e9   : > { %v554_v19 = vmul.f32 1.442695, %v539_v10  ;;  %v1354_v20 = vpop.eup %1353 }
 0x2ea   : > { %v1867_v5 = vadd.f32 %v888_v0, %v1791_v17  ;;  %v511_v29 = vmul.f32 %v1354_v20, %v1873_v62  ;;  %v1356_v30 = vpop.eup %1355  ;;  %v1937_v20 = vmax.f32 %v1846_v46, 1e-12 }
 0x2eb   : > { %v518_v51 = vmul.f32 %v1356_v30, %v1870_v13 }
 0x2ec   : > { %v513_v34 = vsel %vm512_vm12, %v1873_v62, %v511_v29 }
 0x2ed   : > { %v1927_v12 = vsel %vm519_vm4, %v1870_v13, %v518_v51 }
 0x350   : > { %v921_v15 = vpop.xlane.xlu1 %920 }
 0x351   : > { %v941_v18 = vmax.f32 %v921_v15, 1e-12  ;;  %v918_v17 = vpop.xlane.xlu0 %917  ;;  %v1931_v15 = vsel %vm514_vm13, %v515_v16, %v513_v34  ;;  %v851_v34 = vsub.f32 0.0, %v1937_v20  ;;  %vm521_vm13 = vcmp.eq.f32.partialorder %v1870_v13, 0.0 }
 0x352   : > { %v1879_v47 = vmax.f32 %v918_v17, 1e-12 }
 0x353   : > { %1357 = vrsqrt.f32 %v941_v18  ;;  %v1005_v61 = vsub.f32 0.0, %v941_v18  ;;  %vm957_vm14 = vcmp.eq.f32.partialorder %v941_v18, inf  ;;  %v960_v48 = vand.u32 2147483648, %v941_v18 }
 0x354   : > { %1359 = vrsqrt.f32 %v1879_v47  ;;  %v1004_v25 = vsub.f32 0.0, %v1879_v47  ;;  %vm959_vm15 = vcmp.eq.f32.partialorder %v941_v18, 0.0  ;;  %vm950_vm0 = vcmp.eq.f32.partialorder %v1879_v47, inf }
 0x355   : > { %v927_v59 = vpop.xlane.xlu1 %926  ;;  %1361 = vpow2.f32 %v554_v19  ;;  %v1013_v60 = vmul.f32 1111.1111, %v1005_v61  ;;  %v953_v24 = vand.u32 2147483648, %v1879_v47  ;;  %vm952_vm1 = vcmp.eq.f32.partialorder %v1879_v47, 0.0 }
 0x356   : > { %v1889_v26 = vmax.f32 %v927_v59, 1e-12  ;;  %1363 = vpow2.f32 %v552_v58  ;;  %v1012_v27 = vmul.f32 1111.1111, %v1004_v25 }
 0x357   : > { %v1022_v55 = vmul.f32 1.442695, %v1013_v60 }
 0x358   : > { %1365 = vrsqrt.f32 %v1889_v26  ;;  %v1020_v39 = vmul.f32 1.442695, %v1012_v27  ;;  %v1007_v31 = vsub.f32 0.0, %v1889_v26  ;;  %v924_v14 = vpop.xlane.xlu0 %923  ;;  %vm971_vm2 = vcmp.eq.f32.partialorder %v1889_v26, inf }
 0x359   : > { %1367 = vpow2.f32 %v1022_v55  ;;  %v1902_v37 = vmax.f32 %v924_v14, 1e-12  ;;  %v712_v27 = vmul.f32 1.442695, %v698_v41  ;;  %v974_v55 = vand.u32 2147483648, %v1889_v26 }
 0x35a   : > { %1369 = vpow2.f32 %v1020_v39  ;;  %v1015_v53 = vmul.f32 1111.1111, %v1007_v31  ;;  %vm973_vm3 = vcmp.eq.f32.partialorder %v1889_v26, 0.0 }
 0x35b   : > { %1371 = vrsqrt.f32 %v1883_v9  ;;  %v1006_v36 = vsub.f32 0.0, %v1902_v37  ;;  %v933_v56 = vpop.xlane.xlu1 %932  ;;  %vm964_vm5 = vcmp.eq.f32.partialorder %v1902_v37, inf  ;;  %v967_v51 = vand.u32 2147483648, %v1902_v37 }
 0x35c   : > { %1373 = vrsqrt.f32 %v1886_v23  ;;  %v1026_v52 = vmul.f32 1.442695, %v1015_v53  ;;  %v1921_v3 = vmax.f32 %v933_v56, 1e-12  ;;  %vm966_vm6 = vcmp.eq.f32.partialorder %v1902_v37, 0.0 }
 0x35d   : > { %v1358_v6 = vpop.eup %1357  ;;  %1375 = vrsqrt.f32 %v1902_v37  ;;  %v1014_v45 = vmul.f32 1111.1111, %v1006_v36  ;;  %v682_v36 = vand.u32 2147483648, %v1883_v9 }
 0x35e   : > { %v1360_v42 = vpop.eup %1359  ;;  %v956_v50 = vmul.f32 %v1358_v6, %v941_v18  ;;  %1377 = vrsqrt.f32 %v1907_v44  ;;  %vm985_vm10 = vcmp.eq.f32.partialorder %v1921_v3, inf  ;;  %vm987_vm4 = vcmp.eq.f32.partialorder %v1921_v3, 0.0 }
 0x35f   : > { %v949_v49 = vmul.f32 %v1360_v42, %v1879_v47  ;;  %v1912_v54 = vpop.eup %1361  ;;  %1379 = vpow2.f32 %v1026_v52  ;;  %v1024_v4 = vmul.f32 1.442695, %v1014_v45 }
 0x360   : > { %v958_v35 = vsel %vm957_vm14, %v941_v18, %v956_v50  ;;  %v1916_v43 = vpop.eup %1363  ;;  %v714_v18 = vmul.f32 1.442695, %v699_v11  ;;  %1381 = vrsqrt.f32 %v1921_v3  ;;  %v858_v50 = vmul.f32 1111.1111, %v850_v33 }
 0x361   : > { %v961_v57 = vsel %vm959_vm15, %v960_v48, %v958_v35  ;;  %v951_v38 = vsel %vm950_vm0, %v1879_v47, %v949_v49  ;;  %1383 = vpow2.f32 %v1024_v4  ;;  %v1009_v47 = vsub.f32 0.0, %v1921_v3 }
 0x362   : > { %v1366_v1 = vpop.eup %1365  ;;  %v1037_v28 = vsub.f32 0.07, %v961_v57  ;;  %v954_v2 = vsel %vm952_vm1, %v953_v24, %v951_v38  ;;  %v675_v24 = vand.u32 2147483648, %v1886_v23  ;;  %vm832_vm15 = vcmp.eq.f32.partialorder %v1907_v44, inf }
 0x363   : > { %v1036_v0 = vsub.f32 0.07, %v954_v2  ;;  %v970_v7 = vmul.f32 %v1366_v1, %v1889_v26  ;;  %v1368_v10 = vpop.eup %1367  ;;  %v1017_v30 = vmul.f32 1111.1111, %v1009_v47  ;;  %v859_v1 = vmul.f32 1111.1111, %v851_v34 }
 0x364   : > { %v1370_v17 = vpop.eup %1369  ;;  %v1045_v19 = vmul.f32 %v1368_v10, %v1037_v28  ;;  %v872_v28 = vmul.f32 1.442695, %v858_v50  ;;  %vm839_vm0 = vcmp.eq.f32.partialorder %v1937_v20, inf  ;;  %vm834_vm1 = vcmp.eq.f32.partialorder %v1907_v44, 0.0 }
 0x365   : > { %v930_v58 = vpop.xlane.xlu0 %929  ;;  %v1372_v61 = vpop.eup %1371  ;;  %v1044_v25 = vmul.f32 %v1370_v17, %v1036_v0  ;;  %v972_v62 = vsel %vm971_vm2, %v1889_v26, %v970_v7  ;;  %v1030_v53 = vmul.f32 1.442695, %v1017_v30  ;;  %v988_v0 = vand.u32 2147483648, %v1921_v3 }
 0x366   : > { %v1940_v59 = vmax.f32 %v930_v58, 1e-12  ;;  %v1374_v60 = vpop.eup %1373  ;;  %v1053_v29 = vadd.f32 %v1045_v19, %v1827_v21  ;;  %v975_v46 = vsel %vm973_vm3, %v974_v55, %v972_v62  ;;  %v678_v16 = vmul.f32 %v1372_v61, %v1883_v9 }
 0x367   : > { %v1376_v22 = vpop.eup %1375  ;;  %v1052_v39 = vadd.f32 %v1044_v25, %v1831_v8  ;;  %v1039_v11 = vsub.f32 0.07, %v975_v46  ;;  %v671_v38 = vmul.f32 %v1374_v60, %v1886_v23  ;;  %v874_v55 = vmul.f32 1.442695, %v859_v1 }
 0x368   : > { %1385 = vrsqrt.f32 %v1940_v59  ;;  %v963_v31 = vmul.f32 %v1376_v22, %v1902_v37  ;;  %v1008_v14 = vsub.f32 0.0, %v1940_v59  ;;  %v1378_v6 = vpop.eup %1377  ;;  %v680_v35 = vsel %vm679_vm7, %v1883_v9, %v678_v16 }
 0x369   : > { %1387 = vrsqrt.f32 %v1937_v20  ;;  %v1060_v21 = vadd.f32 %v1053_v29, %v1052_v39  ;;  %v1380_v42 = vpop.eup %1379  ;;  %v831_v10 = vmul.f32 %v1378_v6, %v1907_v44  ;;  %vm978_vm12 = vcmp.eq.f32.partialorder %v1940_v59, inf }
 0x36a   : > { %v965_v8 = vsel %vm964_vm5, %v1902_v37, %v963_v31  ;;  %v1016_v26 = vmul.f32 1111.1111, %v1008_v14  ;;  %1389 = vpow2.f32 %v714_v18  ;;  %v1382_v52 = vpop.eup %1381  ;;  %v1047_v45 = vmul.f32 %v1380_v42, %v1039_v11 }
 0x36b   : > { %v968_v41 = vsel %vm966_vm6, %v967_v51, %v965_v8  ;;  %1391 = vpow2.f32 %v1030_v53  ;;  %v1384_v37 = vpop.eup %1383  ;;  %v984_v57 = vmul.f32 %v1382_v52, %v1921_v3  ;;  %vm980_vm14 = vcmp.eq.f32.partialorder %v1940_v59, 0.0 }
 0x36c   : > { %v1038_v48 = vsub.f32 0.07, %v968_v41  ;;  %v1028_v49 = vmul.f32 1.442695, %v1016_v26  ;;  %1393 = vpow2.f32 %v712_v27  ;;  %v939_v7 = vpop.xlane.xlu1 %938  ;;  %v936_v19 = vpop.xlane.xlu0 %935  ;;  %v1055_v62 = vadd.f32 %v1047_v45, %v1841_v40 }
 0x36d   : > { %v986_v2 = vsel %vm985_vm10, %v1921_v3, %v984_v57  ;;  %v1972_v17 = vmax.f32 %v939_v7, 1e-12  ;;  %v1976_v61 = vmax.f32 %v936_v19, 1e-12  ;;  %v683_v39 = vsel %vm681_vm8, %v682_v36, %v680_v35 }
 0x36e   : > { %1395 = vpow2.f32 %v1028_v49  ;;  %v1046_v56 = vmul.f32 %v1384_v37, %v1038_v48  ;;  %v989_v47 = vsel %vm987_vm4, %v988_v0, %v986_v2  ;;  %v833_v9 = vsel %vm832_vm15, %v1907_v44, %v831_v10 }
 0x36f   : > { %1397 = vrsqrt.f32 %v1972_v17  ;;  %v1011_v27 = vsub.f32 0.0, %v1972_v17  ;;  %v1041_v30 = vsub.f32 0.07, %v989_v47  ;;  %v835_v16 = vand.u32 2147483648, %v1907_v44 }
 0x370   : > { %v1054_v18 = vadd.f32 %v1046_v56, %v1853_v32  ;;  %v981_v32 = vand.u32 2147483648, %v1940_v59  ;;  %1399 = vrsqrt.f32 %v1976_v61  ;;  %v522_v11 = vand.u32 2147483648, %v1870_v13 }
 0x371   : > { %v1019_v53 = vmul.f32 1111.1111, %v1011_v27  ;;  %1401 = vpow2.f32 %v872_v28  ;;  %v836_v50 = vsel %vm834_vm1, %v835_v16, %v833_v9  ;;  %v562_v36 = vsub.f32 0.07, %v1931_v15 }
 0x372   : > { %v1386_v4 = vpop.eup %1385  ;;  %v1061_v60 = vadd.f32 %v1060_v21, %v1054_v18  ;;  %v1010_v21 = vsub.f32 0.0, %v1976_v61  ;;  %1403 = vpow2.f32 %v874_v55  ;;  %v523_v52 = vsel %vm521_vm13, %v522_v11, %v1927_v12 }
 0x373   : > { %v977_v58 = vmul.f32 %v1386_v4, %v1940_v59  ;;  %v1388_v25 = vpop.eup %1387  ;;  %v1034_v8 = vmul.f32 1.442695, %v1019_v53  ;;  %v723_v37 = vsub.f32 0.07, %v683_v39  ;;  %v842_v35 = vand.u32 2147483648, %v1937_v20 }
 0x374   : > { %v1986_v29 = vpop.eup %1389  ;;  %v1062_v22 = vadd.f32 %v1061_v60, %v1055_v62  ;;  %v838_v46 = vmul.f32 %v1388_v25, %v1937_v20  ;;  %v1018_v34 = vmul.f32 1111.1111, %v1010_v21  ;;  %vm841_vm2 = vcmp.eq.f32.partialorder %v1937_v20, 0.0 }
 0x375   : > { %v979_v3 = vsel %vm978_vm12, %v1940_v59, %v977_v58  ;;  %v1392_v40 = vpop.eup %1391  ;;  %v673_v59 = vsel %vm672_vm9, %v1886_v23, %v671_v38  ;;  %1405 = vpow2.f32 %v1034_v8  ;;  %v882_v45 = vsub.f32 0.07, %v836_v50 }
 0x376   : > { %v982_v33 = vsel %vm980_vm14, %v981_v32, %v979_v3  ;;  %v1394_v14 = vpop.eup %1393  ;;  %v1049_v26 = vmul.f32 %v1392_v40, %v1041_v30  ;;  %v676_v41 = vsel %vm674_vm11, %v675_v24, %v673_v59  ;;  %v840_v42 = vsel %vm839_vm0, %v1937_v20, %v838_v46 }
 0x377   : > { %v1040_v31 = vsub.f32 0.07, %v982_v33  ;;  %v1032_v49 = vmul.f32 1.442695, %v1018_v34  ;;  %v843_v38 = vsel %vm841_vm2, %v842_v35, %v840_v42  ;;  %vm999_vm3 = vcmp.eq.f32.partialorder %v1972_v17, inf }
 0x378   : > { %v1396_v51 = vpop.eup %1395  ;;  %v1057_v24 = vadd.f32 %v1049_v26, %v1863_v63  ;;  %v1002_v13 = vand.u32 2147483648, %v1972_v17  ;;  %vm1001_vm5 = vcmp.eq.f32.partialorder %v1972_v17, 0.0  ;;  %vm992_vm6 = vcmp.eq.f32.partialorder %v1976_v61, inf }
 0x379   : > { %v1048_v6 = vmul.f32 %v1396_v51, %v1040_v31  ;;  %v1398_v23 = vpop.eup %1397  ;;  %1407 = vpow2.f32 %v1032_v49  ;;  %v995_v63 = vand.u32 2147483648, %v1976_v61  ;;  %vm994_vm7 = vcmp.eq.f32.partialorder %v1976_v61, 0.0 }
 0x37a   : > { %v1400_v57 = vpop.eup %1399  ;;  %v998_v56 = vmul.f32 %v1398_v23, %v1972_v17  ;;  %v563_v0 = vsub.f32 0.07, %v523_v52  ;;  %v883_v4 = vsub.f32 0.07, %v843_v38  ;;  %v570_v19 = vmul.f32 %v1916_v43, %v562_v36 }
 0x37b   : > { %v1056_v48 = vadd.f32 %v1048_v6, %v1867_v5  ;;  %v722_v5 = vsub.f32 0.07, %v676_v41  ;;  %v991_v15 = vmul.f32 %v1400_v57, %v1976_v61  ;;  %v1402_v20 = vpop.eup %1401  ;;  %v731_v47 = vmul.f32 %v1986_v29, %v723_v37 }
 0x37c   : > { %v1000_v1 = vsel %vm999_vm3, %v1972_v17, %v998_v56  ;;  %v1404_v18 = vpop.eup %1403  ;;  %v890_v17 = vmul.f32 %v1402_v20, %v882_v45  ;;  %v571_v60 = vmul.f32 %v1912_v54, %v563_v0  ;;  %vm1073_vm8 = vcmask 0  }
 0x37d   : > { %v1063_v44 = vadd.f32 %v1062_v22, %v1056_v48  ;;  %v1003_v28 = vsel %vm1001_vm5, %v1002_v13, %v1000_v1  ;;  %v993_v2 = vsel %vm992_vm6, %v1976_v61, %v991_v15  ;;  %v730_v7 = vmul.f32 %v1394_v14, %v722_v5 }
 0x37e   : > { %v996_v10 = vsel %vm994_vm7, %v995_v63, %v993_v2  ;;  %v1043_v58 = vsub.f32 0.07, %v1003_v28  ;;  %v891_v3 = vmul.f32 %v1404_v18, %v883_v4  ;;  %v739_v61 = vadd.f32 %v731_v47, %v571_v60 }
 0x37f   : > { %v1064_v12 = vadd.f32 %v1063_v44, %v1057_v24  ;;  %v1042_v25 = vsub.f32 0.07, %v996_v10  ;;  %v1406_v62 = vpop.eup %1405  ;;  %v738_v32 = vadd.f32 %v730_v7, %v570_v19 }
 0x380   : > { %v1051_v55 = vmul.f32 %v1406_v62, %v1043_v58  ;;  %v899_v33 = vadd.f32 %v891_v3, %v739_v61 }
 0x381   : > { %v898_v30 = vadd.f32 %v890_v17, %v738_v32 }
 0x382   : > { %v1059_v39 = vadd.f32 %v1051_v55, %v899_v33 }
 0x383   : > { %v1408_v27 = vpop.eup %1407 }
 0x384   : > { %v1050_v22 = vmul.f32 %v1408_v27, %v1042_v25 }
 0x386   : > { %v1058_v40 = vadd.f32 %v1050_v22, %v898_v30 }
 0x388   : > { %v1065_v43 = vadd.f32 %v1064_v12, %v1058_v40 }
 0x38a   : > { %v1066_v46 = vadd.f32 %v1065_v43, %v1059_v39 }
 0x38c   : > { %v1067_v29 = vrot.slane %v1066_v46, 4 }
 0x38e   : > { %v1068_v31 = vadd.f32 %v1067_v29, %v1066_v46 }
 0x390   : > { %v1069_v53 = vrot.slane %v1068_v31, 2 }
 0x392   : > { %v1070_v14 = vadd.f32 %v1069_v53, %v1068_v31 }
 0x394   : > { %v1071_v59 = vrot.slane %v1070_v14, 1 }
 0x396   : > { %v1072_v54 = vadd.f32 %v1071_v59, %v1070_v14 }
 0x398   : > { %1074 = vst.msk [vmem:[%s112_s14] sm:$0x1] %vm1073_vm8, %v1072_v54 }
 0x399 PF: > { %s11_s6 = sadd.s32 1, %s1415_s6  }
 0x39a   : > { %p8_p4 = scmp.ge.s32.totalorder %s11_s6, 4  }
 0x39c   :  { %10 = sbr.rel (!%p8_p4) target bundleno = 1 (0x1), region = 54 }

// kernel: upsample_loss_forward.2
= control target key start
LH: loop header
LB: loop body
LE: loop exit
PB: predicated region body
PF: predicated region fallthrough
CT: control target
= control target key end

     0   :  { %s3569_s9 = smov 0   ;;  %s6686_s0 = inlined_call_operand.vmem [shape: f32[2,64,8], index: 0, kind: input, shape index: {}]   ;;  %s6687_s1 = inlined_call_operand.vmem [shape: f32[2,8,64], index: 1, kind: input, shape index: {}]   ;;  %s6688_s2 = inlined_call_operand.vmem [shape: f32[2,1,1], index: 2, kind: output, shape index: {}]  }
   0x1 LB: > { %s3436_s10 = sadd.s32 4294967295, %s3538_s9   ;;  %p3440_p0 = scmp.ge.s32.totalorder %s3538_s9, 1  ;;  %s3538_s9 = sphi %s3569_s9, %s12_s9  }
   0x2   : > { %p121_p1 = scmp.lt.s32.totalorder %s3538_s9, 3 }
   0x4   : > { %p122_p2 = pnand %p3440_p0, %p121_p1 }
   0x6   : > { %125 = sbr.rel (%p122_p2) target bundleno = 4055 (0xfd7), region = 28 }
   0xd   : > { %p145_p3 = scmp.lt.s32.totalorder %s3436_s10, 1  ;;  %vm174_vm0 = vcmask 64512   ;;  %vm200_vm1 = vcmask 523264   ;;  %s3710_s27 = smov 0  }
   0xf   : > { %s6862_s10 = smov (!%p145_p3, %s3436_s10), 1 }
  0x10   : > { %s3454_s11 = sshll.u32 %s6862_s10, 6  ;;  %s3443_s12 = sshll.u32 %s6862_s10, 3 }
  0x11   : > { %s149_s15 = scalar_lea.vmem %s6686_s0, %s3454_s11  ;;  %s153_s18 = scalar_lea.vmem %s6687_s1, %s3443_s12 }
  0x12   : > { %s156_s21 = scalar_lea.vmem %s6688_s2, %s6862_s10  ;;  %v165_v0 = vld [vmem:[%s153_s18] sm:$0xff]  ;;  %v158_v4 = vld [vmem:[%s149_s15 + $0x8] sm:$0xff]  ;;  %v159_v6 = vld [vmem:[%s149_s15 + $0x10] sm:$0xff] }
  0x13   : > { %v157_v1 = vld [vmem:[%s149_s15] sm:$0xff]  ;;  %3464 = vmatprep.subr.mxu0 %v165_v0  ;;  %3478 = vmatprep.subr.mxu1 %v165_v0  ;;  %v162_v5 = vld [vmem:[%s149_s15 + $0x28] sm:$0xff]  ;;  %v163_v7 = vld [vmem:[%s149_s15 + $0x30] sm:$0xff]  ;;  %v168_v9 = vmul.f32 %v159_v6, %v159_v6  ;;  %v167_v12 = vmul.f32 %v158_v4, %v158_v4  ;;  %v199_v25 = vmul.f32 %v165_v0, %v165_v0 }
  0x14   : > { %v161_v2 = vld [vmem:[%s149_s15 + $0x20] sm:$0xff]  ;;  %v166_v3 = vmul.f32 %v157_v1, %v157_v1  ;;  %3465 = vmatpush3.msra.mxu0 %v165_v0  ;;  %3479 = vmatpush3.msra.mxu1 %v165_v0  ;;  %v160_v8 = vld [vmem:[%s149_s15 + $0x18] sm:$0xff]  ;;  %v171_v18 = vmul.f32 %v162_v5, %v162_v5  ;;  %v172_v22 = vmul.f32 %v163_v7, %v163_v7 }
  0x15   : > { %3466 = vmatprep.mubr.msk.f32.mxu0 %vm174_vm0, %v157_v1  ;;  %3472 = vmatprep.mubr.msk.f32.mxu1 %vm174_vm0, %v161_v2  ;;  %v169_v11 = vmul.f32 %v160_v8, %v160_v8  ;;  %v181_v13 = vsel %vm174_vm0, %v168_v9, 0.0  ;;  %v164_v14 = vld [vmem:[%s149_s15 + $0x38] sm:$0xff]  ;;  %v170_v15 = vmul.f32 %v161_v2, %v161_v2  ;;  %v178_v17 = vsel %vm174_vm0, %v167_v12, 0.0 }
  0x16   : > { %v175_v10 = vsel %vm174_vm0, %v166_v3, 0.0  ;;  %3467 = vmatmul.mubr.msk.f32.vlgmr.msra.gmra.mrb[0].mxu0 %vm174_vm0, %v158_v4  ;;  %3473 = vmatmul.mubr.msk.f32.vlgmr.msra.gmra.mrb[0].mxu1 %vm174_vm0, %v162_v5  ;;  %v190_v19 = vsel %vm174_vm0, %v171_v18, 0.0  ;;  %v173_v21 = vmul.f32 %v164_v14, %v164_v14  ;;  %v193_v24 = vsel %vm174_vm0, %v172_v22, 0.0 }
  0x17   : > { %3469 = vmatprep.mubr.msk.f32.mxu0 %vm174_vm0, %v159_v6  ;;  %3475 = vmatprep.mubr.msk.f32.mxu1 %vm174_vm0, %v163_v7  ;;  %v184_v16 = vsel %vm174_vm0, %v169_v11, 0.0  ;;  %v187_v20 = vsel %vm174_vm0, %v170_v15, 0.0  ;;  %v201_v26 = vsel %vm200_vm1, %v199_v25, 0.0 }
  0x18   : > { %182 = vadd.xlane.f32.xlu1 %v181_v13  ;;  %176 = vadd.xlane.f32.xlu0 %v175_v10  ;;  %v196_v23 = vsel %vm174_vm0, %v173_v21, 0.0  ;;  %v202_v27 = vrot.slane %v201_v26, 4 }
  0x1a   : > { %3470 = vmatmul.mubr.msk.f32.gmra.mrb[2].mxu0 %vm174_vm0, %v160_v8  ;;  %3476 = vmatmul.mubr.msk.f32.gmra.mrb[2].mxu1 %vm174_vm0, %v164_v14  ;;  %v203_v28 = vadd.f32 %v202_v27, %v201_v26 }
  0x1c   : > { %185 = vadd.xlane.f32.xlu1 %v184_v16  ;;  %179 = vadd.xlane.f32.xlu0 %v178_v17  ;;  %v204_v31 = vrot.slane %v203_v28, 2 }
  0x1e   : > { %v205_v34 = vadd.f32 %v204_v31, %v203_v28 }
  0x20   : > { %191 = vadd.xlane.f32.xlu1 %v190_v19  ;;  %188 = vadd.xlane.f32.xlu0 %v187_v20  ;;  %v206_v35 = vrot.slane %v205_v34, 1 }
  0x22   : > { %v207_v38 = vadd.f32 %v206_v35, %v205_v34 }
  0x24   : > { %197 = vadd.xlane.f32.xlu1 %v196_v23  ;;  %194 = vadd.xlane.f32.xlu0 %v193_v24 }
  0xa5   : > { %v183_v29 = vpop.xlane.xlu1 %182  ;;  %v177_v30 = vpop.xlane.xlu0 %176 }
  0xa6   : > { %v208_v50 = vadd.f32 %v207_v38, %v177_v30  ;;  %v210_v53 = vadd.f32 %v207_v38, %v183_v29 }
  0xa9   : > { %v186_v32 = vpop.xlane.xlu1 %185  ;;  %v180_v33 = vpop.xlane.xlu0 %179 }
  0xaa   : > { %v209_v45 = vadd.f32 %v207_v38, %v180_v33  ;;  %v211_v54 = vadd.f32 %v207_v38, %v186_v32 }
  0xad   : > { %v192_v36 = vpop.xlane.xlu1 %191  ;;  %v189_v37 = vpop.xlane.xlu0 %188 }
  0xae   : > { %v213_v39 = vadd.f32 %v207_v38, %v192_v36  ;;  %v212_v44 = vadd.f32 %v207_v38, %v189_v37 }
  0xb1   : > { %v198_v40 = vpop.xlane.xlu1 %197  ;;  %v195_v41 = vpop.xlane.xlu0 %194 }
  0xb2   : > { %v215_v60 = vadd.f32 %v207_v38, %v198_v40  ;;  %v214_v62 = vadd.f32 %v207_v38, %v195_v41 }
  0xe9   : > { %v3474_v42 = vpop.f32.mrb[0].mxu1  ;;  %v3468_v43 = vpop.f32.mrb[0].mxu0 }
  0xea   : > { %v350_v46 = vmul.f32 2.0, %v3474_v42  ;;  %v346_v47 = vmul.f32 2.0, %v3468_v43  ;;  %v306_v48 = vpop.f32.mrb[1].mxu0  ;;  %v326_v49 = vpop.f32.mrb[1].mxu1 }
  0xeb   : > { %v345_v51 = vmul.f32 2.0, %v306_v48  ;;  %v349_v52 = vmul.f32 2.0, %v326_v49 }
  0xec   : > { %v358_v55 = vsub.f32 %v213_v39, %v350_v46  ;;  %v354_v56 = vsub.f32 %v209_v45, %v346_v47  ;;  %v369_v47 = vlaneseq }
  0xed   : > { %v353_v57 = vsub.f32 %v208_v50, %v345_v51  ;;  %v357_v58 = vsub.f32 %v212_v44, %v349_v52  ;;  %v3477_v59 = vpop.f32.mrb[2].mxu1  ;;  %v3471_v61 = vpop.f32.mrb[2].mxu0 }
  0xee   : > { %v3608_v63 = vmax.f32 %v358_v55, 0.0  ;;  %v3610_v0 = vmax.f32 %v354_v56, 0.0  ;;  %v352_v1 = vmul.f32 2.0, %v3477_v59  ;;  %v348_v2 = vmul.f32 2.0, %v3471_v61  ;;  %v316_v3 = vpop.f32.mrb[3].mxu0  ;;  %v336_v4 = vpop.f32.mrb[3].mxu1 }
  0xef   : > { %v3612_v5 = vmax.f32 %v353_v57, 0.0  ;;  %v3614_v6 = vmax.f32 %v357_v58, 0.0  ;;  %v347_v7 = vmul.f32 2.0, %v316_v3  ;;  %v351_v8 = vmul.f32 2.0, %v336_v4 }
  0xf0   : > { %v384_v9 = vsel %vm200_vm1, %v3608_v63, -inf  ;;  %v3620_v10 = vsel %vm200_vm1, %v3608_v63, inf  ;;  %v379_v11 = vsel %vm200_vm1, %v3610_v0, -inf  ;;  %v3626_v12 = vsel %vm200_vm1, %v3610_v0, inf }
  0xf1   : > { %6745 = vst [vmem:[#allocation2_spill] sm:$0xff] %v3620_v10  ;;  %6746 = vst [vmem:[#allocation3_spill] sm:$0xff] %v3626_v12  ;;  %v378_v13 = vsel %vm200_vm1, %v3612_v5, -inf  ;;  %v3632_v14 = vsel %vm200_vm1, %v3612_v5, inf  ;;  %v382_v15 = vsel %vm200_vm1, %v3614_v6, -inf  ;;  %v3638_v16 = vsel %vm200_vm1, %v3614_v6, inf }
  0xf2   : > { %6747 = vst [vmem:[#allocation4_spill] sm:$0xff] %v3632_v14  ;;  %6748 = vst [vmem:[#allocation5_spill] sm:$0xff] %v3638_v16  ;;  %v360_v17 = vsub.f32 %v215_v60, %v352_v1  ;;  %v356_v18 = vsub.f32 %v211_v54, %v348_v2  ;;  %v355_v19 = vsub.f32 %v210_v53, %v347_v7  ;;  %v3680_v48 = vshrl.u32 %v369_v47, 7 }
  0xf3   : > { %v359_v20 = vsub.f32 %v214_v62, %v351_v8  ;;  %v407_v21 = vmin.f32 %v3632_v14, %v3638_v16  ;;  %v409_v22 = vmin.f32 %v3626_v12, %v3620_v10  ;;  %v383_v23 = vmax.f32 %v378_v13, %v382_v15 }
  0xf4   : > { %v385_v24 = vmax.f32 %v379_v11, %v384_v9  ;;  %v3644_v25 = vmax.f32 %v360_v17, 0.0  ;;  %v3646_v26 = vmax.f32 %v356_v18, 0.0  ;;  %v3648_v27 = vmax.f32 %v355_v19, 0.0 }
  0xf5   : > { %v3650_v28 = vmax.f32 %v359_v20, 0.0  ;;  %v414_v29 = vmin.f32 %v407_v21, %v409_v22  ;;  %v3683_v49 = vadd.s32 8, %v3680_v48  ;;  %v3686_v50 = vadd.s32 16, %v3680_v48 }
  0xf6   : > { %v390_v30 = vmax.f32 %v383_v23, %v385_v24  ;;  %v388_v31 = vsel %vm200_vm1, %v3644_v25, -inf  ;;  %v3656_v32 = vsel %vm200_vm1, %v3644_v25, inf  ;;  %v381_v33 = vsel %vm200_vm1, %v3646_v26, -inf }
  0xf7   : > { %6749 = vst [vmem:[#allocation6_spill] sm:$0xff] %v3656_v32  ;;  %v3662_v34 = vsel %vm200_vm1, %v3646_v26, inf  ;;  %v380_v35 = vsel %vm200_vm1, %v3648_v27, -inf  ;;  %v3668_v36 = vsel %vm200_vm1, %v3648_v27, inf  ;;  %v386_v37 = vsel %vm200_vm1, %v3650_v28, -inf }
  0xf8   : > { %6750 = vst [vmem:[#allocation7_spill] sm:$0xff] %v3662_v34  ;;  %6751 = vst [vmem:[#allocation8_spill] sm:$0xff] %v3668_v36  ;;  %v3674_v38 = vsel %vm200_vm1, %v3650_v28, inf  ;;  %v413_v40 = vmin.f32 %v3662_v34, %v3656_v32  ;;  %v387_v41 = vmax.f32 %v380_v35, %v386_v37  ;;  %v389_v42 = vmax.f32 %v381_v33, %v388_v31 }
  0xf9   : > { %6752 = vst [vmem:[#allocation9_spill] sm:$0xff] %v3674_v38  ;;  %v411_v39 = vmin.f32 %v3668_v36, %v3674_v38  ;;  %v3689_v51 = vadd.s32 24, %v3680_v48  ;;  %v3692_v52 = vadd.s32 32, %v3680_v48  ;;  %v3695_v53 = vadd.s32 40, %v3680_v48 }
  0xfa   : > { %v391_v44 = vmax.f32 %v387_v41, %v389_v42  ;;  %v3698_v54 = vadd.s32 48, %v3680_v48  ;;  %v3701_v55 = vadd.s32 56, %v3680_v48  ;;  %v3706_v11 = vmov 4294967295  }
  0xfb   : > { %v415_v43 = vmin.f32 %v411_v39, %v413_v40  ;;  %6753 = vst [vmem:[#allocation10_spill] sm:$0xff] %v3692_v52  ;;  %6754 = vst [vmem:[#allocation11_spill] sm:$0xff] %v3695_v53  ;;  %v3708_v13 = vmov 0.0  }
  0xfc   : > { %v392_v46 = vmax.f32 %v390_v30, %v391_v44  ;;  %6755 = vst [vmem:[#allocation12_spill] sm:$0xff] %v3698_v54  ;;  %6756 = vst [vmem:[#allocation13_spill] sm:$0xff] %v3701_v55 }
  0xfd   : > { %v416_v45 = vmin.f32 %v414_v29, %v415_v43 }
  0xfe   : > { %393 = vmax.xlane.f32.xlu0 %v392_v46 }
  0xff   : > { %417 = vmin.xlane.f32.xlu1 %v416_v45 }
 0x18b   : > { %v394_v57 = vpop.xlane.xlu0 %393 }
 0x18c   : > { %v418_v56 = vpop.xlane.xlu1 %417  ;;  %v395_v59 = vrot.slane %v394_v57, 4 }
 0x18d   : > { %v419_v58 = vrot.slane %v418_v56, 4 }
 0x18e   : > { %v396_v61 = vmax.f32 %v394_v57, %v395_v59 }
 0x18f   : > { %v420_v60 = vmin.f32 %v418_v56, %v419_v58 }
 0x190   : > { %v397_v1 = vrot.slane %v396_v61, 2 }
 0x191   : > { %v421_v62 = vrot.slane %v420_v60, 2 }
 0x192   : > { %v398_v3 = vmax.f32 %v396_v61, %v397_v1 }
 0x193   : > { %v422_v2 = vmin.f32 %v420_v60, %v421_v62 }
 0x194   : > { %v399_v4 = vrot.slane %v398_v3, 1 }
 0x195   : > { %v423_v7 = vrot.slane %v422_v2, 1 }
 0x196   : > { %v400_v8 = vmax.f32 %v398_v3, %v399_v4 }
 0x197   : > { %v424_v9 = vmin.f32 %v422_v2, %v423_v7 }
 0x198   : > { %3480 = vpush %v400_v8 }
 0x199   : > { %3482 = vpush %v424_v9 }
 0x1c9   : > { %s3481_s22 = spop %3480 }
 0x1ca   : > { %s3483_s23 = spop %3482 }
 0x1cb   : > { %s426_s24 = ssub.f32 %s3481_s22, %s3483_s23 }
 0x1cd   : > { %s3703_s25 = sadd.f32 1e-09, %s426_s24 }
 0x1cf   : > { %s430_s26 = smul.f32 0.001953125, %s3703_s25 }
 0x1d0 LB: >> { %v6757_v52 = vld [vmem:[#allocation10_spill] sm:$0xff]  ;;  %v6758_v53 = vld [vmem:[#allocation11_spill] sm:$0xff]  ;;  %v6759_v54 = vld [vmem:[#allocation12_spill] sm:$0xff]  ;;  %6760 = vst [vmem:[#allocation14_spill] sm:$0xff] %v3542_v11  ;;  %vm444_vm2 = vcmp.eq.s32.totalorder %v3542_v11, %v3686_v50  ;;  %vm442_vm3 = vcmp.eq.s32.totalorder %v3542_v11, %v3680_v48  ;;  %vm445_vm4 = vcmp.eq.s32.totalorder %v3542_v11, %v3689_v51  ;;  %vm443_vm5 = vcmp.eq.s32.totalorder %v3542_v11, %v3683_v49  ;;  %s3131_s27 = sadd.s32 8, %s3550_s27   ;;  %s3550_s27 = sphi %s3710_s27, %s3131_s27   ;;  %v3546_v13 = vphi %v3708_v13, %v3129_v13   ;;  %v3542_v11 = vphi %v3706_v11, %v6848_v11  }
 0x1d1   : >> { %6761 = vst [vmem:[#allocation15_spill] sm:$0xff] %v3546_v13  ;;  %v6689_v15 = vmov 0   ;;  %vm447_vm6 = vcmp.eq.s32.totalorder %v3542_v11, %v6758_v53  ;;  %vm446_vm7 = vcmp.eq.s32.totalorder %v3542_v11, %v6757_v52  ;;  %v6762_v55 = vld [vmem:[#allocation13_spill] sm:$0xff]  ;;  %vm448_vm9 = vcmp.eq.s32.totalorder %v3542_v11, %v6759_v54  ;;  %p436_p4 = scmp.lt.s32.totalorder %s3131_s27, 5000 }
 0x1d2   : >> { %v452_v17 = vsel %vm444_vm2, 1, %v6689_v15  ;;  %v450_v18 = vsel %vm442_vm3, 1, %v6689_v15  ;;  %v453_v19 = vsel %vm445_vm4, 1, %v6689_v15  ;;  %v451_v20 = vsel %vm443_vm5, 1, %v6689_v15 }
 0x1d3   : >> { %v3734_v21 = vsel %vm200_vm1, %v452_v17, 2147483648  ;;  %v3737_v22 = vsel %vm200_vm1, %v450_v18, 2147483648  ;;  %v3740_v23 = vsel %vm200_vm1, %v453_v19, 2147483648  ;;  %v3743_v24 = vsel %vm200_vm1, %v451_v20, 2147483648 }
 0x1d4   : >> { %v490_v29 = vshra.s32 %v3734_v21, 16  ;;  %v460_v30 = vshra.s32 %v3737_v22, 16  ;;  %v505_v31 = vshra.s32 %v3740_v23, 16  ;;  %v475_v33 = vshra.s32 %v3743_v24, 16 }
 0x1d5   : >> { %vm449_vm8 = vcmp.eq.s32.totalorder %v3542_v11, %v6762_v55  ;;  %v455_v39 = vsel %vm447_vm6, 1, %v6689_v15  ;;  %v454_v40 = vsel %vm446_vm7, 1, %v6689_v15  ;;  %v456_v42 = vsel %vm448_vm9, 1, %v6689_v15 }
 0x1d6   : >> { %v3757_v35 = vcvt.s32.f32 %v490_v29  ;;  %v3759_v37 = vcvt.s32.f32 %v460_v30  ;;  %v457_v41 = vsel %vm449_vm8, 1, %v6689_v15  ;;  %v3767_v43 = vcvt.s32.f32 %v505_v31 }
 0x1d7   : >> { %v3769_v44 = vcvt.s32.f32 %v475_v33  ;;  %v3772_v45 = vsel %vm200_vm1, %v455_v39, 2147483648  ;;  %v3775_v46 = vsel %vm200_vm1, %v454_v40, 2147483648  ;;  %v3780_v57 = vsel %vm200_vm1, %v457_v41, 2147483648 }
 0x1d8   : >> { %493 = vmax.xlane.f32.xlu1 %v3757_v35  ;;  %463 = vmax.xlane.f32.xlu0 %v3759_v37  ;;  %v535_v47 = vshra.s32 %v3772_v45, 16  ;;  %v520_v56 = vshra.s32 %v3775_v46, 16  ;;  %v3783_v58 = vsel %vm200_vm1, %v456_v42, 2147483648  ;;  %v565_v61 = vshra.s32 %v3780_v57, 16 }
 0x1d9   : >> { %v550_v62 = vshra.s32 %v3783_v58, 16  ;;  %v3801_v3 = vsub.f32 %v3546_v13, %v3610_v0  ;;  %v3805_v4 = vsub.f32 %v3546_v13, %v3612_v5  ;;  %v3815_v9 = vsub.f32 %v3546_v13, %v3646_v26 }
 0x1da   : >> { %v3787_v59 = vcvt.s32.f32 %v535_v47  ;;  %v3789_v60 = vcvt.s32.f32 %v520_v56  ;;  %v3795_v1 = vcvt.s32.f32 %v565_v61  ;;  %v3819_v17 = vsub.f32 %v3546_v13, %v3648_v27 }
 0x1db   : >> { %v3797_v2 = vcvt.s32.f32 %v550_v62  ;;  %v597_v7 = vsel %vm200_vm1, %v3801_v3, -inf  ;;  %v594_v8 = vsel %vm200_vm1, %v3805_v4, -inf  ;;  %v603_v18 = vsel %vm200_vm1, %v3815_v9, -inf }
 0x1dc   : >> { %508 = vmax.xlane.f32.xlu1 %v3767_v43  ;;  %478 = vmax.xlane.f32.xlu0 %v3769_v44  ;;  %v600_v19 = vsel %vm200_vm1, %v3819_v17, -inf  ;;  %v3827_v20 = vsub.f32 %v3546_v13, %v3608_v63  ;;  %v3831_v29 = vsub.f32 %v3546_v13, %v3614_v6  ;;  %v3839_v33 = vsub.f32 %v3546_v13, %v3644_v25 }
 0x1dd   : >> { %v3843_v39 = vsub.f32 %v3546_v13, %v3650_v28  ;;  %v459_v16 = vand.u32 65535, %v3737_v22 }
 0x1de   : >> { %v609_v30 = vsel %vm200_vm1, %v3827_v20, -inf  ;;  %v606_v31 = vsel %vm200_vm1, %v3831_v29, -inf  ;;  %v615_v40 = vsel %vm200_vm1, %v3839_v33, -inf }
 0x1df   : >> { %v612_v41 = vsel %vm200_vm1, %v3843_v39, -inf  ;;  %v461_v14 = vcvt.s32.f32 %v459_v16  ;;  %v564_v16 = vand.u32 65535, %v3780_v57 }
 0x1e0   : >> { %538 = vmax.xlane.f32.xlu1 %v3787_v59  ;;  %523 = vmax.xlane.f32.xlu0 %v3789_v60 }
 0x1e4   : >> { %568 = vmax.xlane.f32.xlu1 %v3795_v1  ;;  %553 = vmax.xlane.f32.xlu0 %v3797_v2 }
 0x1e8   : >> { %598 = vmax.xlane.f32.xlu1 %v597_v7  ;;  %595 = vmax.xlane.f32.xlu0 %v594_v8 }
 0x1ec   : >> { %604 = vmax.xlane.f32.xlu1 %v603_v18  ;;  %601 = vmax.xlane.f32.xlu0 %v600_v19 }
 0x1f0   : >> { %610 = vmax.xlane.f32.xlu1 %v609_v30  ;;  %607 = vmax.xlane.f32.xlu0 %v606_v31 }
 0x1f4   : >> { %616 = vmax.xlane.f32.xlu1 %v615_v40  ;;  %613 = vmax.xlane.f32.xlu0 %v612_v41 }
 0x265   : >> { %v3849_v42 = vpop.xlane.xlu1 %493  ;;  %v3851_v47 = vpop.xlane.xlu0 %463 }
 0x266   : >> { %vm465_vm2 = vcmp.eq.f32.partialorder %v3759_v37, %v3851_v47  ;;  %vm495_vm4 = vcmp.eq.f32.partialorder %v3757_v35, %v3849_v42  ;;  %v549_v37 = vand.u32 65535, %v3783_v58  ;;  %v566_v35 = vcvt.s32.f32 %v564_v16 }
 0x269   : >> { %v3853_v56 = vpop.xlane.xlu1 %508  ;;  %v3855_v61 = vpop.xlane.xlu0 %478 }
 0x26a   : >> { %vm480_vm0 = vcmp.eq.f32.partialorder %v3769_v44, %v3855_v61  ;;  %vm510_vm3 = vcmp.eq.f32.partialorder %v3767_v43, %v3853_v56 }
 0x26d   : >> { %v3857_v62 = vpop.xlane.xlu1 %538  ;;  %v3859_v7 = vpop.xlane.xlu0 %523 }
 0x26e   : >> { %vm540_vm5 = vcmp.eq.f32.partialorder %v3787_v59, %v3857_v62  ;;  %vm525_vm6 = vcmp.eq.f32.partialorder %v3789_v60, %v3859_v7 }
 0x271   : >> { %v3861_v8 = vpop.xlane.xlu1 %568  ;;  %v3863_v18 = vpop.xlane.xlu0 %553 }
 0x272   : >> { %vm570_vm9 = vcmp.eq.f32.partialorder %v3795_v1, %v3861_v8 }
 0x273   : >> { %v571_v58 = vsel %vm570_vm9, %v566_v35, -inf }
 0x275   : >> { %v3865_v19 = vpop.xlane.xlu1 %598  ;;  %v3867_v30 = vpop.xlane.xlu0 %595 }
 0x276   : >> { %vm619_vm10 = vcmp.ge.f32.partialorder %v3801_v3, %v3865_v19  ;;  %vm618_vm11 = vcmp.ge.f32.partialorder %v3805_v4, %v3867_v30 }
 0x277   : >> { %v627_v31 = vsel %vm619_vm10, -1e+30, %v3801_v3  ;;  %v626_v40 = vsel %vm618_vm11, -1e+30, %v3805_v4 }
 0x278   : >> { %v637_v41 = vsel %vm200_vm1, %v627_v31, -inf  ;;  %v634_v15 = vsel %vm200_vm1, %v626_v40, -inf }
 0x279   : >> { %638 = vmax.xlane.f32.xlu1 %v637_v41  ;;  %v3883_v32 = vpop.xlane.xlu1 %604  ;;  %635 = vmax.xlane.f32.xlu0 %v634_v15  ;;  %v3885_v38 = vpop.xlane.xlu0 %601  ;;  %v474_v41 = vand.u32 65535, %v3743_v24  ;;  %v504_v24 = vand.u32 65535, %v3740_v23  ;;  %v466_v23 = vsel %vm465_vm2, %v461_v14, -inf }
 0x27a   : >> { %vm621_vm12 = vcmp.ge.f32.partialorder %v3815_v9, %v3883_v32  ;;  %vm620_vm13 = vcmp.ge.f32.partialorder %v3819_v17, %v3885_v38 }
 0x27b   : >> { %v629_v10 = vsel %vm621_vm12, -1e+30, %v3815_v9  ;;  %v628_v31 = vsel %vm620_vm13, -1e+30, %v3819_v17  ;;  %v476_v12 = vcvt.s32.f32 %v474_v41  ;;  %v506_v11 = vcvt.s32.f32 %v504_v24 }
 0x27c   : >> { %v643_v15 = vsel %vm200_vm1, %v629_v10, -inf  ;;  %v640_v40 = vsel %vm200_vm1, %v628_v31, -inf  ;;  %v489_v31 = vand.u32 65535, %v3734_v21  ;;  %v534_v21 = vand.u32 65535, %v3772_v45 }
 0x27d   : >> { %644 = vmax.xlane.f32.xlu1 %v643_v15  ;;  %v3903_v34 = vpop.xlane.xlu1 %610  ;;  %641 = vmax.xlane.f32.xlu0 %v640_v40  ;;  %v3905_v36 = vpop.xlane.xlu0 %607  ;;  %v481_v55 = vsel %vm480_vm0, %v476_v12, -inf  ;;  %v511_v44 = vsel %vm510_vm3, %v506_v11, -inf  ;;  %v551_v45 = vcvt.s32.f32 %v549_v37  ;;  %vm555_vm0 = vcmp.eq.f32.partialorder %v3797_v2, %v3863_v18 }
 0x27e   : >> { %vm623_vm14 = vcmp.ge.f32.partialorder %v3827_v20, %v3903_v34  ;;  %vm622_vm15 = vcmp.ge.f32.partialorder %v3831_v29, %v3905_v36  ;;  %v491_v13 = vcvt.s32.f32 %v489_v31  ;;  %v536_v12 = vcvt.s32.f32 %v534_v21 }
 0x27f   : >> { %v631_v10 = vsel %vm623_vm14, -1e+30, %v3827_v20  ;;  %v630_v22 = vsel %vm622_vm15, -1e+30, %v3831_v29  ;;  %v556_v59 = vsel %vm555_vm0, %v551_v45, -inf  ;;  %v470_v21 = vcvt.f32.s32 %v3851_v47 }
 0x280   : >> { %v649_v15 = vsel %vm200_vm1, %v631_v10, -inf  ;;  %v646_v40 = vsel %vm200_vm1, %v630_v22, -inf  ;;  %v519_v10 = vand.u32 65535, %v3775_v46  ;;  %v496_v41 = vsel %vm495_vm4, %v491_v13, -inf }
 0x281   : >> { %650 = vmax.xlane.f32.xlu1 %v649_v15  ;;  %647 = vmax.xlane.f32.xlu0 %v646_v40  ;;  %v3941_v43 = vpop.xlane.xlu0 %613  ;;  %v541_v46 = vsel %vm540_vm5, %v536_v12, -inf  ;;  %v471_v35 = vshll.u32 %v470_v21, 16  ;;  %v545_v45 = vcvt.f32.s32 %v3857_v62  ;;  %v3979_v21 = vstv %s430_s26 }
 0x282   : >> { %v521_v14 = vcvt.s32.f32 %v519_v10  ;;  %vm624_vm8 = vcmp.ge.f32.partialorder %v3843_v39, %v3941_v43 }
 0x283   : >> { %v632_v13 = vsel %vm624_vm8, -1e+30, %v3843_v39 }
 0x284   : >> { %v526_v57 = vsel %vm525_vm6, %v521_v14, -inf  ;;  %v652_v1 = vsel %vm200_vm1, %v632_v13, -inf  ;;  %v500_v14 = vcvt.f32.s32 %v3849_v42 }
 0x285   : >> { %482 = vmax.xlane.f32.xlu1 %v481_v55  ;;  %467 = vmax.xlane.f32.xlu0 %v466_v23  ;;  %v3939_v55 = vpop.xlane.xlu1 %616  ;;  %v485_v23 = vcvt.f32.s32 %v3855_v61 }
 0x286   : >> { %vm625_vm7 = vcmp.ge.f32.partialorder %v3839_v33, %v3939_v55 }
 0x287   : >> { %v633_v11 = vsel %vm625_vm7, -1e+30, %v3839_v33  ;;  %v486_v12 = vshll.u32 %v485_v23, 16  ;;  %v546_v23 = vshll.u32 %v545_v45, 16 }
 0x288   : >> { %v655_v60 = vsel %vm200_vm1, %v633_v11, -inf }
 0x289   : >> { %512 = vmax.xlane.f32.xlu1 %v511_v44  ;;  %497 = vmax.xlane.f32.xlu0 %v496_v41  ;;  %v515_v41 = vcvt.f32.s32 %v3853_v56  ;;  %v560_v56 = vcvt.f32.s32 %v3863_v18 }
 0x28b   : >> { %v561_v18 = vshll.u32 %v560_v56, 16 }
 0x28d   : >> { %542 = vmax.xlane.f32.xlu1 %v541_v46  ;;  %527 = vmax.xlane.f32.xlu0 %v526_v57  ;;  %v530_v46 = vcvt.f32.s32 %v3859_v7 }
 0x28f   : >> { %v531_v42 = vshll.u32 %v530_v46, 16 }
 0x291   : >> { %572 = vmax.xlane.f32.xlu1 %v571_v58  ;;  %557 = vmax.xlane.f32.xlu0 %v556_v59  ;;  %v516_v59 = vshll.u32 %v515_v41, 16 }
 0x295   : >> { %656 = vmax.xlane.f32.xlu1 %v655_v60  ;;  %653 = vmax.xlane.f32.xlu0 %v652_v1  ;;  %v575_v60 = vcvt.f32.s32 %v3861_v8  ;;  %v501_v1 = vshll.u32 %v500_v14, 16 }
 0x306   : >> { %v3961_v2 = vpop.xlane.xlu1 %638  ;;  %v3963_v22 = vpop.xlane.xlu0 %635 }
 0x307   : >> { %v684_v14 = vsub.f32 %v3979_v21, %v3961_v2  ;;  %v683_v45 = vsub.f32 %v3979_v21, %v3963_v22 }
 0x309   : >> { %v692_v4 = vsub.f32 %v684_v14, %v3610_v0 }
 0x30a   : >> { %v3965_v24 = vpop.xlane.xlu1 %644  ;;  %v3967_v31 = vpop.xlane.xlu0 %641 }
 0x30b   : >> { %v685_v46 = vsub.f32 %v3979_v21, %v3967_v31 }
 0x30d   : >> { %v693_v36 = vsub.f32 %v685_v46, %v3648_v27 }
 0x30e   : >> { %v651_v15 = vpop.xlane.xlu1 %650  ;;  %v648_v40 = vpop.xlane.xlu0 %647 }
 0x30f   : >> { %v688_v7 = vsub.f32 %v3979_v21, %v651_v15  ;;  %v686_v15 = vsub.f32 %v3979_v21, %v3965_v24 }
 0x311   : >> { %v696_v3 = vsub.f32 %v688_v7, %v3608_v63 }
 0x312   : >> { %v483_v10 = vpop.xlane.xlu1 %482  ;;  %v468_v16 = vpop.xlane.xlu0 %467 }
 0x313   : >> { %v484_v37 = vcvt.f32.s32 %v483_v10  ;;  %v469_v44 = vcvt.f32.s32 %v468_v16 }
 0x315   : >> { %v487_v61 = vadd.s32 %v486_v12, %v484_v37  ;;  %v472_v47 = vadd.s32 %v471_v35, %v469_v44  ;;  %v687_v44 = vsub.f32 %v3979_v21, %v648_v40  ;;  %v576_v12 = vshll.u32 %v575_v60, 16 }
 0x316   : >> { %v513_v57 = vpop.xlane.xlu1 %512  ;;  %v498_v11 = vpop.xlane.xlu0 %497  ;;  %v694_v60 = vsub.f32 %v686_v15, %v3646_v26 }
 0x317   : >> { %v514_v13 = vcvt.f32.s32 %v513_v57  ;;  %v499_v58 = vcvt.f32.s32 %v498_v11  ;;  %vm579_vm2 = vcmp.eq.s32.totalorder %v487_v61, 0  ;;  %vm578_vm3 = vcmp.eq.s32.totalorder %v472_v47, 0 }
 0x318   : >> { %vm3994_vm4 = vmand %vm619_vm10, %vm579_vm2  ;;  %v695_v19 = vsub.f32 %v687_v44, %v3614_v6 }
 0x319   : >> { %v517_v16 = vadd.s32 %v516_v59, %v514_v13  ;;  %v502_v41 = vadd.s32 %v501_v1, %v499_v58  ;;  %vm4001_vm5 = vmand %vm618_vm11, %vm578_vm3  ;;  %v691_v13 = vsub.f32 %v683_v45, %v3612_v5  ;;  %v700_v29 = vsel %vm3994_vm4, %v692_v4, -1e+30 }
 0x31a   : >> { %v543_v62 = vpop.xlane.xlu1 %542  ;;  %v528_v10 = vpop.xlane.xlu0 %527 }
 0x31b   : >> { %v544_v37 = vcvt.f32.s32 %v543_v62  ;;  %v529_v8 = vcvt.f32.s32 %v528_v10  ;;  %vm581_vm6 = vcmp.eq.s32.totalorder %v517_v16, 0  ;;  %vm580_vm10 = vcmp.eq.s32.totalorder %v502_v41, 0 }
 0x31c   : >> { %vm4018_vm3 = vmand %vm621_vm12, %vm581_vm6  ;;  %v699_v32 = vsel %vm4001_vm5, %v691_v13, -1e+30  ;;  %v708_v10 = vsel %vm200_vm1, %v700_v29, -inf }
 0x31d   : >> { %v547_v35 = vadd.s32 %v546_v23, %v544_v37  ;;  %v532_v57 = vadd.s32 %v531_v42, %v529_v8  ;;  %v702_v42 = vsel %vm4018_vm3, %v694_v60, -1e+30  ;;  %v707_v7 = vsel %vm200_vm1, %v699_v32, -inf }
 0x31e   : >> { %v573_v11 = vpop.xlane.xlu1 %572  ;;  %v558_v2 = vpop.xlane.xlu0 %557  ;;  %v710_v8 = vsel %vm200_vm1, %v702_v42, -inf }
 0x31f   : >> { %vm583_vm9 = vcmp.eq.s32.totalorder %v547_v35, 0  ;;  %v574_v24 = vcvt.f32.s32 %v573_v11  ;;  %v559_v31 = vcvt.f32.s32 %v558_v2  ;;  %vm582_vm2 = vcmp.eq.s32.totalorder %v532_v57, 0 }
 0x320   : >> { %vm679_vm0 = vmand %vm623_vm14, %vm583_vm9 }
 0x321   : >> { %vm678_vm11 = vmand %vm622_vm15, %vm582_vm2  ;;  %v577_v30 = vadd.s32 %v576_v12, %v574_v24  ;;  %v562_v61 = vadd.s32 %v561_v18, %v559_v31  ;;  %v704_v34 = vsel %vm679_vm0, %v696_v3, -1e+30 }
 0x322   : >> { %v703_v20 = vsel %vm678_vm11, %v695_v19, -1e+30  ;;  %v657_v58 = vpop.xlane.xlu1 %656  ;;  %v654_v59 = vpop.xlane.xlu0 %653  ;;  %vm676_vm14 = vmand %vm620_vm13, %vm580_vm10  ;;  %v713_v1 = vsel %vm200_vm1, %v704_v34, -inf }
 0x323   : >> { %vm585_vm12 = vcmp.eq.s32.totalorder %v577_v30, 0  ;;  %vm584_vm15 = vcmp.eq.s32.totalorder %v562_v61, 0  ;;  %v690_v9 = vsub.f32 %v3979_v21, %v657_v58  ;;  %v689_v56 = vsub.f32 %v3979_v21, %v654_v59  ;;  %v6769_v30 = vld [vmem:[#allocation13_spill] sm:$0xff] }
 0x324   : >> { %v711_v23 = vsel %vm200_vm1, %v703_v20, -inf  ;;  %v701_v62 = vsel %vm676_vm14, %v693_v36, -1e+30  ;;  %vm681_vm13 = vmand %vm625_vm7, %vm585_vm12  ;;  %v714_v16 = vmax.f32 %v708_v10, %v713_v1 }
 0x325   : >> { %v698_v38 = vsub.f32 %v690_v9, %v3644_v25  ;;  %v697_v17 = vsub.f32 %v689_v56, %v3650_v28  ;;  %vm680_vm4 = vmand %vm624_vm8, %vm584_vm15  ;;  %v712_v37 = vmax.f32 %v707_v7, %v711_v23  ;;  %v709_v55 = vsel %vm200_vm1, %v701_v62, -inf }
 0x327   : >> { %v706_v44 = vsel %vm681_vm13, %v698_v38, -1e+30  ;;  %v705_v41 = vsel %vm680_vm4, %v697_v17, -1e+30  ;;  %v719_v35 = vmax.f32 %v712_v37, %v714_v16 }
 0x328   : >> { %v717_v33 = vsel %vm200_vm1, %v706_v44, -inf  ;;  %v715_v12 = vsel %vm200_vm1, %v705_v41, -inf }
 0x329   : >> { %v718_v18 = vmax.f32 %v710_v8, %v717_v33  ;;  %v716_v14 = vmax.f32 %v709_v55, %v715_v12 }
 0x32b   : >> { %v720_v45 = vmax.f32 %v716_v14, %v718_v18 }
 0x32d   : >> { %v721_v15 = vmax.f32 %v719_v35, %v720_v45 }
 0x32f   : >> { %v722_v46 = vrot.slane %v721_v15, 4 }
 0x331   : >> { %v723_v39 = vmax.f32 %v721_v15, %v722_v46 }
 0x333   : >> { %v724_v43 = vrot.slane %v723_v39, 2 }
 0x335   : >> { %v725_v40 = vmax.f32 %v723_v39, %v724_v43 }
 0x337   : >> { %v726_v57 = vrot.slane %v725_v40, 1 }
 0x339   : >> { %v4052_v11 = vmax.f32 %v725_v40, %v726_v57  ;;  %v6772_v40 = vld [vmem:[#allocation14_spill] sm:$0xff] }
 0x33b   : >> { %vm728_vm7 = vcmp.ge.f32.partialorder %v699_v32, %v4052_v11  ;;  %vm729_vm8 = vcmp.ge.f32.partialorder %v700_v29, %v4052_v11  ;;  %vm730_vm5 = vcmp.ge.f32.partialorder %v701_v62, %v4052_v11  ;;  %vm731_vm6 = vcmp.ge.f32.partialorder %v702_v42, %v4052_v11  ;;  %v6770_v62 = vld [vmem:[#allocation15_spill] sm:$0xff] }
 0x33c   : >> { %vm732_vm9 = vcmp.ge.f32.partialorder %v703_v20, %v4052_v11  ;;  %vm733_vm10 = vcmp.ge.f32.partialorder %v704_v34, %v4052_v11  ;;  %vm734_vm0 = vcmp.ge.f32.partialorder %v705_v41, %v4052_v11  ;;  %vm735_vm2 = vcmp.ge.f32.partialorder %v706_v44, %v4052_v11 }
 0x33d   : >> { %v736_v2 = vsel %vm728_vm7, %v3680_v48, 64  ;;  %v737_v22 = vsel %vm729_vm8, %v3683_v49, 64  ;;  %v738_v24 = vsel %vm730_vm5, %v3686_v50, 64  ;;  %v739_v31 = vsel %vm731_vm6, %v3689_v51, 64 }
 0x33e   : >> { %v740_v3 = vsel %vm732_vm9, %v6757_v52, 64  ;;  %v741_v19 = vsel %vm733_vm10, %v6758_v53, 64  ;;  %v742_v4 = vsel %vm734_vm0, %v6759_v54, 64  ;;  %v743_v61 = vsel %vm735_vm2, %v6769_v30, 64 }
 0x33f   : >> { %v744_v13 = vsel %vm200_vm1, %v736_v2, 2147483647  ;;  %v745_v47 = vsel %vm200_vm1, %v737_v22, 2147483647  ;;  %v746_v34 = vsel %vm200_vm1, %v738_v24, 2147483647 }
 0x340   : >> { %v747_v20 = vsel %vm200_vm1, %v739_v31, 2147483647  ;;  %v748_v58 = vsel %vm200_vm1, %v740_v3, 2147483647  ;;  %v751_v59 = vsel %vm200_vm1, %v741_v19, 2147483647 }
 0x341   : >> { %vm749_vm11 = vcmp.lt.s32.totalorder %v744_v13, %v748_v58  ;;  %vm752_vm3 = vcmp.lt.s32.totalorder %v745_v47, %v751_v59  ;;  %v754_v60 = vsel %vm200_vm1, %v742_v4, 2147483647  ;;  %v757_v36 = vsel %vm200_vm1, %v743_v61, 2147483647 }
 0x342   : >> { %v750_v29 = vsel %vm749_vm11, %v744_v13, %v748_v58  ;;  %v753_v32 = vsel %vm752_vm3, %v745_v47, %v751_v59  ;;  %vm755_vm14 = vcmp.lt.s32.totalorder %v746_v34, %v754_v60  ;;  %vm758_vm12 = vcmp.lt.s32.totalorder %v747_v20, %v757_v36 }
 0x343   : >> { %v756_v9 = vsel %vm755_vm14, %v746_v34, %v754_v60  ;;  %v759_v56 = vsel %vm758_vm12, %v747_v20, %v757_v36  ;;  %vm760_vm15 = vcmp.lt.s32.totalorder %v750_v29, %v753_v32  ;;  %vm775_vm13 = vcmp.gt.f32.partialorder %v4052_v11, -1e+29 }
 0x344   : >> { %v761_v1 = vsel %vm760_vm15, %v750_v29, %v753_v32  ;;  %vm762_vm4 = vcmp.lt.s32.totalorder %v756_v9, %v759_v56  ;;  %v776_v23 = vsub.f32 0.0, %v4052_v11  ;;  %v6774_v2 = vmov 0  }
 0x345   : >> { %v763_v42 = vsel %vm762_vm4, %v756_v9, %v759_v56 }
 0x346   : >> { %vm764_vm7 = vcmp.lt.s32.totalorder %v761_v1, %v763_v42  ;;  %v4083_v38 = vsel %vm775_vm13, %v776_v23, %v6770_v62 }
 0x347   : >> { %6771 = vst [vmem:[#allocation15_spill] sm:$0xff] %v4083_v38  ;;  %v765_v17 = vsel %vm764_vm7, %v761_v1, %v763_v42  ;;  %v4087_v10 = vsub.f32 %v4083_v38, %v3610_v0  ;;  %v4091_v7 = vsub.f32 %v4083_v38, %v3612_v5  ;;  %v4099_v41 = vsub.f32 %v4083_v38, %v3646_v26 }
 0x348   : >> { %v766_v16 = vrot.slane %v765_v17, 4  ;;  %v4103_v8 = vsub.f32 %v4083_v38, %v3648_v27  ;;  %v4111_v14 = vsub.f32 %v4083_v38, %v3608_v63  ;;  %v4115_v35 = vsub.f32 %v4083_v38, %v3614_v6 }
 0x349   : >> { %v934_v37 = vsel %vm200_vm1, %v4087_v10, -inf  ;;  %v931_v44 = vsel %vm200_vm1, %v4091_v7, -inf  ;;  %v940_v12 = vsel %vm200_vm1, %v4099_v41, -inf }
 0x34a   : >> { %vm767_vm8 = vcmp.lt.s32.totalorder %v765_v17, %v766_v16  ;;  %935 = vmax.xlane.f32.xlu1 %v934_v37  ;;  %932 = vmax.xlane.f32.xlu0 %v931_v44  ;;  %v937_v18 = vsel %vm200_vm1, %v4103_v8, -inf  ;;  %v946_v46 = vsel %vm200_vm1, %v4111_v14, -inf  ;;  %v943_v39 = vsel %vm200_vm1, %v4115_v35, -inf }
 0x34b   : >> { %v768_v33 = vsel %vm767_vm8, %v765_v17, %v766_v16 }
 0x34c   : >> { %v769_v55 = vrot.slane %v768_v33, 2 }
 0x34e   : >> { %vm770_vm5 = vcmp.lt.s32.totalorder %v768_v33, %v769_v55  ;;  %941 = vmax.xlane.f32.xlu1 %v940_v12  ;;  %938 = vmax.xlane.f32.xlu0 %v937_v18 }
 0x34f   : >> { %v771_v45 = vsel %vm770_vm5, %v768_v33, %v769_v55 }
 0x350   : >> { %v772_v15 = vrot.slane %v771_v45, 1 }
 0x352   : >> { %vm773_vm6 = vcmp.lt.s32.totalorder %v771_v45, %v772_v15  ;;  %947 = vmax.xlane.f32.xlu1 %v946_v46  ;;  %944 = vmax.xlane.f32.xlu0 %v943_v39 }
 0x353   : >> { %v774_v43 = vsel %vm773_vm6, %v771_v45, %v772_v15  ;;  %v4206_v45 = vsub.f32 %v4083_v38, %v3644_v25  ;;  %v4210_v15 = vsub.f32 %v4083_v38, %v3650_v28 }
 0x354   : >> { %v4124_v57 = vsel %vm775_vm13, %v774_v43, %v6772_v40 }
 0x355   : >> { %6773 = vst [vmem:[#allocation14_spill] sm:$0xff] %v4124_v57  ;;  %vm780_vm9 = vcmp.eq.s32.totalorder %v4124_v57, %v3683_v49  ;;  %vm779_vm10 = vcmp.eq.s32.totalorder %v4124_v57, %v3680_v48  ;;  %vm782_vm0 = vcmp.eq.s32.totalorder %v4124_v57, %v3689_v51  ;;  %vm781_vm2 = vcmp.eq.s32.totalorder %v4124_v57, %v3686_v50 }
 0x356   : >> { %v788_v22 = vsel %vm780_vm9, 1, %v6774_v2  ;;  %v787_v24 = vsel %vm779_vm10, 1, %v6774_v2  ;;  %v790_v11 = vsel %vm782_vm0, 1, %v6774_v2  ;;  %v789_v31 = vsel %vm781_vm2, 1, %v6774_v2 }
 0x357   : >> { %v4139_v3 = vsel %vm200_vm1, %v788_v22, 2147483648  ;;  %v4142_v19 = vsel %vm200_vm1, %v787_v24, 2147483648  ;;  %v4145_v4 = vsel %vm200_vm1, %v790_v11, 2147483648  ;;  %v4148_v61 = vsel %vm200_vm1, %v789_v31, 2147483648 }
 0x358   : >> { %v812_v13 = vshra.s32 %v4139_v3, 16  ;;  %v797_v47 = vshra.s32 %v4142_v19, 16  ;;  %vm784_vm11 = vcmp.eq.s32.totalorder %v4124_v57, %v6758_v53  ;;  %vm783_vm3 = vcmp.eq.s32.totalorder %v4124_v57, %v6757_v52 }
 0x359   : >> { %vm786_vm14 = vcmp.eq.s32.totalorder %v4124_v57, %v6769_v30  ;;  %vm785_vm12 = vcmp.eq.s32.totalorder %v4124_v57, %v6759_v54  ;;  %v842_v58 = vshra.s32 %v4145_v4, 16  ;;  %v827_v59 = vshra.s32 %v4148_v61, 16 }
 0x35a   : >> { %v4160_v34 = vcvt.s32.f32 %v812_v13  ;;  %v4162_v20 = vcvt.s32.f32 %v797_v47  ;;  %v792_v60 = vsel %vm784_vm11, 1, %v6774_v2  ;;  %v791_v36 = vsel %vm783_vm3, 1, %v6774_v2 }
 0x35b   : >> { %v4171_v29 = vsel %vm200_vm1, %v792_v60, 2147483648  ;;  %v4174_v32 = vsel %vm200_vm1, %v791_v36, 2147483648  ;;  %v794_v9 = vsel %vm786_vm14, 1, %v6774_v2  ;;  %v793_v56 = vsel %vm785_vm12, 1, %v6774_v2 }
 0x35c   : >> { %815 = vmax.xlane.f32.xlu1 %v4160_v34  ;;  %800 = vmax.xlane.f32.xlu0 %v4162_v20  ;;  %v4178_v1 = vcvt.s32.f32 %v842_v58  ;;  %v4180_v23 = vcvt.s32.f32 %v827_v59  ;;  %v872_v42 = vshra.s32 %v4171_v29, 16  ;;  %v857_v62 = vshra.s32 %v4174_v32, 16 }
 0x35d   : >> { %v4185_v17 = vsel %vm200_vm1, %v794_v9, 2147483648  ;;  %v4188_v16 = vsel %vm200_vm1, %v793_v56, 2147483648  ;;  %v952_v46 = vsel %vm200_vm1, %v4206_v45, -inf  ;;  %v949_v39 = vsel %vm200_vm1, %v4210_v15, -inf }
 0x35e   : >> { %v4192_v37 = vcvt.s32.f32 %v872_v42  ;;  %v4194_v44 = vcvt.s32.f32 %v857_v62  ;;  %v902_v33 = vshra.s32 %v4185_v17, 16  ;;  %v887_v55 = vshra.s32 %v4188_v16, 16 }
 0x360   : >> { %845 = vmax.xlane.f32.xlu1 %v4178_v1  ;;  %830 = vmax.xlane.f32.xlu0 %v4180_v23  ;;  %v4200_v12 = vcvt.s32.f32 %v902_v33  ;;  %v4202_v18 = vcvt.s32.f32 %v887_v55 }
 0x364   : >> { %875 = vmax.xlane.f32.xlu1 %v4192_v37  ;;  %860 = vmax.xlane.f32.xlu0 %v4194_v44 }
 0x368   : >> { %905 = vmax.xlane.f32.xlu1 %v4200_v12  ;;  %890 = vmax.xlane.f32.xlu0 %v4202_v18 }
 0x36c   : >> { %953 = vmax.xlane.f32.xlu1 %v952_v46  ;;  %950 = vmax.xlane.f32.xlu0 %v949_v39  ;;  %v811_v46 = vand.u32 65535, %v4139_v3  ;;  %v796_v39 = vand.u32 65535, %v4142_v19 }
 0x3d7   : >> { %v4218_v43 = vpop.xlane.xlu1 %935  ;;  %v4220_v40 = vpop.xlane.xlu0 %932 }
 0x3d8   : >> { %vm956_vm15 = vcmp.ge.f32.partialorder %v4087_v10, %v4218_v43  ;;  %vm955_vm13 = vcmp.ge.f32.partialorder %v4091_v7, %v4220_v40 }
 0x3d9   : >> { %v964_v22 = vsel %vm956_vm15, -1e+30, %v4087_v10  ;;  %v963_v24 = vsel %vm955_vm13, -1e+30, %v4091_v7 }
 0x3da   : >> { %v974_v11 = vsel %vm200_vm1, %v964_v22, -inf  ;;  %v971_v31 = vsel %vm200_vm1, %v963_v24, -inf }
 0x3db   : >> { %v4236_v13 = vpop.xlane.xlu1 %941  ;;  %v4238_v47 = vpop.xlane.xlu0 %938  ;;  %975 = vmax.xlane.f32.xlu1 %v974_v11  ;;  %972 = vmax.xlane.f32.xlu0 %v971_v31  ;;  %v813_v11 = vcvt.s32.f32 %v811_v46  ;;  %v798_v31 = vcvt.s32.f32 %v796_v39 }
 0x3dc   : >> { %vm958_vm4 = vcmp.ge.f32.partialorder %v4099_v41, %v4236_v13  ;;  %vm957_vm7 = vcmp.ge.f32.partialorder %v4103_v8, %v4238_v47 }
 0x3dd   : >> { %v966_v58 = vsel %vm958_vm4, -1e+30, %v4099_v41  ;;  %v965_v59 = vsel %vm957_vm7, -1e+30, %v4103_v8 }
 0x3de   : >> { %v980_v60 = vsel %vm200_vm1, %v966_v58, -inf  ;;  %v977_v36 = vsel %vm200_vm1, %v965_v59, -inf  ;;  %v841_v58 = vand.u32 65535, %v4145_v4  ;;  %v826_v59 = vand.u32 65535, %v4148_v61 }
 0x3df   : >> { %v4254_v9 = vpop.xlane.xlu1 %947  ;;  %v4256_v56 = vpop.xlane.xlu0 %944  ;;  %981 = vmax.xlane.f32.xlu1 %v980_v60  ;;  %978 = vmax.xlane.f32.xlu0 %v977_v36  ;;  %v871_v4 = vand.u32 65535, %v4171_v29  ;;  %v856_v61 = vand.u32 65535, %v4174_v32  ;;  %v886_v29 = vand.u32 65535, %v4188_v16 }
 0x3e0   : >> { %vm960_vm8 = vcmp.ge.f32.partialorder %v4111_v14, %v4254_v9  ;;  %vm959_vm5 = vcmp.ge.f32.partialorder %v4115_v35, %v4256_v56 }
 0x3e1   : >> { %v968_v42 = vsel %vm960_vm8, -1e+30, %v4111_v14  ;;  %v967_v62 = vsel %vm959_vm5, -1e+30, %v4115_v35  ;;  %v873_v46 = vcvt.s32.f32 %v871_v4  ;;  %v858_v39 = vcvt.s32.f32 %v856_v61 }
 0x3e2   : >> { %v986_v33 = vsel %vm200_vm1, %v968_v42, -inf  ;;  %v983_v55 = vsel %vm200_vm1, %v967_v62, -inf  ;;  %v843_v42 = vcvt.s32.f32 %v841_v58  ;;  %v828_v62 = vcvt.s32.f32 %v826_v59 }
 0x3e3   : >> { %987 = vmax.xlane.f32.xlu1 %v986_v33  ;;  %984 = vmax.xlane.f32.xlu0 %v983_v55  ;;  %v888_v59 = vcvt.s32.f32 %v886_v29 }
 0x3e9   : >> { %v4274_v22 = vpop.xlane.xlu1 %815  ;;  %v4276_v24 = vpop.xlane.xlu0 %800 }
 0x3ea   : >> { %vm817_vm6 = vcmp.eq.f32.partialorder %v4160_v34, %v4274_v22  ;;  %vm802_vm9 = vcmp.eq.f32.partialorder %v4162_v20, %v4276_v24 }
 0x3eb   : >> { %v818_v60 = vsel %vm817_vm6, %v813_v11, -inf  ;;  %v803_v3 = vsel %vm802_vm9, %v798_v31, -inf  ;;  %v901_v11 = vand.u32 65535, %v4185_v17 }
 0x3ec   : >> { %819 = vmax.xlane.f32.xlu1 %v818_v60  ;;  %804 = vmax.xlane.f32.xlu0 %v803_v3 }
 0x3ed   : >> { %v4284_v19 = vpop.xlane.xlu1 %845  ;;  %v4286_v36 = vpop.xlane.xlu0 %830  ;;  %v903_v58 = vcvt.s32.f32 %v901_v11 }
 0x3ee   : >> { %vm847_vm10 = vcmp.eq.f32.partialorder %v4178_v1, %v4284_v19  ;;  %vm832_vm0 = vcmp.eq.f32.partialorder %v4180_v23, %v4286_v36 }
 0x3ef   : >> { %v848_v34 = vsel %vm847_vm10, %v843_v42, -inf  ;;  %v833_v20 = vsel %vm832_vm0, %v828_v62, -inf }
 0x3f0   : >> { %849 = vmax.xlane.f32.xlu1 %v848_v34  ;;  %834 = vmax.xlane.f32.xlu0 %v833_v20 }
 0x3f1   : >> { %v876_v33 = vpop.xlane.xlu1 %875  ;;  %v861_v55 = vpop.xlane.xlu0 %860 }
 0x3f2   : >> { %vm877_vm2 = vcmp.eq.f32.partialorder %v4192_v37, %v876_v33  ;;  %vm862_vm11 = vcmp.eq.f32.partialorder %v4194_v44, %v861_v55 }
 0x3f3   : >> { %v878_v32 = vsel %vm877_vm2, %v873_v46, -inf  ;;  %v863_v1 = vsel %vm862_vm11, %v858_v39, -inf  ;;  %v822_v46 = vcvt.f32.s32 %v4274_v22  ;;  %v807_v39 = vcvt.f32.s32 %v4276_v24 }
 0x3f4   : >> { %879 = vmax.xlane.f32.xlu1 %v878_v32  ;;  %864 = vmax.xlane.f32.xlu0 %v863_v1 }
 0x3f5   : >> { %v906_v23 = vpop.xlane.xlu1 %905  ;;  %v891_v31 = vpop.xlane.xlu0 %890 }
 0x3f6   : >> { %vm907_vm3 = vcmp.eq.f32.partialorder %v4200_v12, %v906_v23  ;;  %vm892_vm14 = vcmp.eq.f32.partialorder %v4202_v18, %v891_v31  ;;  %v912_v24 = vcvt.f32.s32 %v906_v23  ;;  %v897_v54 = vcvt.f32.s32 %v891_v31 }
 0x3f7   : >> { %v908_v60 = vsel %vm907_vm3, %v903_v58, -inf  ;;  %v893_v17 = vsel %vm892_vm14, %v888_v59, -inf  ;;  %v823_v58 = vshll.u32 %v822_v46, 16  ;;  %v852_v59 = vcvt.f32.s32 %v4284_v19 }
 0x3f8   : >> { %909 = vmax.xlane.f32.xlu1 %v908_v60  ;;  %894 = vmax.xlane.f32.xlu0 %v893_v17  ;;  %v808_v60 = vshll.u32 %v807_v39, 16  ;;  %v837_v17 = vcvt.f32.s32 %v4286_v36 }
 0x3f9   : >> { %v4300_v16 = vpop.xlane.xlu1 %953  ;;  %v4302_v37 = vpop.xlane.xlu0 %950  ;;  %v853_v30 = vshll.u32 %v852_v59, 16 }
 0x3fa   : >> { %vm962_vm12 = vcmp.ge.f32.partialorder %v4206_v45, %v4300_v16  ;;  %vm961_vm6 = vcmp.ge.f32.partialorder %v4210_v15, %v4302_v37  ;;  %v838_v53 = vshll.u32 %v837_v17, 16 }
 0x3fb   : >> { %v970_v44 = vsel %vm962_vm12, -1e+30, %v4206_v45  ;;  %v969_v12 = vsel %vm961_vm6, -1e+30, %v4210_v15 }
 0x3fc   : >> { %v992_v18 = vsel %vm200_vm1, %v970_v44, -inf  ;;  %v989_v3 = vsel %vm200_vm1, %v969_v12, -inf  ;;  %v882_v44 = vcvt.f32.s32 %v876_v33  ;;  %v867_v12 = vcvt.f32.s32 %v861_v55 }
 0x3fd   : >> { %993 = vmax.xlane.f32.xlu1 %v992_v18  ;;  %990 = vmax.xlane.f32.xlu0 %v989_v3 }
 0x468   : >> { %v976_v42 = vpop.xlane.xlu1 %975  ;;  %v4318_v62 = vpop.xlane.xlu0 %972 }
 0x469   : >> { %v1020_v23 = vsub.f32 %v3979_v21, %v976_v42  ;;  %v1019_v59 = vsub.f32 %v3979_v21, %v4318_v62 }
 0x46b   : >> { %v1028_v7 = vsub.f32 %v1020_v23, %v3610_v0 }
 0x46c   : >> { %v4320_v4 = vpop.xlane.xlu1 %981  ;;  %v4322_v61 = vpop.xlane.xlu0 %978 }
 0x470   : >> { %v988_v34 = vpop.xlane.xlu1 %987  ;;  %v985_v20 = vpop.xlane.xlu0 %984 }
 0x471   : >> { %v1024_v19 = vsub.f32 %v3979_v21, %v988_v34  ;;  %v1023_v55 = vsub.f32 %v3979_v21, %v985_v20 }
 0x473   : >> { %v1032_v10 = vsub.f32 %v1024_v19, %v3608_v63  ;;  %v1031_v43 = vsub.f32 %v1023_v55, %v3614_v6 }
 0x479   : >> { %v820_v11 = vpop.xlane.xlu1 %819  ;;  %v805_v29 = vpop.xlane.xlu0 %804 }
 0x47a   : >> { %v821_v32 = vcvt.f32.s32 %v820_v11  ;;  %v806_v1 = vcvt.f32.s32 %v805_v29  ;;  %v883_v11 = vshll.u32 %v882_v44, 16  ;;  %v868_v29 = vshll.u32 %v867_v12, 16 }
 0x47c   : >> { %v824_v2 = vadd.s32 %v823_v58, %v821_v32  ;;  %v809_v38 = vadd.s32 %v808_v60, %v806_v1  ;;  %v913_v1 = vshll.u32 %v912_v24, 16  ;;  %v898_v58 = vshll.u32 %v897_v54, 16 }
 0x47d   : >> { %v850_v18 = vpop.xlane.xlu1 %849  ;;  %v835_v3 = vpop.xlane.xlu0 %834  ;;  %v1022_v60 = vsub.f32 %v3979_v21, %v4320_v4  ;;  %v1027_v4 = vsub.f32 %v1019_v59, %v3612_v5 }
 0x47e   : >> { %v851_v57 = vcvt.f32.s32 %v850_v18  ;;  %v836_v22 = vcvt.f32.s32 %v835_v3  ;;  %vm916_vm9 = vcmp.eq.s32.totalorder %v824_v2, 0  ;;  %vm915_vm10 = vcmp.eq.s32.totalorder %v809_v38, 0 }
 0x47f   : >> { %vm4340_vm0 = vmand %vm956_vm15, %vm916_vm9  ;;  %v1030_v34 = vsub.f32 %v1022_v60, %v3646_v26 }
 0x480   : >> { %v854_v36 = vadd.s32 %v853_v30, %v851_v57  ;;  %v839_v39 = vadd.s32 %v838_v53, %v836_v22  ;;  %v1021_v30 = vsub.f32 %v3979_v21, %v4322_v61  ;;  %vm4347_vm2 = vmand %vm955_vm13, %vm915_vm10  ;;  %v1036_v35 = vsel %vm4340_vm0, %v1028_v7, -1e+30  ;;  %v6781_v57 = vld [vmem:[#allocation10_spill] sm:$0xff] }
 0x481   : >> { %v880_v46 = vpop.xlane.xlu1 %879  ;;  %v865_v52 = vpop.xlane.xlu0 %864  ;;  %v1035_v13 = vsel %vm4347_vm2, %v1027_v4, -1e+30  ;;  %v1044_v24 = vsel %vm200_vm1, %v1036_v35, -inf }
 0x482   : >> { %v881_v33 = vcvt.f32.s32 %v880_v46  ;;  %v866_v32 = vcvt.f32.s32 %v865_v52  ;;  %vm918_vm11 = vcmp.eq.s32.totalorder %v854_v36, 0  ;;  %vm917_vm15 = vcmp.eq.s32.totalorder %v839_v39, 0 }
 0x483   : >> { %vm4364_vm10 = vmand %vm958_vm4, %vm918_vm11  ;;  %v1029_v20 = vsub.f32 %v1021_v30, %v3648_v27 }
 0x484   : >> { %v884_v31 = vadd.s32 %v883_v11, %v881_v33  ;;  %v869_v52 = vadd.s32 %v868_v29, %v866_v32  ;;  %v1038_v3 = vsel %vm4364_vm10, %v1030_v34, -1e+30  ;;  %v1043_v11 = vsel %vm200_vm1, %v1035_v13, -inf }
 0x485   : >> { %v910_v54 = vpop.xlane.xlu1 %909  ;;  %v895_v38 = vpop.xlane.xlu0 %894  ;;  %v1046_v33 = vsel %vm200_vm1, %v1038_v3, -inf }
 0x486   : >> { %vm920_vm3 = vcmp.eq.s32.totalorder %v884_v31, 0  ;;  %v911_v2 = vcvt.f32.s32 %v910_v54  ;;  %v896_v42 = vcvt.f32.s32 %v895_v38  ;;  %vm919_vm9 = vcmp.eq.s32.totalorder %v869_v52, 0 }
 0x487   : >> { %vm1016_vm14 = vmand %vm960_vm8, %vm920_vm3 }
 0x488   : >> { %vm1015_vm13 = vmand %vm959_vm5, %vm919_vm9  ;;  %v914_v40 = vadd.s32 %v913_v1, %v911_v2  ;;  %v899_v62 = vadd.s32 %v898_v58, %v896_v42  ;;  %v1040_v14 = vsel %vm1016_vm14, %v1032_v10, -1e+30  ;;  %v6782_v42 = vld [vmem:[#allocation11_spill] sm:$0xff] }
 0x489   : >> { %v1039_v9 = vsel %vm1015_vm13, %v1031_v43, -1e+30  ;;  %vm1013_vm8 = vmand %vm957_vm7, %vm917_vm15  ;;  %v1049_v12 = vsel %vm200_vm1, %v1040_v14, -inf  ;;  %v6783_v43 = vld [vmem:[#allocation12_spill] sm:$0xff] }
 0x48a   : >> { %vm922_vm5 = vcmp.eq.s32.totalorder %v914_v40, 0  ;;  %v994_v56 = vpop.xlane.xlu1 %993  ;;  %v991_v41 = vpop.xlane.xlu0 %990  ;;  %vm921_vm4 = vcmp.eq.s32.totalorder %v899_v62, 0  ;;  %v1047_v18 = vsel %vm200_vm1, %v1039_v9, -inf  ;;  %v1037_v8 = vsel %vm1013_vm8, %v1029_v20, -1e+30  ;;  %v6784_v40 = vld [vmem:[#allocation13_spill] sm:$0xff] }
 0x48b   : >> { %v1026_v17 = vsub.f32 %v3979_v21, %v994_v56  ;;  %v1025_v44 = vsub.f32 %v3979_v21, %v991_v41  ;;  %vm1018_vm7 = vmand %vm962_vm12, %vm922_vm5  ;;  %v1050_v29 = vmax.f32 %v1044_v24, %v1049_v12  ;;  %v1048_v46 = vmax.f32 %v1043_v11, %v1047_v18 }
 0x48c   : >> { %vm1017_vm0 = vmand %vm961_vm6, %vm921_vm4  ;;  %v1045_v16 = vsel %vm200_vm1, %v1037_v8, -inf }
 0x48d   : >> { %v1034_v47 = vsub.f32 %v1026_v17, %v3644_v25  ;;  %v1033_v22 = vsub.f32 %v1025_v44, %v3650_v28  ;;  %v1055_v1 = vmax.f32 %v1048_v46, %v1050_v29 }
 0x48f   : >> { %v1042_v19 = vsel %vm1018_vm7, %v1034_v47, -1e+30  ;;  %v1041_v36 = vsel %vm1017_vm0, %v1033_v22, -1e+30 }
 0x490   : >> { %v1053_v45 = vsel %vm200_vm1, %v1042_v19, -inf  ;;  %v1051_v55 = vsel %vm200_vm1, %v1041_v36, -inf }
 0x491   : >> { %v1054_v39 = vmax.f32 %v1046_v33, %v1053_v45  ;;  %v1052_v32 = vmax.f32 %v1045_v16, %v1051_v55 }
 0x493   : >> { %v1056_v58 = vmax.f32 %v1052_v32, %v1054_v39 }
 0x495   : >> { %v1057_v23 = vmax.f32 %v1055_v1, %v1056_v58 }
 0x497   : >> { %v1058_v31 = vrot.slane %v1057_v23, 4 }
 0x499   : >> { %v1059_v15 = vmax.f32 %v1057_v23, %v1058_v31 }
 0x49b   : >> { %v1060_v37 = vrot.slane %v1059_v15, 2 }
 0x49d   : >> { %v1061_v59 = vmax.f32 %v1059_v15, %v1060_v37 }
 0x49f   : >> { %v1062_v60 = vrot.slane %v1061_v59, 1 }
 0x4a1   : >> { %v4397_v30 = vmax.f32 %v1061_v59, %v1062_v60  ;;  %v6787_v59 = vld [vmem:[#allocation14_spill] sm:$0xff] }
 0x4a3   : >> { %vm1064_vm12 = vcmp.ge.f32.partialorder %v1035_v13, %v4397_v30  ;;  %vm1065_vm6 = vcmp.ge.f32.partialorder %v1036_v35, %v4397_v30  ;;  %vm1066_vm2 = vcmp.ge.f32.partialorder %v1037_v8, %v4397_v30  ;;  %vm1067_vm11 = vcmp.ge.f32.partialorder %v1038_v3, %v4397_v30  ;;  %v6785_v8 = vld [vmem:[#allocation15_spill] sm:$0xff] }
 0x4a4   : >> { %vm1068_vm3 = vcmp.ge.f32.partialorder %v1039_v9, %v4397_v30  ;;  %vm1069_vm15 = vcmp.ge.f32.partialorder %v1040_v14, %v4397_v30  ;;  %vm1070_vm14 = vcmp.ge.f32.partialorder %v1041_v36, %v4397_v30  ;;  %vm1071_vm9 = vcmp.ge.f32.partialorder %v1042_v19, %v4397_v30 }
 0x4a5   : >> { %v1072_v53 = vsel %vm1064_vm12, %v3680_v48, 64  ;;  %v1073_v52 = vsel %vm1065_vm6, %v3683_v49, 64  ;;  %v1074_v54 = vsel %vm1066_vm2, %v3686_v50, 64  ;;  %v1075_v38 = vsel %vm1067_vm11, %v3689_v51, 64 }
 0x4a6   : >> { %v1076_v2 = vsel %vm1068_vm3, %v6781_v57, 64  ;;  %v1077_v10 = vsel %vm1069_vm15, %v6782_v42, 64  ;;  %v1078_v7 = vsel %vm1070_vm14, %v6783_v43, 64  ;;  %v1079_v62 = vsel %vm1071_vm9, %v6784_v40, 64 }
 0x4a7   : >> { %v1080_v4 = vsel %vm200_vm1, %v1072_v53, 2147483647  ;;  %v1081_v61 = vsel %vm200_vm1, %v1073_v52, 2147483647  ;;  %v1082_v14 = vsel %vm200_vm1, %v1074_v54, 2147483647 }
 0x4a8   : >> { %v1083_v9 = vsel %vm200_vm1, %v1075_v38, 2147483647  ;;  %v1084_v34 = vsel %vm200_vm1, %v1076_v2, 2147483647  ;;  %v1087_v20 = vsel %vm200_vm1, %v1077_v10, 2147483647 }
 0x4a9   : >> { %vm1085_vm13 = vcmp.lt.s32.totalorder %v1080_v4, %v1084_v34  ;;  %vm1088_vm10 = vcmp.lt.s32.totalorder %v1081_v61, %v1087_v20  ;;  %v1090_v35 = vsel %vm200_vm1, %v1078_v7, 2147483647  ;;  %v1093_v56 = vsel %vm200_vm1, %v1079_v62, 2147483647 }
 0x4aa   : >> { %v1086_v41 = vsel %vm1085_vm13, %v1080_v4, %v1084_v34  ;;  %v1089_v13 = vsel %vm1088_vm10, %v1081_v61, %v1087_v20  ;;  %vm1091_vm8 = vcmp.lt.s32.totalorder %v1082_v14, %v1090_v35  ;;  %vm1094_vm5 = vcmp.lt.s32.totalorder %v1083_v9, %v1093_v56 }
 0x4ab   : >> { %v1092_v17 = vsel %vm1091_vm8, %v1082_v14, %v1090_v35  ;;  %v1095_v44 = vsel %vm1094_vm5, %v1083_v9, %v1093_v56  ;;  %vm1096_vm4 = vcmp.lt.s32.totalorder %v1086_v41, %v1089_v13  ;;  %vm1111_vm7 = vcmp.gt.f32.partialorder %v4397_v30, -1e+29 }
 0x4ac   : >> { %v1097_v12 = vsel %vm1096_vm4, %v1086_v41, %v1089_v13  ;;  %vm1098_vm0 = vcmp.lt.s32.totalorder %v1092_v17, %v1095_v44  ;;  %v1112_v18 = vsub.f32 0.0, %v4397_v30  ;;  %v6789_v53 = vmov 0  }
 0x4ad   : >> { %v1099_v3 = vsel %vm1098_vm0, %v1092_v17, %v1095_v44 }
 0x4ae   : >> { %vm1100_vm12 = vcmp.lt.s32.totalorder %v1097_v12, %v1099_v3  ;;  %v4428_v47 = vsel %vm1111_vm7, %v1112_v18, %v6785_v8 }
 0x4af   : >> { %6786 = vst [vmem:[#allocation15_spill] sm:$0xff] %v4428_v47  ;;  %v1101_v22 = vsel %vm1100_vm12, %v1097_v12, %v1099_v3  ;;  %v4432_v24 = vsub.f32 %v4428_v47, %v3610_v0  ;;  %v4436_v11 = vsub.f32 %v4428_v47, %v3612_v5  ;;  %v4444_v36 = vsub.f32 %v4428_v47, %v3646_v26 }
 0x4b0   : >> { %v1102_v29 = vrot.slane %v1101_v22, 4  ;;  %v4448_v33 = vsub.f32 %v4428_v47, %v3648_v27  ;;  %v4456_v32 = vsub.f32 %v4428_v47, %v3608_v63  ;;  %v4460_v1 = vsub.f32 %v4428_v47, %v3614_v6 }
 0x4b1   : >> { %v1270_v46 = vsel %vm200_vm1, %v4432_v24, -inf  ;;  %v1267_v19 = vsel %vm200_vm1, %v4436_v11, -inf  ;;  %v1276_v55 = vsel %vm200_vm1, %v4444_v36, -inf }
 0x4b2   : >> { %vm1103_vm6 = vcmp.lt.s32.totalorder %v1101_v22, %v1102_v29  ;;  %1271 = vmax.xlane.f32.xlu1 %v1270_v46  ;;  %1268 = vmax.xlane.f32.xlu0 %v1267_v19  ;;  %v1273_v39 = vsel %vm200_vm1, %v4448_v33, -inf  ;;  %v1282_v31 = vsel %vm200_vm1, %v4456_v32, -inf  ;;  %v1279_v15 = vsel %vm200_vm1, %v4460_v1, -inf }
 0x4b3   : >> { %v1104_v45 = vsel %vm1103_vm6, %v1101_v22, %v1102_v29 }
 0x4b4   : >> { %v1105_v16 = vrot.slane %v1104_v45, 2 }
 0x4b6   : >> { %vm1106_vm2 = vcmp.lt.s32.totalorder %v1104_v45, %v1105_v16  ;;  %1277 = vmax.xlane.f32.xlu1 %v1276_v55  ;;  %1274 = vmax.xlane.f32.xlu0 %v1273_v39 }
 0x4b7   : >> { %v1107_v58 = vsel %vm1106_vm2, %v1104_v45, %v1105_v16 }
 0x4b8   : >> { %v1108_v23 = vrot.slane %v1107_v58, 1 }
 0x4ba   : >> { %vm1109_vm11 = vcmp.lt.s32.totalorder %v1107_v58, %v1108_v23  ;;  %1283 = vmax.xlane.f32.xlu1 %v1282_v31  ;;  %1280 = vmax.xlane.f32.xlu0 %v1279_v15 }
 0x4bb   : >> { %v1110_v37 = vsel %vm1109_vm11, %v1107_v58, %v1108_v23  ;;  %v4551_v58 = vsub.f32 %v4428_v47, %v3644_v25  ;;  %v4555_v23 = vsub.f32 %v4428_v47, %v3650_v28 }
 0x4bc   : >> { %v4469_v60 = vsel %vm1111_vm7, %v1110_v37, %v6787_v59 }
 0x4bd   : >> { %6788 = vst [vmem:[#allocation14_spill] sm:$0xff] %v4469_v60  ;;  %vm1116_vm3 = vcmp.eq.s32.totalorder %v4469_v60, %v3683_v49  ;;  %vm1115_vm15 = vcmp.eq.s32.totalorder %v4469_v60, %v3680_v48  ;;  %vm1118_vm14 = vcmp.eq.s32.totalorder %v4469_v60, %v3689_v51  ;;  %vm1117_vm9 = vcmp.eq.s32.totalorder %v4469_v60, %v3686_v50 }
 0x4be   : >> { %v1124_v52 = vsel %vm1116_vm3, 1, %v6789_v53  ;;  %v1123_v54 = vsel %vm1115_vm15, 1, %v6789_v53  ;;  %v1126_v30 = vsel %vm1118_vm14, 1, %v6789_v53  ;;  %v1125_v38 = vsel %vm1117_vm9, 1, %v6789_v53 }
 0x4bf   : >> { %v4484_v2 = vsel %vm200_vm1, %v1124_v52, 2147483648  ;;  %v4487_v10 = vsel %vm200_vm1, %v1123_v54, 2147483648  ;;  %v4490_v7 = vsel %vm200_vm1, %v1126_v30, 2147483648  ;;  %v4493_v62 = vsel %vm200_vm1, %v1125_v38, 2147483648 }
 0x4c0   : >> { %v1148_v4 = vshra.s32 %v4484_v2, 16  ;;  %v1133_v61 = vshra.s32 %v4487_v10, 16  ;;  %vm1120_vm13 = vcmp.eq.s32.totalorder %v4469_v60, %v6782_v42  ;;  %vm1119_vm10 = vcmp.eq.s32.totalorder %v4469_v60, %v6781_v57 }
 0x4c1   : >> { %vm1122_vm8 = vcmp.eq.s32.totalorder %v4469_v60, %v6784_v40  ;;  %vm1121_vm5 = vcmp.eq.s32.totalorder %v4469_v60, %v6783_v43  ;;  %v1178_v34 = vshra.s32 %v4490_v7, 16  ;;  %v1163_v20 = vshra.s32 %v4493_v62, 16 }
 0x4c2   : >> { %v4505_v14 = vcvt.s32.f32 %v1148_v4  ;;  %v4507_v9 = vcvt.s32.f32 %v1133_v61  ;;  %v1128_v35 = vsel %vm1120_vm13, 1, %v6789_v53  ;;  %v1127_v56 = vsel %vm1119_vm10, 1, %v6789_v53 }
 0x4c3   : >> { %v4516_v41 = vsel %vm200_vm1, %v1128_v35, 2147483648  ;;  %v4519_v13 = vsel %vm200_vm1, %v1127_v56, 2147483648  ;;  %v1130_v17 = vsel %vm1122_vm8, 1, %v6789_v53  ;;  %v1129_v44 = vsel %vm1121_vm5, 1, %v6789_v53 }
 0x4c4   : >> { %1151 = vmax.xlane.f32.xlu1 %v4505_v14  ;;  %1136 = vmax.xlane.f32.xlu0 %v4507_v9  ;;  %v4523_v12 = vcvt.s32.f32 %v1178_v34  ;;  %v4525_v18 = vcvt.s32.f32 %v1163_v20  ;;  %v1208_v3 = vshra.s32 %v4516_v41, 16  ;;  %v1193_v8 = vshra.s32 %v4519_v13, 16 }
 0x4c5   : >> { %v4530_v22 = vsel %vm200_vm1, %v1130_v17, 2147483648  ;;  %v4533_v29 = vsel %vm200_vm1, %v1129_v44, 2147483648  ;;  %v1288_v31 = vsel %vm200_vm1, %v4551_v58, -inf  ;;  %v1285_v15 = vsel %vm200_vm1, %v4555_v23, -inf }
 0x4c6   : >> { %v4537_v46 = vcvt.s32.f32 %v1208_v3  ;;  %v4539_v19 = vcvt.s32.f32 %v1193_v8  ;;  %v1238_v45 = vshra.s32 %v4530_v22, 16  ;;  %v1223_v16 = vshra.s32 %v4533_v29, 16 }
 0x4c8   : >> { %1181 = vmax.xlane.f32.xlu1 %v4523_v12  ;;  %1166 = vmax.xlane.f32.xlu0 %v4525_v18  ;;  %v4545_v55 = vcvt.s32.f32 %v1238_v45  ;;  %v4547_v39 = vcvt.s32.f32 %v1223_v16 }
 0x4cc   : >> { %1211 = vmax.xlane.f32.xlu1 %v4537_v46  ;;  %1196 = vmax.xlane.f32.xlu0 %v4539_v19 }
 0x4d0   : >> { %1241 = vmax.xlane.f32.xlu1 %v4545_v55  ;;  %1226 = vmax.xlane.f32.xlu0 %v4547_v39 }
 0x4d4   : >> { %1289 = vmax.xlane.f32.xlu1 %v1288_v31  ;;  %1286 = vmax.xlane.f32.xlu0 %v1285_v15  ;;  %v1147_v31 = vand.u32 65535, %v4484_v2  ;;  %v1132_v15 = vand.u32 65535, %v4487_v10 }
 0x53f   : >> { %v4563_v37 = vpop.xlane.xlu1 %1271  ;;  %v4565_v59 = vpop.xlane.xlu0 %1268 }
 0x540   : >> { %vm1292_vm4 = vcmp.ge.f32.partialorder %v4432_v24, %v4563_v37  ;;  %vm1291_vm7 = vcmp.ge.f32.partialorder %v4436_v11, %v4565_v59 }
 0x541   : >> { %v1300_v52 = vsel %vm1292_vm4, -1e+30, %v4432_v24  ;;  %v1299_v54 = vsel %vm1291_vm7, -1e+30, %v4436_v11 }
 0x542   : >> { %v1310_v30 = vsel %vm200_vm1, %v1300_v52, -inf  ;;  %v1307_v38 = vsel %vm200_vm1, %v1299_v54, -inf }
 0x543   : >> { %v4581_v4 = vpop.xlane.xlu1 %1277  ;;  %v4583_v61 = vpop.xlane.xlu0 %1274  ;;  %1311 = vmax.xlane.f32.xlu1 %v1310_v30  ;;  %1308 = vmax.xlane.f32.xlu0 %v1307_v38  ;;  %v1149_v30 = vcvt.s32.f32 %v1147_v31  ;;  %v1134_v38 = vcvt.s32.f32 %v1132_v15 }
 0x544   : >> { %vm1294_vm0 = vcmp.ge.f32.partialorder %v4444_v36, %v4581_v4  ;;  %vm1293_vm12 = vcmp.ge.f32.partialorder %v4448_v33, %v4583_v61 }
 0x545   : >> { %v1302_v34 = vsel %vm1294_vm0, -1e+30, %v4444_v36  ;;  %v1301_v20 = vsel %vm1293_vm12, -1e+30, %v4448_v33 }
 0x546   : >> { %v1316_v35 = vsel %vm200_vm1, %v1302_v34, -inf  ;;  %v1313_v56 = vsel %vm200_vm1, %v1301_v20, -inf  ;;  %v1177_v34 = vand.u32 65535, %v4490_v7  ;;  %v1162_v20 = vand.u32 65535, %v4493_v62 }
 0x547   : >> { %v4599_v17 = vpop.xlane.xlu1 %1283  ;;  %v4601_v44 = vpop.xlane.xlu0 %1280  ;;  %1317 = vmax.xlane.f32.xlu1 %v1316_v35  ;;  %1314 = vmax.xlane.f32.xlu0 %v1313_v56  ;;  %v1207_v7 = vand.u32 65535, %v4516_v41  ;;  %v1192_v62 = vand.u32 65535, %v4519_v13  ;;  %v1222_v41 = vand.u32 65535, %v4533_v29 }
 0x548   : >> { %vm1296_vm6 = vcmp.ge.f32.partialorder %v4456_v32, %v4599_v17  ;;  %vm1295_vm2 = vcmp.ge.f32.partialorder %v4460_v1, %v4601_v44 }
 0x549   : >> { %v1304_v3 = vsel %vm1296_vm6, -1e+30, %v4456_v32  ;;  %v1303_v8 = vsel %vm1295_vm2, -1e+30, %v4460_v1  ;;  %v1209_v31 = vcvt.s32.f32 %v1207_v7  ;;  %v1194_v15 = vcvt.s32.f32 %v1192_v62 }
 0x54a   : >> { %v1322_v45 = vsel %vm200_vm1, %v1304_v3, -inf  ;;  %v1319_v16 = vsel %vm200_vm1, %v1303_v8, -inf  ;;  %v1179_v3 = vcvt.s32.f32 %v1177_v34  ;;  %v1164_v8 = vcvt.s32.f32 %v1162_v20 }
 0x54b   : >> { %1323 = vmax.xlane.f32.xlu1 %v1322_v45  ;;  %1320 = vmax.xlane.f32.xlu0 %v1319_v16  ;;  %v1224_v20 = vcvt.s32.f32 %v1222_v41 }
 0x551   : >> { %v4619_v52 = vpop.xlane.xlu1 %1151  ;;  %v4621_v54 = vpop.xlane.xlu0 %1136 }
 0x552   : >> { %vm1153_vm11 = vcmp.eq.f32.partialorder %v4505_v14, %v4619_v52  ;;  %vm1138_vm3 = vcmp.eq.f32.partialorder %v4507_v9, %v4621_v54 }
 0x553   : >> { %v1154_v35 = vsel %vm1153_vm11, %v1149_v30, -inf  ;;  %v1139_v2 = vsel %vm1138_vm3, %v1134_v38, -inf  ;;  %v1237_v30 = vand.u32 65535, %v4530_v22 }
 0x554   : >> { %1155 = vmax.xlane.f32.xlu1 %v1154_v35  ;;  %1140 = vmax.xlane.f32.xlu0 %v1139_v2 }
 0x555   : >> { %v4629_v10 = vpop.xlane.xlu1 %1181  ;;  %v4631_v56 = vpop.xlane.xlu0 %1166  ;;  %v1239_v34 = vcvt.s32.f32 %v1237_v30 }
 0x556   : >> { %vm1183_vm15 = vcmp.eq.f32.partialorder %v4523_v12, %v4629_v10  ;;  %vm1168_vm14 = vcmp.eq.f32.partialorder %v4525_v18, %v4631_v56 }
 0x557   : >> { %v1184_v14 = vsel %vm1183_vm15, %v1179_v3, -inf  ;;  %v1169_v9 = vsel %vm1168_vm14, %v1164_v8, -inf }
 0x558   : >> { %1185 = vmax.xlane.f32.xlu1 %v1184_v14  ;;  %1170 = vmax.xlane.f32.xlu0 %v1169_v9 }
 0x559   : >> { %v1212_v45 = vpop.xlane.xlu1 %1211  ;;  %v1197_v16 = vpop.xlane.xlu0 %1196 }
 0x55a   : >> { %vm1213_vm9 = vcmp.eq.f32.partialorder %v4537_v46, %v1212_v45  ;;  %vm1198_vm13 = vcmp.eq.f32.partialorder %v4539_v19, %v1197_v16 }
 0x55b   : >> { %v1214_v13 = vsel %vm1213_vm9, %v1209_v31, -inf  ;;  %v1199_v12 = vsel %vm1198_vm13, %v1194_v15, -inf  ;;  %v1158_v31 = vcvt.f32.s32 %v4619_v52  ;;  %v1143_v15 = vcvt.f32.s32 %v4621_v54 }
 0x55c   : >> { %1215 = vmax.xlane.f32.xlu1 %v1214_v13  ;;  %1200 = vmax.xlane.f32.xlu0 %v1199_v12 }
 0x55d   : >> { %v1242_v18 = vpop.xlane.xlu1 %1241  ;;  %v1227_v38 = vpop.xlane.xlu0 %1226 }
 0x55e   : >> { %vm1243_vm10 = vcmp.eq.f32.partialorder %v4545_v55, %v1242_v18  ;;  %vm1228_vm8 = vcmp.eq.f32.partialorder %v4547_v39, %v1227_v38  ;;  %v1248_v54 = vcvt.f32.s32 %v1242_v18  ;;  %v1233_v43 = vcvt.f32.s32 %v1227_v38 }
 0x55f   : >> { %v1244_v35 = vsel %vm1243_vm10, %v1239_v34, -inf  ;;  %v1229_v22 = vsel %vm1228_vm8, %v1224_v20, -inf  ;;  %v1159_v34 = vshll.u32 %v1158_v31, 16  ;;  %v1188_v20 = vcvt.f32.s32 %v4629_v10 }
 0x560   : >> { %1245 = vmax.xlane.f32.xlu1 %v1244_v35  ;;  %1230 = vmax.xlane.f32.xlu0 %v1229_v22  ;;  %v1144_v35 = vshll.u32 %v1143_v15, 16  ;;  %v1173_v22 = vcvt.f32.s32 %v4631_v56 }
 0x561   : >> { %v4645_v29 = vpop.xlane.xlu1 %1289  ;;  %v4647_v46 = vpop.xlane.xlu0 %1286  ;;  %v1189_v40 = vshll.u32 %v1188_v20, 16 }
 0x562   : >> { %vm1298_vm5 = vcmp.ge.f32.partialorder %v4551_v58, %v4645_v29  ;;  %vm1297_vm11 = vcmp.ge.f32.partialorder %v4555_v23, %v4647_v46  ;;  %v1174_v42 = vshll.u32 %v1173_v22, 16 }
 0x563   : >> { %v1306_v19 = vsel %vm1298_vm5, -1e+30, %v4551_v58  ;;  %v1305_v55 = vsel %vm1297_vm11, -1e+30, %v4555_v23 }
 0x564   : >> { %v1328_v39 = vsel %vm200_vm1, %v1306_v19, -inf  ;;  %v1325_v2 = vsel %vm200_vm1, %v1305_v55, -inf  ;;  %v1218_v19 = vcvt.f32.s32 %v1212_v45  ;;  %v1203_v55 = vcvt.f32.s32 %v1197_v16 }
 0x565   : >> { %1329 = vmax.xlane.f32.xlu1 %v1328_v39  ;;  %1326 = vmax.xlane.f32.xlu0 %v1325_v2 }
 0x5d0   : >> { %v1312_v3 = vpop.xlane.xlu1 %1311  ;;  %v4663_v8 = vpop.xlane.xlu0 %1308 }
 0x5d1   : >> { %v1356_v18 = vsub.f32 %v3979_v21, %v1312_v3  ;;  %v1355_v20 = vsub.f32 %v3979_v21, %v4663_v8 }
 0x5d3   : >> { %v1364_v11 = vsub.f32 %v1356_v18, %v3610_v0 }
 0x5d4   : >> { %v4665_v7 = vpop.xlane.xlu1 %1317  ;;  %v4667_v62 = vpop.xlane.xlu0 %1314 }
 0x5d8   : >> { %v1324_v14 = vpop.xlane.xlu1 %1323  ;;  %v1321_v9 = vpop.xlane.xlu0 %1320 }
 0x5d9   : >> { %v1360_v10 = vsub.f32 %v3979_v21, %v1324_v14  ;;  %v1359_v16 = vsub.f32 %v3979_v21, %v1321_v9 }
 0x5db   : >> { %v1368_v24 = vsub.f32 %v1360_v10, %v3608_v63  ;;  %v1367_v37 = vsub.f32 %v1359_v16, %v3614_v6 }
 0x5e1   : >> { %v1156_v30 = vpop.xlane.xlu1 %1155  ;;  %v1141_v41 = vpop.xlane.xlu0 %1140 }
 0x5e2   : >> { %v1157_v13 = vcvt.f32.s32 %v1156_v30  ;;  %v1142_v12 = vcvt.f32.s32 %v1141_v41  ;;  %v1219_v30 = vshll.u32 %v1218_v19, 16  ;;  %v1204_v41 = vshll.u32 %v1203_v55, 16 }
 0x5e4   : >> { %v1160_v53 = vadd.s32 %v1159_v34, %v1157_v13  ;;  %v1145_v47 = vadd.s32 %v1144_v35, %v1142_v12  ;;  %v1249_v12 = vshll.u32 %v1248_v54, 16  ;;  %v1234_v34 = vshll.u32 %v1233_v43, 16 }
 0x5e5   : >> { %v1186_v39 = vpop.xlane.xlu1 %1185  ;;  %v1171_v2 = vpop.xlane.xlu0 %1170  ;;  %v1358_v35 = vsub.f32 %v3979_v21, %v4665_v7  ;;  %v1363_v7 = vsub.f32 %v1355_v20, %v3612_v5 }
 0x5e6   : >> { %v1187_v60 = vcvt.f32.s32 %v1186_v39  ;;  %v1172_v52 = vcvt.f32.s32 %v1171_v2  ;;  %vm1252_vm3 = vcmp.eq.s32.totalorder %v1160_v53, 0  ;;  %vm1251_vm15 = vcmp.eq.s32.totalorder %v1145_v47, 0 }
 0x5e7   : >> { %vm4685_vm14 = vmand %vm1292_vm4, %vm1252_vm3  ;;  %v1366_v14 = vsub.f32 %v1358_v35, %v3646_v26 }
 0x5e8   : >> { %v1190_v56 = vadd.s32 %v1189_v40, %v1187_v60  ;;  %v1175_v15 = vadd.s32 %v1174_v42, %v1172_v52  ;;  %v1357_v40 = vsub.f32 %v3979_v21, %v4667_v62  ;;  %vm4692_vm9 = vmand %vm1291_vm7, %vm1251_vm15  ;;  %v1372_v1 = vsel %vm4685_vm14, %v1364_v11, -1e+30  ;;  %v6796_v60 = vld [vmem:[#allocation10_spill] sm:$0xff] }
 0x5e9   : >> { %v1216_v31 = vpop.xlane.xlu1 %1215  ;;  %v1201_v57 = vpop.xlane.xlu0 %1200  ;;  %v1371_v4 = vsel %vm4692_vm9, %v1363_v7, -1e+30  ;;  %v1380_v54 = vsel %vm200_vm1, %v1372_v1, -inf }
 0x5ea   : >> { %v1217_v45 = vcvt.f32.s32 %v1216_v31  ;;  %v1202_v13 = vcvt.f32.s32 %v1201_v57  ;;  %vm1254_vm13 = vcmp.eq.s32.totalorder %v1190_v56, 0  ;;  %vm1253_vm4 = vcmp.eq.s32.totalorder %v1175_v15, 0 }
 0x5eb   : >> { %vm4709_vm15 = vmand %vm1294_vm0, %vm1254_vm13  ;;  %v1365_v9 = vsub.f32 %v1357_v40, %v3648_v27 }
 0x5ec   : >> { %v1220_v38 = vadd.s32 %v1219_v30, %v1217_v45  ;;  %v1205_v57 = vadd.s32 %v1204_v41, %v1202_v13  ;;  %v1374_v2 = vsel %vm4709_vm15, %v1366_v14, -1e+30  ;;  %v1379_v30 = vsel %vm200_vm1, %v1371_v4, -inf }
 0x5ed   : >> { %v1246_v43 = vpop.xlane.xlu1 %1245  ;;  %v1231_v47 = vpop.xlane.xlu0 %1230  ;;  %v1382_v45 = vsel %vm200_vm1, %v1374_v2, -inf }
 0x5ee   : >> { %vm1256_vm10 = vcmp.eq.s32.totalorder %v1220_v38, 0  ;;  %v1247_v53 = vcvt.f32.s32 %v1246_v43  ;;  %v1232_v3 = vcvt.f32.s32 %v1231_v47  ;;  %vm1255_vm3 = vcmp.eq.s32.totalorder %v1205_v57, 0 }
 0x5ef   : >> { %vm1352_vm8 = vmand %vm1296_vm6, %vm1256_vm10 }
 0x5f0   : >> { %vm1351_vm7 = vmand %vm1295_vm2, %vm1255_vm3  ;;  %v1250_v59 = vadd.s32 %v1249_v12, %v1247_v53  ;;  %v1235_v8 = vadd.s32 %v1234_v34, %v1232_v3  ;;  %v1376_v32 = vsel %vm1352_vm8, %v1368_v24, -1e+30  ;;  %v6797_v3 = vld [vmem:[#allocation11_spill] sm:$0xff] }
 0x5f1   : >> { %v1375_v17 = vsel %vm1351_vm7, %v1367_v37, -1e+30  ;;  %vm1349_vm6 = vmand %vm1293_vm12, %vm1253_vm4  ;;  %v1385_v55 = vsel %vm200_vm1, %v1376_v32, -inf  ;;  %v6798_v37 = vld [vmem:[#allocation12_spill] sm:$0xff] }
 0x5f2   : >> { %vm1258_vm2 = vcmp.eq.s32.totalorder %v1250_v59, 0  ;;  %v1330_v44 = vpop.xlane.xlu1 %1329  ;;  %v1327_v36 = vpop.xlane.xlu0 %1326  ;;  %vm1257_vm0 = vcmp.eq.s32.totalorder %v1235_v8, 0  ;;  %v1383_v39 = vsel %vm200_vm1, %v1375_v17, -inf  ;;  %v1373_v33 = vsel %vm1349_vm6, %v1365_v9, -1e+30  ;;  %v6799_v59 = vld [vmem:[#allocation13_spill] sm:$0xff] }
 0x5f3   : >> { %v1362_v22 = vsub.f32 %v3979_v21, %v1330_v44  ;;  %v1361_v19 = vsub.f32 %v3979_v21, %v1327_v36  ;;  %vm1354_vm12 = vmand %vm1298_vm5, %vm1258_vm2  ;;  %v1386_v41 = vmax.f32 %v1380_v54, %v1385_v55  ;;  %v1384_v31 = vmax.f32 %v1379_v30, %v1383_v39 }
 0x5f4   : >> { %vm1353_vm14 = vmand %vm1297_vm11, %vm1257_vm0  ;;  %v1381_v29 = vsel %vm200_vm1, %v1373_v33, -inf }
 0x5f5   : >> { %v1370_v61 = vsub.f32 %v1362_v22, %v3644_v25  ;;  %v1369_v52 = vsub.f32 %v1361_v19, %v3650_v28  ;;  %v1391_v12 = vmax.f32 %v1384_v31, %v1386_v41 }
 0x5f7   : >> { %v1378_v10 = vsel %vm1354_vm12, %v1370_v61, -1e+30  ;;  %v1377_v56 = vsel %vm1353_vm14, %v1369_v52, -1e+30 }
 0x5f8   : >> { %v1389_v58 = vsel %vm200_vm1, %v1378_v10, -inf  ;;  %v1387_v16 = vsel %vm200_vm1, %v1377_v56, -inf }
 0x5f9   : >> { %v1390_v15 = vmax.f32 %v1382_v45, %v1389_v58  ;;  %v1388_v13 = vmax.f32 %v1381_v29, %v1387_v16 }
 0x5fb   : >> { %v1392_v34 = vmax.f32 %v1388_v13, %v1390_v15 }
 0x5fd   : >> { %v1393_v18 = vmax.f32 %v1391_v12, %v1392_v34 }
 0x5ff   : >> { %v1394_v38 = vrot.slane %v1393_v18, 4 }
 0x601   : >> { %v1395_v23 = vmax.f32 %v1393_v18, %v1394_v38 }
 0x603   : >> { %v1396_v46 = vrot.slane %v1395_v23, 2 }
 0x605   : >> { %v1397_v20 = vmax.f32 %v1395_v23, %v1396_v46 }
 0x607   : >> { %v1398_v35 = vrot.slane %v1397_v20, 1 }
 0x609   : >> { %v4742_v40 = vmax.f32 %v1397_v20, %v1398_v35  ;;  %v6802_v20 = vld [vmem:[#allocation14_spill] sm:$0xff] }
 0x60b   : >> { %vm1400_vm5 = vcmp.ge.f32.partialorder %v1371_v4, %v4742_v40  ;;  %vm1401_vm11 = vcmp.ge.f32.partialorder %v1372_v1, %v4742_v40  ;;  %vm1402_vm9 = vcmp.ge.f32.partialorder %v1373_v33, %v4742_v40  ;;  %vm1403_vm13 = vcmp.ge.f32.partialorder %v1374_v2, %v4742_v40  ;;  %v6800_v33 = vld [vmem:[#allocation15_spill] sm:$0xff] }
 0x60c   : >> { %vm1404_vm10 = vcmp.ge.f32.partialorder %v1375_v17, %v4742_v40  ;;  %vm1405_vm4 = vcmp.ge.f32.partialorder %v1376_v32, %v4742_v40  ;;  %vm1406_vm8 = vcmp.ge.f32.partialorder %v1377_v56, %v4742_v40  ;;  %vm1407_vm3 = vcmp.ge.f32.partialorder %v1378_v10, %v4742_v40 }
 0x60d   : >> { %v1408_v42 = vsel %vm1400_vm5, %v3680_v48, 64  ;;  %v1409_v57 = vsel %vm1401_vm11, %v3683_v49, 64  ;;  %v1410_v43 = vsel %vm1402_vm9, %v3686_v50, 64  ;;  %v1411_v47 = vsel %vm1403_vm13, %v3689_v51, 64 }
 0x60e   : >> { %v1412_v53 = vsel %vm1404_vm10, %v6796_v60, 64  ;;  %v1413_v24 = vsel %vm1405_vm4, %v6797_v3, 64  ;;  %v1414_v11 = vsel %vm1406_vm8, %v6798_v37, 64  ;;  %v1415_v8 = vsel %vm1407_vm3, %v6799_v59, 64 }
 0x60f   : >> { %v1416_v7 = vsel %vm200_vm1, %v1408_v42, 2147483647  ;;  %v1417_v62 = vsel %vm200_vm1, %v1409_v57, 2147483647  ;;  %v1418_v32 = vsel %vm200_vm1, %v1410_v43, 2147483647 }
 0x610   : >> { %v1419_v17 = vsel %vm200_vm1, %v1411_v47, 2147483647  ;;  %v1420_v14 = vsel %vm200_vm1, %v1412_v53, 2147483647  ;;  %v1423_v9 = vsel %vm200_vm1, %v1413_v24, 2147483647 }
 0x611   : >> { %vm1421_vm7 = vcmp.lt.s32.totalorder %v1416_v7, %v1420_v14  ;;  %vm1424_vm15 = vcmp.lt.s32.totalorder %v1417_v62, %v1423_v9  ;;  %v1426_v1 = vsel %vm200_vm1, %v1414_v11, 2147483647  ;;  %v1429_v44 = vsel %vm200_vm1, %v1415_v8, 2147483647 }
 0x612   : >> { %v1422_v36 = vsel %vm1421_vm7, %v1416_v7, %v1420_v14  ;;  %v1425_v4 = vsel %vm1424_vm15, %v1417_v62, %v1423_v9  ;;  %vm1427_vm6 = vcmp.lt.s32.totalorder %v1418_v32, %v1426_v1  ;;  %vm1430_vm2 = vcmp.lt.s32.totalorder %v1419_v17, %v1429_v44 }
 0x613   : >> { %v1428_v22 = vsel %vm1427_vm6, %v1418_v32, %v1426_v1  ;;  %v1431_v19 = vsel %vm1430_vm2, %v1419_v17, %v1429_v44  ;;  %vm1432_vm0 = vcmp.lt.s32.totalorder %v1422_v36, %v1425_v4  ;;  %vm1447_vm12 = vcmp.gt.f32.partialorder %v4742_v40, -1e+29 }
 0x614   : >> { %v1433_v55 = vsel %vm1432_vm0, %v1422_v36, %v1425_v4  ;;  %vm1434_vm14 = vcmp.lt.s32.totalorder %v1428_v22, %v1431_v19  ;;  %v1448_v39 = vsub.f32 0.0, %v4742_v40  ;;  %v6804_v42 = vmov 0  }
 0x615   : >> { %v1435_v2 = vsel %vm1434_vm14, %v1428_v22, %v1431_v19 }
 0x616   : >> { %vm1436_vm5 = vcmp.lt.s32.totalorder %v1433_v55, %v1435_v2  ;;  %v4773_v61 = vsel %vm1447_vm12, %v1448_v39, %v6800_v33 }
 0x617   : >> { %6801 = vst [vmem:[#allocation15_spill] sm:$0xff] %v4773_v61  ;;  %v1437_v52 = vsel %vm1436_vm5, %v1433_v55, %v1435_v2  ;;  %v4777_v54 = vsub.f32 %v4773_v61, %v3610_v0  ;;  %v4781_v30 = vsub.f32 %v4773_v61, %v3612_v5  ;;  %v4789_v56 = vsub.f32 %v4773_v61, %v3646_v26 }
 0x618   : >> { %v1438_v41 = vrot.slane %v1437_v52, 4  ;;  %v4793_v45 = vsub.f32 %v4773_v61, %v3648_v27  ;;  %v4801_v13 = vsub.f32 %v4773_v61, %v3608_v63  ;;  %v4805_v12 = vsub.f32 %v4773_v61, %v3614_v6 }
 0x619   : >> { %v1606_v31 = vsel %vm200_vm1, %v4777_v54, -inf  ;;  %v1603_v10 = vsel %vm200_vm1, %v4781_v30, -inf  ;;  %v1612_v16 = vsel %vm200_vm1, %v4789_v56, -inf }
 0x61a   : >> { %vm1439_vm11 = vcmp.lt.s32.totalorder %v1437_v52, %v1438_v41  ;;  %1607 = vmax.xlane.f32.xlu1 %v1606_v31  ;;  %1604 = vmax.xlane.f32.xlu0 %v1603_v10  ;;  %v1609_v15 = vsel %vm200_vm1, %v4793_v45, -inf  ;;  %v1618_v38 = vsel %vm200_vm1, %v4801_v13, -inf  ;;  %v1615_v23 = vsel %vm200_vm1, %v4805_v12, -inf }
 0x61b   : >> { %v1440_v58 = vsel %vm1439_vm11, %v1437_v52, %v1438_v41 }
 0x61c   : >> { %v1441_v29 = vrot.slane %v1440_v58, 2 }
 0x61e   : >> { %vm1442_vm9 = vcmp.lt.s32.totalorder %v1440_v58, %v1441_v29  ;;  %1613 = vmax.xlane.f32.xlu1 %v1612_v16  ;;  %1610 = vmax.xlane.f32.xlu0 %v1609_v15 }
 0x61f   : >> { %v1443_v34 = vsel %vm1442_vm9, %v1440_v58, %v1441_v29 }
 0x620   : >> { %v1444_v18 = vrot.slane %v1443_v34, 1 }
 0x622   : >> { %vm1445_vm13 = vcmp.lt.s32.totalorder %v1443_v34, %v1444_v18  ;;  %1619 = vmax.xlane.f32.xlu1 %v1618_v38  ;;  %1616 = vmax.xlane.f32.xlu0 %v1615_v23 }
 0x623   : >> { %v1446_v46 = vsel %vm1445_vm13, %v1443_v34, %v1444_v18  ;;  %v4896_v34 = vsub.f32 %v4773_v61, %v3644_v25  ;;  %v4900_v18 = vsub.f32 %v4773_v61, %v3650_v28 }
 0x624   : >> { %v4814_v35 = vsel %vm1447_vm12, %v1446_v46, %v6802_v20 }
 0x625   : >> { %6803 = vst [vmem:[#allocation14_spill] sm:$0xff] %v4814_v35  ;;  %vm1452_vm10 = vcmp.eq.s32.totalorder %v4814_v35, %v3683_v49  ;;  %vm1451_vm4 = vcmp.eq.s32.totalorder %v4814_v35, %v3680_v48  ;;  %vm1454_vm8 = vcmp.eq.s32.totalorder %v4814_v35, %v3689_v51  ;;  %vm1453_vm3 = vcmp.eq.s32.totalorder %v4814_v35, %v3686_v50 }
 0x626   : >> { %v1460_v57 = vsel %vm1452_vm10, 1, %v6804_v42  ;;  %v1459_v43 = vsel %vm1451_vm4, 1, %v6804_v42  ;;  %v1462_v40 = vsel %vm1454_vm8, 1, %v6804_v42  ;;  %v1461_v47 = vsel %vm1453_vm3, 1, %v6804_v42 }
 0x627   : >> { %v4829_v53 = vsel %vm200_vm1, %v1460_v57, 2147483648  ;;  %v4832_v24 = vsel %vm200_vm1, %v1459_v43, 2147483648  ;;  %v4835_v11 = vsel %vm200_vm1, %v1462_v40, 2147483648  ;;  %v4838_v8 = vsel %vm200_vm1, %v1461_v47, 2147483648 }
 0x628   : >> { %v1484_v7 = vshra.s32 %v4829_v53, 16  ;;  %v1469_v62 = vshra.s32 %v4832_v24, 16  ;;  %vm1456_vm7 = vcmp.eq.s32.totalorder %v4814_v35, %v6797_v3  ;;  %vm1455_vm15 = vcmp.eq.s32.totalorder %v4814_v35, %v6796_v60 }
 0x629   : >> { %vm1458_vm6 = vcmp.eq.s32.totalorder %v4814_v35, %v6799_v59  ;;  %vm1457_vm2 = vcmp.eq.s32.totalorder %v4814_v35, %v6798_v37  ;;  %v1514_v14 = vshra.s32 %v4835_v11, 16  ;;  %v1499_v9 = vshra.s32 %v4838_v8, 16 }
 0x62a   : >> { %v4850_v32 = vcvt.s32.f32 %v1484_v7  ;;  %v4852_v17 = vcvt.s32.f32 %v1469_v62  ;;  %v1464_v1 = vsel %vm1456_vm7, 1, %v6804_v42  ;;  %v1463_v44 = vsel %vm1455_vm15, 1, %v6804_v42 }
 0x62b   : >> { %v4861_v36 = vsel %vm200_vm1, %v1464_v1, 2147483648  ;;  %v4864_v4 = vsel %vm200_vm1, %v1463_v44, 2147483648  ;;  %v1466_v22 = vsel %vm1458_vm6, 1, %v6804_v42  ;;  %v1465_v19 = vsel %vm1457_vm2, 1, %v6804_v42 }
 0x62c   : >> { %1487 = vmax.xlane.f32.xlu1 %v4850_v32  ;;  %1472 = vmax.xlane.f32.xlu0 %v4852_v17  ;;  %v4868_v55 = vcvt.s32.f32 %v1514_v14  ;;  %v4870_v39 = vcvt.s32.f32 %v1499_v9  ;;  %v1544_v2 = vshra.s32 %v4861_v36, 16  ;;  %v1529_v33 = vshra.s32 %v4864_v4, 16 }
 0x62d   : >> { %v4875_v52 = vsel %vm200_vm1, %v1466_v22, 2147483648  ;;  %v4878_v41 = vsel %vm200_vm1, %v1465_v19, 2147483648  ;;  %v1624_v38 = vsel %vm200_vm1, %v4896_v34, -inf  ;;  %v1621_v23 = vsel %vm200_vm1, %v4900_v18, -inf }
 0x62e   : >> { %v4882_v31 = vcvt.s32.f32 %v1544_v2  ;;  %v4884_v10 = vcvt.s32.f32 %v1529_v33  ;;  %v1574_v58 = vshra.s32 %v4875_v52, 16  ;;  %v1559_v29 = vshra.s32 %v4878_v41, 16 }
 0x630   : >> { %1517 = vmax.xlane.f32.xlu1 %v4868_v55  ;;  %1502 = vmax.xlane.f32.xlu0 %v4870_v39  ;;  %v4890_v16 = vcvt.s32.f32 %v1574_v58  ;;  %v4892_v15 = vcvt.s32.f32 %v1559_v29 }
 0x634   : >> { %1547 = vmax.xlane.f32.xlu1 %v4882_v31  ;;  %1532 = vmax.xlane.f32.xlu0 %v4884_v10 }
 0x638   : >> { %1577 = vmax.xlane.f32.xlu1 %v4890_v16  ;;  %1562 = vmax.xlane.f32.xlu0 %v4892_v15 }
 0x63c   : >> { %1625 = vmax.xlane.f32.xlu1 %v1624_v38  ;;  %1622 = vmax.xlane.f32.xlu0 %v1621_v23  ;;  %v1483_v38 = vand.u32 65535, %v4829_v53  ;;  %v1468_v23 = vand.u32 65535, %v4832_v24 }
 0x6a7   : >> { %v4908_v46 = vpop.xlane.xlu1 %1607  ;;  %v4910_v20 = vpop.xlane.xlu0 %1604 }
 0x6a8   : >> { %vm1628_vm0 = vcmp.ge.f32.partialorder %v4777_v54, %v4908_v46  ;;  %vm1627_vm12 = vcmp.ge.f32.partialorder %v4781_v30, %v4910_v20 }
 0x6a9   : >> { %v1636_v57 = vsel %vm1628_vm0, -1e+30, %v4777_v54  ;;  %v1635_v43 = vsel %vm1627_vm12, -1e+30, %v4781_v30 }
 0x6aa   : >> { %v1646_v40 = vsel %vm200_vm1, %v1636_v57, -inf  ;;  %v1643_v47 = vsel %vm200_vm1, %v1635_v43, -inf }
 0x6ab   : >> { %v4926_v7 = vpop.xlane.xlu1 %1613  ;;  %v4928_v62 = vpop.xlane.xlu0 %1610  ;;  %1647 = vmax.xlane.f32.xlu1 %v1646_v40  ;;  %1644 = vmax.xlane.f32.xlu0 %v1643_v47  ;;  %v1485_v40 = vcvt.s32.f32 %v1483_v38  ;;  %v1470_v47 = vcvt.s32.f32 %v1468_v23 }
 0x6ac   : >> { %vm1630_vm14 = vcmp.ge.f32.partialorder %v4789_v56, %v4926_v7  ;;  %vm1629_vm5 = vcmp.ge.f32.partialorder %v4793_v45, %v4928_v62 }
 0x6ad   : >> { %v1638_v14 = vsel %vm1630_vm14, -1e+30, %v4789_v56  ;;  %v1637_v9 = vsel %vm1629_vm5, -1e+30, %v4793_v45 }
 0x6ae   : >> { %v1652_v1 = vsel %vm200_vm1, %v1638_v14, -inf  ;;  %v1649_v44 = vsel %vm200_vm1, %v1637_v9, -inf  ;;  %v1513_v14 = vand.u32 65535, %v4835_v11  ;;  %v1498_v9 = vand.u32 65535, %v4838_v8 }
 0x6af   : >> { %v4944_v22 = vpop.xlane.xlu1 %1619  ;;  %v4946_v19 = vpop.xlane.xlu0 %1616  ;;  %1653 = vmax.xlane.f32.xlu1 %v1652_v1  ;;  %1650 = vmax.xlane.f32.xlu0 %v1649_v44  ;;  %v1543_v11 = vand.u32 65535, %v4861_v36  ;;  %v1528_v8 = vand.u32 65535, %v4864_v4  ;;  %v1558_v36 = vand.u32 65535, %v4878_v41 }
 0x6b0   : >> { %vm1632_vm11 = vcmp.ge.f32.partialorder %v4801_v13, %v4944_v22  ;;  %vm1631_vm9 = vcmp.ge.f32.partialorder %v4805_v12, %v4946_v19 }
 0x6b1   : >> { %v1640_v2 = vsel %vm1632_vm11, -1e+30, %v4801_v13  ;;  %v1639_v33 = vsel %vm1631_vm9, -1e+30, %v4805_v12  ;;  %v1545_v38 = vcvt.s32.f32 %v1543_v11  ;;  %v1530_v23 = vcvt.s32.f32 %v1528_v8 }
 0x6b2   : >> { %v1658_v58 = vsel %vm200_vm1, %v1640_v2, -inf  ;;  %v1655_v29 = vsel %vm200_vm1, %v1639_v33, -inf  ;;  %v1515_v2 = vcvt.s32.f32 %v1513_v14  ;;  %v1500_v33 = vcvt.s32.f32 %v1498_v9 }
 0x6b3   : >> { %1659 = vmax.xlane.f32.xlu1 %v1658_v58  ;;  %1656 = vmax.xlane.f32.xlu0 %v1655_v29  ;;  %v1560_v9 = vcvt.s32.f32 %v1558_v36 }
 0x6b9   : >> { %v4964_v57 = vpop.xlane.xlu1 %1487  ;;  %v4966_v43 = vpop.xlane.xlu0 %1472 }
 0x6ba   : >> { %vm1489_vm13 = vcmp.eq.f32.partialorder %v4850_v32, %v4964_v57  ;;  %vm1474_vm10 = vcmp.eq.f32.partialorder %v4852_v17, %v4966_v43 }
 0x6bb   : >> { %v1490_v1 = vsel %vm1489_vm13, %v1485_v40, -inf  ;;  %v1475_v53 = vsel %vm1474_vm10, %v1470_v47, -inf  ;;  %v1573_v40 = vand.u32 65535, %v4875_v52 }
 0x6bc   : >> { %1491 = vmax.xlane.f32.xlu1 %v1490_v1  ;;  %1476 = vmax.xlane.f32.xlu0 %v1475_v53 }
 0x6bd   : >> { %v4974_v24 = vpop.xlane.xlu1 %1517  ;;  %v4976_v44 = vpop.xlane.xlu0 %1502  ;;  %v1575_v14 = vcvt.s32.f32 %v1573_v40 }
 0x6be   : >> { %vm1519_vm4 = vcmp.eq.f32.partialorder %v4868_v55, %v4974_v24  ;;  %vm1504_vm8 = vcmp.eq.f32.partialorder %v4870_v39, %v4976_v44 }
 0x6bf   : >> { %v1520_v32 = vsel %vm1519_vm4, %v1515_v2, -inf  ;;  %v1505_v17 = vsel %vm1504_vm8, %v1500_v33, -inf }
 0x6c0   : >> { %1521 = vmax.xlane.f32.xlu1 %v1520_v32  ;;  %1506 = vmax.xlane.f32.xlu0 %v1505_v17 }
 0x6c1   : >> { %v1548_v58 = vpop.xlane.xlu1 %1547  ;;  %v1533_v29 = vpop.xlane.xlu0 %1532 }
 0x6c2   : >> { %vm1549_vm3 = vcmp.eq.f32.partialorder %v4882_v31, %v1548_v58  ;;  %vm1534_vm7 = vcmp.eq.f32.partialorder %v4884_v10, %v1533_v29 }
 0x6c3   : >> { %v1550_v4 = vsel %vm1549_vm3, %v1545_v38, -inf  ;;  %v1535_v55 = vsel %vm1534_vm7, %v1530_v23, -inf  ;;  %v1494_v38 = vcvt.f32.s32 %v4964_v57  ;;  %v1479_v23 = vcvt.f32.s32 %v4966_v43 }
 0x6c4   : >> { %1551 = vmax.xlane.f32.xlu1 %v1550_v4  ;;  %1536 = vmax.xlane.f32.xlu0 %v1535_v55 }
 0x6c5   : >> { %v1578_v39 = vpop.xlane.xlu1 %1577  ;;  %v1563_v47 = vpop.xlane.xlu0 %1562 }
 0x6c6   : >> { %vm1579_vm15 = vcmp.eq.f32.partialorder %v4890_v16, %v1578_v39  ;;  %vm1564_vm6 = vcmp.eq.f32.partialorder %v4892_v15, %v1563_v47  ;;  %v1584_v43 = vcvt.f32.s32 %v1578_v39  ;;  %v1569_v37 = vcvt.f32.s32 %v1563_v47 }
 0x6c7   : >> { %v1580_v1 = vsel %vm1579_vm15, %v1575_v14, -inf  ;;  %v1565_v52 = vsel %vm1564_vm6, %v1560_v9, -inf  ;;  %v1495_v14 = vshll.u32 %v1494_v38, 16  ;;  %v1524_v9 = vcvt.f32.s32 %v4974_v24 }
 0x6c8   : >> { %1581 = vmax.xlane.f32.xlu1 %v1580_v1  ;;  %1566 = vmax.xlane.f32.xlu0 %v1565_v52  ;;  %v1480_v1 = vshll.u32 %v1479_v23, 16  ;;  %v1509_v52 = vcvt.f32.s32 %v4976_v44 }
 0x6c9   : >> { %v4990_v41 = vpop.xlane.xlu1 %1625  ;;  %v4992_v31 = vpop.xlane.xlu0 %1622  ;;  %v1525_v59 = vshll.u32 %v1524_v9, 16 }
 0x6ca   : >> { %vm1634_vm2 = vcmp.ge.f32.partialorder %v4896_v34, %v4990_v41  ;;  %vm1633_vm13 = vcmp.ge.f32.partialorder %v4900_v18, %v4992_v31  ;;  %v1510_v3 = vshll.u32 %v1509_v52, 16 }
 0x6cb   : >> { %v1642_v10 = vsel %vm1634_vm2, -1e+30, %v4896_v34  ;;  %v1641_v16 = vsel %vm1633_vm13, -1e+30, %v4900_v18 }
 0x6cc   : >> { %v1664_v15 = vsel %vm200_vm1, %v1642_v10, -inf  ;;  %v1661_v53 = vsel %vm200_vm1, %v1641_v16, -inf  ;;  %v1554_v10 = vcvt.f32.s32 %v1548_v58  ;;  %v1539_v16 = vcvt.f32.s32 %v1533_v29 }
 0x6cd   : >> { %1665 = vmax.xlane.f32.xlu1 %v1664_v15  ;;  %1662 = vmax.xlane.f32.xlu0 %v1661_v53 }
 0x738   : >> { %v1648_v2 = vpop.xlane.xlu1 %1647  ;;  %v5008_v33 = vpop.xlane.xlu0 %1644 }
 0x739   : >> { %v1692_v39 = vsub.f32 %v3979_v21, %v1648_v2  ;;  %v1691_v9 = vsub.f32 %v3979_v21, %v5008_v33 }
 0x73b   : >> { %v1700_v30 = vsub.f32 %v1692_v39, %v3610_v0 }
 0x73c   : >> { %v5010_v11 = vpop.xlane.xlu1 %1653  ;;  %v5012_v8 = vpop.xlane.xlu0 %1650 }
 0x740   : >> { %v1660_v32 = vpop.xlane.xlu1 %1659  ;;  %v1657_v17 = vpop.xlane.xlu0 %1656 }
 0x741   : >> { %v1696_v24 = vsub.f32 %v3979_v21, %v1660_v32  ;;  %v1695_v29 = vsub.f32 %v3979_v21, %v1657_v17 }
 0x743   : >> { %v1704_v54 = vsub.f32 %v1696_v24, %v3608_v63  ;;  %v1703_v46 = vsub.f32 %v1695_v29, %v3614_v6 }
 0x749   : >> { %v1492_v40 = vpop.xlane.xlu1 %1491  ;;  %v1477_v36 = vpop.xlane.xlu0 %1476 }
 0x74a   : >> { %v1493_v4 = vcvt.f32.s32 %v1492_v40  ;;  %v1478_v55 = vcvt.f32.s32 %v1477_v36  ;;  %v1555_v40 = vshll.u32 %v1554_v10, 16  ;;  %v1540_v36 = vshll.u32 %v1539_v16, 16 }
 0x74c   : >> { %v1496_v42 = vadd.s32 %v1495_v14, %v1493_v4  ;;  %v1481_v61 = vadd.s32 %v1480_v1, %v1478_v55  ;;  %v1585_v55 = vshll.u32 %v1584_v43, 16  ;;  %v1570_v14 = vshll.u32 %v1569_v37, 16 }
 0x74d   : >> { %v1522_v15 = vpop.xlane.xlu1 %1521  ;;  %v1507_v53 = vpop.xlane.xlu0 %1506  ;;  %v1694_v1 = vsub.f32 %v3979_v21, %v5010_v11  ;;  %v1699_v11 = vsub.f32 %v1691_v9, %v3612_v5 }
 0x74e   : >> { %v1523_v35 = vcvt.f32.s32 %v1522_v15  ;;  %v1508_v57 = vcvt.f32.s32 %v1507_v53  ;;  %vm1588_vm10 = vcmp.eq.s32.totalorder %v1496_v42, 0  ;;  %vm1587_vm4 = vcmp.eq.s32.totalorder %v1481_v61, 0 }
 0x74f   : >> { %vm5030_vm8 = vmand %vm1628_vm0, %vm1588_vm10  ;;  %v1702_v32 = vsub.f32 %v1694_v1, %v3646_v26 }
 0x750   : >> { %v1526_v44 = vadd.s32 %v1525_v59, %v1523_v35  ;;  %v1511_v23 = vadd.s32 %v1510_v3, %v1508_v57  ;;  %v1693_v59 = vsub.f32 %v3979_v21, %v5012_v8  ;;  %vm5037_vm3 = vmand %vm1627_vm12, %vm1587_vm4  ;;  %v1708_v12 = vsel %vm5030_vm8, %v1700_v30, -1e+30  ;;  %v6811_v35 = vld [vmem:[#allocation10_spill] sm:$0xff] }
 0x751   : >> { %v1552_v38 = vpop.xlane.xlu1 %1551  ;;  %v1537_v60 = vpop.xlane.xlu0 %1536  ;;  %v1707_v7 = vsel %vm5037_vm3, %v1699_v11, -1e+30  ;;  %v1716_v43 = vsel %vm200_vm1, %v1708_v12, -inf }
 0x752   : >> { %v1553_v58 = vcvt.f32.s32 %v1552_v38  ;;  %v1538_v4 = vcvt.f32.s32 %v1537_v60  ;;  %vm1590_vm7 = vcmp.eq.s32.totalorder %v1526_v44, 0  ;;  %vm1589_vm0 = vcmp.eq.s32.totalorder %v1511_v23, 0 }
 0x753   : >> { %vm5054_vm4 = vmand %vm1630_vm14, %vm1590_vm7  ;;  %v1701_v17 = vsub.f32 %v1693_v59, %v3648_v27 }
 0x754   : >> { %v1556_v47 = vadd.s32 %v1555_v40, %v1553_v58  ;;  %v1541_v60 = vadd.s32 %v1540_v36, %v1538_v4  ;;  %v1710_v53 = vsel %vm5054_vm4, %v1702_v32, -1e+30  ;;  %v1715_v40 = vsel %vm200_vm1, %v1707_v7, -inf }
 0x755   : >> { %v1582_v37 = vpop.xlane.xlu1 %1581  ;;  %v1567_v61 = vpop.xlane.xlu0 %1566  ;;  %v1718_v58 = vsel %vm200_vm1, %v1710_v53, -inf }
 0x756   : >> { %vm1592_vm15 = vcmp.eq.s32.totalorder %v1556_v47, 0  ;;  %v1583_v42 = vcvt.f32.s32 %v1582_v37  ;;  %v1568_v2 = vcvt.f32.s32 %v1567_v61  ;;  %vm1591_vm10 = vcmp.eq.s32.totalorder %v1541_v60, 0 }
 0x757   : >> { %vm1688_vm6 = vmand %vm1632_vm11, %vm1592_vm15 }
 0x758   : >> { %vm1687_vm12 = vmand %vm1631_vm9, %vm1591_vm10  ;;  %v1586_v20 = vadd.s32 %v1585_v55, %v1583_v42  ;;  %v1571_v33 = vadd.s32 %v1570_v14, %v1568_v2  ;;  %v1712_v13 = vsel %vm1688_vm6, %v1704_v54, -1e+30  ;;  %v6812_v2 = vld [vmem:[#allocation11_spill] sm:$0xff] }
 0x759   : >> { %v1711_v22 = vsel %vm1687_vm12, %v1703_v46, -1e+30  ;;  %vm1685_vm11 = vmand %vm1629_vm5, %vm1589_vm0  ;;  %v1721_v16 = vsel %vm200_vm1, %v1712_v13, -inf  ;;  %v6813_v46 = vld [vmem:[#allocation12_spill] sm:$0xff] }
 0x75a   : >> { %vm1594_vm9 = vcmp.eq.s32.totalorder %v1586_v20, 0  ;;  %v1666_v19 = vpop.xlane.xlu1 %1665  ;;  %v1663_v56 = vpop.xlane.xlu0 %1662  ;;  %vm1593_vm14 = vcmp.eq.s32.totalorder %v1571_v33, 0  ;;  %v1719_v15 = vsel %vm200_vm1, %v1711_v22, -inf  ;;  %v1709_v45 = vsel %vm1685_vm11, %v1701_v17, -1e+30  ;;  %v6814_v20 = vld [vmem:[#allocation13_spill] sm:$0xff] }
 0x75b   : >> { %v1698_v52 = vsub.f32 %v3979_v21, %v1666_v19  ;;  %v1697_v10 = vsub.f32 %v3979_v21, %v1663_v56  ;;  %vm1690_vm5 = vmand %vm1634_vm2, %vm1594_vm9  ;;  %v1722_v36 = vmax.f32 %v1716_v43, %v1721_v16  ;;  %v1720_v38 = vmax.f32 %v1715_v40, %v1719_v15 }
 0x75c   : >> { %vm1689_vm8 = vmand %vm1633_vm13, %vm1593_vm14  ;;  %v1717_v41 = vsel %vm200_vm1, %v1709_v45, -inf }
 0x75d   : >> { %v1706_v62 = vsub.f32 %v1698_v52, %v3644_v25  ;;  %v1705_v57 = vsub.f32 %v1697_v10, %v3650_v28  ;;  %v1727_v55 = vmax.f32 %v1720_v38, %v1722_v36 }
 0x75f   : >> { %v1714_v24 = vsel %vm1690_vm5, %v1706_v62, -1e+30  ;;  %v1713_v44 = vsel %vm1689_vm8, %v1705_v57, -1e+30 }
 0x760   : >> { %v1725_v34 = vsel %vm200_vm1, %v1714_v24, -inf  ;;  %v1723_v29 = vsel %vm200_vm1, %v1713_v44, -inf }
 0x761   : >> { %v1726_v23 = vmax.f32 %v1718_v58, %v1725_v34  ;;  %v1724_v4 = vmax.f32 %v1717_v41, %v1723_v29 }
 0x763   : >> { %v1728_v14 = vmax.f32 %v1724_v4, %v1726_v23 }
 0x765   : >> { %v1729_v39 = vmax.f32 %v1727_v55, %v1728_v14 }
 0x767   : >> { %v1730_v47 = vrot.slane %v1729_v39, 4 }
 0x769   : >> { %v1731_v18 = vmax.f32 %v1729_v39, %v1730_v47 }
 0x76b   : >> { %v1732_v31 = vrot.slane %v1731_v18, 2 }
 0x76d   : >> { %v1733_v9 = vmax.f32 %v1731_v18, %v1732_v31 }
 0x76f   : >> { %v1734_v1 = vrot.slane %v1733_v9, 1 }
 0x771   : >> { %v5087_v59 = vmax.f32 %v1733_v9, %v1734_v1  ;;  %v6817_v9 = vld [vmem:[#allocation14_spill] sm:$0xff] }
 0x773   : >> { %vm1736_vm2 = vcmp.ge.f32.partialorder %v1707_v7, %v5087_v59  ;;  %vm1737_vm13 = vcmp.ge.f32.partialorder %v1708_v12, %v5087_v59  ;;  %vm1738_vm3 = vcmp.ge.f32.partialorder %v1709_v45, %v5087_v59  ;;  %vm1739_vm7 = vcmp.ge.f32.partialorder %v1710_v53, %v5087_v59  ;;  %v6815_v45 = vld [vmem:[#allocation15_spill] sm:$0xff] }
 0x774   : >> { %vm1740_vm15 = vcmp.ge.f32.partialorder %v1711_v22, %v5087_v59  ;;  %vm1741_vm0 = vcmp.ge.f32.partialorder %v1712_v13, %v5087_v59  ;;  %vm1742_vm6 = vcmp.ge.f32.partialorder %v1713_v44, %v5087_v59  ;;  %vm1743_vm10 = vcmp.ge.f32.partialorder %v1714_v24, %v5087_v59 }
 0x775   : >> { %v1744_v3 = vsel %vm1736_vm2, %v3680_v48, 64  ;;  %v1745_v60 = vsel %vm1737_vm13, %v3683_v49, 64  ;;  %v1746_v37 = vsel %vm1738_vm3, %v3686_v50, 64  ;;  %v1747_v61 = vsel %vm1739_vm7, %v3689_v51, 64 }
 0x776   : >> { %v1748_v42 = vsel %vm1740_vm15, %v6811_v35, 64  ;;  %v1749_v54 = vsel %vm1741_vm0, %v6812_v2, 64  ;;  %v1750_v30 = vsel %vm1742_vm6, %v6813_v46, 64  ;;  %v1751_v33 = vsel %vm1743_vm10, %v6814_v20, 64 }
 0x777   : >> { %v1752_v11 = vsel %vm200_vm1, %v1744_v3, 2147483647  ;;  %v1753_v8 = vsel %vm200_vm1, %v1745_v60, 2147483647  ;;  %v1754_v13 = vsel %vm200_vm1, %v1746_v37, 2147483647 }
 0x778   : >> { %v1755_v22 = vsel %vm200_vm1, %v1747_v61, 2147483647  ;;  %v1756_v32 = vsel %vm200_vm1, %v1748_v42, 2147483647  ;;  %v1759_v17 = vsel %vm200_vm1, %v1749_v54, 2147483647 }
 0x779   : >> { %vm1757_vm12 = vcmp.lt.s32.totalorder %v1752_v11, %v1756_v32  ;;  %vm1760_vm4 = vcmp.lt.s32.totalorder %v1753_v8, %v1759_v17  ;;  %v1762_v12 = vsel %vm200_vm1, %v1750_v30, 2147483647  ;;  %v1765_v19 = vsel %vm200_vm1, %v1751_v33, 2147483647 }
 0x77a   : >> { %v1758_v56 = vsel %vm1757_vm12, %v1752_v11, %v1756_v32  ;;  %v1761_v7 = vsel %vm1760_vm4, %v1753_v8, %v1759_v17  ;;  %vm1763_vm11 = vcmp.lt.s32.totalorder %v1754_v13, %v1762_v12  ;;  %vm1766_vm9 = vcmp.lt.s32.totalorder %v1755_v22, %v1765_v19 }
 0x77b   : >> { %v1764_v52 = vsel %vm1763_vm11, %v1754_v13, %v1762_v12  ;;  %v1767_v10 = vsel %vm1766_vm9, %v1755_v22, %v1765_v19  ;;  %vm1768_vm14 = vcmp.lt.s32.totalorder %v1758_v56, %v1761_v7  ;;  %vm1783_vm5 = vcmp.gt.f32.partialorder %v5087_v59, -1e+29 }
 0x77c   : >> { %v1769_v16 = vsel %vm1768_vm14, %v1758_v56, %v1761_v7  ;;  %vm1770_vm8 = vcmp.lt.s32.totalorder %v1764_v52, %v1767_v10  ;;  %v1784_v15 = vsub.f32 0.0, %v5087_v59  ;;  %v6819_v3 = vmov 0  }
 0x77d   : >> { %v1771_v53 = vsel %vm1770_vm8, %v1764_v52, %v1767_v10 }
 0x77e   : >> { %vm1772_vm2 = vcmp.lt.s32.totalorder %v1769_v16, %v1771_v53  ;;  %v5118_v62 = vsel %vm1783_vm5, %v1784_v15, %v6815_v45 }
 0x77f   : >> { %6816 = vst [vmem:[#allocation15_spill] sm:$0xff] %v5118_v62  ;;  %v1773_v57 = vsel %vm1772_vm2, %v1769_v16, %v1771_v53  ;;  %v5122_v43 = vsub.f32 %v5118_v62, %v3610_v0  ;;  %v5126_v40 = vsub.f32 %v5118_v62, %v3612_v5  ;;  %v5134_v44 = vsub.f32 %v5118_v62, %v3646_v26 }
 0x780   : >> { %v1774_v36 = vrot.slane %v1773_v57, 4  ;;  %v5138_v58 = vsub.f32 %v5118_v62, %v3648_v27  ;;  %v5146_v4 = vsub.f32 %v5118_v62, %v3608_v63  ;;  %v5150_v55 = vsub.f32 %v5118_v62, %v3614_v6 }
 0x781   : >> { %v1942_v38 = vsel %vm200_vm1, %v5122_v43, -inf  ;;  %v1939_v24 = vsel %vm200_vm1, %v5126_v40, -inf  ;;  %v1948_v29 = vsel %vm200_vm1, %v5134_v44, -inf }
 0x782   : >> { %vm1775_vm13 = vcmp.lt.s32.totalorder %v1773_v57, %v1774_v36  ;;  %1943 = vmax.xlane.f32.xlu1 %v1942_v38  ;;  %1940 = vmax.xlane.f32.xlu0 %v1939_v24  ;;  %v1945_v23 = vsel %vm200_vm1, %v5138_v58, -inf  ;;  %v1954_v47 = vsel %vm200_vm1, %v5146_v4, -inf  ;;  %v1951_v18 = vsel %vm200_vm1, %v5150_v55, -inf }
 0x783   : >> { %v1776_v34 = vsel %vm1775_vm13, %v1773_v57, %v1774_v36 }
 0x784   : >> { %v1777_v41 = vrot.slane %v1776_v34, 2 }
 0x786   : >> { %vm1778_vm3 = vcmp.lt.s32.totalorder %v1776_v34, %v1777_v41  ;;  %1949 = vmax.xlane.f32.xlu1 %v1948_v29  ;;  %1946 = vmax.xlane.f32.xlu0 %v1945_v23 }
 0x787   : >> { %v1779_v14 = vsel %vm1778_vm3, %v1776_v34, %v1777_v41 }
 0x788   : >> { %v1780_v39 = vrot.slane %v1779_v14, 1 }
 0x78a   : >> { %vm1781_vm7 = vcmp.lt.s32.totalorder %v1779_v14, %v1780_v39  ;;  %1955 = vmax.xlane.f32.xlu1 %v1954_v47  ;;  %1952 = vmax.xlane.f32.xlu0 %v1951_v18 }
 0x78b   : >> { %v1782_v31 = vsel %vm1781_vm7, %v1779_v14, %v1780_v39  ;;  %v5241_v14 = vsub.f32 %v5118_v62, %v3644_v25  ;;  %v5245_v39 = vsub.f32 %v5118_v62, %v3650_v28 }
 0x78c   : >> { %v5159_v1 = vsel %vm1783_vm5, %v1782_v31, %v6817_v9 }
 0x78d   : >> { %6818 = vst [vmem:[#allocation14_spill] sm:$0xff] %v5159_v1  ;;  %vm1788_vm15 = vcmp.eq.s32.totalorder %v5159_v1, %v3683_v49  ;;  %vm1787_vm0 = vcmp.eq.s32.totalorder %v5159_v1, %v3680_v48  ;;  %vm1790_vm6 = vcmp.eq.s32.totalorder %v5159_v1, %v3689_v51  ;;  %vm1789_vm10 = vcmp.eq.s32.totalorder %v5159_v1, %v3686_v50 }
 0x78e   : >> { %v1796_v60 = vsel %vm1788_vm15, 1, %v6819_v3  ;;  %v1795_v37 = vsel %vm1787_vm0, 1, %v6819_v3  ;;  %v1798_v59 = vsel %vm1790_vm6, 1, %v6819_v3  ;;  %v1797_v61 = vsel %vm1789_vm10, 1, %v6819_v3 }
 0x78f   : >> { %v5174_v42 = vsel %vm200_vm1, %v1796_v60, 2147483648  ;;  %v5177_v54 = vsel %vm200_vm1, %v1795_v37, 2147483648  ;;  %v5180_v30 = vsel %vm200_vm1, %v1798_v59, 2147483648  ;;  %v5183_v33 = vsel %vm200_vm1, %v1797_v61, 2147483648 }
 0x790   : >> { %v1820_v11 = vshra.s32 %v5174_v42, 16  ;;  %v1805_v8 = vshra.s32 %v5177_v54, 16  ;;  %vm1792_vm12 = vcmp.eq.s32.totalorder %v5159_v1, %v6812_v2  ;;  %vm1791_vm4 = vcmp.eq.s32.totalorder %v5159_v1, %v6811_v35 }
 0x791   : >> { %vm1794_vm11 = vcmp.eq.s32.totalorder %v5159_v1, %v6814_v20  ;;  %vm1793_vm9 = vcmp.eq.s32.totalorder %v5159_v1, %v6813_v46  ;;  %v1850_v32 = vshra.s32 %v5180_v30, 16  ;;  %v1835_v17 = vshra.s32 %v5183_v33, 16 }
 0x792   : >> { %v5195_v13 = vcvt.s32.f32 %v1820_v11  ;;  %v5197_v22 = vcvt.s32.f32 %v1805_v8  ;;  %v1800_v12 = vsel %vm1792_vm12, 1, %v6819_v3  ;;  %v1799_v19 = vsel %vm1791_vm4, 1, %v6819_v3 }
 0x793   : >> { %v5206_v56 = vsel %vm200_vm1, %v1800_v12, 2147483648  ;;  %v5209_v7 = vsel %vm200_vm1, %v1799_v19, 2147483648  ;;  %v1802_v52 = vsel %vm1794_vm11, 1, %v6819_v3  ;;  %v1801_v10 = vsel %vm1793_vm9, 1, %v6819_v3 }
 0x794   : >> { %1823 = vmax.xlane.f32.xlu1 %v5195_v13  ;;  %1808 = vmax.xlane.f32.xlu0 %v5197_v22  ;;  %v5213_v16 = vcvt.s32.f32 %v1850_v32  ;;  %v5215_v15 = vcvt.s32.f32 %v1835_v17  ;;  %v1880_v53 = vshra.s32 %v5206_v56, 16  ;;  %v1865_v45 = vshra.s32 %v5209_v7, 16 }
 0x795   : >> { %v5220_v57 = vsel %vm200_vm1, %v1802_v52, 2147483648  ;;  %v5223_v36 = vsel %vm200_vm1, %v1801_v10, 2147483648  ;;  %v1960_v47 = vsel %vm200_vm1, %v5241_v14, -inf  ;;  %v1957_v18 = vsel %vm200_vm1, %v5245_v39, -inf }
 0x796   : >> { %v5227_v38 = vcvt.s32.f32 %v1880_v53  ;;  %v5229_v24 = vcvt.s32.f32 %v1865_v45  ;;  %v1910_v34 = vshra.s32 %v5220_v57, 16  ;;  %v1895_v41 = vshra.s32 %v5223_v36, 16 }
 0x798   : >> { %1853 = vmax.xlane.f32.xlu1 %v5213_v16  ;;  %1838 = vmax.xlane.f32.xlu0 %v5215_v15  ;;  %v5235_v29 = vcvt.s32.f32 %v1910_v34  ;;  %v5237_v23 = vcvt.s32.f32 %v1895_v41 }
 0x79c   : >> { %1883 = vmax.xlane.f32.xlu1 %v5227_v38  ;;  %1868 = vmax.xlane.f32.xlu0 %v5229_v24 }
 0x7a0   : >> { %1913 = vmax.xlane.f32.xlu1 %v5235_v29  ;;  %1898 = vmax.xlane.f32.xlu0 %v5237_v23 }
 0x7a4   : >> { %1961 = vmax.xlane.f32.xlu1 %v1960_v47  ;;  %1958 = vmax.xlane.f32.xlu0 %v1957_v18  ;;  %v1819_v47 = vand.u32 65535, %v5174_v42  ;;  %v1804_v18 = vand.u32 65535, %v5177_v54 }
 0x80f   : >> { %v5253_v31 = vpop.xlane.xlu1 %1943  ;;  %v5255_v9 = vpop.xlane.xlu0 %1940 }
 0x810   : >> { %vm1964_vm14 = vcmp.ge.f32.partialorder %v5122_v43, %v5253_v31  ;;  %vm1963_vm5 = vcmp.ge.f32.partialorder %v5126_v40, %v5255_v9 }
 0x811   : >> { %v1972_v60 = vsel %vm1964_vm14, -1e+30, %v5122_v43  ;;  %v1971_v37 = vsel %vm1963_vm5, -1e+30, %v5126_v40 }
 0x812   : >> { %v1982_v59 = vsel %vm200_vm1, %v1972_v60, -inf  ;;  %v1979_v61 = vsel %vm200_vm1, %v1971_v37, -inf }
 0x813   : >> { %v5271_v11 = vpop.xlane.xlu1 %1949  ;;  %v5273_v8 = vpop.xlane.xlu0 %1946  ;;  %1983 = vmax.xlane.f32.xlu1 %v1982_v59  ;;  %1980 = vmax.xlane.f32.xlu0 %v1979_v61  ;;  %v1821_v59 = vcvt.s32.f32 %v1819_v47  ;;  %v1806_v61 = vcvt.s32.f32 %v1804_v18 }
 0x814   : >> { %vm1966_vm8 = vcmp.ge.f32.partialorder %v5134_v44, %v5271_v11  ;;  %vm1965_vm2 = vcmp.ge.f32.partialorder %v5138_v58, %v5273_v8 }
 0x815   : >> { %v1974_v32 = vsel %vm1966_vm8, -1e+30, %v5134_v44  ;;  %v1973_v17 = vsel %vm1965_vm2, -1e+30, %v5138_v58 }
 0x816   : >> { %v1988_v12 = vsel %vm200_vm1, %v1974_v32, -inf  ;;  %v1985_v19 = vsel %vm200_vm1, %v1973_v17, -inf  ;;  %v1849_v32 = vand.u32 65535, %v5180_v30  ;;  %v1834_v17 = vand.u32 65535, %v5183_v33 }
 0x817   : >> { %v5289_v52 = vpop.xlane.xlu1 %1955  ;;  %v5291_v10 = vpop.xlane.xlu0 %1952  ;;  %1989 = vmax.xlane.f32.xlu1 %v1988_v12  ;;  %1986 = vmax.xlane.f32.xlu0 %v1985_v19  ;;  %v1879_v30 = vand.u32 65535, %v5206_v56  ;;  %v1864_v33 = vand.u32 65535, %v5209_v7  ;;  %v1894_v56 = vand.u32 65535, %v5223_v36 }
 0x818   : >> { %vm1968_vm13 = vcmp.ge.f32.partialorder %v5146_v4, %v5289_v52  ;;  %vm1967_vm3 = vcmp.ge.f32.partialorder %v5150_v55, %v5291_v10 }
 0x819   : >> { %v1976_v53 = vsel %vm1968_vm13, -1e+30, %v5146_v4  ;;  %v1975_v45 = vsel %vm1967_vm3, -1e+30, %v5150_v55  ;;  %v1881_v47 = vcvt.s32.f32 %v1879_v30  ;;  %v1866_v18 = vcvt.s32.f32 %v1864_v33 }
 0x81a   : >> { %v1994_v34 = vsel %vm200_vm1, %v1976_v53, -inf  ;;  %v1991_v41 = vsel %vm200_vm1, %v1975_v45, -inf  ;;  %v1851_v53 = vcvt.s32.f32 %v1849_v32  ;;  %v1836_v45 = vcvt.s32.f32 %v1834_v17 }
 0x81b   : >> { %1995 = vmax.xlane.f32.xlu1 %v1994_v34  ;;  %1992 = vmax.xlane.f32.xlu0 %v1991_v41  ;;  %v1896_v17 = vcvt.s32.f32 %v1894_v56 }
 0x821   : >> { %v5309_v60 = vpop.xlane.xlu1 %1823  ;;  %v5311_v37 = vpop.xlane.xlu0 %1808 }
 0x822   : >> { %vm1825_vm7 = vcmp.eq.f32.partialorder %v5195_v13, %v5309_v60  ;;  %vm1810_vm15 = vcmp.eq.f32.partialorder %v5197_v22, %v5311_v37 }
 0x823   : >> { %v1826_v12 = vsel %vm1825_vm7, %v1821_v59, -inf  ;;  %v1811_v42 = vsel %vm1810_vm15, %v1806_v61, -inf  ;;  %v1909_v59 = vand.u32 65535, %v5220_v57 }
 0x824   : >> { %1827 = vmax.xlane.f32.xlu1 %v1826_v12  ;;  %1812 = vmax.xlane.f32.xlu0 %v1811_v42 }
 0x825   : >> { %v5319_v54 = vpop.xlane.xlu1 %1853  ;;  %v5321_v19 = vpop.xlane.xlu0 %1838  ;;  %v1911_v32 = vcvt.s32.f32 %v1909_v59 }
 0x826   : >> { %vm1855_vm0 = vcmp.eq.f32.partialorder %v5213_v16, %v5319_v54  ;;  %vm1840_vm6 = vcmp.eq.f32.partialorder %v5215_v15, %v5321_v19 }
 0x827   : >> { %v1856_v13 = vsel %vm1855_vm0, %v1851_v53, -inf  ;;  %v1841_v22 = vsel %vm1840_vm6, %v1836_v45, -inf }
 0x828   : >> { %1857 = vmax.xlane.f32.xlu1 %v1856_v13  ;;  %1842 = vmax.xlane.f32.xlu0 %v1841_v22 }
 0x829   : >> { %v1884_v34 = vpop.xlane.xlu1 %1883  ;;  %v1869_v41 = vpop.xlane.xlu0 %1868 }
 0x82a   : >> { %vm1885_vm10 = vcmp.eq.f32.partialorder %v5227_v38, %v1884_v34  ;;  %vm1870_vm12 = vcmp.eq.f32.partialorder %v5229_v24, %v1869_v41 }
 0x82b   : >> { %v1886_v7 = vsel %vm1885_vm10, %v1881_v47, -inf  ;;  %v1871_v16 = vsel %vm1870_vm12, %v1866_v18, -inf  ;;  %v1830_v47 = vcvt.f32.s32 %v5309_v60  ;;  %v1815_v18 = vcvt.f32.s32 %v5311_v37 }
 0x82c   : >> { %1887 = vmax.xlane.f32.xlu1 %v1886_v7  ;;  %1872 = vmax.xlane.f32.xlu0 %v1871_v16 }
 0x82d   : >> { %v1914_v15 = vpop.xlane.xlu1 %1913  ;;  %v1899_v61 = vpop.xlane.xlu0 %1898 }
 0x82e   : >> { %vm1915_vm4 = vcmp.eq.f32.partialorder %v5235_v29, %v1914_v15  ;;  %vm1900_vm11 = vcmp.eq.f32.partialorder %v5237_v23, %v1899_v61  ;;  %v1920_v37 = vcvt.f32.s32 %v1914_v15  ;;  %v1905_v46 = vcvt.f32.s32 %v1899_v61 }
 0x82f   : >> { %v1916_v12 = vsel %vm1915_vm4, %v1911_v32, -inf  ;;  %v1901_v57 = vsel %vm1900_vm11, %v1896_v17, -inf  ;;  %v1831_v32 = vshll.u32 %v1830_v47, 16  ;;  %v1860_v17 = vcvt.f32.s32 %v5319_v54 }
 0x830   : >> { %1917 = vmax.xlane.f32.xlu1 %v1916_v12  ;;  %1902 = vmax.xlane.f32.xlu0 %v1901_v57  ;;  %v1816_v12 = vshll.u32 %v1815_v18, 16  ;;  %v1845_v57 = vcvt.f32.s32 %v5321_v19 }
 0x831   : >> { %v5335_v36 = vpop.xlane.xlu1 %1961  ;;  %v5337_v38 = vpop.xlane.xlu0 %1958  ;;  %v1861_v20 = vshll.u32 %v1860_v17, 16 }
 0x832   : >> { %vm1970_vm9 = vcmp.ge.f32.partialorder %v5241_v14, %v5335_v36  ;;  %vm1969_vm7 = vcmp.ge.f32.partialorder %v5245_v39, %v5337_v38  ;;  %v1846_v2 = vshll.u32 %v1845_v57, 16 }
 0x833   : >> { %v1978_v24 = vsel %vm1970_vm9, -1e+30, %v5241_v14  ;;  %v1977_v29 = vsel %vm1969_vm7, -1e+30, %v5245_v39 }
 0x834   : >> { %v2000_v23 = vsel %vm200_vm1, %v1978_v24, -inf  ;;  %v1997_v42 = vsel %vm200_vm1, %v1977_v29, -inf  ;;  %v1890_v24 = vcvt.f32.s32 %v1884_v34  ;;  %v1875_v29 = vcvt.f32.s32 %v1869_v41 }
 0x835   : >> { %2001 = vmax.xlane.f32.xlu1 %v2000_v23  ;;  %1998 = vmax.xlane.f32.xlu0 %v1997_v42 }
 0x8a0   : >> { %v1984_v53 = vpop.xlane.xlu1 %1983  ;;  %v5353_v45 = vpop.xlane.xlu0 %1980 }
 0x8a1   : >> { %v2028_v15 = vsub.f32 %v3979_v21, %v1984_v53  ;;  %v2027_v17 = vsub.f32 %v3979_v21, %v5353_v45 }
 0x8a3   : >> { %v2036_v40 = vsub.f32 %v2028_v15, %v3610_v0 }
 0x8a4   : >> { %v5355_v30 = vpop.xlane.xlu1 %1989  ;;  %v5357_v33 = vpop.xlane.xlu0 %1986 }
 0x8a8   : >> { %v1996_v13 = vpop.xlane.xlu1 %1995  ;;  %v1993_v22 = vpop.xlane.xlu0 %1992 }
 0x8a9   : >> { %v2032_v54 = vsub.f32 %v3979_v21, %v1996_v13  ;;  %v2031_v41 = vsub.f32 %v3979_v21, %v1993_v22 }
 0x8ab   : >> { %v2040_v43 = vsub.f32 %v2032_v54, %v3608_v63  ;;  %v2039_v31 = vsub.f32 %v2031_v41, %v3614_v6 }
 0x8b1   : >> { %v1828_v59 = vpop.xlane.xlu1 %1827  ;;  %v1813_v56 = vpop.xlane.xlu0 %1812 }
 0x8b2   : >> { %v1829_v7 = vcvt.f32.s32 %v1828_v59  ;;  %v1814_v16 = vcvt.f32.s32 %v1813_v56  ;;  %v1891_v59 = vshll.u32 %v1890_v24, 16  ;;  %v1876_v56 = vshll.u32 %v1875_v29, 16 }
 0x8b4   : >> { %v1832_v3 = vadd.s32 %v1831_v32, %v1829_v7  ;;  %v1817_v62 = vadd.s32 %v1816_v12, %v1814_v16  ;;  %v1921_v16 = vshll.u32 %v1920_v37, 16  ;;  %v1906_v32 = vshll.u32 %v1905_v46, 16 }
 0x8b5   : >> { %v1858_v23 = vpop.xlane.xlu1 %1857  ;;  %v1843_v42 = vpop.xlane.xlu0 %1842  ;;  %v2030_v12 = vsub.f32 %v3979_v21, %v5355_v30  ;;  %v2035_v30 = vsub.f32 %v2027_v17, %v3612_v5 }
 0x8b6   : >> { %v1859_v1 = vcvt.f32.s32 %v1858_v23  ;;  %v1844_v60 = vcvt.f32.s32 %v1843_v42  ;;  %vm1924_vm15 = vcmp.eq.s32.totalorder %v1832_v3, 0  ;;  %vm1923_vm0 = vcmp.eq.s32.totalorder %v1817_v62, 0 }
 0x8b7   : >> { %vm5375_vm6 = vmand %vm1964_vm14, %vm1924_vm15  ;;  %v2038_v13 = vsub.f32 %v2030_v12, %v3646_v26 }
 0x8b8   : >> { %v1862_v19 = vadd.s32 %v1861_v20, %v1859_v1  ;;  %v1847_v18 = vadd.s32 %v1846_v2, %v1844_v60  ;;  %v2029_v20 = vsub.f32 %v3979_v21, %v5357_v33  ;;  %vm5382_vm10 = vmand %vm1963_vm5, %vm1923_vm0  ;;  %v2044_v55 = vsel %vm5375_vm6, %v2036_v40, -1e+30  ;;  %v6826_v1 = vld [vmem:[#allocation10_spill] sm:$0xff] }
 0x8b9   : >> { %v1888_v47 = vpop.xlane.xlu1 %1887  ;;  %v1873_v35 = vpop.xlane.xlu0 %1872  ;;  %v2043_v11 = vsel %vm5382_vm10, %v2035_v30, -1e+30  ;;  %v2052_v37 = vsel %vm200_vm1, %v2044_v55, -inf }
 0x8ba   : >> { %v1889_v34 = vcvt.f32.s32 %v1888_v47  ;;  %v1874_v7 = vcvt.f32.s32 %v1873_v35  ;;  %vm1926_vm12 = vcmp.eq.s32.totalorder %v1862_v19, 0  ;;  %vm1925_vm14 = vcmp.eq.s32.totalorder %v1847_v18, 0 }
 0x8bb   : >> { %vm5399_vm0 = vmand %vm1966_vm8, %vm1926_vm12  ;;  %v2037_v22 = vsub.f32 %v2029_v20, %v3648_v27 }
 0x8bc   : >> { %v1892_v61 = vadd.s32 %v1891_v59, %v1889_v34  ;;  %v1877_v35 = vadd.s32 %v1876_v56, %v1874_v7  ;;  %v2046_v42 = vsel %vm5399_vm0, %v2038_v13, -1e+30  ;;  %v2051_v59 = vsel %vm200_vm1, %v2043_v11, -inf }
 0x8bd   : >> { %v1918_v46 = vpop.xlane.xlu1 %1917  ;;  %v1903_v62 = vpop.xlane.xlu0 %1902  ;;  %v2054_v34 = vsel %vm200_vm1, %v2046_v42, -inf }
 0x8be   : >> { %vm1928_vm4 = vcmp.eq.s32.totalorder %v1892_v61, 0  ;;  %v1919_v3 = vcvt.f32.s32 %v1918_v46  ;;  %v1904_v53 = vcvt.f32.s32 %v1903_v62  ;;  %vm1927_vm15 = vcmp.eq.s32.totalorder %v1877_v35, 0 }
 0x8bf   : >> { %vm2024_vm11 = vmand %vm1968_vm13, %vm1928_vm4 }
 0x8c0   : >> { %vm2023_vm5 = vmand %vm1967_vm3, %vm1927_vm15  ;;  %v1922_v9 = vadd.s32 %v1921_v16, %v1919_v3  ;;  %v1907_v45 = vadd.s32 %v1906_v32, %v1904_v53  ;;  %v2048_v4 = vsel %vm2024_vm11, %v2040_v43, -1e+30  ;;  %v6827_v53 = vld [vmem:[#allocation11_spill] sm:$0xff] }
 0x8c1   : >> { %v2047_v52 = vsel %vm2023_vm5, %v2039_v31, -1e+30  ;;  %vm2021_vm13 = vmand %vm1965_vm2, %vm1925_vm14  ;;  %v2057_v29 = vsel %vm200_vm1, %v2048_v4, -inf  ;;  %v6828_v31 = vld [vmem:[#allocation12_spill] sm:$0xff] }
 0x8c2   : >> { %vm1930_vm3 = vcmp.eq.s32.totalorder %v1922_v9, 0  ;;  %v2002_v10 = vpop.xlane.xlu1 %2001  ;;  %v1999_v44 = vpop.xlane.xlu0 %1998  ;;  %vm1929_vm8 = vcmp.eq.s32.totalorder %v1907_v45, 0  ;;  %v2055_v23 = vsel %vm200_vm1, %v2047_v52, -inf  ;;  %v2045_v58 = vsel %vm2021_vm13, %v2037_v22, -1e+30  ;;  %v6829_v9 = vld [vmem:[#allocation13_spill] sm:$0xff] }
 0x8c3   : >> { %v2034_v57 = vsub.f32 %v3979_v21, %v2002_v10  ;;  %v2033_v24 = vsub.f32 %v3979_v21, %v1999_v44  ;;  %vm2026_vm2 = vmand %vm1970_vm9, %vm1930_vm3  ;;  %v2058_v56 = vmax.f32 %v2052_v37, %v2057_v29  ;;  %v2056_v47 = vmax.f32 %v2051_v59, %v2055_v23 }
 0x8c4   : >> { %vm2025_vm6 = vmand %vm1969_vm7, %vm1929_vm8  ;;  %v2053_v36 = vsel %vm200_vm1, %v2045_v58, -inf }
 0x8c5   : >> { %v2042_v8 = vsub.f32 %v2034_v57, %v3644_v25  ;;  %v2041_v60 = vsub.f32 %v2033_v24, %v3650_v28  ;;  %v2063_v16 = vmax.f32 %v2056_v47, %v2058_v56 }
 0x8c7   : >> { %v2050_v54 = vsel %vm2026_vm2, %v2042_v8, -1e+30  ;;  %v2049_v19 = vsel %vm2025_vm6, %v2041_v60, -1e+30 }
 0x8c8   : >> { %v2061_v14 = vsel %vm200_vm1, %v2050_v54, -inf  ;;  %v2059_v41 = vsel %vm200_vm1, %v2049_v19, -inf }
 0x8c9   : >> { %v2062_v18 = vmax.f32 %v2054_v34, %v2061_v14  ;;  %v2060_v7 = vmax.f32 %v2053_v36, %v2059_v41 }
 0x8cb   : >> { %v2064_v32 = vmax.f32 %v2060_v7, %v2062_v18 }
 0x8cd   : >> { %v2065_v15 = vmax.f32 %v2063_v16, %v2064_v32 }
 0x8cf   : >> { %v2066_v61 = vrot.slane %v2065_v15, 4 }
 0x8d1   : >> { %v2067_v39 = vmax.f32 %v2065_v15, %v2066_v61 }
 0x8d3   : >> { %v2068_v38 = vrot.slane %v2067_v39, 2 }
 0x8d5   : >> { %v2069_v17 = vmax.f32 %v2067_v39, %v2068_v38 }
 0x8d7   : >> { %v2070_v12 = vrot.slane %v2069_v17, 1 }
 0x8d9   : >> { %v5432_v20 = vmax.f32 %v2069_v17, %v2070_v12  ;;  %v6832_v17 = vld [vmem:[#allocation14_spill] sm:$0xff] }
 0x8db   : >> { %vm2072_vm9 = vcmp.ge.f32.partialorder %v2043_v11, %v5432_v20  ;;  %vm2073_vm7 = vcmp.ge.f32.partialorder %v2044_v55, %v5432_v20  ;;  %vm2074_vm10 = vcmp.ge.f32.partialorder %v2045_v58, %v5432_v20  ;;  %vm2075_vm12 = vcmp.ge.f32.partialorder %v2046_v42, %v5432_v20  ;;  %v6830_v58 = vld [vmem:[#allocation15_spill] sm:$0xff] }
 0x8dc   : >> { %vm2076_vm4 = vcmp.ge.f32.partialorder %v2047_v52, %v5432_v20  ;;  %vm2077_vm14 = vcmp.ge.f32.partialorder %v2048_v4, %v5432_v20  ;;  %vm2078_vm11 = vcmp.ge.f32.partialorder %v2049_v19, %v5432_v20  ;;  %vm2079_vm15 = vcmp.ge.f32.partialorder %v2050_v54, %v5432_v20 }
 0x8dd   : >> { %v2080_v2 = vsel %vm2072_vm9, %v3680_v48, 64  ;;  %v2081_v35 = vsel %vm2073_vm7, %v3683_v49, 64  ;;  %v2082_v46 = vsel %vm2074_vm10, %v3686_v50, 64  ;;  %v2083_v62 = vsel %vm2075_vm12, %v3689_v51, 64 }
 0x8de   : >> { %v2084_v3 = vsel %vm2076_vm4, %v6826_v1, 64  ;;  %v2085_v43 = vsel %vm2077_vm14, %v6827_v53, 64  ;;  %v2086_v40 = vsel %vm2078_vm11, %v6828_v31, 64  ;;  %v2087_v45 = vsel %vm2079_vm15, %v6829_v9, 64 }
 0x8df   : >> { %v2088_v30 = vsel %vm200_vm1, %v2080_v2, 2147483647  ;;  %v2089_v33 = vsel %vm200_vm1, %v2081_v35, 2147483647  ;;  %v2090_v4 = vsel %vm200_vm1, %v2082_v46, 2147483647 }
 0x8e0   : >> { %v2091_v52 = vsel %vm200_vm1, %v2083_v62, 2147483647  ;;  %v2092_v13 = vsel %vm200_vm1, %v2084_v3, 2147483647  ;;  %v2095_v22 = vsel %vm200_vm1, %v2085_v43, 2147483647 }
 0x8e1   : >> { %vm2093_vm5 = vcmp.lt.s32.totalorder %v2088_v30, %v2092_v13  ;;  %vm2096_vm0 = vcmp.lt.s32.totalorder %v2089_v33, %v2095_v22  ;;  %v2098_v55 = vsel %vm200_vm1, %v2086_v40, 2147483647  ;;  %v2101_v10 = vsel %vm200_vm1, %v2087_v45, 2147483647 }
 0x8e2   : >> { %v2094_v44 = vsel %vm2093_vm5, %v2088_v30, %v2092_v13  ;;  %v2097_v11 = vsel %vm2096_vm0, %v2089_v33, %v2095_v22  ;;  %vm2099_vm13 = vcmp.lt.s32.totalorder %v2090_v4, %v2098_v55  ;;  %vm2102_vm3 = vcmp.lt.s32.totalorder %v2091_v52, %v2101_v10 }
 0x8e3   : >> { %v2100_v57 = vsel %vm2099_vm13, %v2090_v4, %v2098_v55  ;;  %v2103_v24 = vsel %vm2102_vm3, %v2091_v52, %v2101_v10  ;;  %vm2104_vm8 = vcmp.lt.s32.totalorder %v2094_v44, %v2097_v11  ;;  %vm2119_vm2 = vcmp.gt.f32.partialorder %v5432_v20, -1e+29 }
 0x8e4   : >> { %v2105_v29 = vsel %vm2104_vm8, %v2094_v44, %v2097_v11  ;;  %vm2106_vm6 = vcmp.lt.s32.totalorder %v2100_v57, %v2103_v24  ;;  %v2120_v23 = vsub.f32 0.0, %v5432_v20  ;;  %v6834_v2 = vmov 0  }
 0x8e5   : >> { %v2107_v42 = vsel %vm2106_vm6, %v2100_v57, %v2103_v24 }
 0x8e6   : >> { %vm2108_vm9 = vcmp.lt.s32.totalorder %v2105_v29, %v2107_v42  ;;  %v5463_v8 = vsel %vm2119_vm2, %v2120_v23, %v6830_v58 }
 0x8e7   : >> { %6831 = vst [vmem:[#allocation15_spill] sm:$0xff] %v5463_v8  ;;  %v2109_v60 = vsel %vm2108_vm9, %v2105_v29, %v2107_v42  ;;  %v5467_v37 = vsub.f32 %v5463_v8, %v3610_v0  ;;  %v5471_v59 = vsub.f32 %v5463_v8, %v3612_v5  ;;  %v5479_v19 = vsub.f32 %v5463_v8, %v3646_v26 }
 0x8e8   : >> { %v2110_v56 = vrot.slane %v2109_v60, 4  ;;  %v5483_v34 = vsub.f32 %v5463_v8, %v3648_v27  ;;  %v5491_v7 = vsub.f32 %v5463_v8, %v3608_v63  ;;  %v5495_v16 = vsub.f32 %v5463_v8, %v3614_v6 }
 0x8e9   : >> { %v2278_v47 = vsel %vm200_vm1, %v5467_v37, -inf  ;;  %v2275_v54 = vsel %vm200_vm1, %v5471_v59, -inf  ;;  %v2284_v41 = vsel %vm200_vm1, %v5479_v19, -inf }
 0x8ea   : >> { %vm2111_vm7 = vcmp.lt.s32.totalorder %v2109_v60, %v2110_v56  ;;  %2279 = vmax.xlane.f32.xlu1 %v2278_v47  ;;  %2276 = vmax.xlane.f32.xlu0 %v2275_v54  ;;  %v2281_v18 = vsel %vm200_vm1, %v5483_v34, -inf  ;;  %v2290_v61 = vsel %vm200_vm1, %v5491_v7, -inf  ;;  %v2287_v39 = vsel %vm200_vm1, %v5495_v16, -inf }
 0x8eb   : >> { %v2112_v14 = vsel %vm2111_vm7, %v2109_v60, %v2110_v56 }
 0x8ec   : >> { %v2113_v36 = vrot.slane %v2112_v14, 2 }
 0x8ee   : >> { %vm2114_vm10 = vcmp.lt.s32.totalorder %v2112_v14, %v2113_v36  ;;  %2285 = vmax.xlane.f32.xlu1 %v2284_v41  ;;  %2282 = vmax.xlane.f32.xlu0 %v2281_v18 }
 0x8ef   : >> { %v2115_v32 = vsel %vm2114_vm10, %v2112_v14, %v2113_v36 }
 0x8f0   : >> { %v2116_v15 = vrot.slane %v2115_v32, 1 }
 0x8f2   : >> { %vm2117_vm12 = vcmp.lt.s32.totalorder %v2115_v32, %v2116_v15  ;;  %2291 = vmax.xlane.f32.xlu1 %v2290_v61  ;;  %2288 = vmax.xlane.f32.xlu0 %v2287_v39 }
 0x8f3   : >> { %v2118_v38 = vsel %vm2117_vm12, %v2115_v32, %v2116_v15  ;;  %v5586_v32 = vsub.f32 %v5463_v8, %v3644_v25  ;;  %v5590_v15 = vsub.f32 %v5463_v8, %v3650_v28 }
 0x8f4   : >> { %v5504_v12 = vsel %vm2119_vm2, %v2118_v38, %v6832_v17 }
 0x8f5   : >> { %6833 = vst [vmem:[#allocation14_spill] sm:$0xff] %v5504_v12  ;;  %vm2124_vm4 = vcmp.eq.s32.totalorder %v5504_v12, %v3683_v49  ;;  %vm2123_vm14 = vcmp.eq.s32.totalorder %v5504_v12, %v3680_v48  ;;  %vm2126_vm11 = vcmp.eq.s32.totalorder %v5504_v12, %v3689_v51  ;;  %vm2125_vm15 = vcmp.eq.s32.totalorder %v5504_v12, %v3686_v50 }
 0x8f6   : >> { %v2132_v35 = vsel %vm2124_vm4, 1, %v6834_v2  ;;  %v2131_v46 = vsel %vm2123_vm14, 1, %v6834_v2  ;;  %v2134_v20 = vsel %vm2126_vm11, 1, %v6834_v2  ;;  %v2133_v62 = vsel %vm2125_vm15, 1, %v6834_v2 }
 0x8f7   : >> { %v5519_v3 = vsel %vm200_vm1, %v2132_v35, 2147483648  ;;  %v5522_v43 = vsel %vm200_vm1, %v2131_v46, 2147483648  ;;  %v5525_v40 = vsel %vm200_vm1, %v2134_v20, 2147483648  ;;  %v5528_v45 = vsel %vm200_vm1, %v2133_v62, 2147483648 }
 0x8f8   : >> { %v2156_v30 = vshra.s32 %v5519_v3, 16  ;;  %v2141_v33 = vshra.s32 %v5522_v43, 16  ;;  %vm2128_vm5 = vcmp.eq.s32.totalorder %v5504_v12, %v6827_v53  ;;  %vm2127_vm0 = vcmp.eq.s32.totalorder %v5504_v12, %v6826_v1 }
 0x8f9   : >> { %vm2130_vm13 = vcmp.eq.s32.totalorder %v5504_v12, %v6829_v9  ;;  %vm2129_vm3 = vcmp.eq.s32.totalorder %v5504_v12, %v6828_v31  ;;  %v2186_v13 = vshra.s32 %v5525_v40, 16  ;;  %v2171_v22 = vshra.s32 %v5528_v45, 16 }
 0x8fa   : >> { %v5540_v4 = vcvt.s32.f32 %v2156_v30  ;;  %v5542_v52 = vcvt.s32.f32 %v2141_v33  ;;  %v2136_v55 = vsel %vm2128_vm5, 1, %v6834_v2  ;;  %v2135_v10 = vsel %vm2127_vm0, 1, %v6834_v2 }
 0x8fb   : >> { %v5551_v44 = vsel %vm200_vm1, %v2136_v55, 2147483648  ;;  %v5554_v11 = vsel %vm200_vm1, %v2135_v10, 2147483648  ;;  %v2138_v57 = vsel %vm2130_vm13, 1, %v6834_v2  ;;  %v2137_v24 = vsel %vm2129_vm3, 1, %v6834_v2 }
 0x8fc   : >> { %2159 = vmax.xlane.f32.xlu1 %v5540_v4  ;;  %2144 = vmax.xlane.f32.xlu0 %v5542_v52  ;;  %v5558_v29 = vcvt.s32.f32 %v2186_v13  ;;  %v5560_v23 = vcvt.s32.f32 %v2171_v22  ;;  %v2216_v42 = vshra.s32 %v5551_v44, 16  ;;  %v2201_v58 = vshra.s32 %v5554_v11, 16 }
 0x8fd   : >> { %v5565_v60 = vsel %vm200_vm1, %v2138_v57, 2147483648  ;;  %v5568_v56 = vsel %vm200_vm1, %v2137_v24, 2147483648  ;;  %v2296_v61 = vsel %vm200_vm1, %v5586_v32, -inf  ;;  %v2293_v39 = vsel %vm200_vm1, %v5590_v15, -inf }
 0x8fe   : >> { %v5572_v47 = vcvt.s32.f32 %v2216_v42  ;;  %v5574_v54 = vcvt.s32.f32 %v2201_v58  ;;  %v2246_v14 = vshra.s32 %v5565_v60, 16  ;;  %v2231_v36 = vshra.s32 %v5568_v56, 16 }
 0x900   : >> { %2189 = vmax.xlane.f32.xlu1 %v5558_v29  ;;  %2174 = vmax.xlane.f32.xlu0 %v5560_v23  ;;  %v5580_v41 = vcvt.s32.f32 %v2246_v14  ;;  %v5582_v18 = vcvt.s32.f32 %v2231_v36 }
 0x904   : >> { %2219 = vmax.xlane.f32.xlu1 %v5572_v47  ;;  %2204 = vmax.xlane.f32.xlu0 %v5574_v54 }
 0x908   : >> { %2249 = vmax.xlane.f32.xlu1 %v5580_v41  ;;  %2234 = vmax.xlane.f32.xlu0 %v5582_v18 }
 0x90c   : >> { %2297 = vmax.xlane.f32.xlu1 %v2296_v61  ;;  %2294 = vmax.xlane.f32.xlu0 %v2293_v39  ;;  %v2155_v61 = vand.u32 65535, %v5519_v3  ;;  %v2140_v39 = vand.u32 65535, %v5522_v43 }
 0x977   : >> { %v5598_v38 = vpop.xlane.xlu1 %2279  ;;  %v5600_v17 = vpop.xlane.xlu0 %2276 }
 0x978   : >> { %vm2300_vm8 = vcmp.ge.f32.partialorder %v5467_v37, %v5598_v38  ;;  %vm2299_vm2 = vcmp.ge.f32.partialorder %v5471_v59, %v5600_v17 }
 0x979   : >> { %v2308_v35 = vsel %vm2300_vm8, -1e+30, %v5467_v37  ;;  %v2307_v46 = vsel %vm2299_vm2, -1e+30, %v5471_v59 }
 0x97a   : >> { %v2318_v20 = vsel %vm200_vm1, %v2308_v35, -inf  ;;  %v2315_v62 = vsel %vm200_vm1, %v2307_v46, -inf }
 0x97b   : >> { %v5616_v30 = vpop.xlane.xlu1 %2285  ;;  %v5618_v33 = vpop.xlane.xlu0 %2282  ;;  %2319 = vmax.xlane.f32.xlu1 %v2318_v20  ;;  %2316 = vmax.xlane.f32.xlu0 %v2315_v62  ;;  %v2157_v20 = vcvt.s32.f32 %v2155_v61  ;;  %v2142_v62 = vcvt.s32.f32 %v2140_v39 }
 0x97c   : >> { %vm2302_vm6 = vcmp.ge.f32.partialorder %v5479_v19, %v5616_v30  ;;  %vm2301_vm9 = vcmp.ge.f32.partialorder %v5483_v34, %v5618_v33 }
 0x97d   : >> { %v2310_v13 = vsel %vm2302_vm6, -1e+30, %v5479_v19  ;;  %v2309_v22 = vsel %vm2301_vm9, -1e+30, %v5483_v34 }
 0x97e   : >> { %v2324_v55 = vsel %vm200_vm1, %v2310_v13, -inf  ;;  %v2321_v10 = vsel %vm200_vm1, %v2309_v22, -inf  ;;  %v2185_v13 = vand.u32 65535, %v5525_v40  ;;  %v2170_v22 = vand.u32 65535, %v5528_v45 }
 0x97f   : >> { %v5634_v57 = vpop.xlane.xlu1 %2291  ;;  %v5636_v24 = vpop.xlane.xlu0 %2288  ;;  %2325 = vmax.xlane.f32.xlu1 %v2324_v55  ;;  %2322 = vmax.xlane.f32.xlu0 %v2321_v10  ;;  %v2215_v40 = vand.u32 65535, %v5551_v44  ;;  %v2200_v45 = vand.u32 65535, %v5554_v11  ;;  %v2245_v44 = vand.u32 65535, %v5565_v60  ;;  %v2230_v11 = vand.u32 65535, %v5568_v56 }
 0x980   : >> { %vm2304_vm7 = vcmp.ge.f32.partialorder %v5491_v7, %v5634_v57  ;;  %vm2303_vm10 = vcmp.ge.f32.partialorder %v5495_v16, %v5636_v24 }
 0x981   : >> { %v2312_v42 = vsel %vm2304_vm7, -1e+30, %v5491_v7  ;;  %v2311_v58 = vsel %vm2303_vm10, -1e+30, %v5495_v16  ;;  %v2217_v61 = vcvt.s32.f32 %v2215_v40  ;;  %v2202_v39 = vcvt.s32.f32 %v2200_v45 }
 0x982   : >> { %v2330_v14 = vsel %vm200_vm1, %v2312_v42, -inf  ;;  %v2327_v36 = vsel %vm200_vm1, %v2311_v58, -inf  ;;  %v2187_v42 = vcvt.s32.f32 %v2185_v13  ;;  %v2172_v58 = vcvt.s32.f32 %v2170_v22 }
 0x983   : >> { %2331 = vmax.xlane.f32.xlu1 %v2330_v14  ;;  %2328 = vmax.xlane.f32.xlu0 %v2327_v36  ;;  %v2247_v13 = vcvt.s32.f32 %v2245_v44  ;;  %v2232_v22 = vcvt.s32.f32 %v2230_v11 }
 0x989   : >> { %v5654_v35 = vpop.xlane.xlu1 %2159  ;;  %v5656_v46 = vpop.xlane.xlu0 %2144 }
 0x98a   : >> { %vm2161_vm12 = vcmp.eq.f32.partialorder %v5540_v4, %v5654_v35  ;;  %vm2146_vm4 = vcmp.eq.f32.partialorder %v5542_v52, %v5656_v46 }
 0x98b   : >> { %v2162_v55 = vsel %vm2161_vm12, %v2157_v20, -inf  ;;  %v2147_v3 = vsel %vm2146_vm4, %v2142_v62, -inf }
 0x98c   : >> { %2163 = vmax.xlane.f32.xlu1 %v2162_v55  ;;  %2148 = vmax.xlane.f32.xlu0 %v2147_v3 }
 0x98d   : >> { %v5664_v43 = vpop.xlane.xlu1 %2189  ;;  %v5666_v10 = vpop.xlane.xlu0 %2174 }
 0x98e   : >> { %vm2191_vm14 = vcmp.eq.f32.partialorder %v5558_v29, %v5664_v43  ;;  %vm2176_vm11 = vcmp.eq.f32.partialorder %v5560_v23, %v5666_v10 }
 0x98f   : >> { %v2192_v4 = vsel %vm2191_vm14, %v2187_v42, -inf  ;;  %v2177_v52 = vsel %vm2176_vm11, %v2172_v58, -inf }
 0x990   : >> { %2193 = vmax.xlane.f32.xlu1 %v2192_v4  ;;  %2178 = vmax.xlane.f32.xlu0 %v2177_v52 }
 0x991   : >> { %v5674_v14 = vpop.xlane.xlu1 %2219  ;;  %v5676_v36 = vpop.xlane.xlu0 %2204 }
 0x992   : >> { %vm2221_vm15 = vcmp.eq.f32.partialorder %v5572_v47, %v5674_v14  ;;  %vm2206_vm5 = vcmp.eq.f32.partialorder %v5574_v54, %v5676_v36 }
 0x993   : >> { %v2222_v29 = vsel %vm2221_vm15, %v2217_v61, -inf  ;;  %v2207_v23 = vsel %vm2206_vm5, %v2202_v39, -inf  ;;  %v2166_v61 = vcvt.f32.s32 %v5654_v35  ;;  %v2151_v39 = vcvt.f32.s32 %v5656_v46 }
 0x994   : >> { %2223 = vmax.xlane.f32.xlu1 %v2222_v29  ;;  %2208 = vmax.xlane.f32.xlu0 %v2207_v23  ;;  %v2211_v35 = vcvt.f32.s32 %v5676_v36 }
 0x995   : >> { %v2250_v20 = vpop.xlane.xlu1 %2249  ;;  %v5684_v62 = vpop.xlane.xlu0 %2234  ;;  %v2167_v29 = vshll.u32 %v2166_v61, 16 }
 0x996   : >> { %vm2251_vm0 = vcmp.eq.f32.partialorder %v5580_v41, %v2250_v20  ;;  %vm2236_vm13 = vcmp.eq.f32.partialorder %v5582_v18, %v5684_v62  ;;  %v2256_v12 = vcvt.f32.s32 %v2250_v20 }
 0x997   : >> { %v2252_v60 = vsel %vm2251_vm0, %v2247_v13, -inf  ;;  %v2237_v56 = vsel %vm2236_vm13, %v2232_v22, -inf  ;;  %v2152_v22 = vshll.u32 %v2151_v39, 16  ;;  %v2241_v39 = vcvt.f32.s32 %v5684_v62 }
 0x998   : >> { %2253 = vmax.xlane.f32.xlu1 %v2252_v60  ;;  %2238 = vmax.xlane.f32.xlu0 %v2237_v56  ;;  %v2196_v60 = vcvt.f32.s32 %v5664_v43  ;;  %v2257_v36 = vshll.u32 %v2256_v12, 16 }
 0x999   : >> { %v5689_v47 = vpop.xlane.xlu1 %2297  ;;  %v5691_v54 = vpop.xlane.xlu0 %2294 }
 0x99a   : >> { %vm2306_vm3 = vcmp.ge.f32.partialorder %v5586_v32, %v5689_v47  ;;  %vm2305_vm12 = vcmp.ge.f32.partialorder %v5590_v15, %v5691_v54 }
 0x99b   : >> { %v2314_v41 = vsel %vm2306_vm3, -1e+30, %v5586_v32  ;;  %v2313_v18 = vsel %vm2305_vm12, -1e+30, %v5590_v15 }
 0x99c   : >> { %v2336_v55 = vsel %vm200_vm1, %v2314_v41, -inf  ;;  %v2333_v3 = vsel %vm200_vm1, %v2313_v18, -inf  ;;  %v2181_v41 = vcvt.f32.s32 %v5666_v10  ;;  %v2226_v18 = vcvt.f32.s32 %v5674_v14 }
 0x99d   : >> { %2337 = vmax.xlane.f32.xlu1 %v2336_v55  ;;  %2334 = vmax.xlane.f32.xlu0 %v2333_v3 }
 0x99e   : >> { %v2227_v10 = vshll.u32 %v2226_v18, 16 }
 0xa08   : >> { %v2320_v42 = vpop.xlane.xlu1 %2319  ;;  %v2317_v58 = vpop.xlane.xlu0 %2316 }
 0xa09   : >> { %v2364_v8 = vsub.f32 %v3979_v21, %v2320_v42  ;;  %v2363_v43 = vsub.f32 %v3979_v21, %v2317_v58 }
 0xa0b   : >> { %v2372_v42 = vsub.f32 %v2364_v8, %v3610_v0 }
 0xa0c   : >> { %v5707_v40 = vpop.xlane.xlu1 %2325  ;;  %v5709_v45 = vpop.xlane.xlu0 %2322 }
 0xa0d   : >> { %v2365_v12 = vsub.f32 %v3979_v21, %v5709_v45 }
 0xa10   : >> { %v2332_v4 = vpop.xlane.xlu1 %2331  ;;  %v2329_v52 = vpop.xlane.xlu0 %2328 }
 0xa11   : >> { %v2368_v14 = vsub.f32 %v3979_v21, %v2332_v4  ;;  %v2367_v62 = vsub.f32 %v3979_v21, %v2329_v52  ;;  %v2371_v4 = vsub.f32 %v2363_v43, %v3612_v5 }
 0xa13   : >> { %v2376_v8 = vsub.f32 %v2368_v14, %v3608_v63 }
 0xa19   : >> { %v2164_v44 = vpop.xlane.xlu1 %2163  ;;  %v2149_v11 = vpop.xlane.xlu0 %2148 }
 0xa1a   : >> { %v2165_v23 = vcvt.f32.s32 %v2164_v44  ;;  %v2150_v13 = vcvt.f32.s32 %v2149_v11  ;;  %v2197_v44 = vshll.u32 %v2196_v60, 16  ;;  %v2182_v11 = vshll.u32 %v2181_v41, 16 }
 0xa1b   : >> { %v2242_v60 = vshll.u32 %v2241_v39, 16 }
 0xa1c   : >> { %v2168_v56 = vadd.s32 %v2167_v29, %v2165_v23  ;;  %v2153_v55 = vadd.s32 %v2152_v22, %v2150_v13  ;;  %v2212_v13 = vshll.u32 %v2211_v35, 16 }
 0xa1d   : >> { %v2194_v3 = vpop.xlane.xlu1 %2193  ;;  %v2179_v2 = vpop.xlane.xlu0 %2178 }
 0xa1e   : >> { %v2195_v46 = vcvt.f32.s32 %v2194_v3  ;;  %vm2260_vm4 = vcmp.eq.s32.totalorder %v2168_v56, 0  ;;  %v2180_v61 = vcvt.f32.s32 %v2179_v2  ;;  %vm2259_vm14 = vcmp.eq.s32.totalorder %v2153_v55, 0 }
 0xa1f   : >> { %vm2356_vm11 = vmand %vm2300_vm8, %vm2260_vm4  ;;  %v2366_v56 = vsub.f32 %v3979_v21, %v5707_v40  ;;  %v2375_v55 = vsub.f32 %v2367_v62, %v3614_v6 }
 0xa20   : >> { %v2198_v20 = vadd.s32 %v2197_v44, %v2195_v46  ;;  %v2183_v58 = vadd.s32 %v2182_v11, %v2180_v61  ;;  %vm2355_vm15 = vmand %vm2299_vm2, %vm2259_vm14  ;;  %v5736_v38 = vsel %vm2356_vm11, %v2372_v42, -1e+30  ;;  %v2373_v61 = vsub.f32 %v2365_v12, %v3648_v27 }
 0xa21   : >> { %v2224_v29 = vpop.xlane.xlu1 %2223  ;;  %v2209_v23 = vpop.xlane.xlu0 %2208  ;;  %v2379_v35 = vsel %vm2355_vm15, %v2371_v4, -1e+30  ;;  %v2374_v59 = vsub.f32 %v2366_v56, %v3646_v26  ;;  %v2388_v44 = vsel %vm200_vm1, %v5736_v38, -inf }
 0xa22   : >> { %v2225_v2 = vcvt.f32.s32 %v2224_v29  ;;  %v2210_v22 = vcvt.f32.s32 %v2209_v23  ;;  %vm2262_vm8 = vcmp.eq.s32.totalorder %v2198_v20, 0  ;;  %vm2261_vm0 = vcmp.eq.s32.totalorder %v2183_v58, 0 }
 0xa23   : >> { %v2387_v39 = vsel %vm200_vm1, %v2379_v35, -inf }
 0xa24   : >> { %v2228_v37 = vadd.s32 %v2227_v10, %v2225_v2  ;;  %v2213_v52 = vadd.s32 %v2212_v13, %v2210_v22 }
 0xa25   : >> { %v2254_v41 = vpop.xlane.xlu1 %2253  ;;  %v2239_v18 = vpop.xlane.xlu0 %2238 }
 0xa26   : >> { %vm2264_vm5 = vcmp.eq.s32.totalorder %v2228_v37, 0  ;;  %v2255_v3 = vcvt.f32.s32 %v2254_v41  ;;  %v2240_v40 = vcvt.f32.s32 %v2239_v18  ;;  %vm2263_vm13 = vcmp.eq.s32.totalorder %v2213_v52, 0 }
 0xa27   : >> { %vm2360_vm2 = vmand %vm2304_vm7, %vm2264_vm5 }
 0xa28   : >> { %v2384_v17 = vsel %vm2360_vm2, %v2376_v8, -1e+30  ;;  %vm2359_vm4 = vmand %vm2303_vm10, %vm2263_vm13  ;;  %v2258_v45 = vadd.s32 %v2257_v36, %v2255_v3  ;;  %v2243_v46 = vadd.s32 %v2242_v60, %v2240_v40 }
 0xa29   : >> { %vm2358_vm7 = vmand %vm2302_vm6, %vm2262_vm8  ;;  %v2393_v7 = vsel %vm200_vm1, %v2384_v17, -inf  ;;  %v2383_v57 = vsel %vm2359_vm4, %v2375_v55, -1e+30 }
 0xa2a   : >> { %vm2357_vm10 = vmand %vm2301_vm9, %vm2261_vm0  ;;  %v2394_v16 = vmax.f32 %v2388_v44, %v2393_v7  ;;  %v2391_v24 = vsel %vm200_vm1, %v2383_v57, -inf  ;;  %vm2266_vm14 = vcmp.eq.s32.totalorder %v2258_v45, 0  ;;  %v2338_v43 = vpop.xlane.xlu1 %2337  ;;  %v2335_v11 = vpop.xlane.xlu0 %2334  ;;  %vm2265_vm11 = vcmp.eq.s32.totalorder %v2243_v46, 0 }
 0xa2b   : >> { %v2392_v10 = vmax.f32 %v2387_v39, %v2391_v24  ;;  %v2370_v19 = vsub.f32 %v3979_v21, %v2338_v43  ;;  %v2369_v30 = vsub.f32 %v3979_v21, %v2335_v11  ;;  %v2382_v14 = vsel %vm2358_vm7, %v2374_v59, -1e+30  ;;  %vm2362_vm6 = vmand %vm2306_vm3, %vm2266_vm14 }
 0xa2c   : >> { %v2381_v29 = vsel %vm2357_vm10, %v2373_v61, -1e+30  ;;  %vm2361_vm9 = vmand %vm2305_vm12, %vm2265_vm11  ;;  %v2390_v20 = vsel %vm200_vm1, %v2382_v14, -inf }
 0xa2d   : >> { %v2399_v23 = vmax.f32 %v2392_v10, %v2394_v16  ;;  %v2378_v34 = vsub.f32 %v2370_v19, %v3644_v25  ;;  %v2377_v33 = vsub.f32 %v2369_v30, %v3650_v28  ;;  %v2389_v42 = vsel %vm200_vm1, %v2381_v29, -inf  ;;  %v6835_v10 = vld [vmem:[#allocation15_spill] sm:$0xff] }
 0xa2f   : >> { %v2386_v13 = vsel %vm2362_vm6, %v2378_v34, -1e+30  ;;  %v2385_v36 = vsel %vm2361_vm9, %v2377_v33, -1e+30 }
 0xa30   : >> { %v2397_v2 = vsel %vm200_vm1, %v2386_v13, -inf  ;;  %v2395_v62 = vsel %vm200_vm1, %v2385_v36, -inf }
 0xa31   : >> { %v2398_v32 = vmax.f32 %v2390_v20, %v2397_v2  ;;  %v2396_v47 = vmax.f32 %v2389_v42, %v2395_v62 }
 0xa33   : >> { %v2400_v58 = vmax.f32 %v2396_v47, %v2398_v32 }
 0xa35   : >> { %v2401_v22 = vmax.f32 %v2399_v23, %v2400_v58 }
 0xa37   : >> { %v2402_v60 = vrot.slane %v2401_v22, 4 }
 0xa39   : >> { %v2403_v4 = vmax.f32 %v2401_v22, %v2402_v60 }
 0xa3b   : >> { %v2404_v56 = vrot.slane %v2403_v4, 2 }
 0xa3d   : >> { %v2405_v37 = vmax.f32 %v2403_v4, %v2404_v56 }
 0xa3f   : >> { %v2406_v15 = vrot.slane %v2405_v37, 1 }
 0xa41   : >> { %v5773_v54 = vmax.f32 %v2405_v37, %v2406_v15  ;;  %v6837_v37 = vld [vmem:[#allocation14_spill] sm:$0xff] }
 0xa43   : >> { %vm2408_vm3 = vcmp.ge.f32.partialorder %v2379_v35, %v5773_v54  ;;  %vm2409_vm12 = vcmp.ge.f32.partialorder %v5736_v38, %v5773_v54  ;;  %vm2410_vm15 = vcmp.ge.f32.partialorder %v2381_v29, %v5773_v54  ;;  %vm2411_vm8 = vcmp.ge.f32.partialorder %v2382_v14, %v5773_v54 }
 0xa44   : >> { %vm2412_vm5 = vcmp.ge.f32.partialorder %v2383_v57, %v5773_v54  ;;  %vm2413_vm0 = vcmp.ge.f32.partialorder %v2384_v17, %v5773_v54  ;;  %vm2414_vm2 = vcmp.ge.f32.partialorder %v2385_v36, %v5773_v54  ;;  %vm2415_vm13 = vcmp.ge.f32.partialorder %v2386_v13, %v5773_v54 }
 0xa45   : >> { %v2416_v12 = vsel %vm2408_vm3, %v3680_v48, 64  ;;  %v2417_v8 = vsel %vm2409_vm12, %v3683_v49, 64  ;;  %v2418_v52 = vsel %vm2410_vm15, %v3686_v50, 64  ;;  %v2419_v38 = vsel %vm2411_vm8, %v3689_v51, 64 }
 0xa46   : >> { %v2420_v41 = vsel %vm2412_vm5, %v6826_v1, 64  ;;  %v2421_v18 = vsel %vm2413_vm0, %v6827_v53, 64  ;;  %v2422_v3 = vsel %vm2414_vm2, %v6828_v31, 64  ;;  %v2423_v40 = vsel %vm2415_vm13, %v6829_v9, 64 }
 0xa47   : >> { %v2424_v55 = vsel %vm200_vm1, %v2416_v12, 2147483647  ;;  %v2425_v35 = vsel %vm200_vm1, %v2417_v8, 2147483647  ;;  %v2426_v59 = vsel %vm200_vm1, %v2418_v52, 2147483647 }
 0xa48   : >> { %v2427_v17 = vsel %vm200_vm1, %v2419_v38, 2147483647  ;;  %v2428_v45 = vsel %vm200_vm1, %v2420_v41, 2147483647  ;;  %v2431_v46 = vsel %vm200_vm1, %v2421_v18, 2147483647 }
 0xa49   : >> { %vm2429_vm4 = vcmp.lt.s32.totalorder %v2424_v55, %v2428_v45  ;;  %vm2432_vm7 = vcmp.lt.s32.totalorder %v2425_v35, %v2431_v46  ;;  %v2434_v61 = vsel %vm200_vm1, %v2422_v3, 2147483647  ;;  %v2437_v44 = vsel %vm200_vm1, %v2423_v40, 2147483647 }
 0xa4a   : >> { %v2430_v7 = vsel %vm2429_vm4, %v2424_v55, %v2428_v45  ;;  %v2433_v57 = vsel %vm2432_vm7, %v2425_v35, %v2431_v46  ;;  %vm2435_vm10 = vcmp.lt.s32.totalorder %v2426_v59, %v2434_v61  ;;  %vm2438_vm14 = vcmp.lt.s32.totalorder %v2427_v17, %v2437_v44 }
 0xa4b   : >> { %v2436_v39 = vsel %vm2435_vm10, %v2426_v59, %v2434_v61  ;;  %v2439_v16 = vsel %vm2438_vm14, %v2427_v17, %v2437_v44  ;;  %vm2440_vm11 = vcmp.lt.s32.totalorder %v2430_v7, %v2433_v57  ;;  %vm2455_vm6 = vcmp.gt.f32.partialorder %v5773_v54, -1e+29 }
 0xa4c   : >> { %v2441_v24 = vsel %vm2440_vm11, %v2430_v7, %v2433_v57  ;;  %vm2442_vm9 = vcmp.lt.s32.totalorder %v2436_v39, %v2439_v16  ;;  %v2456_v43 = vsub.f32 0.0, %v5773_v54  ;;  %v6839_v12 = vmov 0  }
 0xa4d   : >> { %v2443_v11 = vsel %vm2442_vm9, %v2436_v39, %v2439_v16 }
 0xa4e   : >> { %vm2444_vm3 = vcmp.lt.s32.totalorder %v2441_v24, %v2443_v11  ;;  %v5805_v19 = vsel %vm2455_vm6, %v2456_v43, %v6835_v10 }
 0xa4f   : >> { %6836 = vst [vmem:[#allocation15_spill] sm:$0xff] %v5805_v19  ;;  %v2445_v30 = vsel %vm2444_vm3, %v2441_v24, %v2443_v11  ;;  %v5809_v14 = vsub.f32 %v5805_v19, %v3610_v0  ;;  %v5813_v29 = vsub.f32 %v5805_v19, %v3612_v5  ;;  %v5821_v13 = vsub.f32 %v5805_v19, %v3646_v26 }
 0xa50   : >> { %v2446_v23 = vrot.slane %v2445_v30, 4  ;;  %v5825_v36 = vsub.f32 %v5805_v19, %v3648_v27  ;;  %v5833_v32 = vsub.f32 %v5805_v19, %v3608_v63  ;;  %v5837_v47 = vsub.f32 %v5805_v19, %v3614_v6 }
 0xa51   : >> { %v2614_v34 = vsel %vm200_vm1, %v5809_v14, -inf  ;;  %v2611_v33 = vsel %vm200_vm1, %v5813_v29, -inf  ;;  %v2620_v42 = vsel %vm200_vm1, %v5821_v13, -inf }
 0xa52   : >> { %vm2447_vm12 = vcmp.lt.s32.totalorder %v2445_v30, %v2446_v23  ;;  %2615 = vmax.xlane.f32.xlu1 %v2614_v34  ;;  %2612 = vmax.xlane.f32.xlu0 %v2611_v33  ;;  %v2617_v62 = vsel %vm200_vm1, %v5825_v36, -inf  ;;  %v2626_v60 = vsel %vm200_vm1, %v5833_v32, -inf  ;;  %v2623_v4 = vsel %vm200_vm1, %v5837_v47, -inf }
 0xa53   : >> { %v2448_v20 = vsel %vm2447_vm12, %v2445_v30, %v2446_v23 }
 0xa54   : >> { %v2449_v2 = vrot.slane %v2448_v20, 2 }
 0xa56   : >> { %vm2450_vm15 = vcmp.lt.s32.totalorder %v2448_v20, %v2449_v2  ;;  %2621 = vmax.xlane.f32.xlu1 %v2620_v42  ;;  %2618 = vmax.xlane.f32.xlu0 %v2617_v62 }
 0xa57   : >> { %v2451_v58 = vsel %vm2450_vm15, %v2448_v20, %v2449_v2 }
 0xa58   : >> { %v2452_v22 = vrot.slane %v2451_v58, 1 }
 0xa5a   : >> { %vm2453_vm8 = vcmp.lt.s32.totalorder %v2451_v58, %v2452_v22  ;;  %2627 = vmax.xlane.f32.xlu1 %v2626_v60  ;;  %2624 = vmax.xlane.f32.xlu0 %v2623_v4 }
 0xa5b   : >> { %v2454_v56 = vsel %vm2453_vm8, %v2451_v58, %v2452_v22  ;;  %v5928_v58 = vsub.f32 %v5805_v19, %v3644_v25  ;;  %v5932_v22 = vsub.f32 %v5805_v19, %v3650_v28 }
 0xa5c   : >> { %v5846_v15 = vsel %vm2455_vm6, %v2454_v56, %v6837_v37 }
 0xa5d   : >> { %6838 = vst [vmem:[#allocation14_spill] sm:$0xff] %v5846_v15  ;;  %vm2460_vm5 = vcmp.eq.s32.totalorder %v5846_v15, %v3683_v49  ;;  %vm2459_vm0 = vcmp.eq.s32.totalorder %v5846_v15, %v3680_v48  ;;  %vm2462_vm2 = vcmp.eq.s32.totalorder %v5846_v15, %v3689_v51  ;;  %vm2461_vm13 = vcmp.eq.s32.totalorder %v5846_v15, %v3686_v50 }
 0xa5e   : >> { %v2468_v8 = vsel %vm2460_vm5, 1, %v6839_v12  ;;  %v2467_v52 = vsel %vm2459_vm0, 1, %v6839_v12  ;;  %v2470_v54 = vsel %vm2462_vm2, 1, %v6839_v12  ;;  %v2469_v38 = vsel %vm2461_vm13, 1, %v6839_v12 }
 0xa5f   : >> { %v5861_v41 = vsel %vm200_vm1, %v2468_v8, 2147483648  ;;  %v5864_v18 = vsel %vm200_vm1, %v2467_v52, 2147483648  ;;  %v5867_v3 = vsel %vm200_vm1, %v2470_v54, 2147483648  ;;  %v5870_v40 = vsel %vm200_vm1, %v2469_v38, 2147483648 }
 0xa60   : >> { %v2492_v55 = vshra.s32 %v5861_v41, 16  ;;  %v2477_v35 = vshra.s32 %v5864_v18, 16  ;;  %vm2464_vm4 = vcmp.eq.s32.totalorder %v5846_v15, %v6827_v53  ;;  %vm2463_vm7 = vcmp.eq.s32.totalorder %v5846_v15, %v6826_v1 }
 0xa61   : >> { %vm2466_vm10 = vcmp.eq.s32.totalorder %v5846_v15, %v6829_v9  ;;  %vm2465_vm14 = vcmp.eq.s32.totalorder %v5846_v15, %v6828_v31  ;;  %v2522_v45 = vshra.s32 %v5867_v3, 16  ;;  %v2507_v46 = vshra.s32 %v5870_v40, 16 }
 0xa62   : >> { %v5882_v59 = vcvt.s32.f32 %v2492_v55  ;;  %v5884_v17 = vcvt.s32.f32 %v2477_v35  ;;  %v2472_v61 = vsel %vm2464_vm4, 1, %v6839_v12  ;;  %v2471_v44 = vsel %vm2463_vm7, 1, %v6839_v12 }
 0xa63   : >> { %v5893_v7 = vsel %vm200_vm1, %v2472_v61, 2147483648  ;;  %v5896_v57 = vsel %vm200_vm1, %v2471_v44, 2147483648  ;;  %v2474_v39 = vsel %vm2466_vm10, 1, %v6839_v12  ;;  %v2473_v16 = vsel %vm2465_vm14, 1, %v6839_v12 }
 0xa64   : >> { %2495 = vmax.xlane.f32.xlu1 %v5882_v59  ;;  %2480 = vmax.xlane.f32.xlu0 %v5884_v17  ;;  %v5900_v24 = vcvt.s32.f32 %v2522_v45  ;;  %v5902_v43 = vcvt.s32.f32 %v2507_v46  ;;  %v2552_v11 = vshra.s32 %v5893_v7, 16  ;;  %v2537_v10 = vshra.s32 %v5896_v57, 16 }
 0xa65   : >> { %v5907_v30 = vsel %vm200_vm1, %v2474_v39, 2147483648  ;;  %v5910_v23 = vsel %vm200_vm1, %v2473_v16, 2147483648  ;;  %v2632_v60 = vsel %vm200_vm1, %v5928_v58, -inf  ;;  %v2629_v4 = vsel %vm200_vm1, %v5932_v22, -inf }
 0xa66   : >> { %v5914_v34 = vcvt.s32.f32 %v2552_v11  ;;  %v5916_v33 = vcvt.s32.f32 %v2537_v10  ;;  %v2582_v20 = vshra.s32 %v5907_v30, 16  ;;  %v2567_v2 = vshra.s32 %v5910_v23, 16 }
 0xa68   : >> { %2525 = vmax.xlane.f32.xlu1 %v5900_v24  ;;  %2510 = vmax.xlane.f32.xlu0 %v5902_v43  ;;  %v5922_v42 = vcvt.s32.f32 %v2582_v20  ;;  %v5924_v62 = vcvt.s32.f32 %v2567_v2 }
 0xa6c   : >> { %2555 = vmax.xlane.f32.xlu1 %v5914_v34  ;;  %2540 = vmax.xlane.f32.xlu0 %v5916_v33 }
 0xa70   : >> { %2585 = vmax.xlane.f32.xlu1 %v5922_v42  ;;  %2570 = vmax.xlane.f32.xlu0 %v5924_v62 }
 0xa74   : >> { %2633 = vmax.xlane.f32.xlu1 %v2632_v60  ;;  %2630 = vmax.xlane.f32.xlu0 %v2629_v4  ;;  %v2491_v60 = vand.u32 65535, %v5861_v41  ;;  %v2476_v4 = vand.u32 65535, %v5864_v18 }
 0xadf   : >> { %v5940_v56 = vpop.xlane.xlu1 %2615  ;;  %v5942_v37 = vpop.xlane.xlu0 %2612 }
 0xae0   : >> { %vm2636_vm11 = vcmp.ge.f32.partialorder %v5809_v14, %v5940_v56  ;;  %vm2635_vm6 = vcmp.ge.f32.partialorder %v5813_v29, %v5942_v37 }
 0xae1   : >> { %v2644_v8 = vsel %vm2636_vm11, -1e+30, %v5809_v14  ;;  %v2643_v52 = vsel %vm2635_vm6, -1e+30, %v5813_v29 }
 0xae2   : >> { %v2654_v54 = vsel %vm200_vm1, %v2644_v8, -inf  ;;  %v2651_v38 = vsel %vm200_vm1, %v2643_v52, -inf }
 0xae3   : >> { %v5958_v55 = vpop.xlane.xlu1 %2621  ;;  %v5960_v35 = vpop.xlane.xlu0 %2618  ;;  %2655 = vmax.xlane.f32.xlu1 %v2654_v54  ;;  %2652 = vmax.xlane.f32.xlu0 %v2651_v38  ;;  %v2493_v54 = vcvt.s32.f32 %v2491_v60  ;;  %v2478_v38 = vcvt.s32.f32 %v2476_v4 }
 0xae4   : >> { %vm2638_vm9 = vcmp.ge.f32.partialorder %v5821_v13, %v5958_v55  ;;  %vm2637_vm3 = vcmp.ge.f32.partialorder %v5825_v36, %v5960_v35 }
 0xae5   : >> { %v2646_v45 = vsel %vm2638_vm9, -1e+30, %v5821_v13  ;;  %v2645_v46 = vsel %vm2637_vm3, -1e+30, %v5825_v36 }
 0xae6   : >> { %v2660_v61 = vsel %vm200_vm1, %v2646_v45, -inf  ;;  %v2657_v44 = vsel %vm200_vm1, %v2645_v46, -inf  ;;  %v2521_v45 = vand.u32 65535, %v5867_v3  ;;  %v2506_v46 = vand.u32 65535, %v5870_v40 }
 0xae7   : >> { %v5976_v39 = vpop.xlane.xlu1 %2627  ;;  %v5978_v16 = vpop.xlane.xlu0 %2624  ;;  %2661 = vmax.xlane.f32.xlu1 %v2660_v61  ;;  %2658 = vmax.xlane.f32.xlu0 %v2657_v44  ;;  %v2551_v3 = vand.u32 65535, %v5893_v7  ;;  %v2536_v40 = vand.u32 65535, %v5896_v57  ;;  %v2581_v7 = vand.u32 65535, %v5907_v30  ;;  %v2566_v57 = vand.u32 65535, %v5910_v23 }
 0xae8   : >> { %vm2640_vm12 = vcmp.ge.f32.partialorder %v5833_v32, %v5976_v39  ;;  %vm2639_vm15 = vcmp.ge.f32.partialorder %v5837_v47, %v5978_v16 }
 0xae9   : >> { %v2648_v11 = vsel %vm2640_vm12, -1e+30, %v5833_v32  ;;  %v2647_v10 = vsel %vm2639_vm15, -1e+30, %v5837_v47  ;;  %v2553_v60 = vcvt.s32.f32 %v2551_v3  ;;  %v2538_v4 = vcvt.s32.f32 %v2536_v40 }
 0xaea   : >> { %v2666_v20 = vsel %vm200_vm1, %v2648_v11, -inf  ;;  %v2663_v2 = vsel %vm200_vm1, %v2647_v10, -inf  ;;  %v2523_v11 = vcvt.s32.f32 %v2521_v45  ;;  %v2508_v10 = vcvt.s32.f32 %v2506_v46 }
 0xaeb   : >> { %2667 = vmax.xlane.f32.xlu1 %v2666_v20  ;;  %2664 = vmax.xlane.f32.xlu0 %v2663_v2  ;;  %v2583_v45 = vcvt.s32.f32 %v2581_v7  ;;  %v2568_v46 = vcvt.s32.f32 %v2566_v57 }
 0xaf1   : >> { %v5996_v8 = vpop.xlane.xlu1 %2495  ;;  %v5998_v52 = vpop.xlane.xlu0 %2480 }
 0xaf2   : >> { %vm2497_vm8 = vcmp.eq.f32.partialorder %v5882_v59, %v5996_v8  ;;  %vm2482_vm5 = vcmp.eq.f32.partialorder %v5884_v17, %v5998_v52 }
 0xaf3   : >> { %v2498_v61 = vsel %vm2497_vm8, %v2493_v54, -inf  ;;  %v2483_v41 = vsel %vm2482_vm5, %v2478_v38, -inf }
 0xaf4   : >> { %2499 = vmax.xlane.f32.xlu1 %v2498_v61  ;;  %2484 = vmax.xlane.f32.xlu0 %v2483_v41 }
 0xaf5   : >> { %v6006_v18 = vpop.xlane.xlu1 %2525  ;;  %v6008_v44 = vpop.xlane.xlu0 %2510 }
 0xaf6   : >> { %vm2527_vm0 = vcmp.eq.f32.partialorder %v5900_v24, %v6006_v18  ;;  %vm2512_vm2 = vcmp.eq.f32.partialorder %v5902_v43, %v6008_v44 }
 0xaf7   : >> { %v2528_v59 = vsel %vm2527_vm0, %v2523_v11, -inf  ;;  %v2513_v17 = vsel %vm2512_vm2, %v2508_v10, -inf }
 0xaf8   : >> { %2529 = vmax.xlane.f32.xlu1 %v2528_v59  ;;  %2514 = vmax.xlane.f32.xlu0 %v2513_v17 }
 0xaf9   : >> { %v6016_v20 = vpop.xlane.xlu1 %2555  ;;  %v6018_v2 = vpop.xlane.xlu0 %2540 }
 0xafa   : >> { %vm2557_vm13 = vcmp.eq.f32.partialorder %v5914_v34, %v6016_v20  ;;  %vm2542_vm4 = vcmp.eq.f32.partialorder %v5916_v33, %v6018_v2 }
 0xafb   : >> { %v2558_v24 = vsel %vm2557_vm13, %v2553_v60, -inf  ;;  %v2543_v43 = vsel %vm2542_vm4, %v2538_v4, -inf  ;;  %v2502_v60 = vcvt.f32.s32 %v5996_v8  ;;  %v2487_v4 = vcvt.f32.s32 %v5998_v52 }
 0xafc   : >> { %2559 = vmax.xlane.f32.xlu1 %v2558_v24  ;;  %2544 = vmax.xlane.f32.xlu0 %v2543_v43  ;;  %v2547_v8 = vcvt.f32.s32 %v6018_v2 }
 0xafd   : >> { %v2586_v54 = vpop.xlane.xlu1 %2585  ;;  %v6026_v38 = vpop.xlane.xlu0 %2570  ;;  %v2503_v24 = vshll.u32 %v2502_v60, 16 }
 0xafe   : >> { %vm2587_vm7 = vcmp.eq.f32.partialorder %v5922_v42, %v2586_v54  ;;  %vm2572_vm10 = vcmp.eq.f32.partialorder %v5924_v62, %v6026_v38  ;;  %v2592_v15 = vcvt.f32.s32 %v2586_v54 }
 0xaff   : >> { %v2588_v30 = vsel %vm2587_vm7, %v2583_v45, -inf  ;;  %v2573_v23 = vsel %vm2572_vm10, %v2568_v46, -inf  ;;  %v2488_v46 = vshll.u32 %v2487_v4, 16  ;;  %v2577_v4 = vcvt.f32.s32 %v6026_v38 }
 0xb00   : >> { %2589 = vmax.xlane.f32.xlu1 %v2588_v30  ;;  %2574 = vmax.xlane.f32.xlu0 %v2573_v23  ;;  %v2532_v30 = vcvt.f32.s32 %v6006_v18  ;;  %v2593_v2 = vshll.u32 %v2592_v15, 16 }
 0xb01   : >> { %v6031_v34 = vpop.xlane.xlu1 %2633  ;;  %v6033_v33 = vpop.xlane.xlu0 %2630 }
 0xb02   : >> { %vm2642_vm14 = vcmp.ge.f32.partialorder %v5928_v58, %v6031_v34  ;;  %vm2641_vm8 = vcmp.ge.f32.partialorder %v5932_v22, %v6033_v33 }
 0xb03   : >> { %v2650_v42 = vsel %vm2642_vm14, -1e+30, %v5928_v58  ;;  %v2649_v62 = vsel %vm2641_vm8, -1e+30, %v5932_v22 }
 0xb04   : >> { %v2672_v61 = vsel %vm200_vm1, %v2650_v42, -inf  ;;  %v2669_v41 = vsel %vm200_vm1, %v2649_v62, -inf  ;;  %v2517_v42 = vcvt.f32.s32 %v6008_v44  ;;  %v2562_v62 = vcvt.f32.s32 %v6016_v20 }
 0xb05   : >> { %2673 = vmax.xlane.f32.xlu1 %v2672_v61  ;;  %2670 = vmax.xlane.f32.xlu0 %v2669_v41 }
 0xb06   : >> { %v2563_v44 = vshll.u32 %v2562_v62, 16 }
 0xb70   : >> { %v2656_v11 = vpop.xlane.xlu1 %2655  ;;  %v2653_v10 = vpop.xlane.xlu0 %2652 }
 0xb71   : >> { %v2700_v19 = vsub.f32 %v3979_v21, %v2656_v11  ;;  %v2699_v18 = vsub.f32 %v3979_v21, %v2653_v10 }
 0xb73   : >> { %v2708_v11 = vsub.f32 %v2700_v19, %v3610_v0 }
 0xb74   : >> { %v6049_v3 = vpop.xlane.xlu1 %2661  ;;  %v6051_v40 = vpop.xlane.xlu0 %2658 }
 0xb75   : >> { %v2701_v15 = vsub.f32 %v3979_v21, %v6051_v40 }
 0xb78   : >> { %v2668_v59 = vpop.xlane.xlu1 %2667  ;;  %v2665_v17 = vpop.xlane.xlu0 %2664 }
 0xb79   : >> { %v2704_v20 = vsub.f32 %v3979_v21, %v2668_v59  ;;  %v2703_v38 = vsub.f32 %v3979_v21, %v2665_v17  ;;  %v2707_v59 = vsub.f32 %v2699_v18, %v3612_v5 }
 0xb7b   : >> { %v2712_v19 = vsub.f32 %v2704_v20, %v3608_v63 }
 0xb81   : >> { %v2500_v7 = vpop.xlane.xlu1 %2499  ;;  %v2485_v57 = vpop.xlane.xlu0 %2484 }
 0xb82   : >> { %v2501_v43 = vcvt.f32.s32 %v2500_v7  ;;  %v2486_v45 = vcvt.f32.s32 %v2485_v57  ;;  %v2533_v7 = vshll.u32 %v2532_v30, 16  ;;  %v2518_v57 = vshll.u32 %v2517_v42, 16 }
 0xb83   : >> { %v2578_v30 = vshll.u32 %v2577_v4, 16 }
 0xb84   : >> { %v2504_v23 = vadd.s32 %v2503_v24, %v2501_v43  ;;  %v2489_v61 = vadd.s32 %v2488_v46, %v2486_v45  ;;  %v2548_v45 = vshll.u32 %v2547_v8, 16 }
 0xb85   : >> { %v2530_v41 = vpop.xlane.xlu1 %2529  ;;  %v2515_v12 = vpop.xlane.xlu0 %2514 }
 0xb86   : >> { %v2531_v52 = vcvt.f32.s32 %v2530_v41  ;;  %vm2596_vm5 = vcmp.eq.s32.totalorder %v2504_v23, 0  ;;  %v2516_v60 = vcvt.f32.s32 %v2515_v12  ;;  %vm2595_vm0 = vcmp.eq.s32.totalorder %v2489_v61, 0 }
 0xb87   : >> { %vm2692_vm2 = vmand %vm2636_vm11, %vm2596_vm5  ;;  %v2702_v23 = vsub.f32 %v3979_v21, %v6049_v3  ;;  %v2711_v61 = vsub.f32 %v2703_v38, %v3614_v6 }
 0xb88   : >> { %v2534_v54 = vadd.s32 %v2533_v7, %v2531_v52  ;;  %v2519_v10 = vadd.s32 %v2518_v57, %v2516_v60  ;;  %vm2691_vm13 = vmand %vm2635_vm6, %vm2595_vm0  ;;  %v6078_v56 = vsel %vm2692_vm2, %v2708_v11, -1e+30  ;;  %v2709_v60 = vsub.f32 %v2701_v15, %v3648_v27 }
 0xb89   : >> { %v2560_v24 = vpop.xlane.xlu1 %2559  ;;  %v2545_v43 = vpop.xlane.xlu0 %2544  ;;  %v2715_v8 = vsel %vm2691_vm13, %v2707_v59, -1e+30  ;;  %v2710_v29 = vsub.f32 %v2702_v23, %v3646_v26  ;;  %v2724_v7 = vsel %vm200_vm1, %v6078_v56, -inf }
 0xb8a   : >> { %v2561_v12 = vcvt.f32.s32 %v2560_v24  ;;  %v2546_v46 = vcvt.f32.s32 %v2545_v43  ;;  %vm2598_vm11 = vcmp.eq.s32.totalorder %v2534_v54, 0  ;;  %vm2597_vm7 = vcmp.eq.s32.totalorder %v2519_v10, 0 }
 0xb8b   : >> { %v2723_v4 = vsel %vm200_vm1, %v2715_v8, -inf }
 0xb8c   : >> { %v2564_v14 = vadd.s32 %v2563_v44, %v2561_v12  ;;  %v2549_v17 = vadd.s32 %v2548_v45, %v2546_v46 }
 0xb8d   : >> { %v2590_v42 = vpop.xlane.xlu1 %2589  ;;  %v2575_v62 = vpop.xlane.xlu0 %2574 }
 0xb8e   : >> { %vm2600_vm4 = vcmp.eq.s32.totalorder %v2564_v14, 0  ;;  %v2591_v41 = vcvt.f32.s32 %v2590_v42  ;;  %v2576_v3 = vcvt.f32.s32 %v2575_v62  ;;  %vm2599_vm10 = vcmp.eq.s32.totalorder %v2549_v17, 0 }
 0xb8f   : >> { %vm2696_vm6 = vmand %vm2640_vm12, %vm2600_vm4 }
 0xb90   : >> { %v2720_v37 = vsel %vm2696_vm6, %v2712_v19, -1e+30  ;;  %vm2695_vm5 = vmand %vm2639_vm15, %vm2599_vm10  ;;  %v2594_v40 = vadd.s32 %v2593_v2, %v2591_v41  ;;  %v2579_v52 = vadd.s32 %v2578_v30, %v2576_v3 }
 0xb91   : >> { %vm2694_vm12 = vmand %vm2638_vm9, %vm2598_vm11  ;;  %v2729_v32 = vsel %vm200_vm1, %v2720_v37, -inf  ;;  %v2719_v39 = vsel %vm2695_vm5, %v2711_v61, -1e+30 }
 0xb92   : >> { %vm2693_vm15 = vmand %vm2637_vm3, %vm2597_vm7  ;;  %v2730_v47 = vmax.f32 %v2724_v7, %v2729_v32  ;;  %v2727_v16 = vsel %vm200_vm1, %v2719_v39, -inf  ;;  %vm2602_vm0 = vcmp.eq.s32.totalorder %v2594_v40, 0  ;;  %v2674_v18 = vpop.xlane.xlu1 %2673  ;;  %v2671_v57 = vpop.xlane.xlu0 %2670  ;;  %vm2601_vm2 = vcmp.eq.s32.totalorder %v2579_v52, 0 }
 0xb93   : >> { %v2728_v44 = vmax.f32 %v2723_v4, %v2727_v16  ;;  %v2706_v13 = vsub.f32 %v3979_v21, %v2674_v18  ;;  %v2705_v55 = vsub.f32 %v3979_v21, %v2671_v57  ;;  %v2718_v20 = vsel %vm2694_vm12, %v2710_v29, -1e+30  ;;  %vm2698_vm9 = vmand %vm2642_vm14, %vm2602_vm0 }
 0xb94   : >> { %v2717_v24 = vsel %vm2693_vm15, %v2709_v60, -1e+30  ;;  %vm2697_vm3 = vmand %vm2641_vm8, %vm2601_vm2  ;;  %v2726_v54 = vsel %vm200_vm1, %v2718_v20, -inf }
 0xb95   : >> { %v2735_v43 = vmax.f32 %v2728_v44, %v2730_v47  ;;  %v2714_v36 = vsub.f32 %v2706_v13, %v3644_v25  ;;  %v2713_v35 = vsub.f32 %v2705_v55, %v3650_v28  ;;  %v2725_v11 = vsel %vm200_vm1, %v2717_v24, -inf  ;;  %v6840_v44 = vld [vmem:[#allocation15_spill] sm:$0xff] }
 0xb97   : >> { %v2722_v45 = vsel %vm2698_vm9, %v2714_v36, -1e+30  ;;  %v2721_v2 = vsel %vm2697_vm3, %v2713_v35, -1e+30 }
 0xb98   : >> { %v2733_v12 = vsel %vm200_vm1, %v2722_v45, -inf  ;;  %v2731_v38 = vsel %vm200_vm1, %v2721_v2, -inf }
 0xb99   : >> { %v2734_v58 = vmax.f32 %v2726_v54, %v2733_v12  ;;  %v2732_v34 = vmax.f32 %v2725_v11, %v2731_v38 }
 0xb9b   : >> { %v2736_v10 = vmax.f32 %v2732_v34, %v2734_v58 }
 0xb9d   : >> { %v2737_v46 = vmax.f32 %v2735_v43, %v2736_v10 }
 0xb9f   : >> { %v2738_v30 = vrot.slane %v2737_v46, 4 }
 0xba1   : >> { %v2739_v59 = vmax.f32 %v2737_v46, %v2738_v30 }
 0xba3   : >> { %v2740_v23 = vrot.slane %v2739_v59, 2 }
 0xba5   : >> { %v2741_v14 = vmax.f32 %v2739_v59, %v2740_v23 }
 0xba7   : >> { %v2742_v22 = vrot.slane %v2741_v14, 1 }
 0xba9   : >> { %v6115_v33 = vmax.f32 %v2741_v14, %v2742_v22  ;;  %v6842_v14 = vld [vmem:[#allocation14_spill] sm:$0xff] }
 0xbab   : >> { %vm2744_vm14 = vcmp.ge.f32.partialorder %v2715_v8, %v6115_v33  ;;  %vm2745_vm8 = vcmp.ge.f32.partialorder %v6078_v56, %v6115_v33  ;;  %vm2746_vm13 = vcmp.ge.f32.partialorder %v2717_v24, %v6115_v33  ;;  %vm2747_vm11 = vcmp.ge.f32.partialorder %v2718_v20, %v6115_v33 }
 0xbac   : >> { %vm2748_vm4 = vcmp.ge.f32.partialorder %v2719_v39, %v6115_v33  ;;  %vm2749_vm7 = vcmp.ge.f32.partialorder %v2720_v37, %v6115_v33  ;;  %vm2750_vm6 = vcmp.ge.f32.partialorder %v2721_v2, %v6115_v33  ;;  %vm2751_vm10 = vcmp.ge.f32.partialorder %v2722_v45, %v6115_v33 }
 0xbad   : >> { %v2752_v15 = vsel %vm2744_vm14, %v3680_v48, 64  ;;  %v2753_v19 = vsel %vm2745_vm8, %v3683_v49, 64  ;;  %v2754_v17 = vsel %vm2746_vm13, %v3686_v50, 64  ;;  %v2755_v56 = vsel %vm2747_vm11, %v3689_v51, 64 }
 0xbae   : >> { %v2756_v42 = vsel %vm2748_vm4, %v6826_v1, 64  ;;  %v2757_v62 = vsel %vm2749_vm7, %v6827_v53, 64  ;;  %v2758_v41 = vsel %vm2750_vm6, %v6828_v31, 64  ;;  %v2759_v3 = vsel %vm2751_vm10, %v6829_v9, 64 }
 0xbaf   : >> { %v2760_v61 = vsel %vm200_vm1, %v2752_v15, 2147483647  ;;  %v2761_v8 = vsel %vm200_vm1, %v2753_v19, 2147483647  ;;  %v2762_v29 = vsel %vm200_vm1, %v2754_v17, 2147483647 }
 0xbb0   : >> { %v2763_v37 = vsel %vm200_vm1, %v2755_v56, 2147483647  ;;  %v2764_v40 = vsel %vm200_vm1, %v2756_v42, 2147483647  ;;  %v2767_v52 = vsel %vm200_vm1, %v2757_v62, 2147483647 }
 0xbb1   : >> { %vm2765_vm5 = vcmp.lt.s32.totalorder %v2760_v61, %v2764_v40  ;;  %vm2768_vm12 = vcmp.lt.s32.totalorder %v2761_v8, %v2767_v52  ;;  %v2770_v60 = vsel %vm200_vm1, %v2758_v41, 2147483647  ;;  %v2773_v7 = vsel %vm200_vm1, %v2759_v3, 2147483647 }
 0xbb2   : >> { %v2766_v32 = vsel %vm2765_vm5, %v2760_v61, %v2764_v40  ;;  %v2769_v39 = vsel %vm2768_vm12, %v2761_v8, %v2767_v52  ;;  %vm2771_vm15 = vcmp.lt.s32.totalorder %v2762_v29, %v2770_v60  ;;  %vm2774_vm0 = vcmp.lt.s32.totalorder %v2763_v37, %v2773_v7 }
 0xbb3   : >> { %v2772_v4 = vsel %vm2771_vm15, %v2762_v29, %v2770_v60  ;;  %v2775_v47 = vsel %vm2774_vm0, %v2763_v37, %v2773_v7  ;;  %vm2776_vm2 = vcmp.lt.s32.totalorder %v2766_v32, %v2769_v39  ;;  %vm2791_vm9 = vcmp.gt.f32.partialorder %v6115_v33, -1e+29 }
 0xbb4   : >> { %v2777_v16 = vsel %vm2776_vm2, %v2766_v32, %v2769_v39  ;;  %vm2778_vm3 = vcmp.lt.s32.totalorder %v2772_v4, %v2775_v47  ;;  %v2792_v18 = vsub.f32 0.0, %v6115_v33  ;;  %v6844_v15 = vmov 0  }
 0xbb5   : >> { %v2779_v57 = vsel %vm2778_vm3, %v2772_v4, %v2775_v47 }
 0xbb6   : >> { %vm2780_vm14 = vcmp.lt.s32.totalorder %v2777_v16, %v2779_v57  ;;  %v6147_v13 = vsel %vm2791_vm9, %v2792_v18, %v6840_v44 }
 0xbb7   : >> { %6841 = vst [vmem:[#allocation15_spill] sm:$0xff] %v6147_v13  ;;  %v2781_v55 = vsel %vm2780_vm14, %v2777_v16, %v2779_v57  ;;  %v6151_v20 = vsub.f32 %v6147_v13, %v3610_v0  ;;  %v6155_v24 = vsub.f32 %v6147_v13, %v3612_v5  ;;  %v6163_v45 = vsub.f32 %v6147_v13, %v3646_v26 }
 0xbb8   : >> { %v2782_v43 = vrot.slane %v2781_v55, 4  ;;  %v6167_v2 = vsub.f32 %v6147_v13, %v3648_v27  ;;  %v6175_v58 = vsub.f32 %v6147_v13, %v3608_v63  ;;  %v6179_v34 = vsub.f32 %v6147_v13, %v3614_v6 }
 0xbb9   : >> { %v2950_v36 = vsel %vm200_vm1, %v6151_v20, -inf  ;;  %v2947_v35 = vsel %vm200_vm1, %v6155_v24, -inf  ;;  %v2956_v11 = vsel %vm200_vm1, %v6163_v45, -inf }
 0xbba   : >> { %vm2783_vm8 = vcmp.lt.s32.totalorder %v2781_v55, %v2782_v43  ;;  %2951 = vmax.xlane.f32.xlu1 %v2950_v36  ;;  %2948 = vmax.xlane.f32.xlu0 %v2947_v35  ;;  %v2953_v38 = vsel %vm200_vm1, %v6167_v2, -inf  ;;  %v2962_v30 = vsel %vm200_vm1, %v6175_v58, -inf  ;;  %v2959_v59 = vsel %vm200_vm1, %v6179_v34, -inf }
 0xbbb   : >> { %v2784_v54 = vsel %vm2783_vm8, %v2781_v55, %v2782_v43 }
 0xbbc   : >> { %v2785_v12 = vrot.slane %v2784_v54, 2 }
 0xbbe   : >> { %vm2786_vm13 = vcmp.lt.s32.totalorder %v2784_v54, %v2785_v12  ;;  %2957 = vmax.xlane.f32.xlu1 %v2956_v11  ;;  %2954 = vmax.xlane.f32.xlu0 %v2953_v38 }
 0xbbf   : >> { %v2787_v10 = vsel %vm2786_vm13, %v2784_v54, %v2785_v12 }
 0xbc0   : >> { %v2788_v46 = vrot.slane %v2787_v10, 1 }
 0xbc2   : >> { %vm2789_vm11 = vcmp.lt.s32.totalorder %v2787_v10, %v2788_v46  ;;  %2963 = vmax.xlane.f32.xlu1 %v2962_v30  ;;  %2960 = vmax.xlane.f32.xlu0 %v2959_v59 }
 0xbc3   : >> { %v2790_v23 = vsel %vm2789_vm11, %v2787_v10, %v2788_v46  ;;  %v6270_v10 = vsub.f32 %v6147_v13, %v3644_v25  ;;  %v6274_v46 = vsub.f32 %v6147_v13, %v3650_v28 }
 0xbc4   : >> { %v6188_v22 = vsel %vm2791_vm9, %v2790_v23, %v6842_v14 }
 0xbc5   : >> { %6843 = vst [vmem:[#allocation14_spill] sm:$0xff] %v6188_v22  ;;  %vm2796_vm4 = vcmp.eq.s32.totalorder %v6188_v22, %v3683_v49  ;;  %vm2795_vm7 = vcmp.eq.s32.totalorder %v6188_v22, %v3680_v48  ;;  %vm2798_vm6 = vcmp.eq.s32.totalorder %v6188_v22, %v3689_v51  ;;  %vm2797_vm10 = vcmp.eq.s32.totalorder %v6188_v22, %v3686_v50 }
 0xbc6   : >> { %v2804_v19 = vsel %vm2796_vm4, 1, %v6844_v15  ;;  %v2803_v17 = vsel %vm2795_vm7, 1, %v6844_v15  ;;  %v2806_v33 = vsel %vm2798_vm6, 1, %v6844_v15  ;;  %v2805_v56 = vsel %vm2797_vm10, 1, %v6844_v15 }
 0xbc7   : >> { %v6203_v42 = vsel %vm200_vm1, %v2804_v19, 2147483648  ;;  %v6206_v62 = vsel %vm200_vm1, %v2803_v17, 2147483648  ;;  %v6209_v41 = vsel %vm200_vm1, %v2806_v33, 2147483648  ;;  %v6212_v3 = vsel %vm200_vm1, %v2805_v56, 2147483648 }
 0xbc8   : >> { %v2828_v61 = vshra.s32 %v6203_v42, 16  ;;  %v2813_v8 = vshra.s32 %v6206_v62, 16  ;;  %vm2800_vm5 = vcmp.eq.s32.totalorder %v6188_v22, %v6827_v53  ;;  %vm2799_vm12 = vcmp.eq.s32.totalorder %v6188_v22, %v6826_v1 }
 0xbc9   : >> { %vm2802_vm15 = vcmp.eq.s32.totalorder %v6188_v22, %v6829_v9  ;;  %vm2801_vm0 = vcmp.eq.s32.totalorder %v6188_v22, %v6828_v31  ;;  %v2858_v40 = vshra.s32 %v6209_v41, 16  ;;  %v2843_v52 = vshra.s32 %v6212_v3, 16 }
 0xbca   : >> { %v6224_v29 = vcvt.s32.f32 %v2828_v61  ;;  %v6226_v37 = vcvt.s32.f32 %v2813_v8  ;;  %v2808_v60 = vsel %vm2800_vm5, 1, %v6844_v15  ;;  %v2807_v7 = vsel %vm2799_vm12, 1, %v6844_v15 }
 0xbcb   : >> { %v6235_v32 = vsel %vm200_vm1, %v2808_v60, 2147483648  ;;  %v6238_v39 = vsel %vm200_vm1, %v2807_v7, 2147483648  ;;  %v2810_v4 = vsel %vm2802_vm15, 1, %v6844_v15  ;;  %v2809_v47 = vsel %vm2801_vm0, 1, %v6844_v15 }
 0xbcc   : >> { %2831 = vmax.xlane.f32.xlu1 %v6224_v29  ;;  %2816 = vmax.xlane.f32.xlu0 %v6226_v37  ;;  %v6242_v16 = vcvt.s32.f32 %v2858_v40  ;;  %v6244_v18 = vcvt.s32.f32 %v2843_v52  ;;  %v2888_v57 = vshra.s32 %v6235_v32, 16  ;;  %v2873_v44 = vshra.s32 %v6238_v39, 16 }
 0xbcd   : >> { %v6249_v55 = vsel %vm200_vm1, %v2810_v4, 2147483648  ;;  %v6252_v43 = vsel %vm200_vm1, %v2809_v47, 2147483648  ;;  %v2968_v30 = vsel %vm200_vm1, %v6270_v10, -inf  ;;  %v2965_v59 = vsel %vm200_vm1, %v6274_v46, -inf }
 0xbce   : >> { %v6256_v36 = vcvt.s32.f32 %v2888_v57  ;;  %v6258_v35 = vcvt.s32.f32 %v2873_v44  ;;  %v2918_v54 = vshra.s32 %v6249_v55, 16  ;;  %v2903_v12 = vshra.s32 %v6252_v43, 16 }
 0xbd0   : >> { %2861 = vmax.xlane.f32.xlu1 %v6242_v16  ;;  %2846 = vmax.xlane.f32.xlu0 %v6244_v18  ;;  %v6264_v11 = vcvt.s32.f32 %v2918_v54  ;;  %v6266_v38 = vcvt.s32.f32 %v2903_v12  ;;  %v2827_v12 = vand.u32 65535, %v6203_v42 }
 0xbd4   : >> { %2891 = vmax.xlane.f32.xlu1 %v6256_v36  ;;  %2876 = vmax.xlane.f32.xlu0 %v6258_v35 }
 0xbd8   : >> { %2921 = vmax.xlane.f32.xlu1 %v6264_v11  ;;  %2906 = vmax.xlane.f32.xlu0 %v6266_v38 }
 0xbdc   : >> { %2969 = vmax.xlane.f32.xlu1 %v2968_v30  ;;  %2966 = vmax.xlane.f32.xlu0 %v2965_v59  ;;  %v2812_v30 = vand.u32 65535, %v6206_v62 }
 0xc47   : >> { %v6282_v23 = vpop.xlane.xlu1 %2951  ;;  %v6284_v14 = vpop.xlane.xlu0 %2948 }
 0xc48   : >> { %vm2972_vm2 = vcmp.ge.f32.partialorder %v6151_v20, %v6282_v23  ;;  %vm2971_vm9 = vcmp.ge.f32.partialorder %v6155_v24, %v6284_v14 }
 0xc49   : >> { %v2980_v15 = vsel %vm2972_vm2, -1e+30, %v6151_v20  ;;  %v2979_v19 = vsel %vm2971_vm9, -1e+30, %v6155_v24 }
 0xc4a   : >> { %v2990_v17 = vsel %vm200_vm1, %v2980_v15, -inf  ;;  %v2987_v33 = vsel %vm200_vm1, %v2979_v19, -inf  ;;  %v2829_v19 = vcvt.s32.f32 %v2827_v12 }
 0xc4b   : >> { %v6300_v56 = vpop.xlane.xlu1 %2957  ;;  %v6302_v61 = vpop.xlane.xlu0 %2954  ;;  %2991 = vmax.xlane.f32.xlu1 %v2990_v17  ;;  %2988 = vmax.xlane.f32.xlu0 %v2987_v33  ;;  %v2814_v17 = vcvt.s32.f32 %v2812_v30  ;;  %v2857_v33 = vand.u32 65535, %v6209_v41  ;;  %v2887_v41 = vand.u32 65535, %v6235_v32  ;;  %v2917_v32 = vand.u32 65535, %v6249_v55 }
 0xc4c   : >> { %vm2974_vm3 = vcmp.ge.f32.partialorder %v6163_v45, %v6300_v56  ;;  %vm2973_vm14 = vcmp.ge.f32.partialorder %v6167_v2, %v6302_v61 }
 0xc4d   : >> { %v2982_v8 = vsel %vm2974_vm3, -1e+30, %v6163_v45  ;;  %v2981_v40 = vsel %vm2973_vm14, -1e+30, %v6167_v2 }
 0xc4e   : >> { %v2996_v52 = vsel %vm200_vm1, %v2982_v8, -inf  ;;  %v2993_v60 = vsel %vm200_vm1, %v2981_v40, -inf  ;;  %v2842_v8 = vand.u32 65535, %v6212_v3  ;;  %v2872_v3 = vand.u32 65535, %v6238_v39 }
 0xc4f   : >> { %v6318_v7 = vpop.xlane.xlu1 %2963  ;;  %v6320_v4 = vpop.xlane.xlu0 %2960  ;;  %2997 = vmax.xlane.f32.xlu1 %v2996_v52  ;;  %2994 = vmax.xlane.f32.xlu0 %v2993_v60  ;;  %v2859_v60 = vcvt.s32.f32 %v2857_v33  ;;  %v2902_v39 = vand.u32 65535, %v6252_v43 }
 0xc50   : >> { %vm2976_vm8 = vcmp.ge.f32.partialorder %v6175_v58, %v6318_v7  ;;  %vm2975_vm13 = vcmp.ge.f32.partialorder %v6179_v34, %v6320_v4  ;;  %v2874_v12 = vcvt.s32.f32 %v2872_v3 }
 0xc51   : >> { %v2984_v47 = vsel %vm2976_vm8, -1e+30, %v6175_v58  ;;  %v2983_v57 = vsel %vm2975_vm13, -1e+30, %v6179_v34  ;;  %v2904_v33 = vcvt.s32.f32 %v2902_v39 }
 0xc52   : >> { %v3002_v44 = vsel %vm200_vm1, %v2984_v47, -inf  ;;  %v2999_v54 = vsel %vm200_vm1, %v2983_v57, -inf  ;;  %v2844_v47 = vcvt.s32.f32 %v2842_v8 }
 0xc53   : >> { %3003 = vmax.xlane.f32.xlu1 %v3002_v44  ;;  %3000 = vmax.xlane.f32.xlu0 %v2999_v54  ;;  %v2889_v54 = vcvt.s32.f32 %v2887_v41 }
 0xc59   : >> { %v6338_v59 = vpop.xlane.xlu1 %2831  ;;  %v6340_v15 = vpop.xlane.xlu0 %2816 }
 0xc5a   : >> { %vm2833_vm11 = vcmp.eq.f32.partialorder %v6224_v29, %v6338_v59  ;;  %vm2818_vm4 = vcmp.eq.f32.partialorder %v6226_v37, %v6340_v15 }
 0xc5b   : >> { %v2834_v40 = vsel %vm2833_vm11, %v2829_v19, -inf  ;;  %v2819_v42 = vsel %vm2818_vm4, %v2814_v17, -inf  ;;  %v2919_v17 = vcvt.s32.f32 %v2917_v32 }
 0xc5c   : >> { %2835 = vmax.xlane.f32.xlu1 %v2834_v40  ;;  %2820 = vmax.xlane.f32.xlu0 %v2819_v42 }
 0xc5d   : >> { %v6348_v62 = vpop.xlane.xlu1 %2861  ;;  %v6350_v52 = vpop.xlane.xlu0 %2846 }
 0xc5e   : >> { %vm2863_vm7 = vcmp.eq.f32.partialorder %v6242_v16, %v6348_v62  ;;  %vm2848_vm6 = vcmp.eq.f32.partialorder %v6244_v18, %v6350_v52 }
 0xc5f   : >> { %v2864_v29 = vsel %vm2863_vm7, %v2859_v60, -inf  ;;  %v2849_v37 = vsel %vm2848_vm6, %v2844_v47, -inf }
 0xc60   : >> { %2865 = vmax.xlane.f32.xlu1 %v2864_v29  ;;  %2850 = vmax.xlane.f32.xlu0 %v2849_v37  ;;  %v2838_v37 = vcvt.f32.s32 %v6338_v59 }
 0xc61   : >> { %v6358_v57 = vpop.xlane.xlu1 %2891  ;;  %v6360_v44 = vpop.xlane.xlu0 %2876 }
 0xc62   : >> { %vm2893_vm10 = vcmp.eq.f32.partialorder %v6256_v36, %v6358_v57  ;;  %vm2878_vm5 = vcmp.eq.f32.partialorder %v6258_v35, %v6360_v44  ;;  %v2839_v39 = vshll.u32 %v2838_v37, 16  ;;  %v2883_v59 = vcvt.f32.s32 %v6360_v44 }
 0xc63   : >> { %v2894_v16 = vsel %vm2893_vm10, %v2889_v54, -inf  ;;  %v2879_v18 = vsel %vm2878_vm5, %v2874_v12, -inf  ;;  %v2823_v54 = vcvt.f32.s32 %v6340_v15 }
 0xc64   : >> { %2895 = vmax.xlane.f32.xlu1 %v2894_v16  ;;  %2880 = vmax.xlane.f32.xlu0 %v2879_v18 }
 0xc65   : >> { %v2922_v30 = vpop.xlane.xlu1 %2921  ;;  %v6368_v19 = vpop.xlane.xlu0 %2906 }
 0xc66   : >> { %vm2923_vm12 = vcmp.eq.f32.partialorder %v6264_v11, %v2922_v30  ;;  %vm2908_vm15 = vcmp.eq.f32.partialorder %v6266_v38, %v6368_v19  ;;  %v2928_v22 = vcvt.f32.s32 %v2922_v30 }
 0xc67   : >> { %v2924_v55 = vsel %vm2923_vm12, %v2919_v17, -inf  ;;  %v2909_v43 = vsel %vm2908_vm15, %v2904_v33, -inf  ;;  %v2824_v17 = vshll.u32 %v2823_v54, 16  ;;  %v2868_v33 = vcvt.f32.s32 %v6348_v62 }
 0xc68   : >> { %2925 = vmax.xlane.f32.xlu1 %v2924_v55  ;;  %2910 = vmax.xlane.f32.xlu0 %v2909_v43  ;;  %v2853_v43 = vcvt.f32.s32 %v6350_v52  ;;  %v2913_v54 = vcvt.f32.s32 %v6368_v19  ;;  %v2929_v44 = vshll.u32 %v2928_v22, 16 }
 0xc69   : >> { %v6373_v36 = vpop.xlane.xlu1 %2969  ;;  %v6375_v35 = vpop.xlane.xlu0 %2966 }
 0xc6a   : >> { %vm2978_vm0 = vcmp.ge.f32.partialorder %v6270_v10, %v6373_v36  ;;  %vm2977_vm11 = vcmp.ge.f32.partialorder %v6274_v46, %v6375_v35 }
 0xc6b   : >> { %v2986_v11 = vsel %vm2978_vm0, -1e+30, %v6270_v10  ;;  %v2985_v38 = vsel %vm2977_vm11, -1e+30, %v6274_v46 }
 0xc6c   : >> { %v3008_v8 = vsel %vm200_vm1, %v2986_v11, -inf  ;;  %v3005_v40 = vsel %vm200_vm1, %v2985_v38, -inf  ;;  %v2898_v11 = vcvt.f32.s32 %v6358_v57 }
 0xc6d   : >> { %3009 = vmax.xlane.f32.xlu1 %v3008_v8  ;;  %3006 = vmax.xlane.f32.xlu0 %v3005_v40 }
 0xc6e   : >> { %v2899_v52 = vshll.u32 %v2898_v11, 16 }
 0xcd8   : >> { %v2992_v42 = vpop.xlane.xlu1 %2991  ;;  %v2989_v60 = vpop.xlane.xlu0 %2988 }
 0xcd9   : >> { %v3036_v13 = vsub.f32 %v3979_v21, %v2992_v42  ;;  %v3035_v62 = vsub.f32 %v3979_v21, %v2989_v60 }
 0xcdc   : >> { %v6391_v47 = vpop.xlane.xlu1 %2997  ;;  %v6393_v41 = vpop.xlane.xlu0 %2994 }
 0xcdd   : >> { %v3037_v22 = vsub.f32 %v3979_v21, %v6393_v41 }
 0xce0   : >> { %v3004_v3 = vpop.xlane.xlu1 %3003  ;;  %v3001_v29 = vpop.xlane.xlu0 %3000 }
 0xce1   : >> { %v3040_v57 = vsub.f32 %v3979_v21, %v3004_v3  ;;  %v3039_v19 = vsub.f32 %v3979_v21, %v3001_v29  ;;  %v3043_v3 = vsub.f32 %v3035_v62, %v3612_v5 }
 0xce9   : >> { %v2836_v12 = vpop.xlane.xlu1 %2835  ;;  %v2821_v32 = vpop.xlane.xlu0 %2820 }
 0xcea   : >> { %v2837_v16 = vcvt.f32.s32 %v2836_v12  ;;  %v2822_v18 = vcvt.f32.s32 %v2821_v32  ;;  %v2869_v12 = vshll.u32 %v2868_v33, 16  ;;  %v2854_v32 = vshll.u32 %v2853_v43, 16 }
 0xceb   : >> { %v3038_v43 = vsub.f32 %v3979_v21, %v6391_v47 }
 0xcec   : >> { %v2840_v55 = vadd.s32 %v2839_v39, %v2837_v16  ;;  %v2825_v38 = vadd.s32 %v2824_v17, %v2822_v18  ;;  %v2884_v18 = vshll.u32 %v2883_v59, 16  ;;  %v3044_v17 = vsub.f32 %v3036_v13, %v3610_v0 }
 0xced   : >> { %v2866_v8 = vpop.xlane.xlu1 %2865  ;;  %v2851_v40 = vpop.xlane.xlu0 %2850  ;;  %v3048_v13 = vsub.f32 %v3040_v57, %v3608_v63  ;;  %v3046_v24 = vsub.f32 %v3038_v43, %v3646_v26 }
 0xcee   : >> { %v2867_v15 = vcvt.f32.s32 %v2866_v8  ;;  %vm2932_vm4 = vcmp.eq.s32.totalorder %v2840_v55, 0  ;;  %v2852_v37 = vcvt.f32.s32 %v2851_v40  ;;  %vm2931_vm7 = vcmp.eq.s32.totalorder %v2825_v38, 0 }
 0xcef   : >> { %vm3028_vm6 = vmand %vm2972_vm2, %vm2932_vm4  ;;  %v2914_v55 = vshll.u32 %v2913_v54, 16  ;;  %v3047_v38 = vsub.f32 %v3039_v19, %v3614_v6 }
 0xcf0   : >> { %v2870_v30 = vadd.s32 %v2869_v12, %v2867_v15  ;;  %v2855_v60 = vadd.s32 %v2854_v32, %v2852_v37  ;;  %vm3027_vm10 = vmand %vm2971_vm9, %vm2931_vm7  ;;  %v6420_v23 = vsel %vm3028_vm6, %v3044_v17, -1e+30  ;;  %v3045_v37 = vsub.f32 %v3037_v22, %v3648_v27 }
 0xcf1   : >> { %v2896_v39 = vpop.xlane.xlu1 %2895  ;;  %v2881_v16 = vpop.xlane.xlu0 %2880  ;;  %v3051_v59 = vsel %vm3027_vm10, %v3043_v3, -1e+30  ;;  %v3060_v12 = vsel %vm200_vm1, %v6420_v23, -inf }
 0xcf2   : >> { %v2897_v42 = vcvt.f32.s32 %v2896_v39  ;;  %v2882_v33 = vcvt.f32.s32 %v2881_v16  ;;  %vm2934_vm2 = vcmp.eq.s32.totalorder %v2870_v30, 0  ;;  %vm2933_vm12 = vcmp.eq.s32.totalorder %v2855_v60, 0 }
 0xcf3   : >> { %v3059_v54 = vsel %vm200_vm1, %v3051_v59, -inf }
 0xcf4   : >> { %v2900_v20 = vadd.s32 %v2899_v52, %v2897_v42  ;;  %v2885_v29 = vadd.s32 %v2884_v18, %v2882_v33 }
 0xcf5   : >> { %v2926_v11 = vpop.xlane.xlu1 %2925  ;;  %v2911_v8 = vpop.xlane.xlu0 %2910 }
 0xcf6   : >> { %vm2936_vm5 = vcmp.eq.s32.totalorder %v2900_v20, 0  ;;  %v2927_v40 = vcvt.f32.s32 %v2926_v11  ;;  %v2912_v47 = vcvt.f32.s32 %v2911_v8  ;;  %vm2935_vm15 = vcmp.eq.s32.totalorder %v2885_v29, 0 }
 0xcf7   : >> { %vm3032_vm9 = vmand %vm2976_vm8, %vm2936_vm5 }
 0xcf8   : >> { %v3056_v14 = vsel %vm3032_vm9, %v3048_v13, -1e+30  ;;  %vm3031_vm4 = vmand %vm2975_vm13, %vm2935_vm15  ;;  %v2930_v41 = vadd.s32 %v2929_v44, %v2927_v40  ;;  %v2915_v15 = vadd.s32 %v2914_v55, %v2912_v47 }
 0xcf9   : >> { %vm3030_vm8 = vmand %vm2974_vm3, %vm2934_vm2  ;;  %v3065_v58 = vsel %vm200_vm1, %v3056_v14, -inf  ;;  %v3055_v7 = vsel %vm3031_vm4, %v3047_v38, -1e+30 }
 0xcfa   : >> { %vm3029_vm13 = vmand %vm2973_vm14, %vm2933_vm12  ;;  %v3066_v34 = vmax.f32 %v3060_v12, %v3065_v58  ;;  %v3063_v4 = vsel %vm200_vm1, %v3055_v7, -inf  ;;  %vm2938_vm7 = vcmp.eq.s32.totalorder %v2930_v41, 0  ;;  %v3010_v62 = vpop.xlane.xlu1 %3009  ;;  %v3007_v32 = vpop.xlane.xlu0 %3006  ;;  %vm2937_vm6 = vcmp.eq.s32.totalorder %v2915_v15, 0 }
 0xcfb   : >> { %v3064_v52 = vmax.f32 %v3059_v54, %v3063_v4  ;;  %v3042_v45 = vsub.f32 %v3979_v21, %v3010_v62  ;;  %v3041_v56 = vsub.f32 %v3979_v21, %v3007_v32  ;;  %v3054_v57 = vsel %vm3030_vm8, %v3046_v24, -1e+30  ;;  %vm3034_vm3 = vmand %vm2978_vm0, %vm2938_vm7  ;;  %v6845_v54 = vld [vmem:[#allocation15_spill] sm:$0xff] }
 0xcfc   : >> { %v3053_v39 = vsel %vm3029_vm13, %v3045_v37, -1e+30  ;;  %vm3033_vm14 = vmand %vm2977_vm11, %vm2937_vm6  ;;  %v3062_v30 = vsel %vm200_vm1, %v3054_v57, -inf }
 0xcfd   : >> { %v3071_v16 = vmax.f32 %v3064_v52, %v3066_v34  ;;  %v3050_v2 = vsub.f32 %v3042_v45, %v3644_v25  ;;  %v3049_v61 = vsub.f32 %v3041_v56, %v3650_v28  ;;  %v3061_v42 = vsel %vm200_vm1, %v3053_v39, -inf }
 0xcff   : >> { %v3058_v18 = vsel %vm3034_vm3, %v3050_v2, -1e+30  ;;  %v3057_v44 = vsel %vm3033_vm14, %v3049_v61, -1e+30 }
 0xd00   : >> { %v3069_v21 = vsel %vm200_vm1, %v3058_v18, -inf  ;;  %v3067_v17 = vsel %vm200_vm1, %v3057_v44, -inf }
 0xd01   : >> { %v3070_v10 = vmax.f32 %v3062_v30, %v3069_v21  ;;  %v3068_v36 = vmax.f32 %v3061_v42, %v3067_v17 }
 0xd03   : >> { %v3072_v19 = vmax.f32 %v3068_v36, %v3070_v10 }
 0xd05   : >> { %v3073_v60 = vmax.f32 %v3071_v16, %v3072_v19 }
 0xd07   : >> { %v3074_v33 = vrot.slane %v3073_v60, 4 }
 0xd09   : >> { %v3075_v55 = vmax.f32 %v3073_v60, %v3074_v33 }
 0xd0b   : >> { %v3076_v3 = vrot.slane %v3075_v55, 2 }
 0xd0d   : >> { %v3077_v43 = vmax.f32 %v3075_v55, %v3076_v3 }
 0xd0f   : >> { %v3078_v46 = vrot.slane %v3077_v43, 1 }
 0xd11   : >> { %v3079_v35 = vmax.f32 %v3077_v43, %v3078_v46 }
 0xd13   : >> { %vm3080_vm0 = vcmp.ge.f32.partialorder %v3051_v59, %v3079_v35  ;;  %vm3081_vm11 = vcmp.ge.f32.partialorder %v6420_v23, %v3079_v35  ;;  %vm3082_vm10 = vcmp.ge.f32.partialorder %v3053_v39, %v3079_v35  ;;  %vm3083_vm2 = vcmp.ge.f32.partialorder %v3054_v57, %v3079_v35  ;;  %v6846_v57 = vld [vmem:[#allocation14_spill] sm:$0xff] }
 0xd14   : >> { %vm3084_vm5 = vcmp.ge.f32.partialorder %v3055_v7, %v3079_v35  ;;  %vm3085_vm12 = vcmp.ge.f32.partialorder %v3056_v14, %v3079_v35  ;;  %vm3086_vm9 = vcmp.ge.f32.partialorder %v3057_v44, %v3079_v35  ;;  %vm3087_vm15 = vcmp.ge.f32.partialorder %v3058_v18, %v3079_v35 }
 0xd15   : >> { %v3088_v20 = vsel %vm3080_vm0, %v3680_v48, 64  ;;  %v3089_v22 = vsel %vm3081_vm11, %v3683_v49, 64  ;;  %v3090_v13 = vsel %vm3082_vm10, %v3686_v50, 64  ;;  %v3091_v29 = vsel %vm3083_vm2, %v3689_v51, 64 }
 0xd16   : >> { %v3092_v11 = vsel %vm3084_vm5, %v6826_v1, 64  ;;  %v3093_v8 = vsel %vm3085_vm12, %v6827_v53, 64  ;;  %v3094_v23 = vsel %vm3086_vm9, %v6828_v31, 64  ;;  %v3095_v40 = vsel %vm3087_vm15, %v6829_v9, 64 }
 0xd17   : >> { %v3096_v47 = vsel %vm200_vm1, %v3088_v20, 2147483647  ;;  %v3097_v38 = vsel %vm200_vm1, %v3089_v22, 2147483647  ;;  %v3098_v59 = vsel %vm200_vm1, %v3090_v13, 2147483647 }
 0xd18   : >> { %v3099_v24 = vsel %vm200_vm1, %v3091_v29, 2147483647  ;;  %v3100_v14 = vsel %vm200_vm1, %v3092_v11, 2147483647  ;;  %v3103_v41 = vsel %vm200_vm1, %v3093_v8, 2147483647 }
 0xd19   : >> { %vm3101_vm4 = vcmp.lt.s32.totalorder %v3096_v47, %v3100_v14  ;;  %vm3104_vm8 = vcmp.lt.s32.totalorder %v3097_v38, %v3103_v41  ;;  %v3106_v1 = vsel %vm200_vm1, %v3094_v23, 2147483647  ;;  %v3109_v53 = vsel %vm200_vm1, %v3095_v40, 2147483647 }
 0xd1a   : >> { %v3102_v31 = vsel %vm3101_vm4, %v3096_v47, %v3100_v14  ;;  %v3105_v9 = vsel %vm3104_vm8, %v3097_v38, %v3103_v41  ;;  %vm3107_vm13 = vcmp.lt.s32.totalorder %v3098_v59, %v3106_v1  ;;  %vm3110_vm7 = vcmp.lt.s32.totalorder %v3099_v24, %v3109_v53 }
 0xd1b   : >> { %v3108_v15 = vsel %vm3107_vm13, %v3098_v59, %v3106_v1  ;;  %v3111_v37 = vsel %vm3110_vm7, %v3099_v24, %v3109_v53  ;;  %vm3112_vm6 = vcmp.lt.s32.totalorder %v3102_v31, %v3105_v9  ;;  %vm3127_vm3 = vcmp.gt.f32.partialorder %v3079_v35, -1e+29 }
 0xd1c   : >> { %v3113_v12 = vsel %vm3112_vm6, %v3102_v31, %v3105_v9  ;;  %vm3114_vm14 = vcmp.lt.s32.totalorder %v3108_v15, %v3111_v37  ;;  %v3128_v58 = vsub.f32 0.0, %v3079_v35 }
 0xd1d   : >> { %v3115_v7 = vsel %vm3114_vm14, %v3108_v15, %v3111_v37 }
 0xd1e   : >> { %vm3116_vm0 = vcmp.lt.s32.totalorder %v3113_v12, %v3115_v7  ;;  %v3129_v13 = vsel %vm3127_vm3, %v3128_v58, %v6845_v54  }
 0xd1f   : >> { %v3117_v34 = vsel %vm3116_vm0, %v3113_v12, %v3115_v7 }
 0xd20   : >> { %v3118_v4 = vrot.slane %v3117_v34, 4 }
 0xd22   : >> { %vm3119_vm11 = vcmp.lt.s32.totalorder %v3117_v34, %v3118_v4 }
 0xd23   : >> { %v3120_v62 = vsel %vm3119_vm11, %v3117_v34, %v3118_v4 }
 0xd24   : >> { %v3121_v32 = vrot.slane %v3120_v62, 2 }
 0xd26   : >> { %vm3122_vm10 = vcmp.lt.s32.totalorder %v3120_v62, %v3121_v32 }
 0xd27   : >> { %v3123_v52 = vsel %vm3122_vm10, %v3120_v62, %v3121_v32 }
 0xd28   : >> { %v3124_v45 = vrot.slane %v3123_v52, 1 }
 0xd2a   : >> { %vm3125_vm2 = vcmp.lt.s32.totalorder %v3123_v52, %v3124_v45 }
 0xd2b   : >> { %v3126_v56 = vsel %vm3125_vm2, %v3123_v52, %v3124_v45 }
 0xd2c   : >> { %v6478_v11 = vsel %vm3127_vm3, %v3126_v56, %v6846_v57  }
 0xd2d   : >> { %v6847_v39 = vmov %v6478_v11 }
 0xd2e   : >> { %v3132_v16 = vsel %vm200_vm1, %v6847_v39, 2147483647  ;;  %v6848_v11 = vmov %v6847_v39 }
 0xd2f   : >> { %v3134_v2 = vshra.s32 %v3132_v16, 16  ;;  %v3133_v18 = vand.u32 65535, %v3132_v16 }
 0xd31   : >> { %v3136_v61 = vcvt.s32.f32 %v3134_v2  ;;  %v3135_v30 = vcvt.s32.f32 %v3133_v18 }
 0xd33   : >> { %3137 = vmin.xlane.f32.xlu0 %v3136_v61 }
 0xdc0   : >> { %v3138_v44 = vpop.xlane.xlu0 %3137 }
 0xdc1   : >> { %vm3139_vm5 = vcmp.eq.f32.partialorder %v3136_v61, %v3138_v44  ;;  %v3144_v42 = vcvt.f32.s32 %v3138_v44 }
 0xdc2   : >> { %v3140_v21 = vsel %vm3139_vm5, %v3135_v30, inf }
 0xdc3   : >> { %3141 = vmin.xlane.f32.xlu1 %v3140_v21  ;;  %v3145_v10 = vshll.u32 %v3144_v42, 16 }
 0xe50   : >> { %v3142_v17 = vpop.xlane.xlu1 %3141 }
 0xe51   : >> { %v3143_v36 = vcvt.f32.s32 %v3142_v17 }
 0xe53   : >> { %v3146_v19 = vadd.s32 %v3145_v10, %v3143_v36 }
 0xe55   : >> { %3484 = vpush %v3146_v19 }
 0xe86   : >> { %s3485_s28 = spop %3484 }
 0xe87   : >> { %p437_p5 = scmp.lt.s32.totalorder %s3485_s28, 0 }
 0xe89   : >> { %p438_p6 = pnand %p437_p5, %p436_p4 }
 0xe8a   : > { %vm3148_vm12 = vcmp.eq.s32.totalorder (%p438_p6), %v6847_v39, %v3680_v48  ;;  %vm3150_vm9 = vcmp.eq.s32.totalorder (%p438_p6), %v6847_v39, %v3686_v50  ;;  %vm3149_vm15 = vcmp.eq.s32.totalorder (%p438_p6), %v6847_v39, %v3683_v49  ;;  %v3553_v60 = vmov (%p438_p6), 0   ;;  %v6849_v23 = vld [vmem:[#allocation10_spill] sm:$0xff] (%p438_p6)  ;;  %v6850_v40 = vld [vmem:[#allocation11_spill] sm:$0xff] (%p438_p6)  ;;  %v6851_v47 = vld [vmem:[#allocation12_spill] sm:$0xff] (%p438_p6) }
 0xe8b   : > { %441 = sbr.rel (!%p438_p6) target bundleno = 464 (0x1d0), region = 68  ;;  %v3156_v33 = vsel (%p438_p6), %vm3148_vm12, 1, %v3553_v60  ;;  %v3158_v55 = vsel (%p438_p6), %vm3150_vm9, 1, %v3553_v60  ;;  %v3157_v3 = vsel (%p438_p6), %vm3149_vm15, 1, %v3553_v60  ;;  %vm3151_vm4 = vcmp.eq.s32.totalorder (%p438_p6), %v6847_v39, %v3689_v51  ;;  %v6852_v37 = vld [vmem:[#allocation13_spill] sm:$0xff] (%p438_p6)  ;;  %v6853_v48 = vld [vmem:[#allocation4_spill] sm:$0xff] (%p438_p6) }
 0xe8c   : > { %v6508_v43 = vsel (%p438_p6), %vm200_vm1, %v3156_v33, 2147483648  ;;  %v6511_v46 = vsel (%p438_p6), %vm200_vm1, %v3158_v55, 2147483648  ;;  %v6514_v35 = vsel (%p438_p6), %vm200_vm1, %v3157_v3, 2147483648  ;;  %v3159_v20 = vsel (%p438_p6), %vm3151_vm4, 1, %v3553_v60  ;;  %v6854_v61 = vld [vmem:[#allocation3_spill] sm:$0xff] (%p438_p6)  ;;  %v6855_v18 = vld [vmem:[#allocation8_spill] sm:$0xff] (%p438_p6) }
 0xe8d   : > { %v3166_v22 = vshra.s32 (%p438_p6), %v6508_v43, 16  ;;  %v3196_v13 = vshra.s32 (%p438_p6), %v6511_v46, 16  ;;  %v3181_v29 = vshra.s32 (%p438_p6), %v6514_v35, 16  ;;  %v6523_v11 = vsel (%p438_p6), %vm200_vm1, %v3159_v20, 2147483648  ;;  %v6856_v50 = vld [vmem:[#allocation7_spill] sm:$0xff] (%p438_p6)  ;;  %v6857_v51 = vld [vmem:[#allocation5_spill] sm:$0xff] (%p438_p6) }
 0xe8e   : > { %v3211_v8 = vshra.s32 (%p438_p6), %v6523_v11, 16  ;;  %vm3152_vm8 = vcmp.eq.s32.totalorder (%p438_p6), %v6847_v39, %v6849_v23  ;;  %vm3153_vm13 = vcmp.eq.s32.totalorder (%p438_p6), %v6847_v39, %v6850_v40  ;;  %vm3154_vm7 = vcmp.eq.s32.totalorder (%p438_p6), %v6847_v39, %v6851_v47  ;;  %v6858_v42 = vld [vmem:[#allocation2_spill] sm:$0xff] (%p438_p6) }
 0xe8f   : > { %v6532_v38 = vcvt.s32.f32 (%p438_p6), %v3166_v22  ;;  %v6534_v59 = vcvt.s32.f32 (%p438_p6), %v3196_v13  ;;  %v3160_v24 = vsel (%p438_p6), %vm3152_vm8, 1, %v3553_v60  ;;  %v6539_v14 = vcvt.s32.f32 (%p438_p6), %v3181_v29  ;;  %v6860_v47 = vld [vmem:[#allocation6_spill] sm:$0xff] (%p438_p6) }
 0xe90   : > { %v6542_v41 = vsel (%p438_p6), %vm200_vm1, %v3160_v24, 2147483648  ;;  %v3161_v1 = vsel (%p438_p6), %vm3153_vm13, 1, %v3553_v60  ;;  %v3162_v53 = vsel (%p438_p6), %vm3154_vm7, 1, %v3553_v60  ;;  %v6552_v31 = vcvt.s32.f32 (%p438_p6), %v3211_v8 }
 0xe91   : > { %3169 = vmax.xlane.f32.xlu0 (%p438_p6), %v6532_v38  ;;  %3199 = vmax.xlane.f32.xlu1 (%p438_p6), %v6534_v59  ;;  %v3226_v9 = vshra.s32 (%p438_p6), %v6542_v41, 16  ;;  %v6556_v15 = vsel (%p438_p6), %vm200_vm1, %v3161_v1, 2147483648  ;;  %vm3155_vm6 = vcmp.eq.s32.totalorder (%p438_p6), %v6847_v39, %v6852_v37  ;;  %v6562_v58 = vsel (%p438_p6), %vm200_vm1, %v3162_v53, 2147483648 }
 0xe92   : > { %v3241_v12 = vshra.s32 %v6556_v15, 16  ;;  %v3163_v7 = vsel %vm3155_vm6, 1, %v3553_v60  ;;  %v3256_v62 = vshra.s32 %v6562_v58, 16  ;;  %v3284_v56 = vsel %vm3148_vm12, %v3612_v5, 0.0 }
 0xe93   : > { %v6568_v54 = vsel %vm200_vm1, %v3163_v7, 2147483648  ;;  %v6572_v34 = vcvt.s32.f32 %v3226_v9  ;;  %v3285_v57 = vsel %vm3149_vm15, %v3610_v0, 0.0  ;;  %v3292_v16 = vsel %vm200_vm1, %v3284_v56, 0.0 }
 0xe94   : > { %v6574_v4 = vcvt.s32.f32 %v3241_v12  ;;  %v3271_v32 = vshra.s32 %v6568_v54, 16  ;;  %v6580_v52 = vcvt.s32.f32 %v3256_v62  ;;  %v3295_v2 = vsel %vm200_vm1, %v3285_v57, 0.0 }
 0xe95   : > { %3184 = vmax.xlane.f32.xlu0 %v6539_v14  ;;  %3214 = vmax.xlane.f32.xlu1 %v6552_v31  ;;  %v3286_v5 = vsel %vm3150_vm9, %v3648_v27, 0.0  ;;  %v3287_v49 = vsel %vm3151_vm4, %v3646_v26, 0.0  ;;  %v3288_v27 = vsel %vm3152_vm8, %v3614_v6, 0.0  ;;  %v3289_v26 = vsel %vm3153_vm13, %v3608_v63, 0.0 }
 0xe96   : > { %v6582_v45 = vcvt.s32.f32 %v3271_v32  ;;  %v3298_v0 = vsel %vm200_vm1, %v3286_v5, 0.0  ;;  %v3301_v44 = vsel %vm200_vm1, %v3287_v49, 0.0  ;;  %v3304_v30 = vsel %vm200_vm1, %v3288_v27, 0.0 }
 0xe97   : > { %v3307_v21 = vsel %vm200_vm1, %v3289_v26, 0.0  ;;  %v3165_v6 = vand.u32 65535, %v6508_v43  ;;  %v3195_v17 = vand.u32 65535, %v6511_v46  ;;  %v3180_v36 = vand.u32 65535, %v6514_v35 }
 0xe98   : > { %v3210_v33 = vand.u32 65535, %v6523_v11  ;;  %v3225_v43 = vand.u32 65535, %v6542_v41  ;;  %v3240_v13 = vand.u32 65535, %v6556_v15  ;;  %v3255_v8 = vand.u32 65535, %v6562_v58 }
 0xe99   : > { %3229 = vmax.xlane.f32.xlu0 %v6572_v34  ;;  %3244 = vmax.xlane.f32.xlu1 %v6574_v4  ;;  %v3167_v10 = vcvt.s32.f32 %v3165_v6  ;;  %v3197_v63 = vcvt.s32.f32 %v3195_v17  ;;  %v3182_v3 = vcvt.s32.f32 %v3180_v36  ;;  %v3270_v24 = vand.u32 65535, %v6568_v54 }
 0xe9a   : > { %v3212_v22 = vcvt.s32.f32 %v3210_v33  ;;  %v3227_v11 = vcvt.s32.f32 %v3225_v43  ;;  %v3257_v41 = vcvt.s32.f32 %v3255_v8  ;;  %v3290_v15 = vsel %vm3154_vm7, %v3650_v28, 0.0 }
 0xe9b   : > { %v3272_v9 = vcvt.s32.f32 %v3270_v24  ;;  %v3310_v7 = vsel %vm200_vm1, %v3290_v15, 0.0  ;;  %v3291_v54 = vsel %vm3155_vm6, %v3644_v25, 0.0 }
 0xe9d   : > { %3259 = vmax.xlane.f32.xlu0 %v6580_v52  ;;  %3274 = vmax.xlane.f32.xlu1 %v6582_v45 }
 0xea1   : > { %3293 = vadd.xlane.f32.xlu0 %v3292_v16  ;;  %3296 = vadd.xlane.f32.xlu1 %v3295_v2 }
 0xea5   : > { %3316 = vmin.xlane.f32.xlu0 %v6853_v48  ;;  %3318 = vmin.xlane.f32.xlu1 %v6854_v61 }
 0xea9   : > { %3320 = vmin.xlane.f32.xlu0 %v6855_v18  ;;  %3299 = vadd.xlane.f32.xlu1 %v3298_v0 }
 0xead   : > { %3302 = vadd.xlane.f32.xlu0 %v3301_v44  ;;  %3322 = vmin.xlane.f32.xlu1 %v6856_v50 }
 0xeb1   : > { %3324 = vmin.xlane.f32.xlu0 %v6857_v51  ;;  %3305 = vadd.xlane.f32.xlu1 %v3304_v30 }
 0xeb5   : > { %3308 = vadd.xlane.f32.xlu0 %v3307_v21  ;;  %3326 = vmin.xlane.f32.xlu1 %v6858_v42 }
 0xf1e   : > { %v6625_v19 = vpop.xlane.xlu0 %3169  ;;  %v6627_v60 = vpop.xlane.xlu1 %3199 }
 0xf1f   : > { %vm3171_vm3 = vcmp.eq.f32.partialorder %v6532_v38, %v6625_v19  ;;  %vm3201_vm14 = vcmp.eq.f32.partialorder %v6534_v59, %v6627_v60  ;;  %v3242_v59 = vcvt.s32.f32 %v3240_v13  ;;  %v3176_v37 = vcvt.f32.s32 %v6625_v19 }
 0xf20   : > { %v3172_v55 = vsel %vm3171_vm3, %v3167_v10, -inf  ;;  %v3202_v35 = vsel %vm3201_vm14, %v3197_v63, -inf  ;;  %v3206_v0 = vcvt.f32.s32 %v6627_v60  ;;  %vm3361_vm3 = vcmask 0  }
 0xf21   : > { %3173 = vmax.xlane.f32.xlu0 %v3172_v55  ;;  %v3177_v61 = vshll.u32 %v3176_v37, 16 }
 0xf22   : > { %v6635_v46 = vpop.xlane.xlu0 %3184  ;;  %v6637_v20 = vpop.xlane.xlu1 %3214  ;;  %v3207_v51 = vshll.u32 %v3206_v0, 16 }
 0xf23   : > { %vm3186_vm0 = vcmp.eq.f32.partialorder %v6539_v14, %v6635_v46  ;;  %vm3216_vm11 = vcmp.eq.f32.partialorder %v6552_v31, %v6637_v20  ;;  %v3191_v49 = vcvt.f32.s32 %v6635_v46  ;;  %v3221_v27 = vcvt.f32.s32 %v6637_v20 }
 0xf24   : > { %v3187_v29 = vsel %vm3186_vm0, %v3182_v3, -inf  ;;  %v3217_v40 = vsel %vm3216_vm11, %v3212_v22, -inf }
 0xf25   : > { %3188 = vmax.xlane.f32.xlu1 %v3187_v29  ;;  %3203 = vmax.xlane.f32.xlu0 %v3202_v35  ;;  %v3192_v21 = vshll.u32 %v3191_v49, 16  ;;  %v3222_v36 = vshll.u32 %v3221_v27, 16 }
 0xf26   : > { %v3230_v23 = vpop.xlane.xlu0 %3229  ;;  %v6645_v38 = vpop.xlane.xlu1 %3244 }
 0xf27   : > { %vm3231_vm10 = vcmp.eq.f32.partialorder %v6572_v34, %v3230_v23  ;;  %vm3246_vm2 = vcmp.eq.f32.partialorder %v6574_v4, %v6645_v38  ;;  %v3313_v34 = vsel %vm200_vm1, %v3291_v54, 0.0  ;;  %v6859_v4 = vld [vmem:[#allocation9_spill] sm:$0xff]  ;;  %v3236_v50 = vcvt.f32.s32 %v3230_v23 }
 0xf28   : > { %v3232_v14 = vsel %vm3231_vm10, %v3227_v11, -inf  ;;  %v3247_v53 = vsel %vm3246_vm2, %v3242_v59, -inf  ;;  %v3251_v60 = vcvt.f32.s32 %v6645_v38 }
 0xf29   : > { %3218 = vmax.xlane.f32.xlu1 %v3217_v40  ;;  %3233 = vmax.xlane.f32.xlu0 %v3232_v14  ;;  %v3237_v19 = vshll.u32 %v3236_v50, 16 }
 0xf2a   : > { %v6651_v1 = vpop.xlane.xlu0 %3259  ;;  %v6653_v31 = vpop.xlane.xlu1 %3274  ;;  %v3252_v29 = vshll.u32 %v3251_v60, 16 }
 0xf2b   : > { %vm3261_vm5 = vcmp.eq.f32.partialorder %v6580_v52, %v6651_v1  ;;  %vm3276_vm12 = vcmp.eq.f32.partialorder %v6582_v45, %v6653_v31  ;;  %v3266_v43 = vcvt.f32.s32 %v6651_v1  ;;  %v3281_v24 = vcvt.f32.s32 %v6653_v31 }
 0xf2c   : > { %v3262_v12 = vsel %vm3261_vm5, %v3257_v41, -inf  ;;  %v3277_v58 = vsel %vm3276_vm12, %v3272_v9, -inf }
 0xf2d   : > { %3248 = vmax.xlane.f32.xlu1 %v3247_v53  ;;  %3263 = vmax.xlane.f32.xlu0 %v3262_v12  ;;  %v3267_v59 = vshll.u32 %v3266_v43, 16 }
 0xf2e   : > { %v3294_v28 = vpop.xlane.xlu0 %3293  ;;  %v3297_v62 = vpop.xlane.xlu1 %3296 }
 0xf31   : > { %3278 = vmax.xlane.f32.xlu1 %v3277_v58  ;;  %3311 = vadd.xlane.f32.xlu0 %v3310_v7 }
 0xf32   : > { %v3317_v32 = vpop.xlane.xlu0 %3316  ;;  %v3319_v52 = vpop.xlane.xlu1 %3318 }
 0xf35   : > { %3328 = vmin.xlane.f32.xlu1 %v6859_v4  ;;  %3314 = vadd.xlane.f32.xlu0 %v3313_v34  ;;  %v3282_v34 = vshll.u32 %v3281_v24, 16 }
 0xf36   : > { %v3321_v45 = vpop.xlane.xlu0 %3320  ;;  %v3300_v56 = vpop.xlane.xlu1 %3299 }
 0xf39   : > { %3330 = vmin.xlane.f32.xlu1 %v6860_v47 }
 0xf3a   : > { %v3303_v57 = vpop.xlane.xlu0 %3302  ;;  %v3323_v16 = vpop.xlane.xlu1 %3322 }
 0xf3e   : > { %v3325_v2 = vpop.xlane.xlu0 %3324  ;;  %v3306_v39 = vpop.xlane.xlu1 %3305 }
 0xf42   : > { %v3309_v25 = vpop.xlane.xlu0 %3308  ;;  %v3327_v5 = vpop.xlane.xlu1 %3326 }
 0xfae   : > { %v3174_v48 = vpop.xlane.xlu0 %3173 }
 0xfaf   : > { %v3175_v18 = vcvt.f32.s32 %v3174_v48 }
 0xfb1   : > { %v3178_v44 = vadd.s32 %v3177_v61, %v3175_v18 }
 0xfb2   : > { %v3189_v30 = vpop.xlane.xlu1 %3188  ;;  %v3204_v26 = vpop.xlane.xlu0 %3203 }
 0xfb3   : > { %v3190_v42 = vcvt.f32.s32 %v3189_v30  ;;  %v3205_v6 = vcvt.f32.s32 %v3204_v26  ;;  %vm3332_vm1 = vcmp.gt.s32.totalorder %v3178_v44, 0 }
 0xfb4   : > { %v3340_v46 = vsel %vm3332_vm1, %v3294_v28, %v3317_v32 }
 0xfb5   : > { %v3193_v17 = vadd.s32 %v3192_v21, %v3190_v42  ;;  %v3208_v10 = vadd.s32 %v3207_v51, %v3205_v6 }
 0xfb6   : > { %v3219_v63 = vpop.xlane.xlu1 %3218  ;;  %v3234_v33 = vpop.xlane.xlu0 %3233 }
 0xfb7   : > { %vm3333_vm9 = vcmp.gt.s32.totalorder %v3193_v17, 0  ;;  %vm3334_vm15 = vcmp.gt.s32.totalorder %v3208_v10, 0  ;;  %v3220_v55 = vcvt.f32.s32 %v3219_v63  ;;  %v3235_v3 = vcvt.f32.s32 %v3234_v33 }
 0xfb8   : > { %v3341_v35 = vsel %vm3333_vm9, %v3297_v62, %v3319_v52  ;;  %v3342_v11 = vsel %vm3334_vm15, %v3300_v56, %v3321_v45 }
 0xfb9   : > { %v3348_v20 = vadd.f32 %v3341_v35, %v3340_v46  ;;  %v3223_v22 = vadd.s32 %v3222_v36, %v3220_v55  ;;  %v3238_v13 = vadd.s32 %v3237_v19, %v3235_v3 }
 0xfba   : > { %v3249_v8 = vpop.xlane.xlu1 %3248  ;;  %v3264_v23 = vpop.xlane.xlu0 %3263 }
 0xfbb   : > { %v3349_v40 = vadd.f32 %v3348_v20, %v3342_v11  ;;  %vm3335_vm4 = vcmp.gt.s32.totalorder %v3223_v22, 0  ;;  %vm3336_vm8 = vcmp.gt.s32.totalorder %v3238_v13, 0  ;;  %v3250_v38 = vcvt.f32.s32 %v3249_v8 }
 0xfbc   : > { %v3343_v14 = vsel %vm3335_vm4, %v3303_v57, %v3323_v16  ;;  %v3265_v41 = vcvt.f32.s32 %v3264_v23  ;;  %v3344_v9 = vsel %vm3336_vm8, %v3306_v39, %v3325_v2 }
 0xfbd   : > { %v3350_v53 = vadd.f32 %v3349_v40, %v3343_v14  ;;  %v3253_v1 = vadd.s32 %v3252_v29, %v3250_v38 }
 0xfbe   : > { %v3268_v15 = vadd.s32 %v3267_v59, %v3265_v41  ;;  %v3279_v12 = vpop.xlane.xlu1 %3278  ;;  %v3312_v58 = vpop.xlane.xlu0 %3311 }
 0xfbf   : > { %v3351_v7 = vadd.f32 %v3350_v53, %v3344_v9  ;;  %vm3337_vm13 = vcmp.gt.s32.totalorder %v3253_v1, 0  ;;  %v3280_v54 = vcvt.f32.s32 %v3279_v12 }
 0xfc0   : > { %v3345_v4 = vsel %vm3337_vm13, %v3309_v25, %v3327_v5  ;;  %vm3338_vm7 = vcmp.gt.s32.totalorder %v3268_v15, 0 }
 0xfc1   : > { %v3352_v47 = vadd.f32 %v3351_v7, %v3345_v4  ;;  %v3283_v28 = vadd.s32 %v3282_v34, %v3280_v54 }
 0xfc2   : > { %v3329_v62 = vpop.xlane.xlu1 %3328  ;;  %v3315_v52 = vpop.xlane.xlu0 %3314 }
 0xfc3   : > { %v3346_v32 = vsel %vm3338_vm7, %v3312_v58, %v3329_v62  ;;  %vm3339_vm6 = vcmp.gt.s32.totalorder %v3283_v28, 0 }
 0xfc4   : > { %v3353_v31 = vadd.f32 %v3352_v47, %v3346_v32 }
 0xfc6   : > { %v3331_v45 = vpop.xlane.xlu1 %3330 }
 0xfc7   : > { %v3347_v56 = vsel %vm3339_vm6, %v3315_v52, %v3331_v45 }
 0xfc8   : > { %v3354_v57 = vadd.f32 %v3353_v31, %v3347_v56 }
 0xfca   : > { %v3355_v16 = vrot.slane %v3354_v57, 4 }
 0xfcc   : > { %v3356_v2 = vadd.f32 %v3355_v16, %v3354_v57 }
 0xfce   : > { %v3357_v39 = vrot.slane %v3356_v2, 2 }
 0xfd0   : > { %v3358_v37 = vadd.f32 %v3357_v39, %v3356_v2 }
 0xfd2   : > { %v3359_v48 = vrot.slane %v3358_v37, 1 }
 0xfd4   : > { %v3360_v61 = vadd.f32 %v3359_v48, %v3358_v37 }
 0xfd6   : > { %3362 = vst.msk [vmem:[%s156_s21] sm:$0x1] %vm3361_vm3, %v3360_v61 }
 0xfd7 PF: > { %s12_s9 = sadd.s32 1, %s3538_s9  }
 0xfd8   : > { %p9_p7 = scmp.ge.s32.totalorder %s12_s9, 4  }
 0xfda   :  { %11 = sbr.rel (!%p9_p7) target bundleno = 1 (0x1), region = 79 }

</bundles_post_ra>
